<compile_context>
chip_gen: v6e
topology: v6e:2x2x1
jax: 0.10.0
libtpu: 0.0.40
codegen_flags: <defaults>
</compile_context>

<pallas_src>
import functools

import jax
import jax.numpy as jnp
from jax.experimental import pallas as pl
from jax.experimental.pallas import tpu as pltpu

NEG_BIG = -1e30  # bias for padded classes -> exp(NEG_BIG - m) == 0 in f32


def _round_up(x, m):
  return (x + m - 1) // m * m


def _dnn_kernel(x_ref,
                w1_ref, b1_ref,
                w2_ref, b2_ref,
                w3_ref, b3_ref,
                w4_ref, b4_ref,
                o_ref):
  """One batch tile of the fused MLP: 4 MXU matmuls + ReLU + softmax.

  Weights arrive bf16 with BatchNorm affines pre-folded into the following
  Linear; bias add / ReLU / softmax run in f32.
  """

  def block(h, w_ref, b_ref):
    y = jnp.dot(h.astype(jnp.bfloat16), w_ref[...],
                preferred_element_type=jnp.float32) + b_ref[...]
    return jnp.maximum(y, 0.0)

  h = block(x_ref[...], w1_ref, b1_ref)
  h = block(h, w2_ref, b2_ref)
  h = block(h, w3_ref, b3_ref)

  logits = jnp.dot(h.astype(jnp.bfloat16), w4_ref[...],
                   preferred_element_type=jnp.float32) + b4_ref[...]
  m = jnp.max(logits, axis=1, keepdims=True)
  e = jnp.exp(logits - m)
  o_ref[...] = e * pl.reciprocal(jnp.sum(e, axis=1, keepdims=True), approx=True)


def dnn_classifier_forward(x, weights, *, num_classes, block_b=256):
  """x: [B, input_size] f32. weights: output of prepare_params()."""
  (w1, b1, w2, b2, w3, b3, w4, b4) = weights
  batch, feat = x.shape
  k_pad = w1.shape[0]
  c_pad = w4.shape[1]

  b_pad = _round_up(max(batch, 1), block_b)
  xp = jnp.zeros((b_pad, k_pad), jnp.float32).at[:batch, :feat].set(x)

  def resident(arr):
    # Same block index for every grid step -> stays VMEM-resident.
    return pl.BlockSpec(arr.shape, lambda i: (0, 0))

  out = pl.pallas_call(
      _dnn_kernel,
      out_shape=jax.ShapeDtypeStruct((b_pad, c_pad), jnp.float32),
      grid=(b_pad // block_b,),
      in_specs=[
          pl.BlockSpec((block_b, k_pad), lambda i: (i, 0)),
          resident(w1), resident(b1),
          resident(w2), resident(b2),
          resident(w3), resident(b3),
          resident(w4), resident(b4),
      ],
      out_specs=pl.BlockSpec((block_b, c_pad), lambda i: (i, 0)),
      compiler_params=pltpu.CompilerParams(
          dimension_semantics=("parallel",)),
  )(xp, w1, b1, w2, b2, w3, b3, w4, b4)
  return out[:batch, :num_classes]


def prepare_params(params, input_size, num_classes, *, lane=128):
  """Fold BN affines into the next Linear, pad to lane-dense shapes, cast bf16."""
  (w1, b1, s1, t1, w2, b2, s2, t2, w3, b3, s3, t3, w4, b4) = params

  # (h * s + t) @ W + b == h @ (s^T * W) + (t @ W + b)
  w2f = s1.reshape(-1, 1) * w2
  b2f = t1 @ w2 + b2
  w3f = s2.reshape(-1, 1) * w3
  b3f = t2 @ w3 + b3
  w4f = s3.reshape(-1, 1) * w4
  b4f = t3 @ w4 + b4

  # Zero-pad first-layer K (input_size) to a multiple of 128 (numerically exact).
  k_pad = _round_up(input_size, lane)
  w1p = jnp.zeros((k_pad, w1.shape[1]), jnp.float32).at[:input_size, :].set(w1)

  # Pad the head to a lane-dense width; padded classes get a huge negative bias.
  c_pad = _round_up(num_classes, lane)
  w4p = jnp.zeros((w4f.shape[0], c_pad), jnp.float32).at[:, :num_classes].set(w4f)
  b4p = jnp.full((1, c_pad), NEG_BIG, jnp.float32).at[:, :num_classes].set(b4f)

  bf = jnp.bfloat16
  return (w1p.astype(bf), b1,
          w2f.astype(bf), b2f,
          w3f.astype(bf), b3f,
          w4p.astype(bf), b4p)


def init_params(key, input_size, num_classes, eps=1e-5):
  """Deterministic 'PyTorch-like' params: Linear weights [in, out], BN folded
  to per-feature (scale, shift) from running stats. Returns the raw (unfused)
  flat tuple."""
  dims = [input_size, 1024, 512, 128, num_classes]
  keys = jax.random.split(key, 32)
  ki = iter(range(32))

  def linear(fan_in, fan_out):
    bound = 1.0 / jnp.sqrt(fan_in)
    w = jax.random.uniform(keys[next(ki)], (fan_in, fan_out), jnp.float32,
                           -bound, bound)
    b = jax.random.uniform(keys[next(ki)], (1, fan_out), jnp.float32,
                           -bound, bound)
    return w, b

  def bn_affine(feat):
    gamma = 1.0 + 0.1 * jax.random.normal(keys[next(ki)], (1, feat), jnp.float32)
    beta = 0.1 * jax.random.normal(keys[next(ki)], (1, feat), jnp.float32)
    running_mean = 0.05 * jax.random.normal(keys[next(ki)], (1, feat), jnp.float32)
    running_var = 1.0 + 0.1 * jax.random.uniform(keys[next(ki)], (1, feat),
                                                 jnp.float32)
    scale = gamma * jax.lax.rsqrt(running_var + eps)
    shift = beta - running_mean * scale
    return scale, shift

  params = []
  for i in range(3):
    w, b = linear(dims[i], dims[i + 1])
    s, t = bn_affine(dims[i + 1])
    params += [w, b, s, t]
  w4, b4 = linear(dims[3], dims[4])
  params += [w4, b4]
  return tuple(params)


def reference_forward_f32(x, params):
  """Pure-JAX f32 reference of the original (unfused) eval-mode module."""
  (w1, b1, s1, t1, w2, b2, s2, t2, w3, b3, s3, t3, w4, b4) = params
  h = jnp.maximum(x @ w1 + b1, 0.0) * s1 + t1
  h = jnp.maximum(h @ w2 + b2, 0.0) * s2 + t2
  h = jnp.maximum(h @ w3 + b3, 0.0) * s3 + t3
  return jax.nn.softmax(h @ w4 + b4, axis=1)


def reference_forward_bf16(x, weights, num_classes):
  """Pure-JAX reference matching the kernel's folded/padded/bf16 numerics."""
  (w1, b1, w2, b2, w3, b3, w4, b4) = weights
  k_pad = w1.shape[0]
  xp = jnp.zeros((x.shape[0], k_pad), jnp.float32).at[:, :x.shape[1]].set(x)

  def block(h, w, b):
    y = jnp.dot(h.astype(jnp.bfloat16), w, preferred_element_type=jnp.float32) + b
    return jnp.maximum(y, 0.0)

  h = block(xp, w1, b1)
  h = block(h, w2, b2)
  h = block(h, w3, b3)
  logits = jnp.dot(h.astype(jnp.bfloat16), w4,
                   preferred_element_type=jnp.float32) + b4
  return jax.nn.softmax(logits, axis=1)[:, :num_classes]


if __name__ == "__main__":
  key = jax.random.PRNGKey(0)
  k_x, k_p, k_x2 = jax.random.split(key, 3)

  input_size, num_classes = 32, 10
  params = init_params(k_p, input_size, num_classes)
  weights = prepare_params(params, input_size, num_classes)

  fwd = jax.jit(functools.partial(dnn_classifier_forward,
                                  num_classes=num_classes, block_b=256))

  # Small demo batch (single grid tile).
  batch = 8
  x = jax.random.normal(k_x, (batch, input_size), jnp.float32)
  out = jax.block_until_ready(fwd(x, weights))
  assert out.shape == (batch, num_classes)
  assert jnp.allclose(jnp.sum(out, axis=1), 1.0, atol=2e-3)
  assert jnp.allclose(out, reference_forward_bf16(x, weights, num_classes),
                      atol=2e-3, rtol=1e-2)
  assert jnp.allclose(out, reference_forward_f32(x, params), atol=5e-2)

  # Larger batch: exercises the batch grid (3 tiles, non-multiple of TB).
  batch2 = 600
  x2 = jax.random.normal(k_x2, (batch2, input_size), jnp.float32)
  out2 = jax.block_until_ready(fwd(x2, weights))
  assert out2.shape == (batch2, num_classes)
  assert jnp.allclose(jnp.sum(out2, axis=1), 1.0, atol=2e-3)
  assert jnp.allclose(out2, reference_forward_bf16(x2, weights, num_classes),
                      atol=2e-3, rtol=1e-2)

  print("KERNEL_OK")
</pallas_src>

<mosaic_0001>
module attributes {stable_mosaic.version = 11 : i64} {
  func.func @_dnn_kernel(%arg0: i32, %arg1: memref<256x128xf32, #tpu.memory_space<vmem>>, %arg2: memref<128x1024xbf16, #tpu.memory_space<vmem>>, %arg3: memref<1x1024xf32, #tpu.memory_space<vmem>>, %arg4: memref<1024x512xbf16, #tpu.memory_space<vmem>>, %arg5: memref<1x512xf32, #tpu.memory_space<vmem>>, %arg6: memref<512x128xbf16, #tpu.memory_space<vmem>>, %arg7: memref<1x128xf32, #tpu.memory_space<vmem>>, %arg8: memref<128x128xbf16, #tpu.memory_space<vmem>>, %arg9: memref<1x128xf32, #tpu.memory_space<vmem>>, %arg10: memref<256x128xf32, #tpu.memory_space<vmem>>) attributes {dimension_semantics = [#tpu.dimension_semantics<parallel>], iteration_bounds = array<i64: 1>, scalar_prefetch = 0 : i64, scratch_operands = 0 : i64, tpu.core_type = #tpu.core_type<tc>, window_params = [{transform_indices = @transform_0, window_bounds = array<i64: 256, 128>}, {pipeline_mode = #tpu.pipeline_mode<synchronous>, transform_indices = @transform_1, window_bounds = array<i64: 128, 1024>}, {pipeline_mode = #tpu.pipeline_mode<synchronous>, transform_indices = @transform_2, window_bounds = array<i64: 1, 1024>}, {pipeline_mode = #tpu.pipeline_mode<synchronous>, transform_indices = @transform_3, window_bounds = array<i64: 1024, 512>}, {pipeline_mode = #tpu.pipeline_mode<synchronous>, transform_indices = @transform_4, window_bounds = array<i64: 1, 512>}, {pipeline_mode = #tpu.pipeline_mode<synchronous>, transform_indices = @transform_5, window_bounds = array<i64: 512, 128>}, {pipeline_mode = #tpu.pipeline_mode<synchronous>, transform_indices = @transform_6, window_bounds = array<i64: 1, 128>}, {pipeline_mode = #tpu.pipeline_mode<synchronous>, transform_indices = @transform_7, window_bounds = array<i64: 128, 128>}, {pipeline_mode = #tpu.pipeline_mode<synchronous>, transform_indices = @transform_8, window_bounds = array<i64: 1, 128>}, {transform_indices = @transform_9, window_bounds = array<i64: 256, 128>}]} {
    %c0 = arith.constant 0 : index
    %c0_0 = arith.constant 0 : index
    %0 = vector.load %arg1[%c0, %c0_0] : memref<256x128xf32, #tpu.memory_space<vmem>>, vector<256x128xf32>
    %1 = arith.truncf %0 : vector<256x128xf32> to vector<256x128xbf16>
    %c0_1 = arith.constant 0 : index
    %c0_2 = arith.constant 0 : index
    %2 = vector.load %arg2[%c0_1, %c0_2] : memref<128x1024xbf16, #tpu.memory_space<vmem>>, vector<128x1024xbf16>
    %cst = arith.constant dense<0.000000e+00> : vector<256x1024xf32>
    %3 = tpu.matmul %1, %2, %cst {dimension_numbers = #tpu.dot_dimension_numbers<[1], [0], [0], [1], [0, 0, 1, 1], [], []>} : vector<256x128xbf16>, vector<128x1024xbf16>, vector<256x1024xf32> -> vector<256x1024xf32>
    %c0_3 = arith.constant 0 : index
    %c0_4 = arith.constant 0 : index
    %4 = vector.load %arg3[%c0_3, %c0_4] : memref<1x1024xf32, #tpu.memory_space<vmem>>, vector<1x1024xf32>
    %5 = vector.broadcast %4 : vector<1x1024xf32> to vector<256x1024xf32>
    %6 = arith.addf %3, %5 : vector<256x1024xf32>
    %cst_5 = arith.constant 0.000000e+00 : f32
    %7 = vector.broadcast %cst_5 : f32 to vector<256x1024xf32>
    %8 = arith.maximumf %6, %7 : vector<256x1024xf32>
    %9 = arith.truncf %8 : vector<256x1024xf32> to vector<256x1024xbf16>
    %c0_6 = arith.constant 0 : index
    %c0_7 = arith.constant 0 : index
    %10 = vector.load %arg4[%c0_6, %c0_7] : memref<1024x512xbf16, #tpu.memory_space<vmem>>, vector<1024x512xbf16>
    %cst_8 = arith.constant dense<0.000000e+00> : vector<256x512xf32>
    %11 = tpu.matmul %9, %10, %cst_8 {dimension_numbers = #tpu.dot_dimension_numbers<[1], [0], [0], [1], [0, 0, 1, 1], [], []>} : vector<256x1024xbf16>, vector<1024x512xbf16>, vector<256x512xf32> -> vector<256x512xf32>
    %c0_9 = arith.constant 0 : index
    %c0_10 = arith.constant 0 : index
    %12 = vector.load %arg5[%c0_9, %c0_10] : memref<1x512xf32, #tpu.memory_space<vmem>>, vector<1x512xf32>
    %13 = vector.broadcast %12 : vector<1x512xf32> to vector<256x512xf32>
    %14 = arith.addf %11, %13 : vector<256x512xf32>
    %cst_11 = arith.constant 0.000000e+00 : f32
    %15 = vector.broadcast %cst_11 : f32 to vector<256x512xf32>
    %16 = arith.maximumf %14, %15 : vector<256x512xf32>
    %17 = arith.truncf %16 : vector<256x512xf32> to vector<256x512xbf16>
    %c0_12 = arith.constant 0 : index
    %c0_13 = arith.constant 0 : index
    %18 = vector.load %arg6[%c0_12, %c0_13] : memref<512x128xbf16, #tpu.memory_space<vmem>>, vector<512x128xbf16>
    %cst_14 = arith.constant dense<0.000000e+00> : vector<256x128xf32>
    %19 = tpu.matmul %17, %18, %cst_14 {dimension_numbers = #tpu.dot_dimension_numbers<[1], [0], [0], [1], [0, 0, 1, 1], [], []>} : vector<256x512xbf16>, vector<512x128xbf16>, vector<256x128xf32> -> vector<256x128xf32>
    %c0_15 = arith.constant 0 : index
    %c0_16 = arith.constant 0 : index
    %20 = vector.load %arg7[%c0_15, %c0_16] : memref<1x128xf32, #tpu.memory_space<vmem>>, vector<1x128xf32>
    %21 = vector.broadcast %20 : vector<1x128xf32> to vector<256x128xf32>
    %22 = arith.addf %19, %21 : vector<256x128xf32>
    %cst_17 = arith.constant 0.000000e+00 : f32
    %23 = vector.broadcast %cst_17 : f32 to vector<256x128xf32>
    %24 = arith.maximumf %22, %23 : vector<256x128xf32>
    %25 = arith.truncf %24 : vector<256x128xf32> to vector<256x128xbf16>
    %c0_18 = arith.constant 0 : index
    %c0_19 = arith.constant 0 : index
    %26 = vector.load %arg8[%c0_18, %c0_19] : memref<128x128xbf16, #tpu.memory_space<vmem>>, vector<128x128xbf16>
    %cst_20 = arith.constant dense<0.000000e+00> : vector<256x128xf32>
    %27 = tpu.matmul %25, %26, %cst_20 {dimension_numbers = #tpu.dot_dimension_numbers<[1], [0], [0], [1], [0, 0, 1, 1], [], []>} : vector<256x128xbf16>, vector<128x128xbf16>, vector<256x128xf32> -> vector<256x128xf32>
    %c0_21 = arith.constant 0 : index
    %c0_22 = arith.constant 0 : index
    %28 = vector.load %arg9[%c0_21, %c0_22] : memref<1x128xf32, #tpu.memory_space<vmem>>, vector<1x128xf32>
    %29 = vector.broadcast %28 : vector<1x128xf32> to vector<256x128xf32>
    %30 = arith.addf %27, %29 : vector<256x128xf32>
    %cst_23 = arith.constant dense<0xFF800000> : vector<256xf32>
    %31 = vector.multi_reduction <maximumf>, %30, %cst_23 [1] : vector<256x128xf32> to vector<256xf32>
    %32 = vector.shape_cast %31 : vector<256xf32> to vector<256x1xf32>
    %33 = vector.broadcast %32 : vector<256x1xf32> to vector<256x128xf32>
    %34 = arith.subf %30, %33 : vector<256x128xf32>
    %35 = math.exp %34 : vector<256x128xf32>
    %cst_24 = arith.constant dense<0.000000e+00> : vector<256xf32>
    %36 = vector.multi_reduction <add>, %35, %cst_24 [1] : vector<256x128xf32> to vector<256xf32>
    %37 = vector.shape_cast %36 : vector<256xf32> to vector<256x1xf32>
    %38 = tpu.reciprocal %37 {approx = true} : vector<256x1xf32> -> vector<256x1xf32>
    %39 = vector.broadcast %38 : vector<256x1xf32> to vector<256x128xf32>
    %40 = arith.mulf %35, %39 : vector<256x128xf32>
    %c0_25 = arith.constant 0 : index
    %c0_26 = arith.constant 0 : index
    %41 = vector.load %arg10[%c0_25, %c0_26] : memref<256x128xf32, #tpu.memory_space<vmem>>, vector<256x128xf32>
    tpu.vector_store %arg10[%c0_25, %c0_26], %40 {strides = array<i32>} : memref<256x128xf32, #tpu.memory_space<vmem>>, vector<256x128xf32>,
    return
  }
  func.func @transform_0(%arg0: i32) -> (i32, i32) {
    %c0_i32 = arith.constant 0 : i32
    %c0_i32_0 = arith.constant 0 : i32
    return %arg0, %c0_i32 : i32, i32
  }
  func.func @transform_1(%arg0: i32) -> (i32, i32) {
    %c0_i32 = arith.constant 0 : i32
    %c0_i32_0 = arith.constant 0 : i32
    %c0_i32_1 = arith.constant 0 : i32
    return %c0_i32, %c0_i32_0 : i32, i32
  }
  func.func @transform_2(%arg0: i32) -> (i32, i32) {
    %c0_i32 = arith.constant 0 : i32
    %c0_i32_0 = arith.constant 0 : i32
    %c0_i32_1 = arith.constant 0 : i32
    return %c0_i32, %c0_i32_0 : i32, i32
  }
  func.func @transform_3(%arg0: i32) -> (i32, i32) {
    %c0_i32 = arith.constant 0 : i32
    %c0_i32_0 = arith.constant 0 : i32
    %c0_i32_1 = arith.constant 0 : i32
    return %c0_i32, %c0_i32_0 : i32, i32
  }
  func.func @transform_4(%arg0: i32) -> (i32, i32) {
    %c0_i32 = arith.constant 0 : i32
    %c0_i32_0 = arith.constant 0 : i32
    %c0_i32_1 = arith.constant 0 : i32
    return %c0_i32, %c0_i32_0 : i32, i32
  }
  func.func @transform_5(%arg0: i32) -> (i32, i32) {
    %c0_i32 = arith.constant 0 : i32
    %c0_i32_0 = arith.constant 0 : i32
    %c0_i32_1 = arith.constant 0 : i32
    return %c0_i32, %c0_i32_0 : i32, i32
  }
  func.func @transform_6(%arg0: i32) -> (i32, i32) {
    %c0_i32 = arith.constant 0 : i32
    %c0_i32_0 = arith.constant 0 : i32
    %c0_i32_1 = arith.constant 0 : i32
    return %c0_i32, %c0_i32_0 : i32, i32
  }
  func.func @transform_7(%arg0: i32) -> (i32, i32) {
    %c0_i32 = arith.constant 0 : i32
    %c0_i32_0 = arith.constant 0 : i32
    %c0_i32_1 = arith.constant 0 : i32
    return %c0_i32, %c0_i32_0 : i32, i32
  }
  func.func @transform_8(%arg0: i32) -> (i32, i32) {
    %c0_i32 = arith.constant 0 : i32
    %c0_i32_0 = arith.constant 0 : i32
    %c0_i32_1 = arith.constant 0 : i32
    return %c0_i32, %c0_i32_0 : i32, i32
  }
  func.func @transform_9(%arg0: i32) -> (i32, i32) {
    %c0_i32 = arith.constant 0 : i32
    %c0_i32_0 = arith.constant 0 : i32
    return %arg0, %c0_i32 : i32, i32
  }
}

</mosaic_0001>

<bundles_post_ra>
// kernel: dnn_classifier_forward.1
= control target key start
LH: loop header
LB: loop body
LE: loop exit
PB: predicated region body
PF: predicated region fallthrough
CT: control target
= control target key end

     0   :  { %14 = vsyncpa [#allocation3], 0  ;;  %s11348_s0 = inlined_call_operand.vmem [shape: f32[256,128], index: 0, kind: input, shape index: {}]   ;;  %s11349_s1 = inlined_call_operand.hbm [shape: bf16[128,1024], index: 1, kind: input, shape index: {}]   ;;  %s11350_s2 = inlined_call_operand.vmem [shape: f32[1,1024], index: 2, kind: input, shape index: {}]   ;;  %s11351_s3 = inlined_call_operand.hbm [shape: bf16[1024,512], index: 3, kind: input, shape index: {}]   ;;  %s11352_s4 = inlined_call_operand.vmem [shape: f32[1,512], index: 4, kind: input, shape index: {}]   ;;  %s11353_s5 = inlined_call_operand.vmem [shape: bf16[512,128], index: 5, kind: input, shape index: {}]   ;;  %s11354_s6 = inlined_call_operand.vmem [shape: f32[1,128], index: 6, kind: input, shape index: {}]   ;;  %s11355_s7 = inlined_call_operand.hbm [shape: bf16[128,128], index: 7, kind: input, shape index: {}]   ;;  %s11356_s8 = inlined_call_operand.vmem [shape: f32[1,128], index: 8, kind: input, shape index: {}]   ;;  %s11357_s9 = inlined_call_operand.vmem [shape: f32[256,128], index: 9, kind: output, shape index: {}]  }
   0x1   :  { %15 = vsyncpa [#allocation5], 0  ;;  %s7491_s30 = smov [#allocation4]  }
   0x2   :  { %s37_s10 = sshll.u32 %s7491_s30, 4  ;;  %s38_s10 = int_to_ptr.vmem [resolvable:$true] %s37_s10 }
   0x3   :  { %s7435_s11 = scalar_lea.vmem %s38_s10, 32768  ;;  %p7440_p1 = scmp.lt.s32.totalorder %s38_s10, %s38_s10 }
   0x4   :  { %p7436_p0 = scmp.ne.s32.totalorder %s38_s10, %s7435_s11  ;;  %p7441_p2 = scmp.lt.s32.totalorder %s7435_s11, %s7435_s11 }
   0x6   :  { %p7442_p3 = por %p7441_p2, %p7440_p1 }
   0x8   :  { %p7443_p4 = pnand %p7442_p3, %p7436_p0 }
   0xa   :  { %7446 = shalt.err (!%p7443_p4)
}
   0xb   :  { %s7492_s12 = smov 256   ;;  %s7493_s13 = smov 16  }
   0xc   :  { %43 = dma.hbm_to_vmem [thread:$0]  %s11351_s3, 32768, %s38_s10, [#allocation5], %s7492_s12, %s7492_s12, %s7493_s13  }
   0xd   :  { %s7494_s16 = smov [#allocation2]  }
   0xe   :  { %s23_s17 = sshll.u32 %s7494_s16, 4  ;;  %s24_s17 = int_to_ptr.vmem [resolvable:$true] %s23_s17 }
   0xf   :  { %s7455_s18 = scalar_lea.vmem %s24_s17, 8192  ;;  %p7460_p6 = scmp.lt.s32.totalorder %s24_s17, %s24_s17 }
  0x10   :  { %p7456_p5 = scmp.ne.s32.totalorder %s24_s17, %s7455_s18  ;;  %p7461_p7 = scmp.lt.s32.totalorder %s7455_s18, %s7455_s18 }
  0x12   :  { %p7462_p8 = por %p7461_p7, %p7460_p6 }
  0x14   :  { %p7463_p9 = pnand %p7462_p8, %p7456_p5 }
  0x16   :  { %7466 = shalt.err (!%p7463_p9)
}
  0x17   :  { %s7495_s19 = smov 512   ;;  %s7496_s20 = smov 32  }
  0x18   :  { %29 = dma.hbm_to_vmem [thread:$0]  %s11349_s1, 8192, %s24_s17, [#allocation3], %s7495_s19, %s7495_s19, %s7496_s20  }
  0x19   :  { %s7497_s23 = smov [#allocation6]  }
  0x1a   :  { %s55_s24 = sshll.u32 %s7497_s23, 4  ;;  %s56_s24 = int_to_ptr.vmem [resolvable:$true] %s55_s24 }
  0x1b   :  { %s7475_s3 = scalar_lea.vmem %s56_s24, 1024  ;;  %p7480_p11 = scmp.lt.s32.totalorder %s56_s24, %s56_s24 }
  0x1c   :  { %p7476_p10 = scmp.ne.s32.totalorder %s56_s24, %s7475_s3  ;;  %p7481_p12 = scmp.lt.s32.totalorder %s7475_s3, %s7475_s3 }
  0x1e   :  { %p7482_p13 = por %p7481_p12, %p7480_p11 }
  0x20   :  { %p7483_p0 = pnand %p7482_p13, %p7476_p10 }
  0x22   :  { %7486 = shalt.err (!%p7483_p0)
}
  0x23   :  { %s7498_s25 = smov 64   ;;  %s7499_s26 = smov 4  }
  0x24   :  { %61 = dma.hbm_to_vmem [thread:$0]  %s11355_s7, 1024, %s56_s24, [#allocation5], %s7498_s25, %s7498_s25, %s7499_s26  }
  0x25   :  { %7487 = dma.done.wait [#allocation3], 8192  }
  0x26   :  { %7488 = vsyncadd [#allocation3], 4294959104 }
  0x27   :  { %7489 = dma.done.wait [#allocation5], 33792  }
  0x28   :  { %7490 = vsyncadd [#allocation5], 4294933504  ;;  %v11360_v0 = vmov 0   ;;  %v178_v1 = vld [vmem:[#allocation2 + $0x1c0] sm:$0xff]  ;;  %v179_v32 = vld [vmem:[#allocation2 + $0x1c8] sm:$0xff] }
  0x29   :  { %580 = vmatprep.mubr.bf16.mxu0 %v11360_v0  ;;  %700 = vmatprep.mubr.bf16.mxu1 %v11360_v0  ;;  %v182_v2 = vld [vmem:[#allocation2 + $0x1e0] sm:$0xff]  ;;  %v183_v33 = vld [vmem:[#allocation2 + $0x1e8] sm:$0xff]  ;;  %v180_v34 = vld [vmem:[#allocation2 + $0x1d0] sm:$0xff] }
  0x2a   :  { %v170_v3 = vld [vmem:[#allocation2 + $0x180] sm:$0xff]  ;;  %v6246_v4 = vcombine.high %v178_v1, %v182_v2  ;;  %v6245_v5 = vcombine.low %v178_v1, %v182_v2  ;;  %v184_v35 = vld [vmem:[#allocation2 + $0x1f0] sm:$0xff]  ;;  %v75_v38 = vld [vmem:[%s11348_s0 + $0x8] sm:$0xff]  ;;  %v6248_v41 = vcombine.high %v179_v32, %v183_v33  ;;  %v6247_v49 = vcombine.low %v179_v32, %v183_v33 }
  0x2b   :  { %v174_v6 = vld [vmem:[#allocation2 + $0x1a0] sm:$0xff]  ;;  %v99_v40 = vld [vmem:[%s11348_s0 + $0xc8] sm:$0xff]  ;;  %v6250_v44 = vcombine.high %v180_v34, %v184_v35  ;;  %v172_v45 = vld [vmem:[#allocation2 + $0x190] sm:$0xff]  ;;  %v6249_v55 = vcombine.low %v180_v34, %v184_v35 }
  0x2c   :  { %v6238_v7 = vcombine.high %v170_v3, %v174_v6  ;;  %v162_v8 = vld [vmem:[#allocation2 + $0x140] sm:$0xff]  ;;  %548 = vmatprep.subr.bf16.mxu0 %v6246_v4  ;;  %6847 = vmatprep.subr.bf16.mxu1 %v6246_v4  ;;  %v6237_v10 = vcombine.low %v170_v3, %v174_v6  ;;  %v171_v42 = vld [vmem:[#allocation2 + $0x188] sm:$0xff]  ;;  %v176_v46 = vld [vmem:[#allocation2 + $0x1b0] sm:$0xff] }
  0x2d   :  { %v166_v9 = vld [vmem:[#allocation2 + $0x160] sm:$0xff]  ;;  %549 = vmatpush1.bf16.msra.mxu0 %v6245_v5  ;;  %6855 = vmatpush1.bf16.msra.mxu1 %v6245_v5  ;;  %v175_v43 = vld [vmem:[#allocation2 + $0x1a8] sm:$0xff]  ;;  %v76_v53 = vld [vmem:[%s11348_s0 + $0x10] sm:$0xff]  ;;  %v6242_v58 = vcombine.high %v172_v45, %v176_v46  ;;  %v6241_v2 = vcombine.low %v172_v45, %v176_v46 }
  0x2e   :  { %550 = vmatprep.subr.bf16.mxu0 %v6238_v7  ;;  %6848 = vmatprep.subr.bf16.mxu1 %v6238_v7  ;;  %v6230_v11 = vcombine.high %v162_v8, %v166_v9  ;;  %v154_v12 = vld [vmem:[#allocation2 + $0x100] sm:$0xff]  ;;  %v6229_v14 = vcombine.low %v162_v8, %v166_v9  ;;  %v163_v50 = vld [vmem:[#allocation2 + $0x148] sm:$0xff]  ;;  %v6240_v52 = vcombine.high %v171_v42, %v175_v43  ;;  %v77_v54 = vld [vmem:[%s11348_s0 + $0x18] sm:$0xff] }
  0x2f   :  { %v158_v13 = vld [vmem:[#allocation2 + $0x120] sm:$0xff]  ;;  %v167_v51 = vld [vmem:[#allocation2 + $0x168] sm:$0xff]  ;;  %v100_v56 = vld [vmem:[%s11348_s0 + $0xd0] sm:$0xff]  ;;  %v6239_v59 = vcombine.low %v171_v42, %v175_v43  ;;  %v7594_v3 = vpack.c.bf16 %v77_v54, %v76_v53 }
  0x30   :  { %v6222_v15 = vcombine.high %v154_v12, %v158_v13  ;;  %v146_v16 = vld [vmem:[#allocation2 + $0xc0] sm:$0xff]  ;;  %v6221_v18 = vcombine.low %v154_v12, %v158_v13  ;;  %v101_v57 = vld [vmem:[%s11348_s0 + $0xd8] sm:$0xff]  ;;  %v155_v60 = vld [vmem:[#allocation2 + $0x108] sm:$0xff]  ;;  %v6232_v62 = vcombine.high %v163_v50, %v167_v51  ;;  %v6231_v7 = vcombine.low %v163_v50, %v167_v51 }
  0x31   :  { %551 = vmatpush1.bf16.msra.mxu0 %v6237_v10  ;;  %6856 = vmatpush1.bf16.msra.mxu1 %v6237_v10  ;;  %v150_v17 = vld [vmem:[#allocation2 + $0xe0] sm:$0xff]  ;;  %v159_v61 = vld [vmem:[#allocation2 + $0x128] sm:$0xff]  ;;  %v164_v63 = vld [vmem:[#allocation2 + $0x150] sm:$0xff]  ;;  %v7596_v4 = vpack.c.bf16 %v101_v57, %v100_v56 }
  0x32   :  { %552 = vmatprep.subr.bf16.mxu0 %v6230_v11  ;;  %6849 = vmatprep.subr.bf16.mxu1 %v6230_v11  ;;  %v6214_v19 = vcombine.high %v146_v16, %v150_v17  ;;  %v138_v20 = vld [vmem:[#allocation2 + $0x80] sm:$0xff]  ;;  %v6213_v22 = vcombine.low %v146_v16, %v150_v17  ;;  %v168_v1 = vld [vmem:[#allocation2 + $0x170] sm:$0xff]  ;;  %v147_v8 = vld [vmem:[#allocation2 + $0xc8] sm:$0xff]  ;;  %v6224_v10 = vcombine.high %v155_v60, %v159_v61 }
  0x33   :  { %v142_v21 = vld [vmem:[#allocation2 + $0xa0] sm:$0xff]  ;;  %v156_v5 = vld [vmem:[#allocation2 + $0x110] sm:$0xff]  ;;  %v151_v9 = vld [vmem:[#allocation2 + $0xe8] sm:$0xff]  ;;  %v6233_v16 = vcombine.low %v164_v63, %v168_v1  ;;  %v6223_v17 = vcombine.low %v155_v60, %v159_v61 }
  0x34   :  { %v6206_v23 = vcombine.high %v138_v20, %v142_v21  ;;  %v130_v24 = vld [vmem:[#allocation2 + $0x40] sm:$0xff]  ;;  %v6205_v26 = vcombine.low %v138_v20, %v142_v21  ;;  %v160_v6 = vld [vmem:[#allocation2 + $0x130] sm:$0xff]  ;;  %v79_v12 = vld [vmem:[%s11348_s0 + $0x28] sm:$0xff]  ;;  %v6216_v21 = vcombine.high %v147_v8, %v151_v9 }
  0x35   :  { %553 = vmatpush1.bf16.msra.mxu0 %v6229_v14  ;;  %6857 = vmatpush1.bf16.msra.mxu1 %v6229_v14  ;;  %v134_v25 = vld [vmem:[#allocation2 + $0x60] sm:$0xff]  ;;  %v103_v14 = vld [vmem:[%s11348_s0 + $0xe8] sm:$0xff]  ;;  %v6226_v20 = vcombine.high %v156_v5, %v160_v6  ;;  %v6225_v32 = vcombine.low %v156_v5, %v160_v6  ;;  %v104_v33 = vld [vmem:[%s11348_s0 + $0xf0] sm:$0xff] }
  0x36   :  { %554 = vmatprep.subr.bf16.mxu0 %v6222_v15  ;;  %6850 = vmatprep.subr.bf16.mxu1 %v6222_v15  ;;  %v6198_v27 = vcombine.high %v130_v24, %v134_v25  ;;  %v122_v28 = vld [vmem:[#allocation2] sm:$0xff]  ;;  %v6197_v30 = vcombine.low %v130_v24, %v134_v25  ;;  %v6234_v15 = vcombine.high %v164_v63, %v168_v1  ;;  %v105_v34 = vld [vmem:[%s11348_s0 + $0xf8] sm:$0xff]  ;;  %v132_v45 = vld [vmem:[#allocation2 + $0x50] sm:$0xff] }
  0x37   :  { %v126_v29 = vld [vmem:[#allocation2 + $0x20] sm:$0xff]  ;;  %v136_v46 = vld [vmem:[#allocation2 + $0x70] sm:$0xff]  ;;  %v181_v50 = vld [vmem:[#allocation2 + $0x1d8] sm:$0xff] }
  0x38   :  { %v6190_v31 = vcombine.high %v122_v28, %v126_v29  ;;  %v74_v36 = vld [vmem:[%s11348_s0] sm:$0xff]  ;;  %v6189_v37 = vcombine.low %v122_v28, %v126_v29  ;;  %v135_v28 = vld [vmem:[#allocation2 + $0x68] sm:$0xff]  ;;  %v185_v51 = vld [vmem:[#allocation2 + $0x1f8] sm:$0xff]  ;;  %v6202_v60 = vcombine.high %v132_v45, %v136_v46 }
  0x39   :  { %555 = vmatpush1.bf16.msra.mxu0 %v6221_v18  ;;  %6858 = vmatpush1.bf16.msra.mxu1 %v6221_v18  ;;  %v98_v39 = vld [vmem:[%s11348_s0 + $0xc0] sm:$0xff]  ;;  %v7574_v47 = vpack.c.bf16 %v75_v38, %v74_v36  ;;  %v139_v18 = vld [vmem:[#allocation2 + $0x88] sm:$0xff]  ;;  %v6252_v61 = vcombine.high %v181_v50, %v185_v51  ;;  %v128_v63 = vld [vmem:[#allocation2 + $0x30] sm:$0xff] }
  0x3a   :  { %556 = vmatprep.subr.bf16.mxu0 %v6214_v19  ;;  %6851 = vmatprep.subr.bf16.mxu1 %v6214_v19  ;;  %v7576_v48 = vpack.c.bf16 %v99_v40, %v98_v39  ;;  %v78_v11 = vld [vmem:[%s11348_s0 + $0x20] sm:$0xff]  ;;  %v143_v19 = vld [vmem:[#allocation2 + $0xa8] sm:$0xff]  ;;  %v140_v40 = vld [vmem:[#allocation2 + $0x90] sm:$0xff] }
  0x3b   :  { %v102_v13 = vld [vmem:[%s11348_s0 + $0xe0] sm:$0xff]  ;;  %v7614_v24 = vpack.c.bf16 %v79_v12, %v78_v11  ;;  %v6208_v29 = vcombine.high %v139_v18, %v143_v19  ;;  %v6207_v36 = vcombine.low %v139_v18, %v143_v19  ;;  %v127_v38 = vld [vmem:[#allocation2 + $0x28] sm:$0xff]  ;;  %v165_v5 = vld [vmem:[#allocation2 + $0x158] sm:$0xff] }
  0x3c   :  { %v7616_v25 = vpack.c.bf16 %v103_v14, %v102_v13  ;;  %v82_v54 = vld [vmem:[%s11348_s0 + $0x40] sm:$0xff]  ;;  %v169_v6 = vld [vmem:[#allocation2 + $0x178] sm:$0xff] }
  0x3d   :  { %557 = vmatpush1.bf16.msra.mxu0 %v6213_v22  ;;  %6859 = vmatpush1.bf16.msra.mxu1 %v6213_v22  ;;  %v148_v22 = vld [vmem:[#allocation2 + $0xd0] sm:$0xff]  ;;  %v85_v11 = vld [vmem:[%s11348_s0 + $0x58] sm:$0xff]  ;;  %v6236_v13 = vcombine.high %v165_v5, %v169_v6  ;;  %v6235_v18 = vcombine.low %v165_v5, %v169_v6 }
  0x3e   :  { %558 = vmatprep.subr.bf16.mxu0 %v6206_v23  ;;  %6852 = vmatprep.subr.bf16.mxu1 %v6206_v23  ;;  %v152_v23 = vld [vmem:[#allocation2 + $0xf0] sm:$0xff]  ;;  %v157_v14 = vld [vmem:[#allocation2 + $0x118] sm:$0xff] }
  0x3f   :  { %v6218_v35 = vcombine.high %v148_v22, %v152_v23  ;;  %v6217_v42 = vcombine.low %v148_v22, %v152_v23  ;;  %v6875_v19 = vld [vmem:[#allocation4 + $0xe4] ss:$16 sps:$4 sm:$0xff]   ;;  %v149_v22 = vld [vmem:[#allocation2 + $0xd8] sm:$0xff]  ;;  %v6879_v5 = vld [vmem:[#allocation4 + $0xc0] ss:$16 sps:$4 sm:$0xff]  }
  0x40   :  { %v153_v23 = vld [vmem:[#allocation2 + $0xf8] sm:$0xff]  ;;  %v6884_v6 = vld [vmem:[#allocation4 + $0xa4] ss:$16 sps:$4 sm:$0xff]  }
  0x41   :  { %559 = vmatpush1.bf16.msra.mxu0 %v6205_v26  ;;  %6860 = vmatpush1.bf16.msra.mxu1 %v6205_v26  ;;  %v6215_v26 = vcombine.low %v147_v8, %v151_v9  ;;  %v6201_v8 = vcombine.low %v132_v45, %v136_v46 }
  0x42   :  { %560 = vmatprep.subr.bf16.mxu0 %v6198_v27  ;;  %6853 = vmatprep.subr.bf16.mxu1 %v6198_v27  ;;  %v131_v27 = vld [vmem:[#allocation2 + $0x48] sm:$0xff] }
  0x43   :  { %v6200_v39 = vcombine.high %v131_v27, %v135_v28 }
  0x45   :  { %561 = vmatpush1.bf16.msra.mxu0 %v6197_v30  ;;  %6861 = vmatpush1.bf16.msra.mxu1 %v6197_v30  ;;  %v80_v30 = vld [vmem:[%s11348_s0 + $0x30] sm:$0xff] }
  0x46   :  { %562 = vmatprep.subr.bf16.mxu0 %v6190_v31  ;;  %6854 = vmatprep.subr.bf16.mxu1 %v6190_v31  ;;  %v81_v31 = vld [vmem:[%s11348_s0 + $0x38] sm:$0xff] }
  0x47   :  { %v7634_v43 = vpack.c.bf16 %v81_v31, %v80_v30  ;;  %v6220_v30 = vcombine.high %v149_v22, %v153_v23 }
  0x49   :  { %563 = vmatpush1.bf16.msra.mxu0 %v6189_v37  ;;  %6862 = vmatpush1.bf16.msra.mxu1 %v6189_v37  ;;  %v123_v37 = vld [vmem:[#allocation2 + $0x8] sm:$0xff] }
  0x4a   :  { %741 = vmatprep.subr.bf16.mxu1 %v6248_v41  ;;  %934 = vmatprep.subr.bf16.mxu0 %v6250_v44  ;;  %v144_v41 = vld [vmem:[#allocation2 + $0xb0] sm:$0xff]  ;;  %v7636_v44 = vpack.c.bf16 %v105_v34, %v104_v33  ;;  %v6191_v57 = vcombine.low %v123_v37, %v127_v38 }
  0x4b   :  { %v6210_v53 = vcombine.high %v140_v40, %v144_v41  ;;  %v6209_v56 = vcombine.low %v140_v40, %v144_v41  ;;  %v88_v34 = vld [vmem:[%s11348_s0 + $0x70] sm:$0xff]  ;;  %v129_v40 = vld [vmem:[#allocation2 + $0x38] sm:$0xff] }
  0x4c   :  { %581 = vmatmul.mubr.bf16.vlgmr.msra.gmra.mxu0 %v7574_v47  ;;  %701 = vmatmul.mubr.bf16.vlgmr.msra.gmra.mxu1 %v7576_v48 }
  0x4d   :  { %742 = vmatpush1.bf16.msra.mxu1 %v6247_v49  ;;  %590 = vmatprep.mubr.bf16.mxu0 %v11360_v0  ;;  %v6199_v49 = vcombine.low %v131_v27, %v135_v28  ;;  %v141_v28 = vld [vmem:[#allocation2 + $0x98] sm:$0xff] }
  0x4e   :  { %743 = vmatprep.subr.bf16.mxu1 %v6240_v52  ;;  %710 = vmatprep.mubr.bf16.mxu1 %v11360_v0  ;;  %v6192_v52 = vcombine.high %v123_v37, %v127_v38  ;;  %v89_v37 = vld [vmem:[%s11348_s0 + $0x78] sm:$0xff] }
  0x4f   :  { %935 = vmatpush1.bf16.msra.mxu0 %v6249_v55  ;;  %v83_v55 = vld [vmem:[%s11348_s0 + $0x48] sm:$0xff] }
  0x50   :  { %936 = vmatprep.subr.bf16.mxu0 %v6242_v58  ;;  %v173_v58 = vld [vmem:[#allocation2 + $0x198] sm:$0xff]  ;;  %v7648_v1 = vpack.c.bf16 %v83_v55, %v82_v54  ;;  %v92_v54 = vld [vmem:[%s11348_s0 + $0x90] sm:$0xff] }
  0x51   :  { %744 = vmatpush1.bf16.msra.mxu1 %v6239_v59  ;;  %v177_v59 = vld [vmem:[#allocation2 + $0x1b8] sm:$0xff] }
  0x52   :  { %745 = vmatprep.subr.bf16.mxu1 %v6232_v62  ;;  %v124_v62 = vld [vmem:[#allocation2 + $0x10] sm:$0xff]  ;;  %v6243_v12 = vcombine.low %v173_v58, %v177_v59  ;;  %v93_v55 = vld [vmem:[%s11348_s0 + $0x98] sm:$0xff] }
  0x53   :  { %937 = vmatpush1.bf16.msra.mxu0 %v6241_v2  ;;  %v6251_v2 = vcombine.low %v181_v50, %v185_v51  ;;  %v6194_v9 = vcombine.high %v124_v62, %v128_v63  ;;  %v91_v50 = vld [vmem:[%s11348_s0 + $0x88] sm:$0xff]  ;;  %v6878_v51 = vld [vmem:[#allocation4 + $0x2e4] ss:$16 sps:$4 sm:$0xff]  }
  0x54   :  { %591 = vmatmul.mubr.bf16.gmra.mxu0 %v7594_v3  ;;  %711 = vmatmul.mubr.bf16.gmra.mxu1 %v7596_v4 }
  0x55   :  { %746 = vmatpush1.bf16.msra.mxu1 %v6231_v7  ;;  %600 = vmatprep.mubr.bf16.mxu0 %v11360_v0  ;;  %v6244_v7 = vcombine.high %v173_v58, %v177_v59  ;;  %v95_v58 = vld [vmem:[%s11348_s0 + $0xa8] sm:$0xff] }
  0x56   :  { %747 = vmatprep.subr.bf16.mxu1 %v6224_v10  ;;  %720 = vmatprep.mubr.bf16.mxu1 %v11360_v0  ;;  %v84_v10 = vld [vmem:[%s11348_s0 + $0x50] sm:$0xff] }
  0x57   :  { %938 = vmatprep.subr.bf16.mxu0 %v6234_v15  ;;  %v161_v15 = vld [vmem:[#allocation2 + $0x138] sm:$0xff] }
  0x58   :  { %939 = vmatpush1.bf16.msra.mxu0 %v6233_v16  ;;  %v6193_v16 = vcombine.low %v124_v62, %v128_v63  ;;  %v6227_v27 = vcombine.low %v157_v14, %v161_v15  ;;  %v6873_v63 = vld [vmem:[#allocation4 + $0xe0] ss:$16 sps:$4 sm:$0xff]  }
  0x59   :  { %748 = vmatpush1.bf16.msra.mxu1 %v6223_v17  ;;  %940 = vmatprep.subr.bf16.mxu0 %v6226_v20  ;;  %v7660_v17 = vpack.c.bf16 %v85_v11, %v84_v10  ;;  %v6228_v20 = vcombine.high %v157_v14, %v161_v15  ;;  %v6893_v10 = vld [vmem:[#allocation4 + $0x64] ss:$16 sps:$4 sm:$0xff]   ;;  %v6891_v11 = vld [vmem:[#allocation4 + $0x60] ss:$16 sps:$4 sm:$0xff]  }
  0x5a   :  { %749 = vmatprep.subr.bf16.mxu1 %v6216_v21  ;;  %v86_v21 = vld [vmem:[%s11348_s0 + $0x60] sm:$0xff] }
  0x5b   :  { %v6902_v14 = vld [vmem:[#allocation4 + $0x24] ss:$16 sps:$4 sm:$0xff]   ;;  %v6900_v15 = vld [vmem:[#allocation4 + $0x20] ss:$16 sps:$4 sm:$0xff]  }
  0x5c   :  { %601 = vmatmul.mubr.bf16.gmra.mxu0 %v7614_v24  ;;  %721 = vmatmul.mubr.bf16.gmra.mxu1 %v7616_v25 }
  0x5d   :  { %750 = vmatpush1.bf16.msra.mxu1 %v6215_v26  ;;  %610 = vmatprep.mubr.bf16.mxu0 %v11360_v0  ;;  %v87_v26 = vld [vmem:[%s11348_s0 + $0x68] sm:$0xff] }
  0x5e   :  { %751 = vmatprep.subr.bf16.mxu1 %v6208_v29  ;;  %730 = vmatprep.mubr.bf16.mxu1 %v11360_v0  ;;  %v145_v29 = vld [vmem:[#allocation2 + $0xb8] sm:$0xff]  ;;  %v7672_v31 = vpack.c.bf16 %v87_v26, %v86_v21  ;;  %v6917_v21 = vld [vmem:[#allocation4 + $0x1c4] ss:$16 sps:$4 sm:$0xff]   ;;  %v6918_v26 = vld [vmem:[#allocation4 + $0x1a0] ss:$16 sps:$4 sm:$0xff]  }
  0x5f   :  { %941 = vmatpush1.bf16.msra.mxu0 %v6225_v32  ;;  %v6219_v32 = vcombine.low %v149_v22, %v153_v23  ;;  %v6212_v33 = vcombine.high %v141_v28, %v145_v29  ;;  %v6211_v38 = vcombine.low %v141_v28, %v145_v29  ;;  %v6915_v22 = vld [vmem:[#allocation4 + $0x1c0] ss:$16 sps:$4 sm:$0xff]   ;;  %v6920_v23 = vld [vmem:[#allocation4 + $0x1a4] ss:$16 sps:$4 sm:$0xff]  }
  0x60   :  { %942 = vmatprep.subr.bf16.mxu0 %v6218_v35  ;;  %v133_v35 = vld [vmem:[#allocation2 + $0x58] sm:$0xff]  ;;  %v6924_v28 = vld [vmem:[#allocation4 + $0x180] ss:$16 sps:$4 sm:$0xff]   ;;  %v6929_v29 = vld [vmem:[#allocation4 + $0x164] ss:$16 sps:$4 sm:$0xff]  }
  0x61   :  { %752 = vmatpush1.bf16.msra.mxu1 %v6207_v36  ;;  %v137_v36 = vld [vmem:[#allocation2 + $0x78] sm:$0xff] }
  0x62   :  { %753 = vmatprep.subr.bf16.mxu1 %v6200_v39  ;;  %v125_v39 = vld [vmem:[#allocation2 + $0x18] sm:$0xff]  ;;  %v6204_v41 = vcombine.high %v133_v35, %v137_v36  ;;  %v6203_v45 = vcombine.low %v133_v35, %v137_v36  ;;  %v6936_v35 = vld [vmem:[#allocation4 + $0x120] ss:$16 sps:$4 sm:$0xff]   ;;  %v6944_v36 = vld [vmem:[#allocation4 + $0x104] ss:$16 sps:$4 sm:$0xff]  }
  0x63   :  { %943 = vmatpush1.bf16.msra.mxu0 %v6217_v42  ;;  %v7684_v42 = vpack.c.bf16 %v89_v37, %v88_v34  ;;  %v6196_v46 = vcombine.high %v125_v39, %v129_v40  ;;  %v6938_v34 = vld [vmem:[#allocation4 + $0x124] ss:$16 sps:$4 sm:$0xff]   ;;  %v6942_v37 = vld [vmem:[#allocation4 + $0x100] ss:$16 sps:$4 sm:$0xff]  }
  0x64   :  { %611 = vmatmul.mubr.bf16.gmra.mxu0 %v7634_v43  ;;  %731 = vmatmul.mubr.bf16.gmra.mxu1 %v7636_v44 }
  0x65   :  { %754 = vmatpush1.bf16.msra.mxu1 %v6199_v49  ;;  %620 = vmatprep.mubr.bf16.mxu0 %v11360_v0  ;;  %v90_v49 = vld [vmem:[%s11348_s0 + $0x80] sm:$0xff] }
  0x66   :  { %755 = vmatprep.subr.bf16.mxu1 %v6192_v52  ;;  %773 = vmatprep.mubr.bf16.mxu1 %v11360_v0  ;;  %v6195_v52 = vcombine.low %v125_v39, %v129_v40  ;;  %v6887_v39 = vld [vmem:[#allocation4 + $0x2c4] ss:$16 sps:$4 sm:$0xff]  }
  0x67   :  { %944 = vmatprep.subr.bf16.mxu0 %v6210_v53  ;;  %v7696_v53 = vpack.c.bf16 %v91_v50, %v90_v49  ;;  %v6971_v40 = vld [vmem:[#allocation4 + $0x4e4] ss:$16 sps:$4 sm:$0xff]  }
  0x68   :  { %945 = vmatpush1.bf16.msra.mxu0 %v6209_v56  ;;  %v7708_v56 = vpack.c.bf16 %v93_v55, %v92_v54  ;;  %v6905_v49 = vld [vmem:[#allocation4 + $0x284] ss:$16 sps:$4 sm:$0xff]   ;;  %v188_v54 = vlaneseq }
  0x69   :  { %756 = vmatpush1.bf16.msra.mxu1 %v6191_v57  ;;  %946 = vmatprep.subr.bf16.mxu0 %v6202_v60  ;;  %v94_v57 = vld [vmem:[%s11348_s0 + $0xa0] sm:$0xff]  ;;  %v96_v60 = vld [vmem:[%s11348_s0 + $0xb0] sm:$0xff] }
  0x6a   :  { %1127 = vmatprep.subr.bf16.mxu1 %v6252_v61  ;;  %v7720_v59 = vpack.c.bf16 %v95_v58, %v94_v57  ;;  %v97_v61 = vld [vmem:[%s11348_s0 + $0xb8] sm:$0xff]  ;;  %v6914_v50 = vld [vmem:[#allocation4 + $0x264] ss:$16 sps:$4 sm:$0xff]   ;;  %v6930_v57 = vld [vmem:[#allocation4 + $0x220] ss:$16 sps:$4 sm:$0xff]   ;;  %v7782_v58 = vshrl.u32 %v188_v54, 7 }
  0x6b   :  { %v7732_v62 = vpack.c.bf16 %v97_v61, %v96_v60  ;;  %v6932_v55 = vld [vmem:[#allocation4 + $0x224] ss:$16 sps:$4 sm:$0xff]  }
  0x6c   :  { %621 = vmatmul.mubr.bf16.gmra.mxu0 %v7648_v1  ;;  %774 = vmatmul.mubr.bf16.vlgmr.msra.gmra.mxu1 %v7574_v47  ;;  %11496 = vst [vmem:[#allocation9_spill] sm:$0xff] %v7782_v58  ;;  %v6941_v60 = vld [vmem:[#allocation4 + $0x204] ss:$16 sps:$4 sm:$0xff]   ;;  %v11359_v61 = vsub.s32 0, %v7782_v58 }
  0x6d   :  { %1128 = vmatpush1.bf16.msra.mxu1 %v6251_v2  ;;  %630 = vmatprep.mubr.bf16.mxu0 %v11360_v0  ;;  %v6881_v2 = vld [vmem:[#allocation4 + $0xc4] ss:$16 sps:$4 sm:$0xff]  }
  0x6e   :  { %783 = vmatprep.mubr.bf16.mxu1 %v11360_v0  ;;  %1129 = vmatprep.subr.bf16.mxu1 %v6244_v7  ;;  %v6882_v7 = vld [vmem:[#allocation4 + $0xa0] ss:$16 sps:$4 sm:$0xff]  }
  0x6f   :  { %947 = vmatpush1.bf16.msra.mxu0 %v6201_v8  ;;  %v6890_v8 = vld [vmem:[#allocation4 + $0x84] ss:$16 sps:$4 sm:$0xff]  }
  0x70   :  { %948 = vmatprep.subr.bf16.mxu0 %v6194_v9  ;;  %v6888_v9 = vld [vmem:[#allocation4 + $0x80] ss:$16 sps:$4 sm:$0xff]  }
  0x71   :  { %1130 = vmatpush1.bf16.msra.mxu1 %v6243_v12  ;;  %v6899_v12 = vld [vmem:[#allocation4 + $0x44] ss:$16 sps:$4 sm:$0xff]  }
  0x72   :  { %1131 = vmatprep.subr.bf16.mxu1 %v6236_v13  ;;  %v6897_v13 = vld [vmem:[#allocation4 + $0x40] ss:$16 sps:$4 sm:$0xff]  }
  0x73   :  { %949 = vmatpush1.bf16.msra.mxu0 %v6193_v16  ;;  %v6908_v16 = vld [vmem:[#allocation4 + $0x4] ss:$16 sps:$4 sm:$0xff]  }
  0x74   :  { %631 = vmatmul.mubr.bf16.gmra.mxu0 %v7660_v17  ;;  %784 = vmatmul.mubr.bf16.gmra.mxu1 %v7594_v3 }
  0x75   :  { %640 = vmatprep.mubr.bf16.mxu0 %v11360_v0  ;;  %793 = vmatprep.mubr.bf16.mxu1 %v11360_v0 }
  0x76   :  { %1132 = vmatpush1.bf16.msra.mxu1 %v6235_v18  ;;  %3262 = vmatprep.subr.bf16.mxu0 %v6875_v19  ;;  %v6906_v18 = vld [vmem:[#allocation4] ss:$16 sps:$4 sm:$0xff]   ;;  %v6911_v19 = vld [vmem:[#allocation4 + $0x1e4] ss:$16 sps:$4 sm:$0xff]  }
  0x77   :  { %1133 = vmatprep.subr.bf16.mxu1 %v6228_v20  ;;  %v6909_v20 = vld [vmem:[#allocation4 + $0x1e0] ss:$16 sps:$4 sm:$0xff]  }
  0x7a   :  { %1134 = vmatpush1.bf16.msra.mxu1 %v6227_v27  ;;  %v6926_v27 = vld [vmem:[#allocation4 + $0x184] ss:$16 sps:$4 sm:$0xff]  }
  0x7b   :  { %1135 = vmatprep.subr.bf16.mxu1 %v6220_v30  ;;  %v6927_v30 = vld [vmem:[#allocation4 + $0x160] ss:$16 sps:$4 sm:$0xff]  }
  0x7c   :  { %641 = vmatmul.mubr.bf16.gmra.mxu0 %v7672_v31  ;;  %794 = vmatmul.mubr.bf16.gmra.mxu1 %v7614_v24 }
  0x7d   :  { %650 = vmatprep.mubr.bf16.mxu0 %v11360_v0  ;;  %803 = vmatprep.mubr.bf16.mxu1 %v11360_v0 }
  0x7e   :  { %1136 = vmatpush1.bf16.msra.mxu1 %v6219_v32  ;;  %v6935_v32 = vld [vmem:[#allocation4 + $0x144] ss:$16 sps:$4 sm:$0xff]  }
  0x7f   :  { %1137 = vmatprep.subr.bf16.mxu1 %v6212_v33  ;;  %v6933_v33 = vld [vmem:[#allocation4 + $0x140] ss:$16 sps:$4 sm:$0xff]  }
  0x82   :  { %1138 = vmatpush1.bf16.msra.mxu1 %v6211_v38  ;;  %v6876_v38 = vld [vmem:[#allocation4 + $0x2e0] ss:$16 sps:$4 sm:$0xff]  }
  0x83   :  { %1139 = vmatprep.subr.bf16.mxu1 %v6204_v41  ;;  %v6885_v41 = vld [vmem:[#allocation4 + $0x2c0] ss:$16 sps:$4 sm:$0xff]  }
  0x84   :  { %651 = vmatmul.mubr.bf16.gmra.mxu0 %v7684_v42  ;;  %804 = vmatmul.mubr.bf16.gmra.mxu1 %v7634_v43 }
  0x85   :  { %660 = vmatprep.mubr.bf16.mxu0 %v11360_v0  ;;  %813 = vmatprep.mubr.bf16.mxu1 %v11360_v0 }
  0x86   :  { %1140 = vmatpush1.bf16.msra.mxu1 %v6203_v45  ;;  %v6896_v45 = vld [vmem:[#allocation4 + $0x2a4] ss:$16 sps:$4 sm:$0xff]  }
  0x87   :  { %1141 = vmatprep.subr.bf16.mxu1 %v6196_v46  ;;  %v6894_v46 = vld [vmem:[#allocation4 + $0x2a0] ss:$16 sps:$4 sm:$0xff]  }
  0x8a   :  { %1142 = vmatpush1.bf16.msra.mxu1 %v6195_v52  ;;  %v6923_v52 = vld [vmem:[#allocation4 + $0x244] ss:$16 sps:$4 sm:$0xff]  }
  0x8b   :  { %3455 = vmatprep.subr.bf16.mxu1 %v6878_v51  ;;  %v6912_v51 = vld [vmem:[#allocation4 + $0x260] ss:$16 sps:$4 sm:$0xff]  }
  0x8c   :  { %661 = vmatmul.mubr.bf16.gmra.mxu0 %v7696_v53  ;;  %814 = vmatmul.mubr.bf16.gmra.mxu1 %v7648_v1 }
  0x8d   :  { %670 = vmatprep.mubr.bf16.mxu0 %v11360_v0  ;;  %823 = vmatprep.mubr.bf16.mxu1 %v11360_v0 }
  0x94   :  { %671 = vmatmul.mubr.bf16.gmra.mxu0 %v7708_v56  ;;  %824 = vmatmul.mubr.bf16.gmra.mxu1 %v7660_v17 }
  0x95   :  { %680 = vmatprep.mubr.bf16.mxu0 %v11360_v0  ;;  %833 = vmatprep.mubr.bf16.mxu1 %v11360_v0 }
  0x9c   :  { %681 = vmatmul.mubr.bf16.gmra.mxu0 %v7720_v59  ;;  %834 = vmatmul.mubr.bf16.gmra.mxu1 %v7672_v31 }
  0x9d   :  { %690 = vmatprep.mubr.bf16.mxu0 %v11360_v0  ;;  %843 = vmatprep.mubr.bf16.mxu1 %v11360_v0 }
  0xa4   :  { %691 = vmatmul.mubr.bf16.gmra.mxu0 %v7732_v62  ;;  %844 = vmatmul.mubr.bf16.gmra.mxu1 %v7684_v42 }
  0xa5   :  { %853 = vmatprep.mubr.bf16.mxu1 %v11360_v0  ;;  %966 = vmatprep.mubr.bf16.mxu0 %v11360_v0 }
  0xac   :  { %854 = vmatmul.mubr.bf16.gmra.mxu1 %v7696_v53  ;;  %967 = vmatmul.mubr.bf16.vlgmr.msra.gmra.mxu0 %v7574_v47 }
  0xad   :  { %863 = vmatprep.mubr.bf16.mxu1 %v11360_v0  ;;  %976 = vmatprep.mubr.bf16.mxu0 %v11360_v0 }
  0xae   :  { %3263 = vmatpush1.bf16.msra.mxu0 %v6873_v63  ;;  %v6947_v63 = vld [vmem:[#allocation4 + $0x3e4] ss:$16 sps:$4 sm:$0xff]  }
  0xaf   :  { %3264 = vmatprep.subr.bf16.mxu0 %v6881_v2  ;;  %v7792_v2 = vld [vmem:[%s11350_s2] sm:$0xff] }
  0xb2   :  { %3265 = vmatpush1.bf16.msra.mxu0 %v6879_v5  ;;  %v11358_v5 = vsub.s32 1, %v7782_v58 }
  0xb3   :  { %3266 = vmatprep.subr.bf16.mxu0 %v6884_v6  ;;  %v6945_v6 = vld [vmem:[#allocation4 + $0x3e0] ss:$16 sps:$4 sm:$0xff]  }
  0xb4   :  { %864 = vmatmul.mubr.bf16.gmra.mxu1 %v7708_v56  ;;  %977 = vmatmul.mubr.bf16.gmra.mxu0 %v7594_v3 }
  0xb5   :  { %873 = vmatprep.mubr.bf16.mxu1 %v11360_v0  ;;  %986 = vmatprep.mubr.bf16.mxu0 %v11360_v0 }
  0xb6   :  { %3267 = vmatpush1.bf16.msra.mxu0 %v6882_v7  ;;  %v6950_v7 = vld [vmem:[#allocation4 + $0x3c4] ss:$16 sps:$4 sm:$0xff]  }
  0xb7   :  { %3268 = vmatprep.subr.bf16.mxu0 %v6890_v8 }
  0xba   :  { %3269 = vmatpush1.bf16.msra.mxu0 %v6888_v9 }
  0xbb   :  { %3270 = vmatprep.subr.bf16.mxu0 %v6893_v10  ;;  %v7807_v10 = vrot.slane %v7792_v2, %v11358_v5 }
  0xbc   :  { %874 = vmatmul.mubr.bf16.gmra.mxu1 %v7720_v59  ;;  %987 = vmatmul.mubr.bf16.gmra.mxu0 %v7614_v24 }
  0xbd   :  { %883 = vmatprep.mubr.bf16.mxu1 %v11360_v0  ;;  %996 = vmatprep.mubr.bf16.mxu0 %v11360_v0 }
  0xbe   :  { %3271 = vmatpush1.bf16.msra.mxu0 %v6891_v11 }
  0xbf   :  { %3272 = vmatprep.subr.bf16.mxu0 %v6899_v12 }
  0xc2   :  { %3273 = vmatpush1.bf16.msra.mxu0 %v6897_v13  ;;  %v6948_v13 = vld [vmem:[#allocation4 + $0x3c0] ss:$16 sps:$4 sm:$0xff]  }
  0xc3   :  { %3274 = vmatprep.subr.bf16.mxu0 %v6902_v14 }
  0xc4   :  { %884 = vmatmul.mubr.bf16.gmra.mxu1 %v7732_v62  ;;  %997 = vmatmul.mubr.bf16.gmra.mxu0 %v7634_v43 }
  0xc5   :  { %893 = vmatprep.mubr.bf16.mxu1 %v11360_v0  ;;  %1006 = vmatprep.mubr.bf16.mxu0 %v11360_v0 }
  0xc6   :  { %3275 = vmatpush1.bf16.msra.mxu0 %v6900_v15  ;;  %v6953_v15 = vld [vmem:[#allocation4 + $0x3a4] ss:$16 sps:$4 sm:$0xff]  }
  0xc7   :  { %3276 = vmatprep.subr.bf16.mxu0 %v6908_v16 }
  0xca   :  { %3277 = vmatpush1.bf16.msra.mxu0 %v6906_v18 }
  0xcb   :  { %3278 = vmatprep.subr.bf16.mxu0 %v6911_v19 }
  0xcc   :  { %894 = vmatmul.mubr.bf16.gmra.mxu1 %v7576_v48  ;;  %1007 = vmatmul.mubr.bf16.gmra.mxu0 %v7648_v1 }
  0xcd   :  { %903 = vmatprep.mubr.bf16.mxu1 %v11360_v0  ;;  %1016 = vmatprep.mubr.bf16.mxu0 %v11360_v0 }
  0xce   :  { %3279 = vmatpush2.bf16.msra.mxu0 %v6909_v20 }
  0xcf   :  { %3280 = vmatprep.subr.bf16.mxu0 %v6917_v21 }
  0xd2   :  { %3281 = vmatpush2.bf16.msra.mxu0 %v6915_v22  ;;  %v6951_v22 = vld [vmem:[#allocation4 + $0x3a0] ss:$16 sps:$4 sm:$0xff]  }
  0xd3   :  { %3282 = vmatprep.subr.bf16.mxu0 %v6920_v23 }
  0xd4   :  { %904 = vmatmul.mubr.bf16.gmra.mxu1 %v7596_v4  ;;  %1017 = vmatmul.mubr.bf16.gmra.mxu0 %v7660_v17 }
  0xd5   :  { %913 = vmatprep.mubr.bf16.mxu1 %v11360_v0  ;;  %1026 = vmatprep.mubr.bf16.mxu0 %v11360_v0 }
  0xd6   :  { %3283 = vmatpush2.bf16.msra.mxu0 %v6918_v26 }
  0xd7   :  { %3284 = vmatprep.subr.bf16.mxu0 %v6926_v27 }
  0xda   :  { %3285 = vmatpush2.bf16.msra.mxu0 %v6924_v28  ;;  %v6956_v28 = vld [vmem:[#allocation4 + $0x384] ss:$16 sps:$4 sm:$0xff]  }
  0xdb   :  { %3286 = vmatprep.subr.bf16.mxu0 %v6929_v29 }
  0xdc   :  { %914 = vmatmul.mubr.bf16.gmra.mxu1 %v7616_v25  ;;  %1027 = vmatmul.mubr.bf16.gmra.mxu0 %v7672_v31 }
  0xdd   :  { %923 = vmatprep.mubr.bf16.mxu1 %v11360_v0  ;;  %1036 = vmatprep.mubr.bf16.mxu0 %v11360_v0 }
  0xde   :  { %3287 = vmatpush2.bf16.msra.mxu0 %v6927_v30 }
  0xdf   :  { %3288 = vmatprep.subr.bf16.mxu0 %v6935_v32 }
  0xe2   :  { %3289 = vmatpush2.bf16.msra.mxu0 %v6933_v33 }
  0xe3   :  { %3290 = vmatprep.subr.bf16.mxu0 %v6938_v34 }
  0xe4   :  { %924 = vmatmul.mubr.bf16.gmra.mxu1 %v7636_v44  ;;  %1037 = vmatmul.mubr.bf16.gmra.mxu0 %v7684_v42 }
  0xe5   :  { %1046 = vmatprep.mubr.bf16.mxu0 %v11360_v0  ;;  %1159 = vmatprep.mubr.bf16.mxu1 %v11360_v0 }
  0xe6   :  { %3291 = vmatpush2.bf16.msra.mxu0 %v6936_v35 }
  0xe7   :  { %3292 = vmatprep.subr.bf16.mxu0 %v6944_v36 }
  0xea   :  { %3293 = vmatpush2.bf16.msra.mxu0 %v6942_v37  ;;  %v6954_v37 = vld [vmem:[#allocation4 + $0x380] ss:$16 sps:$4 sm:$0xff]  }
  0xeb   :  { %3648 = vmatprep.subr.bf16.mxu0 %v6971_v40 }
  0xec   :  { %1047 = vmatmul.mubr.bf16.gmra.mxu0 %v7696_v53  ;;  %1160 = vmatmul.mubr.bf16.vlgmr.msra.gmra.mxu1 %v7574_v47  ;;  %v6903_v47 = vld [vmem:[#allocation4 + $0x280] ss:$16 sps:$4 sm:$0xff]  }
  0xed   :  { %3456 = vmatpush1.bf16.msra.mxu1 %v6876_v38  ;;  %1056 = vmatprep.mubr.bf16.mxu0 %v11360_v0 }
  0xee   :  { %1169 = vmatprep.mubr.bf16.mxu1 %v11360_v0  ;;  %3457 = vmatprep.subr.bf16.mxu1 %v6887_v39  ;;  %v6959_v39 = vld [vmem:[#allocation4 + $0x364] ss:$16 sps:$4 sm:$0xff]  }
  0xf1   :  { %3458 = vmatpush1.bf16.msra.mxu1 %v6885_v41 }
  0xf2   :  { %3459 = vmatprep.subr.bf16.mxu1 %v6896_v45 }
  0xf4   :  { %1057 = vmatmul.mubr.bf16.gmra.mxu0 %v7708_v56  ;;  %1170 = vmatmul.mubr.bf16.gmra.mxu1 %v7594_v3  ;;  %v6921_v3 = vld [vmem:[#allocation4 + $0x240] ss:$16 sps:$4 sm:$0xff]  }
  0xf5   :  { %1066 = vmatprep.mubr.bf16.mxu0 %v11360_v0  ;;  %1179 = vmatprep.mubr.bf16.mxu1 %v11360_v0 }
  0xf6   :  { %3460 = vmatpush1.bf16.msra.mxu1 %v6894_v46 }
  0xf7   :  { %3461 = vmatprep.subr.bf16.mxu1 %v6905_v49 }
  0xfa   :  { %3462 = vmatpush1.bf16.msra.mxu1 %v6903_v47 }
  0xfb   :  { %3463 = vmatprep.subr.bf16.mxu1 %v6914_v50 }
  0xfc   :  { %1067 = vmatmul.mubr.bf16.gmra.mxu0 %v7720_v59  ;;  %1180 = vmatmul.mubr.bf16.gmra.mxu1 %v7614_v24  ;;  %v6939_v24 = vld [vmem:[#allocation4 + $0x200] ss:$16 sps:$4 sm:$0xff]  }
  0xfd   :  { %1076 = vmatprep.mubr.bf16.mxu0 %v11360_v0  ;;  %1189 = vmatprep.mubr.bf16.mxu1 %v11360_v0 }
  0xfe   :  { %3464 = vmatpush1.bf16.msra.mxu1 %v6912_v51 }
  0xff   :  { %3465 = vmatprep.subr.bf16.mxu1 %v6923_v52  ;;  %v6957_v52 = vld [vmem:[#allocation4 + $0x360] ss:$16 sps:$4 sm:$0xff]  }
 0x102   :  { %3466 = vmatpush1.bf16.msra.mxu1 %v6921_v3 }
 0x103   :  { %3467 = vmatprep.subr.bf16.mxu1 %v6932_v55 }
 0x104   :  { %1077 = vmatmul.mubr.bf16.gmra.mxu0 %v7732_v62  ;;  %1190 = vmatmul.mubr.bf16.gmra.mxu1 %v7634_v43  ;;  %v7798_v43 = vrot.slane %v7792_v2, %v11359_v61 }
 0x105   :  { %1086 = vmatprep.mubr.bf16.mxu0 %v11360_v0  ;;  %1199 = vmatprep.mubr.bf16.mxu1 %v11360_v0 }
 0x106   :  { %3468 = vmatpush1.bf16.msra.mxu1 %v6930_v57  ;;  %v6962_v57 = vld [vmem:[#allocation4 + $0x344] ss:$16 sps:$4 sm:$0xff]  }
 0x107   :  { %3469 = vmatprep.subr.bf16.mxu1 %v6941_v60 }
 0x10a   :  { %3470 = vmatpush1.bf16.msra.mxu1 %v6939_v24 }
 0x10b   :  { %3471 = vmatprep.subr.bf16.mxu1 %v6947_v63 }
 0x10c   :  { %v7800_v8 = vpop.f32.mrf.mxu0  ;;  %v702_v9 = vpop.f32.mrf.mxu1  ;;  %1087 = vmatmul.mubr.bf16.gmra.mxu0 %v7576_v48  ;;  %1200 = vmatmul.mubr.bf16.gmra.mxu1 %v7648_v1 }
 0x10d   :  { %1096 = vmatprep.mubr.bf16.mxu0 %v11360_v0  ;;  %1209 = vmatprep.mubr.bf16.mxu1 %v11360_v0  ;;  %v703_v14 = vadd.f32 %v702_v9, %v7798_v43 }
 0x10e   :  { %v584_v11 = vpop.f32.mrf.mxu0  ;;  %v704_v12 = vpop.f32.mrf.mxu1  ;;  %3472 = vmatpush2.bf16.msra.mxu1 %v6945_v6 }
 0x10f   :  { %3473 = vmatprep.subr.bf16.mxu1 %v6950_v7  ;;  %v705_v18 = vadd.f32 %v704_v12, %v7807_v10  ;;  %v1512_v23 = vmax.f32 %v703_v14, 0.0  ;;  %v6960_v14 = vld [vmem:[#allocation4 + $0x340] ss:$16 sps:$4 sm:$0xff]  }
 0x110   :  { %v7812_v16 = vpop.f32.mrf.mxu0  ;;  %v706_v1 = vpop.f32.mrf.mxu1 }
 0x111   :  { %v707_v19 = vadd.f32 %v706_v1, %v7798_v43  ;;  %v1513_v32 = vmax.f32 %v705_v18, 0.0  ;;  %v6965_v1 = vld [vmem:[#allocation4 + $0x324] ss:$16 sps:$4 sm:$0xff]  }
 0x112   :  { %v588_v20 = vpop.f32.mrf.mxu0  ;;  %v708_v21 = vpop.f32.mrf.mxu1  ;;  %3474 = vmatpush2.bf16.msra.mxu1 %v6948_v13 }
 0x113   :  { %v1520_v26 = vmax.f32 %v707_v19, 0.0  ;;  %v709_v27 = vadd.f32 %v708_v21, %v7807_v10  ;;  %3475 = vmatprep.subr.bf16.mxu1 %v6953_v15  ;;  %v589_v46 = vadd.f32 %v588_v20, %v7807_v10  ;;  %v587_v19 = vadd.f32 %v7812_v16, %v7798_v43 }
 0x114   :  { %v7817_v29 = vpop.f32.mrf.mxu0  ;;  %v712_v30 = vpop.f32.mrf.mxu1  ;;  %1097 = vmatmul.mubr.bf16.gmra.mxu0 %v7596_v4  ;;  %1210 = vmatmul.mubr.bf16.gmra.mxu1 %v7660_v17  ;;  %v585_v17 = vadd.f32 %v584_v11, %v7807_v10 }
 0x115   :  { %v7821_v33 = vpack.c.bf16 %v1520_v26, %v1512_v23  ;;  %v1521_v34 = vmax.f32 %v709_v27, 0.0  ;;  %1106 = vmatprep.mubr.bf16.mxu0 %v11360_v0  ;;  %1219 = vmatprep.mubr.bf16.mxu1 %v11360_v0  ;;  %v713_v38 = vadd.f32 %v712_v30, %v7798_v43  ;;  %v1329_v6 = vmax.f32 %v589_v46, 0.0 }
 0x116   :  { %v594_v35 = vpop.f32.mrf.mxu0  ;;  %v714_v36 = vpop.f32.mrf.mxu1  ;;  %3476 = vmatpush2.bf16.msra.mxu1 %v6951_v22  ;;  %v1321_v60 = vmax.f32 %v585_v17, 0.0 }
 0x117   :  { %11497 = vst [vmem:[#allocation10_spill] sm:$0xff] %v7821_v33  ;;  %3477 = vmatprep.subr.bf16.mxu1 %v6956_v28  ;;  %v7826_v40 = vpack.c.bf16 %v1521_v34, %v1513_v32  ;;  %v715_v49 = vadd.f32 %v714_v36, %v7807_v10  ;;  %v1528_v3 = vmax.f32 %v713_v38, 0.0  ;;  %v595_v20 = vadd.f32 %v594_v35, %v7807_v10  ;;  %v6968_v35 = vld [vmem:[#allocation4 + $0x304] ss:$16 sps:$4 sm:$0xff]  }
 0x118   :  { %v7829_v41 = vpop.f32.mrf.mxu0  ;;  %v716_v45 = vpop.f32.mrf.mxu1  ;;  %v7856_v28 = vpack.c.bf16 %v1329_v6, %v1321_v60  ;;  %v1328_v38 = vmax.f32 %v587_v19, 0.0  ;;  %v593_v60 = vadd.f32 %v7817_v29, %v7798_v43  ;;  %v6969_v29 = vld [vmem:[#allocation4 + $0x4e0] ss:$16 sps:$4 sm:$0xff]  }
 0x119   :  { %11498 = vst [vmem:[#allocation11_spill] sm:$0xff] %v7826_v40  ;;  %v717_v47 = vadd.f32 %v716_v45, %v7798_v43  ;;  %v1529_v7 = vmax.f32 %v715_v49, 0.0 }
 0x11a   :  { %v598_v50 = vpop.f32.mrf.mxu0  ;;  %v718_v51 = vpop.f32.mrf.mxu1  ;;  %3478 = vmatpush2.bf16.msra.mxu1 %v6954_v37  ;;  %11501 = vst [vmem:[#allocation14_spill] sm:$0xff] %v7856_v28 }
 0x11b   :  { %v1536_v54 = vmax.f32 %v717_v47, 0.0  ;;  %v719_v55 = vadd.f32 %v718_v51, %v7807_v10  ;;  %3479 = vmatprep.subr.bf16.mxu1 %v6959_v39  ;;  %v599_v23 = vadd.f32 %v598_v50, %v7807_v10  ;;  %v1337_v39 = vmax.f32 %v595_v20, 0.0 }
 0x11c   :  { %v7835_v24 = vpop.f32.mrf.mxu0  ;;  %v722_v63 = vpop.f32.mrf.mxu1  ;;  %1107 = vmatmul.mubr.bf16.gmra.mxu0 %v7616_v25  ;;  %1220 = vmatmul.mubr.bf16.gmra.mxu1 %v7672_v31  ;;  %v583_v31 = vadd.f32 %v7800_v8, %v7798_v43  ;;  %v6963_v8 = vld [vmem:[#allocation4 + $0x320] ss:$16 sps:$4 sm:$0xff]  }
 0x11d   :  { %v7839_v9 = vpack.c.bf16 %v1536_v54, %v1528_v3  ;;  %v1537_v11 = vmax.f32 %v719_v55, 0.0  ;;  %1116 = vmatprep.mubr.bf16.mxu0 %v11360_v0  ;;  %1229 = vmatprep.mubr.bf16.mxu1 %v11360_v0  ;;  %v723_v15 = vadd.f32 %v722_v63, %v7798_v43  ;;  %v1345_v46 = vmax.f32 %v599_v23, 0.0  ;;  %v6966_v3 = vld [vmem:[#allocation4 + $0x300] ss:$16 sps:$4 sm:$0xff]   ;;  %v6974_v55 = vld [vmem:[#allocation4 + $0x6e4] ss:$16 sps:$4 sm:$0xff]  }
 0x11e   :  { %v604_v12 = vpop.f32.mrf.mxu0  ;;  %v724_v13 = vpop.f32.mrf.mxu1  ;;  %3480 = vmatpush2.bf16.msra.mxu1 %v6957_v52  ;;  %v1320_v37 = vmax.f32 %v583_v31, 0.0  ;;  %v597_v63 = vadd.f32 %v7829_v41, %v7798_v43  ;;  %v1336_v23 = vmax.f32 %v593_v60, 0.0 }
 0x11f   :  { %11499 = vst [vmem:[#allocation12_spill] sm:$0xff] %v7839_v9  ;;  %3481 = vmatprep.subr.bf16.mxu1 %v6962_v57  ;;  %v7844_v18 = vpack.c.bf16 %v1537_v11, %v1529_v7  ;;  %v725_v26 = vadd.f32 %v724_v13, %v7807_v10  ;;  %v1544_v34 = vmax.f32 %v723_v15, 0.0  ;;  %v605_v6 = vadd.f32 %v604_v12, %v7807_v10  ;;  %v6977_v12 = vld [vmem:[#allocation4 + $0x4c4] ss:$16 sps:$4 sm:$0xff]  }
 0x120   :  { %v7851_v21 = vpop.f32.mrf.mxu0  ;;  %v726_v22 = vpop.f32.mrf.mxu1 }
 0x121   :  { %11500 = vst [vmem:[#allocation13_spill] sm:$0xff] %v7844_v18  ;;  %v727_v27 = vadd.f32 %v726_v22, %v7798_v43  ;;  %v1545_v49 = vmax.f32 %v725_v26, 0.0  ;;  %v1344_v26 = vmax.f32 %v597_v63, 0.0 }
 0x122   :  { %v608_v30 = vpop.f32.mrf.mxu0  ;;  %v728_v32 = vpop.f32.mrf.mxu1  ;;  %3482 = vmatpush2.bf16.msra.mxu1 %v6960_v14 }
 0x123   :  { %v1552_v36 = vmax.f32 %v727_v27, 0.0  ;;  %v729_v16 = vadd.f32 %v728_v32, %v7807_v10  ;;  %3483 = vmatprep.subr.bf16.mxu1 %v6965_v1  ;;  %v609_v13 = vadd.f32 %v608_v30, %v7807_v10  ;;  %v7882_v1 = vpack.c.bf16 %v1345_v46, %v1337_v39  ;;  %v6980_v39 = vld [vmem:[#allocation4 + $0x4a4] ss:$16 sps:$4 sm:$0xff]  }
 0x124   :  { %v7859_v17 = vpop.f32.mrf.mxu0  ;;  %v732_v45 = vpop.f32.mrf.mxu1  ;;  %1117 = vmatmul.mubr.bf16.gmra.mxu0 %v7636_v44  ;;  %1230 = vmatmul.mubr.bf16.gmra.mxu1 %v7684_v42  ;;  %v7870_v42 = vpack.c.bf16 %v1328_v38, %v1320_v37  ;;  %v1353_v27 = vmax.f32 %v605_v6, 0.0  ;;  %v6975_v38 = vld [vmem:[#allocation4 + $0x4c0] ss:$16 sps:$4 sm:$0xff]   ;;  %v603_v46 = vadd.f32 %v7835_v24, %v7798_v43 }
 0x125   :  { %v7863_v47 = vpack.c.bf16 %v1552_v36, %v1544_v34  ;;  %v1553_v50 = vmax.f32 %v729_v16, 0.0  ;;  %1239 = vmatprep.mubr.bf16.mxu1 %v11360_v0  ;;  %3294 = vmatprep.mubr.bf16.mxu0 %v7856_v28  ;;  %v733_v54 = vadd.f32 %v732_v45, %v7798_v43  ;;  %11505 = vst [vmem:[#allocation18_spill] sm:$0xff] %v7882_v1  ;;  %v6978_v6 = vld [vmem:[#allocation4 + $0x4a0] ss:$16 sps:$4 sm:$0xff]  }
 0x126   :  { %v614_v51 = vpop.f32.mrf.mxu0  ;;  %v734_v52 = vpop.f32.mrf.mxu1  ;;  %3484 = vmatpush2.bf16.msra.mxu1 %v6963_v8  ;;  %11504 = vst [vmem:[#allocation17_spill] sm:$0xff] %v7870_v42  ;;  %v1361_v8 = vmax.f32 %v609_v13, 0.0  ;;  %v1352_v24 = vmax.f32 %v603_v46, 0.0 }
 0x127   :  { %11502 = vst [vmem:[#allocation15_spill] sm:$0xff] %v7863_v47  ;;  %3485 = vmatprep.subr.bf16.mxu1 %v6968_v35  ;;  %v7868_v57 = vpack.c.bf16 %v1553_v50, %v1545_v49  ;;  %v735_v14 = vadd.f32 %v734_v52, %v7807_v10  ;;  %v1560_v20 = vmax.f32 %v733_v54, 0.0  ;;  %v607_v49 = vadd.f32 %v7851_v21, %v7798_v43 }
 0x128   :  { %v7877_v7 = vpop.f32.mrf.mxu0  ;;  %v736_v11 = vpop.f32.mrf.mxu1 }
 0x129   :  { %11503 = vst [vmem:[#allocation16_spill] sm:$0xff] %v7868_v57  ;;  %v737_v15 = vadd.f32 %v736_v11, %v7798_v43  ;;  %v1561_v34 = vmax.f32 %v735_v14, 0.0  ;;  %v6986_v11 = vld [vmem:[#allocation4 + $0x484] ss:$16 sps:$4 sm:$0xff]   ;;  %v1360_v13 = vmax.f32 %v607_v49, 0.0 }
 0x12a   :  { %v618_v31 = vpop.f32.mrf.mxu0  ;;  %v738_v19 = vpop.f32.mrf.mxu1  ;;  %3486 = vmatpush2.bf16.msra.mxu1 %v6966_v3  ;;  %v615_v3 = vadd.f32 %v614_v51, %v7807_v10 }
 0x12b   :  { %v1568_v22 = vmax.f32 %v737_v15, 0.0  ;;  %v739_v41 = vadd.f32 %v738_v19, %v7807_v10  ;;  %3841 = vmatprep.subr.bf16.mxu1 %v6974_v55  ;;  %v619_v54 = vadd.f32 %v618_v31, %v7807_v10  ;;  %v7909_v55 = vpack.c.bf16 %v1361_v8, %v1353_v27 }
 0x12c   :  { %v7885_v30 = vpop.f32.mrf.mxu0  ;;  %v7887_v32 = vpop.f32.mrf.mxu1  ;;  %1240 = vmatmul.mubr.bf16.gmra.mxu1 %v7696_v53  ;;  %3295 = vmatmul.mubr.bf16.vlgmr.msra.gmra.mxu0 %v7870_v42  ;;  %v7899_v53 = vpack.c.bf16 %v1344_v26, %v1336_v23  ;;  %v1369_v51 = vmax.f32 %v615_v3, 0.0  ;;  %v11377_v42 = vsub.s32 2, %v7782_v58 }
 0x12d   :  { %v7891_v36 = vpack.c.bf16 %v1568_v22, %v1560_v20  ;;  %v1569_v16 = vmax.f32 %v739_v41, 0.0  ;;  %1249 = vmatprep.mubr.bf16.mxu1 %v11360_v0  ;;  %3304 = vmatprep.mubr.bf16.mxu0 %v7882_v1  ;;  %11509 = vst [vmem:[#allocation22_spill] sm:$0xff] %v7909_v55  ;;  %v1377_v15 = vmax.f32 %v619_v54, 0.0  ;;  %v6989_v20 = vld [vmem:[#allocation4 + $0x464] ss:$16 sps:$4 sm:$0xff]   ;;  %v7923_v22 = vpack.c.bf16 %v1360_v13, %v1352_v24 }
 0x12e   :  { %v624_v35 = vpop.f32.mrf.mxu0  ;;  %v7895_v37 = vpop.f32.mrf.mxu1  ;;  %3649 = vmatpush1.bf16.msra.mxu0 %v6969_v29  ;;  %11508 = vst [vmem:[#allocation21_spill] sm:$0xff] %v7899_v53  ;;  %v6984_v29 = vld [vmem:[#allocation4 + $0x480] ss:$16 sps:$4 sm:$0xff]   ;;  %v617_v41 = vadd.f32 %v7877_v7, %v7798_v43  ;;  %v7031_v1 = vld [vmem:[#allocation4 + $0x544] ss:$16 sps:$4 sm:$0xff]  }
 0x12f   :  { %11506 = vst [vmem:[#allocation19_spill] sm:$0xff] %v7891_v36  ;;  %3650 = vmatprep.subr.bf16.mxu0 %v6977_v12  ;;  %v7897_v45 = vpack.c.bf16 %v1569_v16, %v1561_v34  ;;  %11510 = vst [vmem:[#allocation23_spill] sm:$0xff] %v7923_v22  ;;  %v625_v26 = vadd.f32 %v624_v35, %v7807_v10  ;;  %v7933_v8 = vpack.c.bf16 %v1377_v15, %v1369_v51 }
 0x130   :  { %v626_v50 = vpop.f32.mrf.mxu0  ;;  %v7905_v52 = vpop.f32.mrf.mxu1  ;;  %v1376_v46 = vmax.f32 %v617_v41, 0.0 }
 0x131   :  { %11507 = vst [vmem:[#allocation20_spill] sm:$0xff] %v7897_v45  ;;  %11511 = vst [vmem:[#allocation24_spill] sm:$0xff] %v7933_v8  ;;  %v1385_v35 = vmax.f32 %v625_v26, 0.0  ;;  %v627_v13 = vadd.f32 %v626_v50, %v7798_v43 }
 0x132   :  { %v628_v60 = vpop.f32.mrf.mxu0  ;;  %v7911_v63 = vpop.f32.mrf.mxu1  ;;  %3651 = vmatpush1.bf16.msra.mxu0 %v6975_v38  ;;  %v6987_v38 = vld [vmem:[#allocation4 + $0x460] ss:$16 sps:$4 sm:$0xff]  }
 0x133   :  { %3652 = vmatprep.subr.bf16.mxu0 %v6980_v39  ;;  %v629_v27 = vadd.f32 %v628_v60, %v7807_v10  ;;  %v6995_v39 = vld [vmem:[#allocation4 + $0x444] ss:$16 sps:$4 sm:$0xff]  }
 0x134   :  { %v7913_v14 = vpop.f32.mrf.mxu0  ;;  %v7915_v21 = vpop.f32.mrf.mxu1  ;;  %1250 = vmatmul.mubr.bf16.gmra.mxu1 %v7708_v56  ;;  %3305 = vmatmul.mubr.bf16.gmra.mxu0 %v7899_v53  ;;  %v613_v56 = vadd.f32 %v7859_v17, %v7798_v43 }
 0x135   :  { %1259 = vmatprep.mubr.bf16.mxu1 %v11360_v0  ;;  %3314 = vmatprep.mubr.bf16.mxu0 %v7909_v55  ;;  %v1393_v3 = vmax.f32 %v629_v27, 0.0  ;;  %v6996_v27 = vld [vmem:[#allocation4 + $0x420] ss:$16 sps:$4 sm:$0xff]  }
 0x136   :  { %v634_v31 = vpop.f32.mrf.mxu0  ;;  %v7921_v19 = vpop.f32.mrf.mxu1  ;;  %3653 = vmatpush1.bf16.msra.mxu0 %v6978_v6  ;;  %v1368_v17 = vmax.f32 %v613_v56, 0.0  ;;  %v6993_v6 = vld [vmem:[#allocation4 + $0x440] ss:$16 sps:$4 sm:$0xff]  }
 0x137   :  { %3654 = vmatprep.subr.bf16.mxu0 %v6986_v11  ;;  %v6998_v11 = vld [vmem:[#allocation4 + $0x424] ss:$16 sps:$4 sm:$0xff]   ;;  %v7956_v56 = vpack.c.bf16 %v1393_v3, %v1385_v35  ;;  %v7002_v3 = vld [vmem:[#allocation4 + $0x400] ss:$16 sps:$4 sm:$0xff]  }
 0x138   :  { %v636_v12 = vpop.f32.mrf.mxu0  ;;  %v7929_v23 = vpop.f32.mrf.mxu1  ;;  %v7947_v24 = vpack.c.bf16 %v1376_v46, %v1368_v17 }
 0x139   :  { %11513 = vst [vmem:[#allocation26_spill] sm:$0xff] %v7956_v56 }
 0x13a   :  { %v638_v34 = vpop.f32.mrf.mxu0  ;;  %v7935_v16 = vpop.f32.mrf.mxu1  ;;  %3655 = vmatpush1.bf16.msra.mxu0 %v6984_v29  ;;  %11512 = vst [vmem:[#allocation25_spill] sm:$0xff] %v7947_v24  ;;  %v635_v29 = vadd.f32 %v634_v31, %v7807_v10 }
 0x13b   :  { %3656 = vmatprep.subr.bf16.mxu0 %v6989_v20  ;;  %v639_v20 = vadd.f32 %v638_v34, %v7807_v10 }
 0x13c   :  { %v7937_v49 = vpop.f32.mrf.mxu0  ;;  %v7939_v7 = vpop.f32.mrf.mxu1  ;;  %1260 = vmatmul.mubr.bf16.gmra.mxu1 %v7720_v59  ;;  %3315 = vmatmul.mubr.bf16.gmra.mxu0 %v7923_v22  ;;  %v623_v59 = vadd.f32 %v7885_v30, %v7798_v43  ;;  %v1392_v30 = vmax.f32 %v627_v13, 0.0  ;;  %v1401_v31 = vmax.f32 %v635_v29, 0.0 }
 0x13d   :  { %1269 = vmatprep.mubr.bf16.mxu1 %v11360_v0  ;;  %3324 = vmatprep.mubr.bf16.mxu0 %v7933_v8  ;;  %v1409_v34 = vmax.f32 %v639_v20, 0.0 }
 0x13e   :  { %v644_v54 = vpop.f32.mrf.mxu0  ;;  %v7945_v60 = vpop.f32.mrf.mxu1  ;;  %3657 = vmatpush1.bf16.msra.mxu0 %v6987_v38  ;;  %v7004_v38 = vld [vmem:[#allocation4 + $0x404] ss:$16 sps:$4 sm:$0xff]  }
 0x13f   :  { %3658 = vmatprep.subr.bf16.mxu0 %v6995_v39  ;;  %v1384_v39 = vmax.f32 %v623_v59, 0.0  ;;  %v637_v59 = vadd.f32 %v636_v12, %v7798_v43  ;;  %v645_v20 = vadd.f32 %v644_v54, %v7807_v10  ;;  %v7979_v61 = vpack.c.bf16 %v1409_v34, %v1401_v31 }
 0x140   :  { %v646_v51 = vpop.f32.mrf.mxu0  ;;  %v7952_v15 = vpop.f32.mrf.mxu1  ;;  %v11516_v31 = vmov 0  }
 0x141   :  { %11515 = vst [vmem:[#allocation28_spill] sm:$0xff] %v7979_v61  ;;  %v1417_v54 = vmax.f32 %v645_v20, 0.0 }
 0x142   :  { %v648_v41 = vpop.f32.mrf.mxu0  ;;  %v7958_v26 = vpop.f32.mrf.mxu1  ;;  %3659 = vmatpush1.bf16.msra.mxu0 %v6993_v6  ;;  %v7007_v6 = vld [vmem:[#allocation4 + $0x5e4] ss:$16 sps:$4 sm:$0xff]  }
 0x143   :  { %3660 = vmatprep.subr.bf16.mxu0 %v6998_v11  ;;  %v7970_v11 = vpack.c.bf16 %v1392_v30, %v1384_v39  ;;  %v649_v5 = vadd.f32 %v648_v41, %v7807_v10  ;;  %v7013_v39 = vld [vmem:[#allocation4 + $0x5c4] ss:$16 sps:$4 sm:$0xff]  }
 0x144   :  { %v7960_v17 = vpop.f32.mrf.mxu0  ;;  %v7962_v50 = vpop.f32.mrf.mxu1  ;;  %1270 = vmatmul.mubr.bf16.gmra.mxu1 %v7732_v62  ;;  %3325 = vmatmul.mubr.bf16.gmra.mxu0 %v7947_v24  ;;  %v633_v62 = vadd.f32 %v7913_v14, %v7798_v43  ;;  %v1408_v14 = vmax.f32 %v637_v59, 0.0 }
 0x145   :  { %1279 = vmatprep.mubr.bf16.mxu1 %v11360_v0  ;;  %3334 = vmatprep.mubr.bf16.mxu0 %v7956_v56  ;;  %11514 = vst [vmem:[#allocation27_spill] sm:$0xff] %v7970_v11  ;;  %v1425_v41 = vmax.f32 %v649_v5, 0.0 }
 0x146   :  { %v654_v46 = vpop.f32.mrf.mxu0  ;;  %v7968_v35 = vpop.f32.mrf.mxu1  ;;  %3661 = vmatpush1.bf16.msra.mxu0 %v6996_v27  ;;  %v1400_v30 = vmax.f32 %v633_v62, 0.0  ;;  %v7016_v62 = vld [vmem:[#allocation4 + $0x5a4] ss:$16 sps:$4 sm:$0xff]  }
 0x147   :  { %3662 = vmatprep.subr.bf16.mxu0 %v7004_v38  ;;  %v7005_v38 = vld [vmem:[#allocation4 + $0x5e0] ss:$16 sps:$4 sm:$0xff]   ;;  %v8004_v8 = vpack.c.bf16 %v1425_v41, %v1417_v54 }
 0x148   :  { %v656_v13 = vpop.f32.mrf.mxu0  ;;  %v7975_v29 = vpop.f32.mrf.mxu1  ;;  %v7993_v59 = vpack.c.bf16 %v1408_v14, %v1400_v30  ;;  %v7014_v30 = vld [vmem:[#allocation4 + $0x5a0] ss:$16 sps:$4 sm:$0xff]   ;;  %v7022_v14 = vld [vmem:[#allocation4 + $0x584] ss:$16 sps:$4 sm:$0xff]  }
 0x149   :  { %11518 = vst [vmem:[#allocation30_spill] sm:$0xff] %v8004_v8 }
 0x14a   :  { %v658_v27 = vpop.f32.mrf.mxu0  ;;  %v7981_v0 = vpop.f32.mrf.mxu1  ;;  %3663 = vmatpush1.bf16.msra.mxu0 %v7002_v3  ;;  %11517 = vst [vmem:[#allocation29_spill] sm:$0xff] %v7993_v59 }
 0x14b   :  { %3664 = vmatprep.subr.bf16.mxu0 %v7007_v6  ;;  %v7011_v6 = vld [vmem:[#allocation4 + $0x5c0] ss:$16 sps:$4 sm:$0xff]   ;;  %v659_v24 = vadd.f32 %v658_v27, %v7807_v10 }
 0x14c   :  { %v7983_v56 = vpop.f32.mrf.mxu0  ;;  %v7985_v12 = vpop.f32.mrf.mxu1  ;;  %1280 = vmatmul.mubr.bf16.gmra.mxu1 %v7576_v48  ;;  %3335 = vmatmul.mubr.bf16.gmra.mxu0 %v7970_v11  ;;  %v643_v48 = vadd.f32 %v7937_v49, %v7798_v43  ;;  %v647_v11 = vadd.f32 %v646_v51, %v7798_v43 }
 0x14d   :  { %1289 = vmatprep.mubr.bf16.mxu1 %v11516_v31  ;;  %3344 = vmatprep.mubr.bf16.mxu0 %v7979_v61  ;;  %v655_v61 = vadd.f32 %v654_v46, %v7807_v10  ;;  %v1441_v54 = vmax.f32 %v659_v24, 0.0  ;;  %v657_v46 = vadd.f32 %v656_v13, %v7798_v43 }
 0x14e   :  { %v664_v34 = vpop.f32.mrf.mxu0  ;;  %v7991_v3 = vpop.f32.mrf.mxu1  ;;  %3665 = vmatpush2.bf16.msra.mxu0 %v7005_v38  ;;  %v1416_v49 = vmax.f32 %v643_v48, 0.0  ;;  %v1424_v22 = vmax.f32 %v647_v11, 0.0  ;;  %v7020_v11 = vld [vmem:[#allocation4 + $0x580] ss:$16 sps:$4 sm:$0xff]  }
 0x14f   :  { %3666 = vmatprep.subr.bf16.mxu0 %v7013_v39  ;;  %v1433_v27 = vmax.f32 %v655_v61, 0.0  ;;  %v1440_v28 = vmax.f32 %v657_v46, 0.0  ;;  %v7029_v46 = vld [vmem:[#allocation4 + $0x540] ss:$16 sps:$4 sm:$0xff]  }
 0x150   :  { %v7998_v20 = vpop.f32.mrf.mxu0  ;;  %v8000_v5 = vpop.f32.mrf.mxu1  ;;  %v8019_v48 = vpack.c.bf16 %v1424_v22, %v1416_v49 }
 0x151   :  { %v8035_v22 = vpack.c.bf16 %v1441_v54, %v1433_v27 }
 0x152   :  { %v668_v38 = vpop.f32.mrf.mxu0  ;;  %v8006_v39 = vpop.f32.mrf.mxu1  ;;  %3667 = vmatpush2.bf16.msra.mxu0 %v7011_v6  ;;  %11519 = vst [vmem:[#allocation31_spill] sm:$0xff] %v8019_v48 }
 0x153   :  { %3668 = vmatprep.subr.bf16.mxu0 %v7016_v62  ;;  %v7025_v62 = vld [vmem:[#allocation4 + $0x564] ss:$16 sps:$4 sm:$0xff]   ;;  %11521 = vst [vmem:[#allocation32_spill] sm:$0xff] %v8035_v22 }
 0x154   :  { %v8008_v51 = vpop.f32.mrf.mxu0  ;;  %v8010_v55 = vpop.f32.mrf.mxu1  ;;  %1290 = vmatmul.mubr.bf16.gmra.mxu1 %v7596_v4  ;;  %3345 = vmatmul.mubr.bf16.gmra.mxu0 %v7993_v59  ;;  %v653_v4 = vadd.f32 %v7960_v17, %v7798_v43  ;;  %v7023_v17 = vld [vmem:[#allocation4 + $0x560] ss:$16 sps:$4 sm:$0xff]  }
 0x155   :  { %1299 = vmatprep.mubr.bf16.mxu1 %v11516_v31  ;;  %3354 = vmatprep.mubr.bf16.mxu0 %v8004_v8  ;;  %v11520_v8 = vsub.s32 3, %v7782_v58 }
 0x156   :  { %v674_v41 = vpop.f32.mrf.mxu0  ;;  %v8017_v6 = vpop.f32.mrf.mxu1  ;;  %3669 = vmatpush2.bf16.msra.mxu0 %v7014_v30  ;;  %v665_v30 = vadd.f32 %v664_v34, %v7807_v10 }
 0x157   :  { %3670 = vmatprep.subr.bf16.mxu0 %v7022_v14  ;;  %v8031_v59 = vrot.slane %v7792_v2, %v11520_v8  ;;  %v669_v14 = vadd.f32 %v668_v38, %v7807_v10  ;;  %v1432_v8 = vmax.f32 %v653_v4, 0.0  ;;  %v7034_v4 = vld [vmem:[#allocation4 + $0x524] ss:$16 sps:$4 sm:$0xff]  }
 0x158   :  { %v8024_v61 = vpop.f32.mrf.mxu0  ;;  %v8026_v24 = vpop.f32.mrf.mxu1  ;;  %v1449_v27 = vmax.f32 %v665_v30, 0.0  ;;  %v667_v30 = vadd.f32 %v7998_v20, %v7798_v43 }
 0x159   :  { %v782_v13 = vadd.f32 %v7911_v63, %v8031_v59  ;;  %v778_v38 = vadd.f32 %v7895_v37, %v8031_v59  ;;  %v1457_v54 = vmax.f32 %v669_v14, 0.0  ;;  %v8059_v37 = vpack.c.bf16 %v1440_v28, %v1432_v8 }
 0x15a   :  { %v678_v49 = vpop.f32.mrf.mxu0  ;;  %v8037_v53 = vpop.f32.mrf.mxu1  ;;  %3671 = vmatpush2.bf16.msra.mxu0 %v7020_v11  ;;  %v792_v20 = vadd.f32 %v7935_v16, %v8031_v59  ;;  %v788_v16 = vadd.f32 %v7921_v19, %v8031_v59  ;;  %v673_v19 = vadd.f32 %v8008_v51, %v7798_v43 }
 0x15b   :  { %3672 = vmatprep.subr.bf16.mxu0 %v7025_v62  ;;  %v1331_v62 = vmax.f32 %v782_v13, 0.0  ;;  %11522 = vst [vmem:[#allocation33_spill] sm:$0xff] %v8059_v37  ;;  %v1323_v13 = vmax.f32 %v778_v38, 0.0  ;;  %v679_v28 = vadd.f32 %v678_v49, %v7807_v10  ;;  %v7040_v38 = vld [vmem:[#allocation4 + $0x504] ss:$16 sps:$4 sm:$0xff]  }
 0x15c   :  { %v8042_v36 = vpop.f32.mrf.mxu0  ;;  %v8044_v34 = vpop.f32.mrf.mxu1  ;;  %1300 = vmatmul.mubr.bf16.gmra.mxu1 %v7616_v25  ;;  %3355 = vmatmul.mubr.bf16.gmra.mxu0 %v8019_v48  ;;  %v8057_v25 = vrot.slane %v7792_v2, %v11377_v42  ;;  %v675_v2 = vadd.f32 %v674_v41, %v7807_v10 }
 0x15d   :  { %1309 = vmatprep.mubr.bf16.mxu1 %v11516_v31  ;;  %3364 = vmatprep.mubr.bf16.mxu0 %v8035_v22  ;;  %v663_v31 = vadd.f32 %v7983_v56, %v7798_v43  ;;  %v7032_v56 = vld [vmem:[#allocation4 + $0x520] ss:$16 sps:$4 sm:$0xff]   ;;  %v8079_v48 = vpack.c.bf16 %v1331_v62, %v1323_v13  ;;  %v1347_v13 = vmax.f32 %v792_v20, 0.0 }
 0x15e   :  { %v684_v63 = vpop.f32.mrf.mxu0  ;;  %v8052_v11 = vpop.f32.mrf.mxu1  ;;  %3673 = vmatpush2.bf16.msra.mxu0 %v7023_v17  ;;  %v780_v22 = vadd.f32 %v7905_v52, %v8057_v25  ;;  %v1465_v62 = vmax.f32 %v675_v2, 0.0  ;;  %v1339_v2 = vmax.f32 %v788_v16, 0.0  ;;  %v6972_v20 = vld [vmem:[#allocation4 + $0x6e0] ss:$16 sps:$4 sm:$0xff]   ;;  %v802_v16 = vadd.f32 %v7958_v26, %v8031_v59 }
 0x15f   :  { %3674 = vmatprep.subr.bf16.mxu0 %v7031_v1  ;;  %v8069_v1 = vpack.c.bf16 %v1457_v54, %v1449_v27  ;;  %11524 = vst [vmem:[#allocation35_spill] sm:$0xff] %v8079_v48  ;;  %v776_v27 = vadd.f32 %v7887_v32, %v8057_v25  ;;  %v1448_v52 = vmax.f32 %v663_v31, 0.0  ;;  %v1456_v54 = vmax.f32 %v667_v30, 0.0  ;;  %v7038_v30 = vld [vmem:[#allocation4 + $0x500] ss:$16 sps:$4 sm:$0xff]  }
 0x160   :  { %v8065_v14 = vpop.f32.mrf.mxu0  ;;  %v8067_v17 = vpop.f32.mrf.mxu1  ;;  %v1473_v32 = vmax.f32 %v679_v28, 0.0  ;;  %v685_v28 = vadd.f32 %v684_v63, %v7807_v10  ;;  %v7067_v63 = vld [vmem:[#allocation4 + $0xec] ss:$16 sps:$4 sm:$0xff]  }
 0x161   :  { %11523 = vst [vmem:[#allocation34_spill] sm:$0xff] %v8069_v1  ;;  %v8095_v45 = vpack.c.bf16 %v1456_v54, %v1448_v52 }
 0x162   :  { %v688_v8 = vpop.f32.mrf.mxu0  ;;  %v8075_v42 = vpop.f32.mrf.mxu1  ;;  %3675 = vmatpush2.bf16.msra.mxu0 %v7029_v46  ;;  %v1330_v46 = vmax.f32 %v780_v22, 0.0  ;;  %v8113_v54 = vpack.c.bf16 %v1473_v32, %v1465_v62  ;;  %v798_v62 = vadd.f32 %v7945_v60, %v8031_v59  ;;  %v1481_v26 = vmax.f32 %v685_v28, 0.0 }
 0x163   :  { %3676 = vmatprep.subr.bf16.mxu0 %v7034_v4  ;;  %11525 = vst [vmem:[#allocation36_spill] sm:$0xff] %v8095_v45  ;;  %v683_v60 = vadd.f32 %v8042_v36, %v7798_v43  ;;  %v687_v28 = vadd.f32 %v8065_v14, %v7798_v43  ;;  %v800_v36 = vadd.f32 %v7952_v15, %v8057_v25 }
 0x164   :  { %v8083_v41 = vpop.f32.mrf.mxu0  ;;  %v8085_v49 = vpop.f32.mrf.mxu1  ;;  %1310 = vmatmul.mubr.bf16.gmra.mxu1 %v7636_v44  ;;  %3365 = vmatmul.mubr.bf16.gmra.mxu0 %v8059_v37  ;;  %v1322_v44 = vmax.f32 %v776_v27, 0.0  ;;  %v790_v27 = vadd.f32 %v7929_v23, %v8057_v25  ;;  %11527 = vst [vmem:[#allocation38_spill] sm:$0xff] %v8113_v54  ;;  %v8117_v37 = vpack.c.bf16 %v1347_v13, %v1339_v2  ;;  %v1363_v2 = vmax.f32 %v802_v16, 0.0 }
 0x165   :  { %3487 = vmatprep.mubr.bf16.mxu1 %v8079_v48  ;;  %3374 = vmatprep.mubr.bf16.mxu0 %v8069_v1  ;;  %v677_v48 = vadd.f32 %v8024_v61, %v7798_v43  ;;  %v6983_v61 = vld [vmem:[#allocation4 + $0x6c4] ss:$16 sps:$4 sm:$0xff]  }
 0x166   :  { %v694_v4 = vpop.f32.mrf.mxu0  ;;  %v8093_v31 = vpop.f32.mrf.mxu1  ;;  %3677 = vmatpush2.bf16.msra.mxu0 %v7032_v56  ;;  %v689_v56 = vadd.f32 %v688_v8, %v7807_v10  ;;  %11528 = vst [vmem:[#allocation39_spill] sm:$0xff] %v8117_v37  ;;  %v786_v8 = vadd.f32 %v7915_v21, %v8057_v25  ;;  %v1346_v21 = vmax.f32 %v790_v27, 0.0  ;;  %v1355_v27 = vmax.f32 %v798_v62, 0.0 }
 0x167   :  { %3678 = vmatprep.subr.bf16.mxu0 %v7040_v38  ;;  %v8107_v38 = vpack.c.bf16 %v1330_v46, %v1322_v44  ;;  %v1464_v46 = vmax.f32 %v673_v19, 0.0  ;;  %v1472_v44 = vmax.f32 %v677_v48, 0.0  ;;  %v6992_v19 = vld [vmem:[#allocation4 + $0x6a4] ss:$16 sps:$4 sm:$0xff]   ;;  %v1488_v62 = vmax.f32 %v687_v28, 0.0 }
 0x168   :  { %v8101_v1 = vpop.f32.mrf.mxu0  ;;  %v8103_v22 = vpop.f32.mrf.mxu1  ;;  %v1489_v32 = vmax.f32 %v689_v56, 0.0  ;;  %v7010_v28 = vld [vmem:[#allocation4 + $0x664] ss:$16 sps:$4 sm:$0xff]  }
 0x169   :  { %11526 = vst [vmem:[#allocation37_spill] sm:$0xff] %v8107_v38 }
 0x16a   :  { %v698_v52 = vpop.f32.mrf.mxu0  ;;  %v8111_v51 = vpop.f32.mrf.mxu1  ;;  %3679 = vmatpush2.bf16.msra.mxu0 %v7038_v30  ;;  %v6981_v30 = vld [vmem:[#allocation4 + $0x6c0] ss:$16 sps:$4 sm:$0xff]   ;;  %v8147_v16 = vpack.c.bf16 %v1489_v32, %v1481_v26  ;;  %v808_v32 = vadd.f32 %v7968_v35, %v8031_v59  ;;  %v693_v35 = vadd.f32 %v8083_v41, %v7798_v43 }
 0x16b   :  { %4034 = vmatprep.subr.bf16.mxu0 %v7067_v63  ;;  %v7008_v41 = vld [vmem:[#allocation4 + $0x660] ss:$16 sps:$4 sm:$0xff]  }
 0x16c   :  { %v8121_v47 = vpop.f32.mrf.mxu1  ;;  %v8123_v23 = vpop.f32.mrf.mxu0  ;;  %3375 = vmatmul.mubr.bf16.gmra.mxu0 %v8095_v45  ;;  %3488 = vmatmul.mubr.bf16.vlgmr.msra.gmra.mxu1 %v8107_v38  ;;  %v1338_v38 = vmax.f32 %v786_v8, 0.0  ;;  %v8135_v45 = vpack.c.bf16 %v1472_v44, %v1464_v46  ;;  %11530 = vst [vmem:[#allocation41_spill] sm:$0xff] %v8147_v16  ;;  %v6990_v46 = vld [vmem:[#allocation4 + $0x6a0] ss:$16 sps:$4 sm:$0xff]   ;;  %v812_v44 = vadd.f32 %v7981_v0, %v8031_v59 }
 0x16d   :  { %3497 = vmatprep.mubr.bf16.mxu1 %v8117_v37  ;;  %3842 = vmatpush1.bf16.msra.mxu1 %v6972_v20  ;;  %v695_v37 = vadd.f32 %v694_v4, %v7807_v10  ;;  %v8159_v4 = vpack.c.bf16 %v1363_v2, %v1355_v27  ;;  %v6999_v2 = vld [vmem:[#allocation4 + $0x680] ss:$16 sps:$4 sm:$0xff]  }
 0x16e   :  { %v8130_v13 = vpop.f32.mrf.mxu1  ;;  %v8132_v48 = vpop.f32.mrf.mxu0  ;;  %3384 = vmatprep.mubr.bf16.mxu0 %v8113_v54  ;;  %3843 = vmatprep.subr.bf16.mxu1 %v6983_v61  ;;  %11529 = vst [vmem:[#allocation40_spill] sm:$0xff] %v8135_v45  ;;  %v699_v61 = vadd.f32 %v698_v52, %v7807_v10  ;;  %v8149_v63 = vpack.c.bf16 %v1346_v21, %v1338_v38  ;;  %v7001_v10 = vld [vmem:[#allocation4 + $0x684] ss:$16 sps:$4 sm:$0xff]   ;;  %v1480_v38 = vmax.f32 %v683_v60, 0.0  ;;  %v1379_v60 = vmax.f32 %v812_v44, 0.0 }
 0x16f   :  { %11532 = vst [vmem:[#allocation43_spill] sm:$0xff] %v8159_v4  ;;  %v796_v52 = vadd.f32 %v7939_v7, %v8057_v25  ;;  %v1497_v0 = vmax.f32 %v695_v37, 0.0  ;;  %v1362_v7 = vmax.f32 %v800_v36, 0.0  ;;  %v697_v37 = vadd.f32 %v8101_v1, %v7798_v43 }
 0x170   :  { %v8141_v56 = vpop.f32.mrf.mxu1  ;;  %v8143_v20 = vpop.f32.mrf.mxu0  ;;  %11531 = vst [vmem:[#allocation42_spill] sm:$0xff] %v8149_v63  ;;  %v810_v44 = vadd.f32 %v7975_v29, %v8057_v25  ;;  %v822_v43 = vadd.f32 %v8006_v39, %v8031_v59  ;;  %v818_v39 = vadd.f32 %v7991_v3, %v8031_v59 }
 0x171   :  { %3844 = vmatpush1.bf16.msra.mxu1 %v6981_v30  ;;  %v1505_v30 = vmax.f32 %v699_v61, 0.0  ;;  %v1354_v27 = vmax.f32 %v796_v52, 0.0 }
 0x172   :  { %v8153_v8 = vpop.f32.mrf.mxu1  ;;  %v8155_v14 = vpop.f32.mrf.mxu0  ;;  %3845 = vmatprep.subr.bf16.mxu1 %v6992_v19 }
 0x174   :  { %v8163_v26 = vpop.f32.mrf.mxu1  ;;  %v8165_v15 = vpop.f32.mrf.mxu0  ;;  %3385 = vmatmul.mubr.bf16.gmra.mxu0 %v8135_v45  ;;  %3498 = vmatmul.mubr.bf16.gmra.mxu1 %v8149_v63  ;;  %v8177_v63 = vpack.c.bf16 %v1488_v62, %v1480_v38  ;;  %v7019_v38 = vld [vmem:[#allocation4 + $0x644] ss:$16 sps:$4 sm:$0xff]   ;;  %v806_v62 = vadd.f32 %v7962_v50, %v8057_v25 }
 0x175   :  { %3507 = vmatprep.mubr.bf16.mxu1 %v8159_v4  ;;  %3394 = vmatprep.mubr.bf16.mxu0 %v8147_v16  ;;  %v1371_v4 = vmax.f32 %v808_v32, 0.0  ;;  %v8187_v16 = vpack.c.bf16 %v1505_v30, %v1497_v0  ;;  %v1496_v32 = vmax.f32 %v693_v35, 0.0  ;;  %v1504_v0 = vmax.f32 %v697_v37, 0.0 }
 0x176   :  { %v8173_v21 = vpop.f32.mrf.mxu1  ;;  %v8175_v19 = vpop.f32.mrf.mxu0  ;;  %3846 = vmatpush1.bf16.msra.mxu1 %v6990_v46  ;;  %11533 = vst [vmem:[#allocation44_spill] sm:$0xff] %v8177_v63  ;;  %v8189_v46 = vpack.c.bf16 %v1362_v7, %v1354_v27  ;;  %v1370_v27 = vmax.f32 %v806_v62, 0.0 }
 0x177   :  { %3847 = vmatprep.subr.bf16.mxu1 %v7001_v10  ;;  %11534 = vst [vmem:[#allocation45_spill] sm:$0xff] %v8187_v16  ;;  %v8199_v1 = vpack.c.bf16 %v1379_v60, %v1371_v4  ;;  %v1378_v4 = vmax.f32 %v810_v44, 0.0  ;;  %v1395_v60 = vmax.f32 %v822_v43, 0.0  ;;  %v8217_v35 = vpack.c.bf16 %v1504_v0, %v1496_v32  ;;  %v7026_v43 = vld [vmem:[#allocation4 + $0x620] ss:$16 sps:$4 sm:$0xff]  }
 0x178   :  { %v8183_v61 = vpop.f32.mrf.mxu1  ;;  %v8185_v36 = vpop.f32.mrf.mxu0  ;;  %11535 = vst [vmem:[#allocation46_spill] sm:$0xff] %v8189_v46  ;;  %v820_v44 = vadd.f32 %v8000_v5, %v8057_v25  ;;  %v7037_v32 = vld [vmem:[#allocation4 + $0x604] ss:$16 sps:$4 sm:$0xff]   ;;  %v816_v0 = vadd.f32 %v7985_v12, %v8057_v25  ;;  %v828_v5 = vadd.f32 %v8017_v6, %v8031_v59  ;;  %v7035_v12 = vld [vmem:[#allocation4 + $0x600] ss:$16 sps:$4 sm:$0xff]  }
 0x179   :  { %11536 = vst [vmem:[#allocation47_spill] sm:$0xff] %v8199_v1  ;;  %11537 = vst [vmem:[#allocation48_spill] sm:$0xff] %v8217_v35 }
 0x17a   :  { %v8193_v10 = vpop.f32.mrf.mxu1  ;;  %v8195_v52 = vpop.f32.mrf.mxu0  ;;  %3848 = vmatpush1.bf16.msra.mxu1 %v6999_v2  ;;  %v7017_v2 = vld [vmem:[#allocation4 + $0x640] ss:$16 sps:$4 sm:$0xff]   ;;  %v1403_v6 = vmax.f32 %v828_v5, 0.0  ;;  %v826_v5 = vadd.f32 %v8010_v55, %v8057_v25 }
 0x17b   :  { %3849 = vmatprep.subr.bf16.mxu1 %v7010_v28  ;;  %v7028_v28 = vld [vmem:[#allocation4 + $0x624] ss:$16 sps:$4 sm:$0xff]   ;;  %v7044_v55 = vld [vmem:[#allocation4 + $0x7c0] ss:$16 sps:$4 sm:$0xff]  }
 0x17c   :  { %v8203_v30 = vpop.f32.mrf.mxu1  ;;  %v8205_v29 = vpop.f32.mrf.mxu0  ;;  %3395 = vmatmul.mubr.bf16.gmra.mxu0 %v8177_v63  ;;  %3508 = vmatmul.mubr.bf16.gmra.mxu1 %v8189_v46  ;;  %v8223_v46 = vpack.c.bf16 %v1378_v4, %v1370_v27  ;;  %v1386_v27 = vmax.f32 %v816_v0, 0.0  ;;  %v7046_v0 = vld [vmem:[#allocation4 + $0x7c4] ss:$16 sps:$4 sm:$0xff]  }
 0x17d   :  { %3517 = vmatprep.mubr.bf16.mxu1 %v8199_v1  ;;  %3404 = vmatprep.mubr.bf16.mxu0 %v8187_v16  ;;  %v1387_v1 = vmax.f32 %v818_v39, 0.0 }
 0x17e   :  { %v8213_v7 = vpop.f32.mrf.mxu1  ;;  %v8215_v50 = vpop.f32.mrf.mxu0  ;;  %3850 = vmatpush1.bf16.msra.mxu1 %v7008_v41  ;;  %11538 = vst [vmem:[#allocation49_spill] sm:$0xff] %v8223_v46 }
 0x17f   :  { %3851 = vmatprep.subr.bf16.mxu1 %v7019_v38  ;;  %v832_v38 = vadd.f32 %v8037_v53, %v8031_v59  ;;  %v8233_v62 = vpack.c.bf16 %v1395_v60, %v1387_v1  ;;  %v1394_v53 = vmax.f32 %v820_v44, 0.0  ;;  %v830_v44 = vadd.f32 %v8026_v24, %v8057_v25 }
 0x180   :  { %v8219_v37 = vpop.f32.mrf.mxu1  ;;  %v8221_v3 = vpop.f32.mrf.mxu0  ;;  %v838_v24 = vadd.f32 %v8052_v11, %v8031_v59 }
 0x181   :  { %11539 = vst [vmem:[#allocation50_spill] sm:$0xff] %v8233_v62  ;;  %v1411_v60 = vmax.f32 %v832_v38, 0.0  ;;  %v8255_v63 = vpack.c.bf16 %v1394_v53, %v1386_v27  ;;  %v842_v38 = vadd.f32 %v8075_v42, %v8031_v59  ;;  %v1410_v42 = vmax.f32 %v830_v44, 0.0 }
 0x182   :  { %v8227_v16 = vpop.f32.mrf.mxu1  ;;  %v8229_v41 = vpop.f32.mrf.mxu0  ;;  %3852 = vmatpush1.bf16.msra.mxu1 %v7017_v2  ;;  %v1419_v11 = vmax.f32 %v838_v24, 0.0  ;;  %v840_v44 = vadd.f32 %v8067_v17, %v8057_v25  ;;  %v7052_v24 = vld [vmem:[#allocation4 + $0x784] ss:$16 sps:$4 sm:$0xff]   ;;  %v848_v17 = vadd.f32 %v8093_v31, %v8031_v59 }
 0x183   :  { %3853 = vmatprep.subr.bf16.mxu1 %v7028_v28  ;;  %v7043_v28 = vld [vmem:[#allocation4 + $0x7e4] ss:$16 sps:$4 sm:$0xff]   ;;  %11540 = vst [vmem:[#allocation51_spill] sm:$0xff] %v8255_v63 }
 0x184   :  { %v8237_v39 = vpop.f32.mrf.mxu1  ;;  %v8239_v4 = vpop.f32.mrf.mxu0  ;;  %3405 = vmatmul.mubr.bf16.gmra.mxu0 %v8217_v35  ;;  %3518 = vmatmul.mubr.bf16.gmra.mxu1 %v8223_v46 }
 0x185   :  { %3414 = vmatprep.mubr.bf16.mxu0 %v7826_v40  ;;  %3527 = vmatprep.mubr.bf16.mxu1 %v8233_v62 }
 0x186   :  { %v8247_v1 = vpop.f32.mrf.mxu1  ;;  %v8249_v2 = vpop.f32.mrf.mxu0  ;;  %3854 = vmatpush1.bf16.msra.mxu1 %v7026_v43  ;;  %v7041_v43 = vld [vmem:[#allocation4 + $0x7e0] ss:$16 sps:$4 sm:$0xff]  }
 0x187   :  { %3855 = vmatprep.subr.bf16.mxu1 %v7037_v32  ;;  %v8265_v32 = vpack.c.bf16 %v1411_v60, %v1403_v6  ;;  %v7049_v6 = vld [vmem:[#allocation4 + $0x7a4] ss:$16 sps:$4 sm:$0xff]  }
 0x188   :  { %v8251_v35 = vpop.f32.mrf.mxu1  ;;  %v8253_v46 = vpop.f32.mrf.mxu0 }
 0x189   :  { %11541 = vst [vmem:[#allocation52_spill] sm:$0xff] %v8265_v32 }
 0x18a   :  { %v8259_v62 = vpop.f32.mrf.mxu1  ;;  %v8261_v40 = vpop.f32.mrf.mxu0  ;;  %3856 = vmatpush1.bf16.msra.mxu1 %v7035_v12 }
 0x18b   :  { %3857 = vmatprep.subr.bf16.mxu1 %v7043_v28  ;;  %v1427_v28 = vmax.f32 %v842_v38, 0.0  ;;  %v7047_v38 = vld [vmem:[#allocation4 + $0x7a0] ss:$16 sps:$4 sm:$0xff]  }
 0x18c   :  { %v8269_v53 = vpop.f32.mrf.mxu1  ;;  %v8271_v27 = vpop.f32.mrf.mxu0  ;;  %3415 = vmatmul.mubr.bf16.gmra.mxu0 %v7821_v33  ;;  %3528 = vmatmul.mubr.bf16.gmra.mxu1 %v8255_v63  ;;  %v1402_v33 = vmax.f32 %v826_v5, 0.0 }
 0x18d   :  { %11542 = vst [vmem:[#allocation53_spill] sm:$0xff] %v8269_v53  ;;  %3424 = vmatprep.mubr.bf16.mxu0 %v7844_v18  ;;  %3537 = vmatprep.mubr.bf16.mxu1 %v8265_v32  ;;  %v210_v18 = vsub.s32 5, %v7782_v58  ;;  %v8298_v5 = vpack.c.bf16 %v1427_v28, %v1419_v11  ;;  %v7050_v11 = vld [vmem:[#allocation4 + $0x780] ss:$16 sps:$4 sm:$0xff]  }
 0x18e   :  { %v8279_v12 = vpop.f32.mrf.mxu1  ;;  %v8281_v60 = vpop.f32.mrf.mxu0  ;;  %3858 = vmatpush2.bf16.msra.mxu1 %v7041_v43  ;;  %v8288_v54 = vpack.c.bf16 %v1410_v42, %v1402_v33  ;;  %v836_v33 = vadd.f32 %v8044_v34, %v8057_v25  ;;  %v1426_v34 = vmax.f32 %v840_v44, 0.0 }
 0x18f   :  { %3859 = vmatprep.subr.bf16.mxu1 %v7046_v0  ;;  %v852_v0 = vadd.f32 %v8111_v51, %v8031_v59  ;;  %11544 = vst [vmem:[#allocation55_spill] sm:$0xff] %v8298_v5  ;;  %v8313_v51 = vld [vmem:[%s11350_s2] sm:$0xff] }
 0x190   :  { %v8283_v45 = vpop.f32.mrf.mxu1  ;;  %v8285_v63 = vpop.f32.mrf.mxu0  ;;  %11543 = vst [vmem:[#allocation54_spill] sm:$0xff] %v8288_v54  ;;  %11547 = vst [vmem:[#allocation58_spill] sm:$0xff] %v8313_v51 }
 0x191   :  { %v1443_v31 = vmax.f32 %v852_v0, 0.0 }
 0x192   :  { %v8292_v32 = vpop.f32.mrf.mxu1  ;;  %v8294_v43 = vpop.f32.mrf.mxu0  ;;  %3860 = vmatpush2.bf16.msra.mxu1 %v7044_v55  ;;  %v8316_v55 = vrot.slane %v8313_v51, %v210_v18 }
 0x193   :  { %3861 = vmatprep.subr.bf16.mxu1 %v7049_v6 }
 0x194   :  { %v8302_v42 = vpop.f32.mrf.mxu1  ;;  %v8304_v53 = vpop.f32.mrf.mxu0  ;;  %3425 = vmatmul.mubr.bf16.gmra.mxu0 %v7839_v9  ;;  %3538 = vmatmul.mubr.bf16.gmra.mxu1 %v8288_v54  ;;  %v7055_v54 = vld [vmem:[#allocation4 + $0x764] ss:$16 sps:$4 sm:$0xff]   ;;  %v1418_v9 = vmax.f32 %v836_v33, 0.0  ;;  %v971_v44 = vadd.f32 %v8132_v48, %v8316_v55  ;;  %v7053_v33 = vld [vmem:[#allocation4 + $0x760] ss:$16 sps:$4 sm:$0xff]  }
 0x195   :  { %11545 = vst [vmem:[#allocation56_spill] sm:$0xff] %v8302_v42  ;;  %11546 = vst [vmem:[#allocation57_spill] sm:$0xff] %v8304_v53  ;;  %3434 = vmatprep.mubr.bf16.mxu0 %v7868_v57  ;;  %3547 = vmatprep.mubr.bf16.mxu1 %v8298_v5  ;;  %v206_v42 = vsub.s32 4, %v7782_v58  ;;  %v1435_v57 = vmax.f32 %v848_v17, 0.0  ;;  %v975_v5 = vadd.f32 %v8155_v14, %v8316_v55  ;;  %v7058_v48 = vld [vmem:[#allocation4 + $0x744] ss:$16 sps:$4 sm:$0xff]  }
 0x196   :  { %v8320_v28 = vpop.f32.mrf.mxu1  ;;  %v8322_v6 = vpop.f32.mrf.mxu0  ;;  %3862 = vmatpush2.bf16.msra.mxu1 %v7047_v38  ;;  %v850_v38 = vadd.f32 %v8103_v22, %v8057_v25  ;;  %v862_v17 = vadd.f32 %v8153_v8, %v8031_v59  ;;  %v1325_v8 = vmax.f32 %v971_v44, 0.0 }
 0x197   :  { %11548 = vst [vmem:[#allocation59_spill] sm:$0xff] %v8320_v28  ;;  %3863 = vmatprep.subr.bf16.mxu1 %v7052_v24  ;;  %v8333_v28 = vpack.c.bf16 %v1426_v34, %v1418_v9  ;;  %v8343_v58 = vpack.c.bf16 %v1443_v31, %v1435_v57  ;;  %v846_v9 = vadd.f32 %v8085_v49, %v8057_v25 }
 0x198   :  { %v8325_v53 = vpop.f32.mrf.mxu1  ;;  %v8327_v18 = vpop.f32.mrf.mxu0  ;;  %v8348_v14 = vrot.slane %v8313_v51, %v206_v42  ;;  %v858_v57 = vadd.f32 %v8130_v13, %v8031_v59  ;;  %v1442_v49 = vmax.f32 %v850_v38, 0.0  ;;  %v7056_v51 = vld [vmem:[#allocation4 + $0x740] ss:$16 sps:$4 sm:$0xff]  }
 0x199   :  { %11549 = vst [vmem:[#allocation60_spill] sm:$0xff] %v8325_v53  ;;  %11550 = vst [vmem:[#allocation61_spill] sm:$0xff] %v8333_v28  ;;  %v11553_v53 = vld [vmem:[#allocation15_spill] sm:$0xff] }
 0x19a   :  { %v8337_v0 = vpop.f32.mrf.mxu1  ;;  %v8339_v24 = vpop.f32.mrf.mxu0  ;;  %3864 = vmatpush2.bf16.msra.mxu1 %v7050_v11  ;;  %11551 = vst [vmem:[#allocation62_spill] sm:$0xff] %v8343_v58  ;;  %v11554_v11 = vld [vmem:[#allocation20_spill] sm:$0xff]  ;;  %v969_v13 = vadd.f32 %v8123_v23, %v8348_v14  ;;  %v1451_v38 = vmax.f32 %v858_v57, 0.0  ;;  %v860_v23 = vadd.f32 %v8141_v56, %v8057_v25  ;;  %v872_v57 = vadd.f32 %v8193_v10, %v8031_v59 }
 0x19b   :  { %3865 = vmatprep.subr.bf16.mxu1 %v7055_v54  ;;  %v1333_v54 = vmax.f32 %v975_v5, 0.0  ;;  %v973_v5 = vadd.f32 %v8143_v20, %v8348_v14  ;;  %v868_v10 = vadd.f32 %v8173_v21, %v8031_v59  ;;  %v979_v21 = vadd.f32 %v8165_v15, %v8348_v14 }
 0x19c   :  { %v8350_v22 = vpop.f32.mrf.mxu1  ;;  %v8352_v34 = vpop.f32.mrf.mxu0  ;;  %3435 = vmatmul.mubr.bf16.gmra.mxu0 %v11553_v53  ;;  %3548 = vmatmul.mubr.bf16.gmra.mxu1 %v8333_v28  ;;  %v7061_v53 = vld [vmem:[#allocation4 + $0x724] ss:$16 sps:$4 sm:$0xff]   ;;  %v1434_v28 = vmax.f32 %v846_v9, 0.0  ;;  %v870_v15 = vadd.f32 %v8183_v61, %v8057_v25 }
 0x19d   :  { %11552 = vst [vmem:[#allocation63_spill] sm:$0xff] %v8350_v22  ;;  %3444 = vmatprep.mubr.bf16.mxu0 %v11554_v11  ;;  %3557 = vmatprep.mubr.bf16.mxu1 %v8343_v58  ;;  %v1459_v22 = vmax.f32 %v862_v17, 0.0  ;;  %v981_v11 = vadd.f32 %v8175_v19, %v8316_v55  ;;  %v8376_v17 = vpack.c.bf16 %v1333_v54, %v1325_v8  ;;  %v1324_v8 = vmax.f32 %v969_v13, 0.0 }
 0x19e   :  { %v8360_v42 = vpop.f32.mrf.mxu1  ;;  %v8362_v31 = vpop.f32.mrf.mxu0  ;;  %3866 = vmatpush2.bf16.msra.mxu1 %v7053_v33  ;;  %v985_v33 = vadd.f32 %v8195_v52, %v8316_v55  ;;  %v7064_v52 = vld [vmem:[#allocation4 + $0x704] ss:$16 sps:$4 sm:$0xff]   ;;  %v1332_v54 = vmax.f32 %v973_v5, 0.0  ;;  %v7062_v5 = vld [vmem:[#allocation4 + $0x700] ss:$16 sps:$4 sm:$0xff]  }
 0x19f   :  { %3867 = vmatprep.subr.bf16.mxu1 %v7058_v48  ;;  %11557 = vst [vmem:[#allocation66_spill] sm:$0xff] %v8376_v17  ;;  %v8378_v48 = vpack.c.bf16 %v1442_v49, %v1434_v28  ;;  %v8388_v19 = vpack.c.bf16 %v1459_v22, %v1451_v38  ;;  %v856_v28 = vadd.f32 %v8121_v47, %v8057_v25  ;;  %v1458_v47 = vmax.f32 %v860_v23, 0.0 }
 0x1a0   :  { %v8368_v44 = vpop.f32.mrf.mxu1  ;;  %v8370_v58 = vpop.f32.mrf.mxu0  ;;  %v1349_v22 = vmax.f32 %v985_v33, 0.0  ;;  %v1475_v38 = vmax.f32 %v872_v57, 0.0  ;;  %v995_v57 = vadd.f32 %v8229_v41, %v8316_v55  ;;  %v7073_v41 = vld [vmem:[#allocation4 + $0xcc] ss:$16 sps:$4 sm:$0xff]  }
 0x1a1   :  { %11555 = vst [vmem:[#allocation64_spill] sm:$0xff] %v8368_v44  ;;  %11556 = vst [vmem:[#allocation65_spill] sm:$0xff] %v8370_v58  ;;  %v7059_v44 = vld [vmem:[#allocation4 + $0x720] ss:$16 sps:$4 sm:$0xff]  }
 0x1a2   :  { %11558 = vst [vmem:[#allocation67_spill] sm:$0xff] %v8378_v48  ;;  %v8382_v9 = vpop.f32.mrf.mxu1  ;;  %v8384_v20 = vpop.f32.mrf.mxu0  ;;  %3868 = vmatpush2.bf16.msra.mxu1 %v7056_v51  ;;  %11559 = vst [vmem:[#allocation68_spill] sm:$0xff] %v8388_v19  ;;  %v11561_v58 = vld [vmem:[#allocation19_spill] sm:$0xff]  ;;  %v1341_v51 = vmax.f32 %v981_v11, 0.0  ;;  %v983_v11 = vadd.f32 %v8185_v36, %v8348_v14 }
 0x1a3   :  { %3869 = vmatprep.subr.bf16.mxu1 %v7061_v53 }
 0x1a4   :  { %v8392_v49 = vpop.f32.mrf.mxu1  ;;  %v8394_v56 = vpop.f32.mrf.mxu0  ;;  %3445 = vmatmul.mubr.bf16.gmra.mxu0 %v11561_v58  ;;  %3558 = vmatmul.mubr.bf16.gmra.mxu1 %v8378_v48  ;;  %v7070_v58 = vld [vmem:[#allocation4 + $0x2ec] ss:$16 sps:$4 sm:$0xff]   ;;  %v1450_v48 = vmax.f32 %v856_v28, 0.0 }
 0x1a5   :  { %11560 = vst [vmem:[#allocation69_spill] sm:$0xff] %v8392_v49  ;;  %3567 = vmatprep.mubr.bf16.mxu1 %v8388_v19  ;;  %3680 = vmatprep.mubr.bf16.mxu0 %v8376_v17  ;;  %v8406_v49 = vpack.c.bf16 %v1332_v54, %v1324_v8  ;;  %v1467_v17 = vmax.f32 %v868_v10, 0.0  ;;  %v7065_v54 = vld [vmem:[#allocation4 + $0xe8] ss:$16 sps:$4 sm:$0xff]   ;;  %v882_v10 = vadd.f32 %v8227_v16, %v8031_v59 }
 0x1a6   :  { %v8402_v53 = vpop.f32.mrf.mxu1  ;;  %v8404_v13 = vpop.f32.mrf.mxu0  ;;  %3870 = vmatpush2.bf16.msra.mxu1 %v7059_v44  ;;  %v991_v44 = vadd.f32 %v8215_v50, %v8316_v55  ;;  %v8422_v28 = vpack.c.bf16 %v1458_v47, %v1450_v48  ;;  %v866_v48 = vadd.f32 %v8163_v26, %v8057_v25  ;;  %v878_v16 = vadd.f32 %v8213_v7, %v8031_v59 }
 0x1a7   :  { %3871 = vmatprep.subr.bf16.mxu1 %v7064_v52  ;;  %11562 = vst [vmem:[#allocation70_spill] sm:$0xff] %v8406_v49  ;;  %v8420_v52 = vpack.c.bf16 %v1349_v22, %v1341_v51  ;;  %v8432_v50 = vpack.c.bf16 %v1475_v38, %v1467_v17  ;;  %v1340_v51 = vmax.f32 %v979_v21, 0.0  ;;  %v1348_v22 = vmax.f32 %v983_v11, 0.0  ;;  %v7071_v21 = vld [vmem:[#allocation4 + $0xc8] ss:$16 sps:$4 sm:$0xff]  }
 0x1a8   :  { %v8412_v33 = vpop.f32.mrf.mxu1  ;;  %v8414_v23 = vpop.f32.mrf.mxu0  ;;  %11564 = vst [vmem:[#allocation72_spill] sm:$0xff] %v8422_v28  ;;  %v1357_v17 = vmax.f32 %v991_v44, 0.0  ;;  %v1491_v11 = vmax.f32 %v882_v10, 0.0  ;;  %v989_v7 = vadd.f32 %v8205_v29, %v8348_v14  ;;  %v993_v44 = vadd.f32 %v8221_v3, %v8348_v14 }
 0x1a9   :  { %11563 = vst [vmem:[#allocation71_spill] sm:$0xff] %v8420_v52  ;;  %11565 = vst [vmem:[#allocation73_spill] sm:$0xff] %v8432_v50  ;;  %v8450_v19 = vpack.c.bf16 %v1348_v22, %v1340_v51  ;;  %v1005_v10 = vadd.f32 %v8261_v40, %v8316_v55  ;;  %v880_v29 = vadd.f32 %v8219_v37, %v8057_v25  ;;  %v7074_v22 = vld [vmem:[#allocation4 + $0xa8] ss:$16 sps:$4 sm:$0xff]   ;;  %v7082_v40 = vld [vmem:[#allocation4 + $0x8c] ss:$16 sps:$4 sm:$0xff]  }
 0x1aa   :  { %v8426_v8 = vpop.f32.mrf.mxu1  ;;  %v8428_v36 = vpop.f32.mrf.mxu0  ;;  %3872 = vmatpush2.bf16.msra.mxu1 %v7062_v5  ;;  %v1365_v5 = vmax.f32 %v995_v57, 0.0 }
 0x1ab   :  { %4227 = vmatprep.subr.bf16.mxu1 %v7070_v58  ;;  %v1474_v58 = vmax.f32 %v870_v15, 0.0  ;;  %11566 = vst [vmem:[#allocation74_spill] sm:$0xff] %v8450_v19 }
 0x1ac   :  { %v8436_v47 = vpop.f32.mrf.mxu0  ;;  %v8438_v61 = vpop.f32.mrf.mxu1  ;;  %3568 = vmatmul.mubr.bf16.gmra.mxu1 %v8422_v28  ;;  %3681 = vmatmul.mubr.bf16.vlgmr.msra.gmra.mxu0 %v8406_v49  ;;  %v7076_v28 = vld [vmem:[#allocation4 + $0xac] ss:$16 sps:$4 sm:$0xff]   ;;  %v1466_v49 = vmax.f32 %v866_v48, 0.0 }
 0x1ad   :  { %3577 = vmatprep.mubr.bf16.mxu1 %v8432_v50  ;;  %3690 = vmatprep.mubr.bf16.mxu0 %v8420_v52  ;;  %v1483_v52 = vmax.f32 %v878_v16, 0.0  ;;  %v892_v16 = vadd.f32 %v8259_v62, %v8031_v59  ;;  %v888_v62 = vadd.f32 %v8247_v1, %v8031_v59  ;;  %v999_v1 = vadd.f32 %v8239_v4, %v8348_v14 }
 0x1ae   :  { %v8446_v26 = vpop.f32.mrf.mxu0  ;;  %v8448_v38 = vpop.f32.mrf.mxu1  ;;  %4035 = vmatpush1.bf16.msra.mxu0 %v7065_v54  ;;  %v1001_v54 = vadd.f32 %v8249_v2, %v8316_v55  ;;  %v8466_v48 = vpack.c.bf16 %v1474_v58, %v1466_v49  ;;  %v876_v49 = vadd.f32 %v8203_v30, %v8057_v25  ;;  %v1490_v30 = vmax.f32 %v880_v29, 0.0 }
 0x1af   :  { %4036 = vmatprep.subr.bf16.mxu0 %v7073_v41  ;;  %v8464_v41 = vpack.c.bf16 %v1365_v5, %v1357_v17  ;;  %v8476_v2 = vpack.c.bf16 %v1491_v11, %v1483_v52  ;;  %v1356_v17 = vmax.f32 %v989_v7, 0.0  ;;  %v1364_v5 = vmax.f32 %v993_v44, 0.0  ;;  %v7080_v7 = vld [vmem:[#allocation4 + $0x88] ss:$16 sps:$4 sm:$0xff]  }
 0x1b0   :  { %v8456_v57 = vpop.f32.mrf.mxu0  ;;  %v8458_v15 = vpop.f32.mrf.mxu1  ;;  %11568 = vst [vmem:[#allocation76_spill] sm:$0xff] %v8466_v48  ;;  %v1373_v52 = vmax.f32 %v1001_v54, 0.0  ;;  %v1507_v44 = vmax.f32 %v892_v16, 0.0  ;;  %v1003_v54 = vadd.f32 %v8253_v46, %v8348_v14  ;;  %v1015_v16 = vadd.f32 %v8294_v43, %v8316_v55  ;;  %v7091_v43 = vld [vmem:[#allocation4 + $0x4c] ss:$16 sps:$4 sm:$0xff]  }
 0x1b1   :  { %11567 = vst [vmem:[#allocation75_spill] sm:$0xff] %v8464_v41  ;;  %11569 = vst [vmem:[#allocation77_spill] sm:$0xff] %v8476_v2  ;;  %v8494_v50 = vpack.c.bf16 %v1364_v5, %v1356_v17  ;;  %v890_v4 = vadd.f32 %v8251_v35, %v8057_v25  ;;  %v7083_v5 = vld [vmem:[#allocation4 + $0x68] ss:$16 sps:$4 sm:$0xff]  }
 0x1b2   :  { %v8470_v51 = vpop.f32.mrf.mxu0  ;;  %v8472_v3 = vpop.f32.mrf.mxu1  ;;  %4037 = vmatpush1.bf16.msra.mxu0 %v7071_v21  ;;  %v1381_v21 = vmax.f32 %v1005_v10, 0.0 }
 0x1b3   :  { %4038 = vmatprep.subr.bf16.mxu0 %v7076_v28  ;;  %11570 = vst [vmem:[#allocation78_spill] sm:$0xff] %v8494_v50 }
 0x1b4   :  { %v8480_v58 = vpop.f32.mrf.mxu0  ;;  %v8482_v37 = vpop.f32.mrf.mxu1  ;;  %3578 = vmatmul.mubr.bf16.gmra.mxu1 %v8466_v48  ;;  %3691 = vmatmul.mubr.bf16.gmra.mxu0 %v8450_v19  ;;  %v7085_v48 = vld [vmem:[#allocation4 + $0x6c] ss:$16 sps:$4 sm:$0xff]   ;;  %v1482_v19 = vmax.f32 %v876_v49, 0.0 }
 0x1b5   :  { %3587 = vmatprep.mubr.bf16.mxu1 %v8476_v2  ;;  %3700 = vmatprep.mubr.bf16.mxu0 %v8464_v41  ;;  %v1499_v41 = vmax.f32 %v888_v62, 0.0  ;;  %v902_v62 = vadd.f32 %v8292_v32, %v8031_v59  ;;  %v898_v32 = vadd.f32 %v8279_v12, %v8031_v59  ;;  %v1009_v12 = vadd.f32 %v8271_v27, %v8348_v14 }
 0x1b6   :  { %v8490_v28 = vpop.f32.mrf.mxu0  ;;  %v8492_v11 = vpop.f32.mrf.mxu1  ;;  %4039 = vmatpush1.bf16.msra.mxu0 %v7074_v22  ;;  %v1011_v22 = vadd.f32 %v8281_v60, %v8316_v55  ;;  %v8510_v49 = vpack.c.bf16 %v1490_v30, %v1482_v19  ;;  %v886_v19 = vadd.f32 %v8237_v39, %v8057_v25  ;;  %v1506_v39 = vmax.f32 %v890_v4, 0.0 }
 0x1b7   :  { %4040 = vmatprep.subr.bf16.mxu0 %v7082_v40  ;;  %v8508_v40 = vpack.c.bf16 %v1381_v21, %v1373_v52  ;;  %v8520_v60 = vpack.c.bf16 %v1507_v44, %v1499_v41  ;;  %v1372_v52 = vmax.f32 %v999_v1, 0.0  ;;  %v1380_v21 = vmax.f32 %v1003_v54, 0.0  ;;  %v7089_v1 = vld [vmem:[#allocation4 + $0x48] ss:$16 sps:$4 sm:$0xff]  }
 0x1b8   :  { %v8500_v10 = vpop.f32.mrf.mxu0  ;;  %v8502_v29 = vpop.f32.mrf.mxu1  ;;  %11572 = vst [vmem:[#allocation80_spill] sm:$0xff] %v8510_v49  ;;  %v1389_v41 = vmax.f32 %v1011_v22, 0.0  ;;  %v1523_v54 = vmax.f32 %v902_v62, 0.0  ;;  %v1013_v22 = vadd.f32 %v8285_v63, %v8348_v14  ;;  %v1025_v62 = vadd.f32 %v8339_v24, %v8316_v55  ;;  %v7100_v24 = vld [vmem:[#allocation4 + $0xc] ss:$16 sps:$4 sm:$0xff]  }
 0x1b9   :  { %11571 = vst [vmem:[#allocation79_spill] sm:$0xff] %v8508_v40  ;;  %11573 = vst [vmem:[#allocation81_spill] sm:$0xff] %v8520_v60  ;;  %v8538_v2 = vpack.c.bf16 %v1380_v21, %v1372_v52  ;;  %v900_v27 = vadd.f32 %v8283_v45, %v8057_v25  ;;  %v7092_v21 = vld [vmem:[#allocation4 + $0x28] ss:$16 sps:$4 sm:$0xff]  }
 0x1ba   :  { %v8514_v17 = vpop.f32.mrf.mxu0  ;;  %v8516_v46 = vpop.f32.mrf.mxu1  ;;  %4041 = vmatpush1.bf16.msra.mxu0 %v7080_v7  ;;  %v1397_v7 = vmax.f32 %v1015_v16, 0.0 }
 0x1bb   :  { %4042 = vmatprep.subr.bf16.mxu0 %v7085_v48  ;;  %11574 = vst [vmem:[#allocation82_spill] sm:$0xff] %v8538_v2 }
 0x1bc   :  { %v8524_v30 = vpop.f32.mrf.mxu0  ;;  %v8526_v35 = vpop.f32.mrf.mxu1  ;;  %3588 = vmatmul.mubr.bf16.gmra.mxu1 %v8510_v49  ;;  %3701 = vmatmul.mubr.bf16.gmra.mxu0 %v8494_v50  ;;  %v7094_v49 = vld [vmem:[#allocation4 + $0x2c] ss:$16 sps:$4 sm:$0xff]   ;;  %v1498_v50 = vmax.f32 %v886_v19, 0.0 }
 0x1bd   :  { %3597 = vmatprep.mubr.bf16.mxu1 %v8520_v60  ;;  %3710 = vmatprep.mubr.bf16.mxu0 %v8508_v40  ;;  %v1515_v40 = vmax.f32 %v898_v32, 0.0  ;;  %v912_v32 = vadd.f32 %v8337_v0, %v8031_v59 }
 0x1be   :  { %v8534_v48 = vpop.f32.mrf.mxu0  ;;  %v8536_v44 = vpop.f32.mrf.mxu1  ;;  %4043 = vmatpush1.bf16.msra.mxu0 %v7083_v5  ;;  %v1021_v5 = vadd.f32 %v8322_v6, %v8316_v55  ;;  %v8554_v19 = vpack.c.bf16 %v1506_v39, %v1498_v50  ;;  %v1396_v39 = vmax.f32 %v1013_v22, 0.0 }
 0x1bf   :  { %4044 = vmatprep.subr.bf16.mxu0 %v7091_v43  ;;  %v8552_v43 = vpack.c.bf16 %v1397_v7, %v1389_v41  ;;  %v8564_v6 = vpack.c.bf16 %v1523_v54, %v1515_v40  ;;  %v11578_v41 = vld [vmem:[#allocation53_spill] sm:$0xff]  ;;  %v1388_v7 = vmax.f32 %v1009_v12, 0.0  ;;  %v1413_v54 = vmax.f32 %v1025_v62, 0.0 }
 0x1c0   :  { %v8544_v16 = vpop.f32.mrf.mxu0  ;;  %v8546_v4 = vpop.f32.mrf.mxu1  ;;  %11576 = vst [vmem:[#allocation84_spill] sm:$0xff] %v8554_v19  ;;  %v896_v50 = vadd.f32 %v11578_v41, %v8057_v25  ;;  %v1405_v40 = vmax.f32 %v1021_v5, 0.0  ;;  %v7098_v41 = vld [vmem:[#allocation4 + $0x8] ss:$16 sps:$4 sm:$0xff]   ;;  %v11583_v5 = vld [vmem:[#allocation57_spill] sm:$0xff] }
 0x1c1   :  { %11575 = vst [vmem:[#allocation83_spill] sm:$0xff] %v8552_v43  ;;  %11577 = vst [vmem:[#allocation85_spill] sm:$0xff] %v8564_v6  ;;  %v1019_v62 = vadd.f32 %v11583_v5, %v8348_v14 }
 0x1c2   :  { %v8558_v52 = vpop.f32.mrf.mxu0  ;;  %v8560_v63 = vpop.f32.mrf.mxu1  ;;  %4045 = vmatpush1.bf16.msra.mxu0 %v7089_v1  ;;  %v11581_v1 = vld [vmem:[#allocation59_spill] sm:$0xff] }
 0x1c3   :  { %4046 = vmatprep.subr.bf16.mxu0 %v7094_v49  ;;  %v908_v0 = vadd.f32 %v11581_v1, %v8031_v59  ;;  %v1522_v49 = vmax.f32 %v900_v27, 0.0  ;;  %v1023_v1 = vadd.f32 %v8327_v18, %v8348_v14 }
 0x1c4   :  { %v8568_v60 = vpop.f32.mrf.mxu0  ;;  %v8570_v45 = vpop.f32.mrf.mxu1  ;;  %3598 = vmatmul.mubr.bf16.gmra.mxu1 %v8554_v19  ;;  %3711 = vmatmul.mubr.bf16.gmra.mxu0 %v8538_v2  ;;  %v7103_v19 = vld [vmem:[#allocation4 + $0x1ec] ss:$16 sps:$4 sm:$0xff]   ;;  %v1514_v2 = vmax.f32 %v896_v50, 0.0 }
 0x1c5   :  { %11579 = vst [vmem:[#allocation53_spill] sm:$0xff] %v8568_v60  ;;  %11580 = vst [vmem:[#allocation86_spill] sm:$0xff] %v8570_v45  ;;  %3607 = vmatprep.mubr.bf16.mxu1 %v8564_v6  ;;  %3720 = vmatprep.mubr.bf16.mxu0 %v8552_v43  ;;  %v1539_v45 = vmax.f32 %v912_v32, 0.0  ;;  %v8582_v60 = vpack.c.bf16 %v1396_v39, %v1388_v7  ;;  %v1531_v6 = vmax.f32 %v908_v0, 0.0  ;;  %v11588_v7 = vld [vmem:[#allocation60_spill] sm:$0xff] }
 0x1c6   :  { %v8578_v12 = vpop.f32.mrf.mxu0  ;;  %v8580_v22 = vpop.f32.mrf.mxu1  ;;  %4047 = vmatpush1.bf16.msra.mxu0 %v7092_v21  ;;  %v1031_v21 = vadd.f32 %v8362_v31, %v8316_v55  ;;  %v1035_v32 = vadd.f32 %v8384_v20, %v8316_v55  ;;  %v8598_v50 = vpack.c.bf16 %v1522_v49, %v1514_v2  ;;  %v910_v39 = vadd.f32 %v11588_v7, %v8057_v25  ;;  %v7109_v20 = vld [vmem:[#allocation4 + $0x1cc] ss:$16 sps:$4 sm:$0xff]  }
 0x1c7   :  { %4048 = vmatprep.subr.bf16.mxu0 %v7100_v24  ;;  %11582 = vst [vmem:[#allocation59_spill] sm:$0xff] %v8582_v60  ;;  %v8596_v24 = vpack.c.bf16 %v1413_v54, %v1405_v40  ;;  %v922_v0 = vadd.f32 %v8382_v9, %v8031_v59  ;;  %v8608_v31 = vpack.c.bf16 %v1539_v45, %v1531_v6  ;;  %v11590_v40 = vld [vmem:[#allocation56_spill] sm:$0xff]  ;;  %v1404_v54 = vmax.f32 %v1019_v62, 0.0 }
 0x1c8   :  { %v8588_v43 = vpop.f32.mrf.mxu0  ;;  %v8590_v27 = vpop.f32.mrf.mxu1  ;;  %11587 = vst [vmem:[#allocation89_spill] sm:$0xff] %v8598_v50  ;;  %v906_v2 = vadd.f32 %v11590_v40, %v8057_v25  ;;  %v1412_v49 = vmax.f32 %v1023_v1, 0.0  ;;  %v918_v9 = vadd.f32 %v8360_v42, %v8031_v59  ;;  %v1421_v6 = vmax.f32 %v1031_v21, 0.0  ;;  %v7107_v1 = vld [vmem:[#allocation4 + $0x1c8] ss:$16 sps:$4 sm:$0xff]   ;;  %v11595_v21 = vld [vmem:[#allocation65_spill] sm:$0xff] }
 0x1c9   :  { %11584 = vst [vmem:[#allocation57_spill] sm:$0xff] %v8588_v43  ;;  %11585 = vst [vmem:[#allocation87_spill] sm:$0xff] %v8590_v27  ;;  %v7101_v27 = vld [vmem:[#allocation4 + $0x1e8] ss:$16 sps:$4 sm:$0xff]   ;;  %v1429_v45 = vmax.f32 %v1035_v32, 0.0  ;;  %v1555_v40 = vmax.f32 %v922_v0, 0.0  ;;  %v1029_v42 = vadd.f32 %v8352_v34, %v8348_v14  ;;  %v1033_v32 = vadd.f32 %v11595_v21, %v8348_v14 }
 0x1ca   :  { %11586 = vst [vmem:[#allocation88_spill] sm:$0xff] %v8596_v24  ;;  %v8602_v5 = vpop.f32.mrf.mxu0  ;;  %v8604_v18 = vpop.f32.mrf.mxu1  ;;  %4049 = vmatpush1.bf16.msra.mxu0 %v7098_v41  ;;  %11589 = vst [vmem:[#allocation60_spill] sm:$0xff] %v8608_v31  ;;  %v1045_v0 = vadd.f32 %v8428_v36, %v8316_v55  ;;  %v11600_v34 = vld [vmem:[#allocation64_spill] sm:$0xff] }
 0x1cb   :  { %4050 = vmatprep.subr.bf16.mxu0 %v7103_v19  ;;  %v1538_v19 = vmax.f32 %v910_v39, 0.0  ;;  %v7118_v36 = vld [vmem:[#allocation4 + $0x18c] ss:$16 sps:$4 sm:$0xff]  }
 0x1cc   :  { %v8612_v43 = vpop.f32.mrf.mxu0  ;;  %v8614_v7 = vpop.f32.mrf.mxu1  ;;  %3608 = vmatmul.mubr.bf16.gmra.mxu1 %v8598_v50  ;;  %3721 = vmatmul.mubr.bf16.gmra.mxu0 %v8582_v60  ;;  %v7112_v50 = vld [vmem:[#allocation4 + $0x1ac] ss:$16 sps:$4 sm:$0xff]   ;;  %v1530_v60 = vmax.f32 %v906_v2, 0.0 }
 0x1cd   :  { %11591 = vst [vmem:[#allocation56_spill] sm:$0xff] %v8612_v43  ;;  %11592 = vst [vmem:[#allocation90_spill] sm:$0xff] %v8614_v7  ;;  %3617 = vmatprep.mubr.bf16.mxu1 %v8608_v31  ;;  %3730 = vmatprep.mubr.bf16.mxu0 %v8596_v24  ;;  %v8626_v7 = vpack.c.bf16 %v1412_v49, %v1404_v54  ;;  %v1547_v31 = vmax.f32 %v918_v9, 0.0  ;;  %v920_v54 = vadd.f32 %v11600_v34, %v8057_v25 }
 0x1ce   :  { %v8622_v41 = vpop.f32.mrf.mxu0  ;;  %v8624_v62 = vpop.f32.mrf.mxu1  ;;  %4051 = vmatpush2.bf16.msra.mxu0 %v7101_v27  ;;  %v1041_v27 = vadd.f32 %v8404_v13, %v8316_v55  ;;  %v8642_v2 = vpack.c.bf16 %v1538_v19, %v1530_v60  ;;  %v932_v9 = vadd.f32 %v8426_v8, %v8031_v59  ;;  %v11601_v13 = vld [vmem:[#allocation9_spill] sm:$0xff]  ;;  %v11603_v60 = vld [vmem:[#allocation63_spill] sm:$0xff]  ;;  %v1428_v19 = vmax.f32 %v1033_v32, 0.0  ;;  %v7116_v32 = vld [vmem:[#allocation4 + $0x188] ss:$16 sps:$4 sm:$0xff]  }
 0x1cf   :  { %11593 = vst [vmem:[#allocation91_spill] sm:$0xff] %v8624_v62  ;;  %4052 = vmatprep.subr.bf16.mxu0 %v7109_v20  ;;  %11594 = vst [vmem:[#allocation92_spill] sm:$0xff] %v8626_v7  ;;  %v8640_v20 = vpack.c.bf16 %v1429_v45, %v1421_v6  ;;  %v8653_v43 = vpack.c.bf16 %v1555_v40, %v1547_v31  ;;  %v916_v6 = vadd.f32 %v11603_v60, %v8057_v25 }
 0x1d0   :  { %v8632_v24 = vpop.f32.mrf.mxu0  ;;  %v8634_v39 = vpop.f32.mrf.mxu1  ;;  %11599 = vst [vmem:[#allocation95_spill] sm:$0xff] %v8642_v2  ;;  %v1420_v45 = vmax.f32 %v1029_v42, 0.0  ;;  %v928_v8 = vadd.f32 %v8402_v53, %v8031_v59  ;;  %v1437_v31 = vmax.f32 %v1041_v27, 0.0  ;;  %v1571_v60 = vmax.f32 %v932_v9, 0.0 }
 0x1d1   :  { %11596 = vst [vmem:[#allocation65_spill] sm:$0xff] %v8632_v24  ;;  %11597 = vst [vmem:[#allocation93_spill] sm:$0xff] %v8634_v39  ;;  %v7110_v39 = vld [vmem:[#allocation4 + $0x1a8] ss:$16 sps:$4 sm:$0xff]   ;;  %v218_v24 = vsub.s32 7, %v11601_v13  ;;  %v1546_v59 = vmax.f32 %v916_v6, 0.0  ;;  %v1039_v27 = vadd.f32 %v8394_v56, %v8348_v14  ;;  %v1055_v9 = vadd.f32 %v8470_v51, %v8316_v55 }
 0x1d2   :  { %11598 = vst [vmem:[#allocation94_spill] sm:$0xff] %v8640_v20  ;;  %v8646_v49 = vpop.f32.mrf.mxu0  ;;  %v8648_v21 = vpop.f32.mrf.mxu1  ;;  %4053 = vmatpush2.bf16.msra.mxu0 %v7107_v1  ;;  %11602 = vst [vmem:[#allocation64_spill] sm:$0xff] %v8653_v43  ;;  %v1445_v1 = vmax.f32 %v1045_v0, 0.0  ;;  %v8674_v53 = vpack.c.bf16 %v1428_v19, %v1420_v45  ;;  %v1043_v0 = vadd.f32 %v8414_v23, %v8348_v14  ;;  %v7119_v19 = vld [vmem:[#allocation4 + $0x168] ss:$16 sps:$4 sm:$0xff]  }
 0x1d3   :  { %4054 = vmatprep.subr.bf16.mxu0 %v7112_v50  ;;  %v1554_v50 = vmax.f32 %v920_v54, 0.0  ;;  %v930_v56 = vadd.f32 %v8412_v33, %v8057_v25  ;;  %v7127_v51 = vld [vmem:[#allocation4 + $0x14c] ss:$16 sps:$4 sm:$0xff]  }
 0x1d4   :  { %v8657_v34 = vpop.f32.mrf.mxu0  ;;  %v8659_v62 = vpop.f32.mrf.mxu1  ;;  %3618 = vmatmul.mubr.bf16.gmra.mxu1 %v8642_v2  ;;  %3731 = vmatmul.mubr.bf16.gmra.mxu0 %v8626_v7  ;;  %v11605_v2 = vld [vmem:[#allocation58_spill] sm:$0xff]  ;;  %v1444_v33 = vmax.f32 %v1043_v0, 0.0 }
 0x1d5   :  { %11604 = vst [vmem:[#allocation63_spill] sm:$0xff] %v8659_v62  ;;  %3627 = vmatprep.mubr.bf16.mxu1 %v8653_v43  ;;  %3740 = vmatprep.mubr.bf16.mxu0 %v8640_v20  ;;  %v8672_v62 = vrot.slane %v11605_v2, %v218_v24  ;;  %v7121_v7 = vld [vmem:[#allocation4 + $0x16c] ss:$16 sps:$4 sm:$0xff]   ;;  %11606 = vst [vmem:[#allocation58_spill] sm:$0xff] %v8674_v53  ;;  %v1051_v24 = vadd.f32 %v8446_v26, %v8316_v55  ;;  %v7125_v0 = vld [vmem:[#allocation4 + $0x148] ss:$16 sps:$4 sm:$0xff]  }
 0x1d6   :  { %v8667_v40 = vpop.f32.mrf.mxu0  ;;  %v8669_v42 = vpop.f32.mrf.mxu1  ;;  %4055 = vmatpush2.bf16.msra.mxu0 %v7110_v39  ;;  %v1563_v39 = vmax.f32 %v928_v8, 0.0  ;;  %v8690_v6 = vpack.c.bf16 %v1554_v50, %v1546_v59  ;;  %v214_v8 = vsub.s32 6, %v11601_v13  ;;  %v1436_v50 = vmax.f32 %v1039_v27, 0.0 }
 0x1d7   :  { %4056 = vmatprep.subr.bf16.mxu0 %v7118_v36  ;;  %v8688_v36 = vpack.c.bf16 %v1445_v1, %v1437_v31  ;;  %v1168_v26 = vadd.f32 %v8472_v3, %v8672_v62  ;;  %v11611_v31 = vld [vmem:[#allocation69_spill] sm:$0xff]  ;;  %v1164_v3 = vadd.f32 %v8448_v38, %v8672_v62 }
 0x1d8   :  { %v8680_v54 = vpop.f32.mrf.mxu0  ;;  %v8682_v20 = vpop.f32.mrf.mxu1  ;;  %11609 = vst [vmem:[#allocation98_spill] sm:$0xff] %v8690_v6  ;;  %v8701_v43 = vpack.c.bf16 %v1571_v60, %v1563_v39  ;;  %v926_v1 = vadd.f32 %v11611_v31, %v8057_v25  ;;  %v1461_v60 = vmax.f32 %v1055_v9, 0.0  ;;  %v1570_v25 = vmax.f32 %v930_v56, 0.0 }
 0x1d9   :  { %11607 = vst [vmem:[#allocation96_spill] sm:$0xff] %v8682_v20  ;;  %11608 = vst [vmem:[#allocation97_spill] sm:$0xff] %v8688_v36  ;;  %v8720_v39 = vrot.slane %v11605_v2, %v214_v8  ;;  %v1335_v31 = vmax.f32 %v1168_v26, 0.0  ;;  %v8722_v38 = vpack.c.bf16 %v1444_v33, %v1436_v50  ;;  %v1049_v9 = vadd.f32 %v8436_v47, %v8348_v14  ;;  %v7136_v33 = vld [vmem:[#allocation4 + $0x10c] ss:$16 sps:$4 sm:$0xff]  }
 0x1da   :  { %v8694_v45 = vpop.f32.mrf.mxu0  ;;  %v8696_v23 = vpop.f32.mrf.mxu1  ;;  %4057 = vmatpush2.bf16.msra.mxu0 %v7116_v32  ;;  %11610 = vst [vmem:[#allocation99_spill] sm:$0xff] %v8701_v43  ;;  %v1453_v32 = vmax.f32 %v1051_v24, 0.0  ;;  %v7130_v24 = vld [vmem:[#allocation4 + $0x12c] ss:$16 sps:$4 sm:$0xff]   ;;  %v1053_v56 = vadd.f32 %v8456_v57, %v8348_v14  ;;  %v1061_v26 = vadd.f32 %v8490_v28, %v8316_v55  ;;  %v1065_v47 = vadd.f32 %v8514_v17, %v8316_v55 }
 0x1db   :  { %4058 = vmatprep.subr.bf16.mxu0 %v7121_v7  ;;  %11612 = vst [vmem:[#allocation69_spill] sm:$0xff] %v8722_v38  ;;  %v1166_v8 = vadd.f32 %v8458_v15, %v8720_v39  ;;  %v1178_v50 = vadd.f32 %v8516_v46, %v8672_v62  ;;  %v1452_v15 = vmax.f32 %v1049_v9, 0.0  ;;  %v1162_v28 = vadd.f32 %v8438_v61, %v8720_v39 }
 0x1dc   :  { %v8705_v59 = vpop.f32.mrf.mxu0  ;;  %v8707_v20 = vpop.f32.mrf.mxu1  ;;  %3628 = vmatmul.mubr.bf16.gmra.mxu1 %v8690_v6  ;;  %3741 = vmatmul.mubr.bf16.gmra.mxu0 %v8674_v53  ;;  %v1562_v53 = vmax.f32 %v926_v1, 0.0  ;;  %v8732_v6 = vpack.c.bf16 %v1461_v60, %v1453_v32  ;;  %v7128_v1 = vld [vmem:[#allocation4 + $0x128] ss:$16 sps:$4 sm:$0xff]   ;;  %v1460_v32 = vmax.f32 %v1053_v56, 0.0  ;;  %v1174_v46 = vadd.f32 %v8492_v11, %v8672_v62 }
 0x1dd   :  { %3637 = vmatprep.mubr.bf16.mxu1 %v8701_v43  ;;  %3750 = vmatprep.mubr.bf16.mxu0 %v8688_v36  ;;  %v1334_v60 = vmax.f32 %v1166_v8, 0.0  ;;  %v1351_v9 = vmax.f32 %v1178_v50, 0.0  ;;  %v1326_v56 = vmax.f32 %v1162_v28, 0.0  ;;  %v1059_v11 = vadd.f32 %v8480_v58, %v8348_v14 }
 0x1de   :  { %v8715_v7 = vpop.f32.mrf.mxu0  ;;  %v8717_v27 = vpop.f32.mrf.mxu1  ;;  %4059 = vmatpush2.bf16.msra.mxu0 %v7119_v19  ;;  %v1327_v19 = vmax.f32 %v1164_v3, 0.0  ;;  %11613 = vst [vmem:[#allocation100_spill] sm:$0xff] %v8732_v6  ;;  %v8734_v2 = vpack.c.bf16 %v1570_v25, %v1562_v53  ;;  %v1469_v25 = vmax.f32 %v1061_v26, 0.0  ;;  %v1075_v50 = vadd.f32 %v8558_v52, %v8316_v55  ;;  %v7163_v52 = vld [vmem:[#allocation4 + $0x4ec] ss:$16 sps:$4 sm:$0xff]  }
 0x1df   :  { %4060 = vmatprep.subr.bf16.mxu0 %v7127_v51  ;;  %v1176_v58 = vadd.f32 %v8502_v29, %v8720_v39 }
 0x1e0   :  { %v8728_v36 = vpop.f32.mrf.mxu0  ;;  %v8730_v43 = vpop.f32.mrf.mxu1  ;;  %11614 = vst [vmem:[#allocation101_spill] sm:$0xff] %v8734_v2  ;;  %v8748_v53 = vpack.c.bf16 %v1335_v31, %v1327_v19  ;;  %v8766_v19 = vpack.c.bf16 %v1460_v32, %v1452_v15  ;;  %v8780_v15 = vpack.c.bf16 %v1334_v60, %v1326_v56  ;;  %v1172_v60 = vadd.f32 %v8482_v37, %v8720_v39 }
 0x1e2   :  { %v8742_v51 = vpop.f32.mrf.mxu0  ;;  %v8744_v57 = vpop.f32.mrf.mxu1  ;;  %4061 = vmatpush2.bf16.msra.mxu0 %v7125_v0  ;;  %11615 = vst [vmem:[#allocation102_spill] sm:$0xff] %v8748_v53  ;;  %v1477_v0 = vmax.f32 %v1065_v47, 0.0  ;;  %11616 = vst [vmem:[#allocation103_spill] sm:$0xff] %v8766_v19  ;;  %v1343_v47 = vmax.f32 %v1174_v46, 0.0 }
 0x1e3   :  { %4062 = vmatprep.subr.bf16.mxu0 %v7130_v24  ;;  %v7134_v24 = vld [vmem:[#allocation4 + $0x108] ss:$16 sps:$4 sm:$0xff]   ;;  %11617 = vst [vmem:[#allocation104_spill] sm:$0xff] %v8780_v15 }
 0x1e4   :  { %v8752_v3 = vpop.f32.mrf.mxu0  ;;  %v8754_v17 = vpop.f32.mrf.mxu1  ;;  %3638 = vmatmul.mubr.bf16.gmra.mxu1 %v8734_v2  ;;  %3751 = vmatmul.mubr.bf16.gmra.mxu0 %v8722_v38  ;;  %v8788_v32 = vpack.c.bf16 %v1477_v0, %v1469_v25  ;;  %v8792_v46 = vpack.c.bf16 %v1351_v9, %v1343_v47  ;;  %v1468_v38 = vmax.f32 %v1059_v11, 0.0  ;;  %v1493_v0 = vmax.f32 %v1075_v50, 0.0  ;;  %v7088_v11 = vld [vmem:[#allocation4 + $0x2ac] ss:$16 sps:$4 sm:$0xff]  }
 0x1e5   :  { %3873 = vmatprep.mubr.bf16.mxu1 %v8748_v53  ;;  %3760 = vmatprep.mubr.bf16.mxu0 %v8732_v6  ;;  %v1063_v53 = vadd.f32 %v8500_v10, %v8348_v14  ;;  %v7079_v6 = vld [vmem:[#allocation4 + $0x2cc] ss:$16 sps:$4 sm:$0xff]   ;;  %v1350_v9 = vmax.f32 %v1176_v58, 0.0  ;;  %v1073_v50 = vadd.f32 %v8544_v16, %v8348_v14 }
 0x1e6   :  { %v8762_v61 = vpop.f32.mrf.mxu0  ;;  %v8764_v31 = vpop.f32.mrf.mxu1  ;;  %4063 = vmatpush2.bf16.msra.mxu0 %v7128_v1  ;;  %v1071_v1 = vadd.f32 %v8534_v48, %v8316_v55  ;;  %11618 = vst [vmem:[#allocation105_spill] sm:$0xff] %v8788_v32  ;;  %v1188_v48 = vadd.f32 %v8560_v63, %v8672_v62  ;;  %11619 = vst [vmem:[#allocation106_spill] sm:$0xff] %v8792_v46  ;;  %v1184_v63 = vadd.f32 %v8536_v44, %v8672_v62 }
 0x1e7   :  { %4064 = vmatprep.subr.bf16.mxu0 %v7136_v33  ;;  %v7068_v33 = vld [vmem:[#allocation4 + $0x2e8] ss:$16 sps:$4 sm:$0xff]   ;;  %v1476_v56 = vmax.f32 %v1063_v53, 0.0  ;;  %v1069_v44 = vadd.f32 %v8524_v30, %v8348_v14  ;;  %v1186_v30 = vadd.f32 %v8546_v4, %v8720_v39 }
 0x1e8   :  { %v8772_v8 = vpop.f32.mrf.mxu0  ;;  %v8774_v26 = vpop.f32.mrf.mxu1  ;;  %v1485_v25 = vmax.f32 %v1071_v1, 0.0  ;;  %v1367_v47 = vmax.f32 %v1188_v48, 0.0  ;;  %v1342_v1 = vmax.f32 %v1172_v60, 0.0  ;;  %v1085_v48 = vadd.f32 %v8602_v5, %v8316_v55  ;;  %v7097_v5 = vld [vmem:[#allocation4 + $0x28c] ss:$16 sps:$4 sm:$0xff]  }
 0x1ea   :  { %v8784_v28 = vpop.f32.mrf.mxu0  ;;  %v8786_v10 = vpop.f32.mrf.mxu1  ;;  %4065 = vmatpush2.bf16.msra.mxu0 %v7134_v24  ;;  %v7077_v24 = vld [vmem:[#allocation4 + $0x2c8] ss:$16 sps:$4 sm:$0xff]  }
 0x1eb   :  { %4420 = vmatprep.subr.bf16.mxu0 %v7163_v52  ;;  %v8826_v52 = vpack.c.bf16 %v1350_v9, %v1342_v1 }
 0x1ec   :  { %v8796_v29 = vpop.f32.mrf.mxu1  ;;  %v8798_v2 = vpop.f32.mrf.mxu0  ;;  %3761 = vmatmul.mubr.bf16.gmra.mxu0 %v8766_v19  ;;  %3874 = vmatmul.mubr.bf16.vlgmr.msra.gmra.mxu1 %v8780_v15  ;;  %v8810_v15 = vpack.c.bf16 %v1476_v56, %v1468_v38  ;;  %v8824_v38 = vpack.c.bf16 %v1493_v0, %v1485_v25  ;;  %v7086_v56 = vld [vmem:[#allocation4 + $0x2a8] ss:$16 sps:$4 sm:$0xff]   ;;  %v1182_v25 = vadd.f32 %v8526_v35, %v8720_v39  ;;  %v1492_v0 = vmax.f32 %v1073_v50, 0.0 }
 0x1ed   :  { %3883 = vmatprep.mubr.bf16.mxu1 %v8792_v46  ;;  %4228 = vmatpush1.bf16.msra.mxu1 %v7068_v33  ;;  %v1359_v46 = vmax.f32 %v1184_v63, 0.0  ;;  %11622 = vst [vmem:[#allocation109_spill] sm:$0xff] %v8826_v52 }
 0x1ee   :  { %v8805_v37 = vpop.f32.mrf.mxu1  ;;  %v8807_v53 = vpop.f32.mrf.mxu0  ;;  %3770 = vmatprep.mubr.bf16.mxu0 %v8788_v32  ;;  %4229 = vmatprep.subr.bf16.mxu1 %v7079_v6  ;;  %11620 = vst [vmem:[#allocation107_spill] sm:$0xff] %v8810_v15  ;;  %v1081_v6 = vadd.f32 %v8578_v12, %v8316_v55  ;;  %11621 = vst [vmem:[#allocation108_spill] sm:$0xff] %v8824_v38  ;;  %v1198_v12 = vadd.f32 %v8604_v18, %v8672_v62 }
 0x1ef   :  { %v8836_v63 = vpack.c.bf16 %v1367_v47, %v1359_v46  ;;  %v1194_v18 = vadd.f32 %v8580_v22, %v8672_v62  ;;  %v1509_v46 = vmax.f32 %v1085_v48, 0.0  ;;  %v1366_v47 = vmax.f32 %v1186_v30, 0.0  ;;  %v11626_v22 = vld [vmem:[#allocation53_spill] sm:$0xff] }
 0x1f0   :  { %v8816_v33 = vpop.f32.mrf.mxu1  ;;  %v8818_v58 = vpop.f32.mrf.mxu0  ;;  %v1383_v50 = vmax.f32 %v1198_v12, 0.0  ;;  %v1079_v48 = vadd.f32 %v11626_v22, %v8348_v14  ;;  %v1095_v12 = vadd.f32 %v8646_v49, %v8316_v55  ;;  %v7115_v49 = vld [vmem:[#allocation4 + $0x24c] ss:$16 sps:$4 sm:$0xff]  }
 0x1f1   :  { %4230 = vmatpush1.bf16.msra.mxu1 %v7077_v24  ;;  %11623 = vst [vmem:[#allocation110_spill] sm:$0xff] %v8836_v63  ;;  %v1484_v24 = vmax.f32 %v1069_v44, 0.0  ;;  %v7095_v44 = vld [vmem:[#allocation4 + $0x288] ss:$16 sps:$4 sm:$0xff]   ;;  %v1375_v19 = vmax.f32 %v1194_v18, 0.0  ;;  %v1208_v18 = vadd.f32 %v8648_v21, %v8672_v62  ;;  %v11637_v21 = vld [vmem:[#allocation91_spill] sm:$0xff] }
 0x1f2   :  { %v8830_v16 = vpop.f32.mrf.mxu1  ;;  %v8832_v60 = vpop.f32.mrf.mxu0  ;;  %4231 = vmatprep.subr.bf16.mxu1 %v7088_v11  ;;  %v1501_v11 = vmax.f32 %v1081_v6, 0.0 }
 0x1f3   :  { %v8854_v6 = vpack.c.bf16 %v1492_v0, %v1484_v24 }
 0x1f4   :  { %v8840_v9 = vpop.f32.mrf.mxu1  ;;  %v8842_v4 = vpop.f32.mrf.mxu0  ;;  %3771 = vmatmul.mubr.bf16.gmra.mxu0 %v8810_v15  ;;  %3884 = vmatmul.mubr.bf16.gmra.mxu1 %v8826_v52  ;;  %v7106_v15 = vld [vmem:[#allocation4 + $0x26c] ss:$16 sps:$4 sm:$0xff]   ;;  %v1358_v52 = vmax.f32 %v1182_v25, 0.0  ;;  %v11631_v25 = vld [vmem:[#allocation87_spill] sm:$0xff] }
 0x1f5   :  { %3893 = vmatprep.mubr.bf16.mxu1 %v8836_v63  ;;  %3780 = vmatprep.mubr.bf16.mxu0 %v8824_v38  ;;  %11625 = vst [vmem:[#allocation112_spill] sm:$0xff] %v8854_v6  ;;  %v11627_v63 = vld [vmem:[#allocation57_spill] sm:$0xff]  ;;  %v1196_v0 = vadd.f32 %v11631_v25, %v8720_v39 }
 0x1f6   :  { %v8850_v35 = vpop.f32.mrf.mxu1  ;;  %v8852_v1 = vpop.f32.mrf.mxu0  ;;  %4232 = vmatpush1.bf16.msra.mxu1 %v7086_v56  ;;  %v1083_v32 = vadd.f32 %v11627_v63, %v8348_v14  ;;  %v1091_v56 = vadd.f32 %v8622_v41, %v8316_v55  ;;  %v8870_v24 = vpack.c.bf16 %v1366_v47, %v1358_v52  ;;  %v8880_v41 = vpack.c.bf16 %v1383_v50, %v1375_v19  ;;  %v11634_v52 = vld [vmem:[#allocation86_spill] sm:$0xff] }
 0x1f7   :  { %11624 = vst [vmem:[#allocation111_spill] sm:$0xff] %v8852_v1  ;;  %4233 = vmatprep.subr.bf16.mxu1 %v7097_v5  ;;  %v8868_v5 = vpack.c.bf16 %v1509_v46, %v1501_v11  ;;  %v1500_v11 = vmax.f32 %v1079_v48, 0.0  ;;  %v1192_v46 = vadd.f32 %v11634_v52, %v8720_v39  ;;  %v1204_v19 = vadd.f32 %v11637_v21, %v8672_v62  ;;  %v7113_v52 = vld [vmem:[#allocation4 + $0x248] ss:$16 sps:$4 sm:$0xff]  }
 0x1f8   :  { %v8860_v38 = vpop.f32.mrf.mxu1  ;;  %v8862_v30 = vpop.f32.mrf.mxu0  ;;  %11630 = vst [vmem:[#allocation113_spill] sm:$0xff] %v8870_v24  ;;  %11633 = vst [vmem:[#allocation114_spill] sm:$0xff] %v8880_v41  ;;  %v1508_v47 = vmax.f32 %v1083_v32, 0.0  ;;  %v1525_v50 = vmax.f32 %v1095_v12, 0.0  ;;  %v11640_v21 = vld [vmem:[#allocation56_spill] sm:$0xff] }
 0x1f9   :  { %11628 = vst [vmem:[#allocation53_spill] sm:$0xff] %v8862_v30  ;;  %11629 = vst [vmem:[#allocation57_spill] sm:$0xff] %v8868_v5  ;;  %v7104_v30 = vld [vmem:[#allocation4 + $0x268] ss:$16 sps:$4 sm:$0xff]   ;;  %v1089_v12 = vadd.f32 %v11640_v21, %v8348_v14 }
 0x1fa   :  { %v8874_v22 = vpop.f32.mrf.mxu1  ;;  %v8876_v63 = vpop.f32.mrf.mxu0  ;;  %4234 = vmatpush1.bf16.msra.mxu1 %v7095_v44  ;;  %v1517_v44 = vmax.f32 %v1091_v56, 0.0  ;;  %v8898_v56 = vpack.c.bf16 %v1508_v47, %v1500_v11 }
 0x1fb   :  { %11632 = vst [vmem:[#allocation87_spill] sm:$0xff] %v8876_v63  ;;  %4235 = vmatprep.subr.bf16.mxu1 %v7106_v15  ;;  %v1382_v15 = vmax.f32 %v1196_v0, 0.0 }
 0x1fc   :  { %v8884_v1 = vpop.f32.mrf.mxu1  ;;  %v8886_v25 = vpop.f32.mrf.mxu0  ;;  %3781 = vmatmul.mubr.bf16.gmra.mxu0 %v8854_v6  ;;  %3894 = vmatmul.mubr.bf16.gmra.mxu1 %v8870_v24  ;;  %v7124_v6 = vld [vmem:[#allocation4 + $0x22c] ss:$16 sps:$4 sm:$0xff]   ;;  %v1374_v24 = vmax.f32 %v1192_v46, 0.0  ;;  %11639 = vst [vmem:[#allocation116_spill] sm:$0xff] %v8898_v56  ;;  %v11645_v46 = vld [vmem:[#allocation93_spill] sm:$0xff] }
 0x1fd   :  { %11635 = vst [vmem:[#allocation86_spill] sm:$0xff] %v8884_v1  ;;  %11636 = vst [vmem:[#allocation115_spill] sm:$0xff] %v8886_v25  ;;  %3903 = vmatprep.mubr.bf16.mxu1 %v8880_v41  ;;  %3790 = vmatprep.mubr.bf16.mxu0 %v8868_v5  ;;  %v1399_v25 = vmax.f32 %v1208_v18, 0.0  ;;  %v11641_v41 = vld [vmem:[#allocation65_spill] sm:$0xff]  ;;  %v1391_v1 = vmax.f32 %v1204_v19, 0.0  ;;  %v1105_v18 = vadd.f32 %v8694_v45, %v8316_v55 }
 0x1fe   :  { %v8894_v48 = vpop.f32.mrf.mxu1  ;;  %v8896_v32 = vpop.f32.mrf.mxu0  ;;  %4236 = vmatpush1.bf16.msra.mxu1 %v7104_v30  ;;  %v1093_v63 = vadd.f32 %v11641_v41, %v8348_v14  ;;  %v1101_v30 = vadd.f32 %v8667_v40, %v8316_v55  ;;  %v8914_v11 = vpack.c.bf16 %v1382_v15, %v1374_v24  ;;  %v1206_v47 = vadd.f32 %v11645_v46, %v8720_v39  ;;  %v7133_v45 = vld [vmem:[#allocation4 + $0x20c] ss:$16 sps:$4 sm:$0xff]  }
 0x1ff   :  { %11638 = vst [vmem:[#allocation91_spill] sm:$0xff] %v8896_v32  ;;  %4237 = vmatprep.subr.bf16.mxu1 %v7115_v49  ;;  %v8912_v49 = vpack.c.bf16 %v1525_v50, %v1517_v44  ;;  %v1218_v19 = vadd.f32 %v8696_v23, %v8672_v62  ;;  %v8924_v40 = vpack.c.bf16 %v1399_v25, %v1391_v1  ;;  %v1516_v44 = vmax.f32 %v1089_v12, 0.0  ;;  %v11647_v24 = vld [vmem:[#allocation90_spill] sm:$0xff] }
 0x200   :  { %v8904_v5 = vpop.f32.mrf.mxu1  ;;  %v8906_v0 = vpop.f32.mrf.mxu0  ;;  %11644 = vst [vmem:[#allocation117_spill] sm:$0xff] %v8914_v11  ;;  %v1202_v50 = vadd.f32 %v11647_v24, %v8720_v39  ;;  %v1524_v15 = vmax.f32 %v1093_v63, 0.0  ;;  %v1214_v23 = vadd.f32 %v8669_v42, %v8672_v62  ;;  %v1541_v1 = vmax.f32 %v1105_v18, 0.0  ;;  %v7131_v12 = vld [vmem:[#allocation4 + $0x208] ss:$16 sps:$4 sm:$0xff]  }
 0x201   :  { %11642 = vst [vmem:[#allocation56_spill] sm:$0xff] %v8906_v0  ;;  %11643 = vst [vmem:[#allocation65_spill] sm:$0xff] %v8912_v49  ;;  %v7122_v0 = vld [vmem:[#allocation4 + $0x228] ss:$16 sps:$4 sm:$0xff]   ;;  %v1415_v24 = vmax.f32 %v1218_v19, 0.0  ;;  %v1099_v42 = vadd.f32 %v8657_v34, %v8348_v14  ;;  %v1103_v18 = vadd.f32 %v8680_v54, %v8348_v14  ;;  %v1115_v19 = vadd.f32 %v8742_v51, %v8316_v55 }
 0x202   :  { %v8918_v21 = vpop.f32.mrf.mxu1  ;;  %v8920_v41 = vpop.f32.mrf.mxu0  ;;  %4238 = vmatpush1.bf16.msra.mxu1 %v7113_v52  ;;  %11646 = vst [vmem:[#allocation93_spill] sm:$0xff] %v8924_v40  ;;  %v1533_v52 = vmax.f32 %v1101_v30, 0.0  ;;  %v8942_v30 = vpack.c.bf16 %v1524_v15, %v1516_v44  ;;  %v11653_v34 = vld [vmem:[#allocation96_spill] sm:$0xff] }
 0x203   :  { %4239 = vmatprep.subr.bf16.mxu1 %v7124_v6  ;;  %v1398_v6 = vmax.f32 %v1206_v47, 0.0  ;;  %v7142_v51 = vld [vmem:[#allocation4 + $0x3cc] ss:$16 sps:$4 sm:$0xff]  }
 0x204   :  { %v8928_v32 = vpop.f32.mrf.mxu1  ;;  %v8930_v46 = vpop.f32.mrf.mxu0  ;;  %3791 = vmatmul.mubr.bf16.gmra.mxu0 %v8898_v56  ;;  %3904 = vmatmul.mubr.bf16.gmra.mxu1 %v8914_v11  ;;  %v7139_v56 = vld [vmem:[#allocation4 + $0x3ec] ss:$16 sps:$4 sm:$0xff]   ;;  %v1390_v11 = vmax.f32 %v1202_v50, 0.0  ;;  %11649 = vst [vmem:[#allocation118_spill] sm:$0xff] %v8942_v30  ;;  %v1216_v50 = vadd.f32 %v11653_v34, %v8720_v39 }
 0x205   :  { %3913 = vmatprep.mubr.bf16.mxu1 %v8924_v40  ;;  %3800 = vmatprep.mubr.bf16.mxu0 %v8912_v49  ;;  %v1407_v49 = vmax.f32 %v1214_v23, 0.0  ;;  %v1228_v23 = vadd.f32 %v8744_v57, %v8672_v62  ;;  %v1224_v57 = vadd.f32 %v8717_v27, %v8672_v62  ;;  %v1109_v27 = vadd.f32 %v8705_v59, %v8348_v14 }
 0x206   :  { %v8938_v25 = vpop.f32.mrf.mxu1  ;;  %v8940_v63 = vpop.f32.mrf.mxu0  ;;  %4240 = vmatpush1.bf16.msra.mxu1 %v7122_v0  ;;  %v1111_v0 = vadd.f32 %v8715_v7, %v8316_v55  ;;  %v8958_v44 = vpack.c.bf16 %v1398_v6, %v1390_v11  ;;  %v11655_v11 = vld [vmem:[#allocation63_spill] sm:$0xff]  ;;  %v1540_v6 = vmax.f32 %v1103_v18, 0.0  ;;  %v7140_v18 = vld [vmem:[#allocation4 + $0x3c8] ss:$16 sps:$4 sm:$0xff]   ;;  %v1226_v59 = vadd.f32 %v8730_v43, %v8720_v39 }
 0x207   :  { %11648 = vst [vmem:[#allocation90_spill] sm:$0xff] %v8940_v63  ;;  %4241 = vmatprep.subr.bf16.mxu1 %v7133_v45  ;;  %v8956_v45 = vpack.c.bf16 %v1541_v1, %v1533_v52  ;;  %v8968_v7 = vpack.c.bf16 %v1415_v24, %v1407_v49  ;;  %v1532_v52 = vmax.f32 %v1099_v42, 0.0  ;;  %v1212_v1 = vadd.f32 %v11655_v11, %v8720_v39 }
 0x208   :  { %v8948_v40 = vpop.f32.mrf.mxu1  ;;  %v8950_v47 = vpop.f32.mrf.mxu0  ;;  %11652 = vst [vmem:[#allocation121_spill] sm:$0xff] %v8958_v44  ;;  %v1557_v49 = vmax.f32 %v1115_v19, 0.0  ;;  %v1431_v11 = vmax.f32 %v1228_v23, 0.0  ;;  %v1113_v19 = vadd.f32 %v8728_v36, %v8348_v14  ;;  %v1125_v23 = vadd.f32 %v8784_v28, %v8316_v55 }
 0x209   :  { %11650 = vst [vmem:[#allocation119_spill] sm:$0xff] %v8950_v47  ;;  %11651 = vst [vmem:[#allocation120_spill] sm:$0xff] %v8956_v45  ;;  %v7137_v47 = vld [vmem:[#allocation4 + $0x3e8] ss:$16 sps:$4 sm:$0xff]   ;;  %v1548_v28 = vmax.f32 %v1109_v27, 0.0 }
 0x20a   :  { %v8962_v15 = vpop.f32.mrf.mxu1  ;;  %v8964_v54 = vpop.f32.mrf.mxu0  ;;  %4242 = vmatpush1.bf16.msra.mxu1 %v7131_v12  ;;  %11654 = vst [vmem:[#allocation96_spill] sm:$0xff] %v8968_v7  ;;  %v1549_v12 = vmax.f32 %v1111_v0, 0.0  ;;  %v8986_v0 = vpack.c.bf16 %v1540_v6, %v1532_v52  ;;  %v7143_v6 = vld [vmem:[#allocation4 + $0x3a8] ss:$16 sps:$4 sm:$0xff]  }
 0x20b   :  { %4243 = vmatprep.subr.bf16.mxu1 %v7139_v56  ;;  %v1414_v56 = vmax.f32 %v1216_v50, 0.0 }
 0x20c   :  { %v8972_v63 = vpop.f32.mrf.mxu1  ;;  %v8974_v34 = vpop.f32.mrf.mxu0  ;;  %3801 = vmatmul.mubr.bf16.gmra.mxu0 %v8942_v30  ;;  %3914 = vmatmul.mubr.bf16.gmra.mxu1 %v8958_v44  ;;  %v7145_v30 = vld [vmem:[#allocation4 + $0x3ac] ss:$16 sps:$4 sm:$0xff]   ;;  %v1406_v44 = vmax.f32 %v1212_v1, 0.0  ;;  %11656 = vst [vmem:[#allocation63_spill] sm:$0xff] %v8986_v0 }
 0x20d   :  { %3923 = vmatprep.mubr.bf16.mxu1 %v8968_v7  ;;  %3810 = vmatprep.mubr.bf16.mxu0 %v8956_v45  ;;  %v1423_v45 = vmax.f32 %v1224_v57, 0.0  ;;  %v1238_v57 = vadd.f32 %v8786_v10, %v8672_v62  ;;  %v1234_v10 = vadd.f32 %v8764_v31, %v8672_v62  ;;  %v1119_v31 = vadd.f32 %v8752_v3, %v8348_v14  ;;  %v7149_v3 = vld [vmem:[#allocation4 + $0x368] ss:$16 sps:$4 sm:$0xff]  }
 0x20e   :  { %v8982_v24 = vpop.f32.mrf.mxu1  ;;  %v8984_v42 = vpop.f32.mrf.mxu0  ;;  %4244 = vmatpush2.bf16.msra.mxu1 %v7137_v47  ;;  %v1121_v47 = vadd.f32 %v8762_v61, %v8316_v55  ;;  %v9002_v52 = vpack.c.bf16 %v1414_v56, %v1406_v44  ;;  %v7148_v55 = vld [vmem:[#allocation4 + $0x38c] ss:$16 sps:$4 sm:$0xff]   ;;  %v1222_v44 = vadd.f32 %v8707_v20, %v8720_v39 }
 0x20f   :  { %4245 = vmatprep.subr.bf16.mxu1 %v7142_v51  ;;  %v9000_v51 = vpack.c.bf16 %v1557_v49, %v1549_v12  ;;  %v9012_v61 = vpack.c.bf16 %v1431_v11, %v1423_v45  ;;  %v1556_v12 = vmax.f32 %v1113_v19, 0.0  ;;  %v1573_v45 = vmax.f32 %v1125_v23, 0.0  ;;  %v7146_v11 = vld [vmem:[#allocation4 + $0x388] ss:$16 sps:$4 sm:$0xff]   ;;  %v7151_v19 = vld [vmem:[#allocation4 + $0x36c] ss:$16 sps:$4 sm:$0xff]  }
 0x210   :  { %v8992_v7 = vpop.f32.mrf.mxu1  ;;  %v8994_v50 = vpop.f32.mrf.mxu0  ;;  %11658 = vst [vmem:[#allocation123_spill] sm:$0xff] %v9002_v52  ;;  %v1565_v56 = vmax.f32 %v1121_v47, 0.0  ;;  %v1447_v27 = vmax.f32 %v1238_v57, 0.0  ;;  %v1123_v23 = vadd.f32 %v8772_v8, %v8348_v14  ;;  %v1236_v57 = vadd.f32 %v8774_v26, %v8720_v39 }
 0x211   :  { %11657 = vst [vmem:[#allocation122_spill] sm:$0xff] %v9000_v51  ;;  %11659 = vst [vmem:[#allocation124_spill] sm:$0xff] %v9012_v61  ;;  %v9030_v47 = vpack.c.bf16 %v1556_v12, %v1548_v28  ;;  %v1248_v14 = vadd.f32 %v8830_v16, %v8672_v62  ;;  %v1564_v12 = vmax.f32 %v1119_v31, 0.0  ;;  %v1244_v16 = vadd.f32 %v8805_v37, %v8672_v62 }
 0x212   :  { %v9006_v1 = vpop.f32.mrf.mxu1  ;;  %v9008_v36 = vpop.f32.mrf.mxu0  ;;  %4246 = vmatpush2.bf16.msra.mxu1 %v7140_v18 }
 0x213   :  { %4247 = vmatprep.subr.bf16.mxu1 %v7145_v30  ;;  %v1430_v30 = vmax.f32 %v1226_v59, 0.0  ;;  %11660 = vst [vmem:[#allocation125_spill] sm:$0xff] %v9030_v47 }
 0x214   :  { %v9016_v49 = vpop.f32.mrf.mxu1  ;;  %v9018_v43 = vpop.f32.mrf.mxu0  ;;  %3811 = vmatmul.mubr.bf16.gmra.mxu0 %v8986_v0  ;;  %3924 = vmatmul.mubr.bf16.gmra.mxu1 %v9002_v52  ;;  %v1422_v52 = vmax.f32 %v1222_v44, 0.0  ;;  %v9040_v0 = vpack.c.bf16 %v1573_v45, %v1565_v56  ;;  %v7154_v44 = vld [vmem:[#allocation4 + $0x34c] ss:$16 sps:$4 sm:$0xff]   ;;  %v1572_v56 = vmax.f32 %v1123_v23, 0.0 }
 0x215   :  { %3933 = vmatprep.mubr.bf16.mxu1 %v9012_v61  ;;  %3820 = vmatprep.mubr.bf16.mxu0 %v9000_v51  ;;  %v1439_v51 = vmax.f32 %v1234_v10, 0.0 }
 0x216   :  { %v9026_v20 = vpop.f32.mrf.mxu1  ;;  %v9028_v18 = vpop.f32.mrf.mxu0  ;;  %4248 = vmatpush2.bf16.msra.mxu1 %v7143_v6  ;;  %11661 = vst [vmem:[#allocation126_spill] sm:$0xff] %v9040_v0  ;;  %v9042_v6 = vpack.c.bf16 %v1430_v30, %v1422_v52  ;;  %v1232_v52 = vadd.f32 %v8754_v17, %v8720_v39  ;;  %v7152_v30 = vld [vmem:[#allocation4 + $0x348] ss:$16 sps:$4 sm:$0xff]   ;;  %v9070_v31 = vpack.c.bf16 %v1572_v56, %v1564_v12 }
 0x217   :  { %4249 = vmatprep.subr.bf16.mxu1 %v7148_v55  ;;  %v9052_v8 = vpack.c.bf16 %v1447_v27, %v1439_v51  ;;  %v1446_v51 = vmax.f32 %v1236_v57, 0.0  ;;  %v7157_v27 = vld [vmem:[#allocation4 + $0x32c] ss:$16 sps:$4 sm:$0xff]   ;;  %v1246_v57 = vadd.f32 %v8816_v33, %v8720_v39  ;;  %v1242_v56 = vadd.f32 %v8796_v29, %v8720_v39  ;;  %v1960_v33 = vld [vmem:[%s11352_s4] sm:$0xf] }
 0x218   :  { %v9036_v61 = vpop.f32.mrf.mxu1  ;;  %v9038_v59 = vpop.f32.mrf.mxu0  ;;  %11662 = vst [vmem:[#allocation127_spill] sm:$0xff] %v9042_v6  ;;  %11664 = vst [vmem:[#allocation129_spill] sm:$0xff] %v9070_v31 }
 0x219   :  { %11663 = vst [vmem:[#allocation128_spill] sm:$0xff] %v9052_v8  ;;  %v1462_v29 = vmax.f32 %v1246_v57, 0.0  ;;  %v11672_v57 = vsub.s32 1, %v11601_v13 }
 0x21a   :  { %v9046_v55 = vpop.f32.mrf.mxu1  ;;  %v9048_v28 = vpop.f32.mrf.mxu0  ;;  %4250 = vmatpush2.bf16.msra.mxu1 %v7146_v11  ;;  %v1463_v11 = vmax.f32 %v1248_v14, 0.0  ;;  %v7155_v14 = vld [vmem:[#allocation4 + $0x328] ss:$16 sps:$4 sm:$0xff]  }
 0x21b   :  { %4251 = vmatprep.subr.bf16.mxu1 %v7151_v19  ;;  %v1438_v19 = vmax.f32 %v1232_v52, 0.0  ;;  %v7160_v52 = vld [vmem:[#allocation4 + $0x30c] ss:$16 sps:$4 sm:$0xff]  }
 0x21c   :  { %v9056_v10 = vpop.f32.mrf.mxu1  ;;  %v9058_v26 = vpop.f32.mrf.mxu0  ;;  %3821 = vmatmul.mubr.bf16.gmra.mxu0 %v9030_v47  ;;  %3934 = vmatmul.mubr.bf16.gmra.mxu1 %v9042_v6 }
 0x21d   :  { %3943 = vmatprep.mubr.bf16.mxu1 %v9052_v8  ;;  %3830 = vmatprep.mubr.bf16.mxu0 %v9040_v0  ;;  %v1455_v8 = vmax.f32 %v1244_v16, 0.0  ;;  %v9076_v6 = vpack.c.bf16 %v1446_v51, %v1438_v19  ;;  %v11671_v19 = vsub.s32 0, %v11601_v13  ;;  %v1268_v13 = vadd.f32 %v8918_v21, %v8672_v62 }
 0x21e   :  { %v9066_v45 = vpop.f32.mrf.mxu1  ;;  %v9068_v17 = vpop.f32.mrf.mxu0  ;;  %4252 = vmatpush2.bf16.msra.mxu1 %v7149_v3  ;;  %v1264_v21 = vadd.f32 %v8894_v48, %v8672_v62  ;;  %v7172_v48 = vld [vmem:[#allocation4 + $0x4ac] ss:$16 sps:$4 sm:$0xff]  }
 0x21f   :  { %4253 = vmatprep.subr.bf16.mxu1 %v7154_v44  ;;  %11665 = vst [vmem:[#allocation130_spill] sm:$0xff] %v9076_v6  ;;  %v1258_v44 = vadd.f32 %v8874_v22, %v8672_v62  ;;  %v9086_v12 = vpack.c.bf16 %v1463_v11, %v1455_v8  ;;  %v1254_v22 = vadd.f32 %v8850_v35, %v8672_v62  ;;  %v11669_v8 = vld [vmem:[#allocation14_spill] sm:$0xff] }
 0x220   :  { %v9072_v23 = vpop.f32.mrf.mxu1  ;;  %v9074_v37 = vpop.f32.mrf.mxu0  ;;  %v9109_v47 = vrot.slane %v1960_v33, %v11671_v19 }
 0x221   :  { %11667 = vst [vmem:[#allocation132_spill] sm:$0xff] %v9086_v12 }
 0x222   :  { %v9080_v0 = vpop.f32.mrf.mxu1  ;;  %v9082_v3 = vpop.f32.mrf.mxu0  ;;  %4254 = vmatpush2.bf16.msra.mxu1 %v7152_v30 }
 0x223   :  { %11666 = vst [vmem:[#allocation131_spill] sm:$0xff] %v9082_v3  ;;  %4255 = vmatprep.subr.bf16.mxu1 %v7157_v27  ;;  %v7158_v27 = vld [vmem:[#allocation4 + $0x308] ss:$16 sps:$4 sm:$0xff]   ;;  %v1471_v3 = vmax.f32 %v1254_v22, 0.0  ;;  %v1252_v22 = vadd.f32 %v8840_v9, %v8720_v39 }
 0x224   :  { %v9093_v16 = vpop.f32.mrf.mxu1  ;;  %v9095_v51 = vpop.f32.mrf.mxu0  ;;  %3831 = vmatmul.mubr.bf16.gmra.mxu0 %v9070_v31  ;;  %3944 = vmatmul.mubr.bf16.gmra.mxu1 %v9076_v6  ;;  %v1479_v31 = vmax.f32 %v1258_v44, 0.0  ;;  %v7166_v6 = vld [vmem:[#allocation4 + $0x6ec] ss:$16 sps:$4 sm:$0xff]  }
 0x225   :  { %11668 = vst [vmem:[#allocation133_spill] sm:$0xff] %v9095_v51  ;;  %3953 = vmatprep.mubr.bf16.mxu1 %v9086_v12  ;;  %4066 = vmatprep.mubr.bf16.mxu0 %v11669_v8  ;;  %v1454_v51 = vmax.f32 %v1242_v56, 0.0  ;;  %v9117_v8 = vrot.slane %v1960_v33, %v11672_v57  ;;  %v3297_v56 = vadd.f32 %v8798_v2, %v9109_v47 }
 0x226   :  { %v9103_v30 = vpop.f32.mrf.mxu1  ;;  %v9105_v11 = vpop.f32.mrf.mxu0  ;;  %4256 = vmatpush2.bf16.msra.mxu1 %v7155_v14  ;;  %v1256_v14 = vadd.f32 %v8860_v38, %v8720_v39  ;;  %v9131_v33 = vpack.c.bf16 %v1479_v31, %v1471_v3 }
 0x227   :  { %11670 = vst [vmem:[#allocation14_spill] sm:$0xff] %v9105_v11  ;;  %4257 = vmatprep.subr.bf16.mxu1 %v7160_v52  ;;  %v9119_v11 = vpack.c.bf16 %v1462_v29, %v1454_v51  ;;  %v7161_v52 = vld [vmem:[#allocation4 + $0x4e8] ss:$16 sps:$4 sm:$0xff]   ;;  %v7169_v51 = vld [vmem:[#allocation4 + $0x4cc] ss:$16 sps:$4 sm:$0xff]   ;;  %v3299_v2 = vadd.f32 %v8807_v53, %v9117_v8 }
 0x228   :  { %v9111_v35 = vpop.f32.mrf.mxu1  ;;  %v9113_v12 = vpop.f32.mrf.mxu0  ;;  %11674 = vst [vmem:[#allocation135_spill] sm:$0xff] %v9131_v33  ;;  %v1478_v9 = vmax.f32 %v1256_v14, 0.0  ;;  %v3303_v14 = vadd.f32 %v8832_v60, %v9117_v8 }
 0x229   :  { %11673 = vst [vmem:[#allocation134_spill] sm:$0xff] %v9119_v11 }
 0x22a   :  { %v9123_v19 = vpop.f32.mrf.mxu1  ;;  %v9125_v44 = vpop.f32.mrf.mxu0  ;;  %4258 = vmatpush2.bf16.msra.mxu1 %v7158_v27  ;;  %v11676_v27 = vld [vmem:[#allocation17_spill] sm:$0xff] }
 0x22b   :  { %4613 = vmatprep.subr.bf16.mxu1 %v7166_v6  ;;  %v11678_v6 = vld [vmem:[#allocation18_spill] sm:$0xff] }
 0x22c   :  { %v9135_v38 = vpop.f32.mrf.mxu0  ;;  %v3489_v29 = vpop.f32.mrf.mxu1  ;;  %3954 = vmatmul.mubr.bf16.gmra.mxu1 %v9119_v11  ;;  %4067 = vmatmul.mubr.bf16.vlgmr.msra.gmra.mxu0 %v11676_v27  ;;  %v7167_v11 = vld [vmem:[#allocation4 + $0x4c8] ss:$16 sps:$4 sm:$0xff]   ;;  %v3301_v27 = vadd.f32 %v8818_v58, %v9109_v47  ;;  %v1266_v58 = vadd.f32 %v8904_v5, %v8720_v39 }
 0x22d   :  { %11675 = vst [vmem:[#allocation136_spill] sm:$0xff] %v9135_v38  ;;  %v9143_v31 = vadd.f32 %v3489_v29, %v3297_v56  ;;  %3963 = vmatprep.mubr.bf16.mxu1 %v9131_v33  ;;  %4076 = vmatprep.mubr.bf16.mxu0 %v11678_v6  ;;  %v1495_v38 = vmax.f32 %v1268_v13, 0.0  ;;  %v1470_v56 = vmax.f32 %v1252_v22, 0.0  ;;  %v1487_v6 = vmax.f32 %v1264_v21, 0.0  ;;  %v7178_v21 = vld [vmem:[#allocation4 + $0x48c] ss:$16 sps:$4 sm:$0xff]  }
 0x22e   :  { %v9147_v3 = vpop.f32.mrf.mxu0  ;;  %v3491_v57 = vpop.f32.mrf.mxu1  ;;  %4421 = vmatpush1.bf16.msra.mxu0 %v7161_v52  ;;  %v3307_v22 = vadd.f32 %v8842_v4, %v9109_v47  ;;  %v11685_v4 = vld [vmem:[#allocation111_spill] sm:$0xff] }
 0x22f   :  { %11677 = vst [vmem:[#allocation17_spill] sm:$0xff] %v9143_v31  ;;  %v9151_v53 = vadd.f32 %v3491_v57, %v3299_v2  ;;  %4422 = vmatprep.subr.bf16.mxu0 %v7169_v51  ;;  %v9159_v52 = vpack.c.bf16 %v1478_v9, %v1470_v56  ;;  %v7170_v51 = vld [vmem:[#allocation4 + $0x4a8] ss:$16 sps:$4 sm:$0xff]   ;;  %v1278_v57 = vadd.f32 %v8962_v15, %v8672_v62 }
 0x230   :  { %v9153_v29 = vpop.f32.mrf.mxu0  ;;  %v3493_v33 = vpop.f32.mrf.mxu1  ;;  %v11683_v9 = vld [vmem:[#allocation86_spill] sm:$0xff]  ;;  %v1274_v15 = vadd.f32 %v8938_v25, %v8672_v62 }
 0x231   :  { %v9157_v31 = vadd.f32 %v3493_v33, %v3301_v27  ;;  %11680 = vst [vmem:[#allocation137_spill] sm:$0xff] %v9159_v52  ;;  %v9171_v33 = vpack.c.bf16 %v1495_v38, %v1487_v6  ;;  %v1262_v5 = vadd.f32 %v11683_v9, %v8720_v39  ;;  %v7176_v9 = vld [vmem:[#allocation4 + $0x488] ss:$16 sps:$4 sm:$0xff]   ;;  %v7181_v25 = vld [vmem:[#allocation4 + $0x46c] ss:$16 sps:$4 sm:$0xff]  }
 0x232   :  { %v9163_v13 = vpop.f32.mrf.mxu0  ;;  %v3495_v2 = vpop.f32.mrf.mxu1  ;;  %4423 = vmatpush1.bf16.msra.mxu0 %v7167_v11  ;;  %v11684_v11 = vld [vmem:[#allocation21_spill] sm:$0xff] }
 0x233   :  { %11679 = vst [vmem:[#allocation18_spill] sm:$0xff] %v9157_v31  ;;  %v9169_v60 = vadd.f32 %v3495_v2, %v3303_v14  ;;  %11682 = vst [vmem:[#allocation139_spill] sm:$0xff] %v9171_v33  ;;  %4424 = vmatprep.subr.bf16.mxu0 %v7172_v48  ;;  %v3309_v31 = vadd.f32 %v11685_v4, %v9117_v8  ;;  %v11687_v48 = vld [vmem:[#allocation22_spill] sm:$0xff]  ;;  %v1494_v14 = vmax.f32 %v1266_v58, 0.0 }
 0x234   :  { %v9175_v27 = vpop.f32.mrf.mxu0  ;;  %v3499_v56 = vpop.f32.mrf.mxu1  ;;  %3964 = vmatmul.mubr.bf16.gmra.mxu1 %v9159_v52  ;;  %4077 = vmatmul.mubr.bf16.gmra.mxu0 %v11684_v11  ;;  %v11689_v11 = vld [vmem:[#allocation53_spill] sm:$0xff] }
 0x235   :  { %11681 = vst [vmem:[#allocation138_spill] sm:$0xff] %v9169_v60  ;;  %v9183_v38 = vadd.f32 %v3499_v56, %v3307_v22  ;;  %3973 = vmatprep.mubr.bf16.mxu1 %v9171_v33  ;;  %4086 = vmatprep.mubr.bf16.mxu0 %v11687_v48  ;;  %v3311_v52 = vadd.f32 %v11689_v11, %v9109_v47  ;;  %v1511_v60 = vmax.f32 %v1278_v57, 0.0  ;;  %v1486_v22 = vmax.f32 %v1262_v5, 0.0  ;;  %v11691_v48 = vld [vmem:[#allocation87_spill] sm:$0xff] }
 0x236   :  { %v9187_v6 = vpop.f32.mrf.mxu0  ;;  %v3501_v2 = vpop.f32.mrf.mxu1  ;;  %4425 = vmatpush1.bf16.msra.mxu0 %v7170_v51  ;;  %v3313_v58 = vadd.f32 %v11691_v48, %v9117_v8  ;;  %v1276_v11 = vadd.f32 %v8948_v40, %v8720_v39  ;;  %v11693_v5 = vld [vmem:[#allocation115_spill] sm:$0xff]  ;;  %v1272_v40 = vadd.f32 %v8928_v32, %v8720_v39 }
 0x237   :  { %11686 = vst [vmem:[#allocation86_spill] sm:$0xff] %v9183_v38  ;;  %11688 = vst [vmem:[#allocation21_spill] sm:$0xff] %v9187_v6  ;;  %v9191_v4 = vadd.f32 %v3501_v2, %v3309_v31  ;;  %4426 = vmatprep.subr.bf16.mxu0 %v7178_v21  ;;  %v1503_v38 = vmax.f32 %v1274_v15, 0.0  ;;  %v9199_v51 = vpack.c.bf16 %v1494_v14, %v1486_v22  ;;  %v7179_v21 = vld [vmem:[#allocation4 + $0x468] ss:$16 sps:$4 sm:$0xff]   ;;  %v11697_v22 = vld [vmem:[#allocation91_spill] sm:$0xff] }
 0x238   :  { %v9193_v56 = vpop.f32.mrf.mxu0  ;;  %v3503_v33 = vpop.f32.mrf.mxu1  ;;  %v3317_v2 = vadd.f32 %v11693_v5, %v9109_v47  ;;  %v3319_v5 = vadd.f32 %v11697_v22, %v9117_v8  ;;  %v1510_v32 = vmax.f32 %v1276_v11, 0.0  ;;  %v3323_v11 = vadd.f32 %v8920_v41, %v9117_v8 }
 0x239   :  { %11690 = vst [vmem:[#allocation111_spill] sm:$0xff] %v9191_v4  ;;  %v9197_v6 = vadd.f32 %v3503_v33, %v3311_v52  ;;  %11692 = vst [vmem:[#allocation22_spill] sm:$0xff] %v9199_v51  ;;  %v1288_v4 = vadd.f32 %v9006_v1, %v8672_v62  ;;  %v9211_v52 = vpack.c.bf16 %v1511_v60, %v1503_v38  ;;  %v7187_v33 = vld [vmem:[#allocation4 + $0x44c] ss:$16 sps:$4 sm:$0xff]  }
 0x23a   :  { %v9203_v57 = vpop.f32.mrf.mxu0  ;;  %v3505_v31 = vpop.f32.mrf.mxu1  ;;  %4427 = vmatpush1.bf16.msra.mxu0 %v7176_v9  ;;  %v11696_v9 = vld [vmem:[#allocation23_spill] sm:$0xff]  ;;  %v1284_v1 = vadd.f32 %v8982_v24, %v8672_v62  ;;  %v11699_v38 = vld [vmem:[#allocation24_spill] sm:$0xff] }
 0x23b   :  { %v9209_v48 = vadd.f32 %v3505_v31, %v3313_v58  ;;  %11695 = vst [vmem:[#allocation87_spill] sm:$0xff] %v9211_v52  ;;  %4428 = vmatprep.subr.bf16.mxu0 %v7181_v25  ;;  %v7185_v31 = vld [vmem:[#allocation4 + $0x448] ss:$16 sps:$4 sm:$0xff]   ;;  %v7190_v24 = vld [vmem:[#allocation4 + $0x42c] ss:$16 sps:$4 sm:$0xff]  }
 0x23c   :  { %v9215_v15 = vpop.f32.mrf.mxu0  ;;  %v3509_v14 = vpop.f32.mrf.mxu1  ;;  %3974 = vmatmul.mubr.bf16.gmra.mxu1 %v9199_v51  ;;  %4087 = vmatmul.mubr.bf16.gmra.mxu0 %v11696_v9  ;;  %v11700_v9 = vld [vmem:[#allocation56_spill] sm:$0xff] }
 0x23d   :  { %11694 = vst [vmem:[#allocation53_spill] sm:$0xff] %v9209_v48  ;;  %v9223_v60 = vadd.f32 %v3509_v14, %v3317_v2  ;;  %3983 = vmatprep.mubr.bf16.mxu1 %v9211_v52  ;;  %4096 = vmatprep.mubr.bf16.mxu0 %v11699_v38  ;;  %v3321_v51 = vadd.f32 %v11700_v9, %v9109_v47  ;;  %v1527_v48 = vmax.f32 %v1288_v4, 0.0  ;;  %v1502_v2 = vmax.f32 %v1272_v40, 0.0 }
 0x23e   :  { %v9227_v25 = vpop.f32.mrf.mxu0  ;;  %v3511_v58 = vpop.f32.mrf.mxu1  ;;  %4429 = vmatpush1.bf16.msra.mxu0 %v7179_v21  ;;  %v1519_v38 = vmax.f32 %v1284_v1, 0.0  ;;  %v1286_v9 = vadd.f32 %v8992_v7, %v8720_v39  ;;  %v3327_v40 = vadd.f32 %v8930_v46, %v9109_v47  ;;  %v1282_v7 = vadd.f32 %v8972_v63, %v8720_v39  ;;  %v11705_v46 = vld [vmem:[#allocation90_spill] sm:$0xff] }
 0x23f   :  { %11698 = vst [vmem:[#allocation115_spill] sm:$0xff] %v9223_v60  ;;  %v9231_v22 = vadd.f32 %v3511_v58, %v3319_v5  ;;  %4430 = vmatprep.subr.bf16.mxu0 %v7187_v33  ;;  %v9239_v21 = vpack.c.bf16 %v1510_v32, %v1502_v2  ;;  %v7188_v33 = vld [vmem:[#allocation4 + $0x428] ss:$16 sps:$4 sm:$0xff]   ;;  %v1298_v58 = vadd.f32 %v9046_v55, %v8672_v62 }
 0x240   :  { %v9233_v14 = vpop.f32.mrf.mxu0  ;;  %v3513_v52 = vpop.f32.mrf.mxu1  ;;  %v3329_v2 = vadd.f32 %v11705_v46, %v9117_v8  ;;  %v1294_v55 = vadd.f32 %v9026_v20, %v8672_v62  ;;  %v1526_v63 = vmax.f32 %v1286_v9, 0.0  ;;  %v7199_v20 = vld [vmem:[#allocation4 + $0x5ec] ss:$16 sps:$4 sm:$0xff]   ;;  %v3333_v9 = vadd.f32 %v8964_v54, %v9117_v8 }
 0x241   :  { %v9237_v60 = vadd.f32 %v3513_v52, %v3321_v51  ;;  %11701 = vst [vmem:[#allocation23_spill] sm:$0xff] %v9239_v21  ;;  %v9251_v51 = vpack.c.bf16 %v1527_v48, %v1519_v38  ;;  %v7196_v52 = vld [vmem:[#allocation4 + $0x40c] ss:$16 sps:$4 sm:$0xff]  }
 0x242   :  { %v9243_v4 = vpop.f32.mrf.mxu0  ;;  %v3515_v5 = vpop.f32.mrf.mxu1  ;;  %4431 = vmatpush1.bf16.msra.mxu0 %v7185_v31  ;;  %v11704_v31 = vld [vmem:[#allocation25_spill] sm:$0xff] }
 0x243   :  { %v9249_v41 = vadd.f32 %v3515_v5, %v3323_v11  ;;  %11703 = vst [vmem:[#allocation24_spill] sm:$0xff] %v9251_v51  ;;  %4432 = vmatprep.subr.bf16.mxu0 %v7190_v24  ;;  %v11707_v24 = vld [vmem:[#allocation26_spill] sm:$0xff] }
 0x244   :  { %v9255_v1 = vpop.f32.mrf.mxu0  ;;  %v3519_v32 = vpop.f32.mrf.mxu1  ;;  %3984 = vmatmul.mubr.bf16.gmra.mxu1 %v9239_v21  ;;  %4097 = vmatmul.mubr.bf16.gmra.mxu0 %v11704_v31  ;;  %v7194_v5 = vld [vmem:[#allocation4 + $0x408] ss:$16 sps:$4 sm:$0xff]   ;;  %v11708_v31 = vld [vmem:[#allocation119_spill] sm:$0xff] }
 0x245   :  { %11702 = vst [vmem:[#allocation91_spill] sm:$0xff] %v9249_v41  ;;  %v9263_v48 = vadd.f32 %v3519_v32, %v3327_v40  ;;  %3993 = vmatprep.mubr.bf16.mxu1 %v9251_v51  ;;  %4106 = vmatprep.mubr.bf16.mxu0 %v11707_v24  ;;  %v3331_v21 = vadd.f32 %v11708_v31, %v9109_v47  ;;  %v1543_v41 = vmax.f32 %v1298_v58, 0.0  ;;  %v1518_v40 = vmax.f32 %v1282_v7, 0.0 }
 0x246   :  { %v9267_v11 = vpop.f32.mrf.mxu0  ;;  %v3521_v38 = vpop.f32.mrf.mxu1  ;;  %4433 = vmatpush1.bf16.msra.mxu0 %v7188_v33  ;;  %v1535_v24 = vmax.f32 %v1294_v55, 0.0  ;;  %v1296_v31 = vadd.f32 %v9036_v61, %v8720_v39  ;;  %v3337_v7 = vadd.f32 %v8974_v34, %v9109_v47  ;;  %v1292_v61 = vadd.f32 %v9016_v49, %v8720_v39 }
 0x247   :  { %11706 = vst [vmem:[#allocation56_spill] sm:$0xff] %v9263_v48  ;;  %v9271_v46 = vadd.f32 %v3521_v38, %v3329_v2  ;;  %4434 = vmatprep.subr.bf16.mxu0 %v7196_v52  ;;  %v9279_v33 = vpack.c.bf16 %v1526_v63, %v1518_v40  ;;  %v7197_v52 = vld [vmem:[#allocation4 + $0x5e8] ss:$16 sps:$4 sm:$0xff]   ;;  %v1308_v38 = vadd.f32 %v9080_v0, %v8672_v62 }
 0x248   :  { %v9273_v32 = vpop.f32.mrf.mxu0  ;;  %v3523_v51 = vpop.f32.mrf.mxu1  ;;  %v3339_v34 = vadd.f32 %v8984_v42, %v9117_v8  ;;  %v1304_v0 = vadd.f32 %v9066_v45, %v8672_v62  ;;  %v1542_v49 = vmax.f32 %v1296_v31, 0.0  ;;  %v7208_v45 = vld [vmem:[#allocation4 + $0x5ac] ss:$16 sps:$4 sm:$0xff]   ;;  %v3343_v31 = vadd.f32 %v9008_v36, %v9117_v8 }
 0x249   :  { %v9277_v48 = vadd.f32 %v3523_v51, %v3331_v21  ;;  %11709 = vst [vmem:[#allocation25_spill] sm:$0xff] %v9279_v33  ;;  %v9291_v21 = vpack.c.bf16 %v1543_v41, %v1535_v24  ;;  %v7205_v51 = vld [vmem:[#allocation4 + $0x5cc] ss:$16 sps:$4 sm:$0xff]   ;;  %v7203_v24 = vld [vmem:[#allocation4 + $0x5c8] ss:$16 sps:$4 sm:$0xff]  }
 0x24a   :  { %v9283_v58 = vpop.f32.mrf.mxu0  ;;  %v3525_v2 = vpop.f32.mrf.mxu1  ;;  %4435 = vmatpush1.bf16.msra.mxu0 %v7194_v5  ;;  %v11711_v5 = vld [vmem:[#allocation27_spill] sm:$0xff] }
 0x24b   :  { %v9289_v54 = vadd.f32 %v3525_v2, %v3333_v9  ;;  %11710 = vst [vmem:[#allocation90_spill] sm:$0xff] %v9291_v21  ;;  %4436 = vmatprep.subr.bf16.mxu0 %v7199_v20  ;;  %v11712_v20 = vld [vmem:[#allocation28_spill] sm:$0xff]  ;;  %v3341_v2 = vadd.f32 %v8994_v50, %v9109_v47  ;;  %v1306_v50 = vadd.f32 %v9072_v23, %v8720_v39 }
 0x24c   :  { %v9295_v55 = vpop.f32.mrf.mxu0  ;;  %v3529_v63 = vpop.f32.mrf.mxu1  ;;  %3994 = vmatmul.mubr.bf16.gmra.mxu1 %v9279_v33  ;;  %4107 = vmatmul.mubr.bf16.gmra.mxu0 %v11711_v5  ;;  %v1559_v5 = vmax.f32 %v1308_v38, 0.0  ;;  %v1302_v23 = vadd.f32 %v9056_v10, %v8720_v39 }
 0x24d   :  { %v9303_v41 = vadd.f32 %v3529_v63, %v3337_v7  ;;  %4003 = vmatprep.mubr.bf16.mxu1 %v9291_v21  ;;  %4116 = vmatprep.mubr.bf16.mxu0 %v11712_v20  ;;  %v1534_v7 = vmax.f32 %v1292_v61, 0.0  ;;  %v1551_v20 = vmax.f32 %v1304_v0, 0.0  ;;  %v3347_v61 = vadd.f32 %v9018_v43, %v9109_v47  ;;  %v7214_v0 = vld [vmem:[#allocation4 + $0x58c] ss:$16 sps:$4 sm:$0xff]  }
 0x24e   :  { %v9307_v40 = vpop.f32.mrf.mxu0  ;;  %v3531_v9 = vpop.f32.mrf.mxu1  ;;  %4437 = vmatpush2.bf16.msra.mxu0 %v7197_v52  ;;  %v3349_v43 = vadd.f32 %v9028_v18, %v9117_v8  ;;  %v1558_v10 = vmax.f32 %v1306_v50, 0.0  ;;  %v3353_v50 = vadd.f32 %v9048_v28, %v9117_v8  ;;  %v7223_v28 = vld [vmem:[#allocation4 + $0x54c] ss:$16 sps:$4 sm:$0xff]  }
 0x24f   :  { %v9311_v42 = vadd.f32 %v3531_v9, %v3339_v34  ;;  %4438 = vmatprep.subr.bf16.mxu0 %v7205_v51  ;;  %v9319_v52 = vpack.c.bf16 %v1542_v49, %v1534_v7  ;;  %v7206_v51 = vld [vmem:[#allocation4 + $0x5a8] ss:$16 sps:$4 sm:$0xff]   ;;  %v1318_v9 = vadd.f32 %v9123_v19, %v8672_v62  ;;  %v1314_v19 = vadd.f32 %v9103_v30, %v8672_v62  ;;  %v7217_v62 = vld [vmem:[#allocation4 + $0x56c] ss:$16 sps:$4 sm:$0xff]  }
 0x250   :  { %v9313_v63 = vpop.f32.mrf.mxu0  ;;  %v3533_v21 = vpop.f32.mrf.mxu1  ;;  %v1550_v30 = vmax.f32 %v1302_v23, 0.0  ;;  %v3357_v23 = vadd.f32 %v9058_v26, %v9109_v47 }
 0x251   :  { %v9317_v33 = vadd.f32 %v3533_v21, %v3341_v2  ;;  %11713 = vst [vmem:[#allocation26_spill] sm:$0xff] %v9319_v52  ;;  %v9331_v21 = vpack.c.bf16 %v1559_v5, %v1551_v20  ;;  %v7212_v20 = vld [vmem:[#allocation4 + $0x588] ss:$16 sps:$4 sm:$0xff]  }
 0x252   :  { %v9323_v38 = vpop.f32.mrf.mxu0  ;;  %v3535_v34 = vpop.f32.mrf.mxu1  ;;  %4439 = vmatpush2.bf16.msra.mxu0 %v7203_v24  ;;  %v11715_v24 = vld [vmem:[#allocation29_spill] sm:$0xff] }
 0x253   :  { %v9329_v36 = vadd.f32 %v3535_v34, %v3343_v31  ;;  %11714 = vst [vmem:[#allocation119_spill] sm:$0xff] %v9331_v21  ;;  %4440 = vmatprep.subr.bf16.mxu0 %v7208_v45  ;;  %v11716_v45 = vld [vmem:[#allocation30_spill] sm:$0xff]  ;;  %v3351_v34 = vadd.f32 %v9038_v59, %v9109_v47  ;;  %v1316_v59 = vadd.f32 %v9111_v35, %v8720_v39 }
 0x254   :  { %v9335_v49 = vpop.f32.mrf.mxu0  ;;  %v3539_v2 = vpop.f32.mrf.mxu1  ;;  %4004 = vmatmul.mubr.bf16.gmra.mxu1 %v9319_v52  ;;  %4117 = vmatmul.mubr.bf16.gmra.mxu0 %v11715_v24  ;;  %v1575_v24 = vmax.f32 %v1318_v9, 0.0 }
 0x255   :  { %v9343_v5 = vadd.f32 %v3539_v2, %v3347_v61  ;;  %4013 = vmatprep.mubr.bf16.mxu1 %v9331_v21  ;;  %4126 = vmatprep.mubr.bf16.mxu0 %v11716_v45  ;;  %v1567_v45 = vmax.f32 %v1314_v19, 0.0  ;;  %v1312_v19 = vadd.f32 %v9093_v16, %v8720_v39  ;;  %v7221_v16 = vld [vmem:[#allocation4 + $0x548] ss:$16 sps:$4 sm:$0xff]  }
 0x256   :  { %v9347_v7 = vpop.f32.mrf.mxu0  ;;  %v3541_v31 = vpop.f32.mrf.mxu1  ;;  %4441 = vmatpush2.bf16.msra.mxu0 %v7206_v51  ;;  %v9359_v51 = vpack.c.bf16 %v1558_v10, %v1550_v30 }
 0x257   :  { %v9351_v18 = vadd.f32 %v3541_v31, %v3349_v43  ;;  %4442 = vmatprep.subr.bf16.mxu0 %v7214_v0  ;;  %v7215_v0 = vld [vmem:[#allocation4 + $0x568] ss:$16 sps:$4 sm:$0xff]   ;;  %v9369_v52 = vpack.c.bf16 %v1575_v24, %v1567_v45  ;;  %v7226_v45 = vld [vmem:[#allocation4 + $0x52c] ss:$16 sps:$4 sm:$0xff]  }
 0x258   :  { %v9353_v61 = vpop.f32.mrf.mxu0  ;;  %v3543_v2 = vpop.f32.mrf.mxu1  ;;  %11717 = vst [vmem:[#allocation27_spill] sm:$0xff] %v9359_v51  ;;  %v11720_v24 = vld [vmem:[#allocation32_spill] sm:$0xff] }
 0x259   :  { %v9357_v21 = vadd.f32 %v3543_v2, %v3351_v34  ;;  %11718 = vst [vmem:[#allocation28_spill] sm:$0xff] %v9369_v52  ;;  %v11719_v34 = vld [vmem:[#allocation31_spill] sm:$0xff]  ;;  %v3361_v2 = vadd.f32 %v9074_v37, %v9109_v47  ;;  %v7224_v37 = vld [vmem:[#allocation4 + $0x528] ss:$16 sps:$4 sm:$0xff]  }
 0x25a   :  { %v9363_v9 = vpop.f32.mrf.mxu0  ;;  %v3545_v43 = vpop.f32.mrf.mxu1  ;;  %4443 = vmatpush2.bf16.msra.mxu0 %v7212_v20  ;;  %v3359_v20 = vadd.f32 %v9068_v17, %v9117_v8  ;;  %v1566_v17 = vmax.f32 %v1312_v19, 0.0  ;;  %v7232_v19 = vld [vmem:[#allocation4 + $0x50c] ss:$16 sps:$4 sm:$0xff]  }
 0x25b   :  { %v9367_v31 = vadd.f32 %v3545_v43, %v3353_v50  ;;  %4444 = vmatprep.subr.bf16.mxu0 %v7217_v62  ;;  %v1574_v62 = vmax.f32 %v1316_v59, 0.0 }
 0x25c   :  { %v9373_v10 = vpop.f32.mrf.mxu0  ;;  %v3549_v35 = vpop.f32.mrf.mxu1  ;;  %4014 = vmatmul.mubr.bf16.gmra.mxu1 %v9359_v51  ;;  %4127 = vmatmul.mubr.bf16.gmra.mxu0 %v11719_v34 }
 0x25d   :  { %v9379_v26 = vadd.f32 %v3549_v35, %v3357_v23  ;;  %4023 = vmatprep.mubr.bf16.mxu1 %v9369_v52  ;;  %4136 = vmatprep.mubr.bf16.mxu0 %v11720_v24  ;;  %v11722_v35 = vld [vmem:[#allocation131_spill] sm:$0xff]  ;;  %v9395_v24 = vpack.c.bf16 %v1574_v62, %v1566_v17  ;;  %v11726_v62 = vld [vmem:[#allocation14_spill] sm:$0xff] }
 0x25e   :  { %v9383_v30 = vpop.f32.mrf.mxu0  ;;  %v3551_v39 = vpop.f32.mrf.mxu1  ;;  %4445 = vmatpush2.bf16.msra.mxu0 %v7215_v0  ;;  %v3363_v34 = vadd.f32 %v11722_v35, %v9117_v8  ;;  %v3369_v17 = vadd.f32 %v11726_v62, %v9117_v8  ;;  %v11729_v35 = vld [vmem:[#allocation35_spill] sm:$0xff] }
 0x25f   :  { %v9387_v50 = vadd.f32 %v3551_v39, %v3359_v20  ;;  %4446 = vmatprep.subr.bf16.mxu0 %v7223_v28  ;;  %11723 = vst [vmem:[#allocation30_spill] sm:$0xff] %v9395_v24  ;;  %v11724_v20 = vld [vmem:[#allocation133_spill] sm:$0xff] }
 0x260   :  { %v9389_v43 = vpop.f32.mrf.mxu0  ;;  %v3553_v23 = vpop.f32.mrf.mxu1  ;;  %v3367_v28 = vadd.f32 %v11724_v20, %v9109_v47  ;;  %v3371_v20 = vadd.f32 %v9113_v12, %v9109_v47 }
 0x261   :  { %11721 = vst [vmem:[#allocation29_spill] sm:$0xff] %v9387_v50  ;;  %v9393_v59 = vadd.f32 %v3553_v23, %v3361_v2  ;;  %v11725_v2 = vld [vmem:[#allocation33_spill] sm:$0xff] }
 0x262   :  { %v9397_v0 = vpop.f32.mrf.mxu0  ;;  %v3555_v52 = vpop.f32.mrf.mxu1  ;;  %4447 = vmatpush2.bf16.msra.mxu0 %v7221_v16  ;;  %v11728_v16 = vld [vmem:[#allocation34_spill] sm:$0xff] }
 0x263   :  { %v9401_v39 = vadd.f32 %v3555_v52, %v3363_v34  ;;  %4448 = vmatprep.subr.bf16.mxu0 %v7226_v45  ;;  %v7230_v34 = vld [vmem:[#allocation4 + $0x508] ss:$16 sps:$4 sm:$0xff]  }
 0x264   :  { %v9403_v51 = vpop.f32.mrf.mxu0  ;;  %v3559_v50 = vpop.f32.mrf.mxu1  ;;  %4024 = vmatmul.mubr.bf16.gmra.mxu1 %v9395_v24  ;;  %4137 = vmatmul.mubr.bf16.gmra.mxu0 %v11725_v2 }
 0x265   :  { %v9409_v23 = vadd.f32 %v3559_v50, %v3367_v28  ;;  %4146 = vmatprep.mubr.bf16.mxu0 %v11728_v16  ;;  %4259 = vmatprep.mubr.bf16.mxu1 %v11729_v35  ;;  %v3373_v50 = vadd.f32 %v9125_v44, %v9117_v8  ;;  %v3379_v44 = vadd.f32 %v9147_v3, %v9117_v8 }
 0x266   :  { %v9413_v52 = vpop.f32.mrf.mxu0  ;;  %v3561_v45 = vpop.f32.mrf.mxu1  ;;  %4449 = vmatpush2.bf16.msra.mxu0 %v7224_v37  ;;  %v11734_v37 = vld [vmem:[#allocation136_spill] sm:$0xff] }
 0x267   :  { %11727 = vst [vmem:[#allocation31_spill] sm:$0xff] %v9409_v23  ;;  %11730 = vst [vmem:[#allocation32_spill] sm:$0xff] %v9413_v52  ;;  %v9417_v24 = vadd.f32 %v3561_v45, %v3369_v17  ;;  %4450 = vmatprep.subr.bf16.mxu0 %v7232_v19  ;;  %v7164_v23 = vld [vmem:[#allocation4 + $0x6e8] ss:$16 sps:$4 sm:$0xff]   ;;  %v3377_v52 = vadd.f32 %v11734_v37, %v9109_v47  ;;  %v7175_v17 = vld [vmem:[#allocation4 + $0x6cc] ss:$16 sps:$4 sm:$0xff]  }
 0x268   :  { %v9419_v2 = vpop.f32.mrf.mxu0  ;;  %v3563_v62 = vpop.f32.mrf.mxu1  ;;  %v11742_v37 = vld [vmem:[#allocation39_spill] sm:$0xff] }
 0x269   :  { %11731 = vst [vmem:[#allocation131_spill] sm:$0xff] %v9417_v24  ;;  %11732 = vst [vmem:[#allocation133_spill] sm:$0xff] %v9419_v2  ;;  %v9423_v28 = vadd.f32 %v3563_v62, %v3371_v20  ;;  %v11736_v24 = vld [vmem:[#allocation36_spill] sm:$0xff]  ;;  %v11737_v2 = vld [vmem:[#allocation37_spill] sm:$0xff] }
 0x26a   :  { %v9425_v16 = vpop.f32.mrf.mxu0  ;;  %v3565_v35 = vpop.f32.mrf.mxu1  ;;  %4451 = vmatpush2.bf16.msra.mxu0 %v7230_v34  ;;  %v11739_v62 = vld [vmem:[#allocation17_spill] sm:$0xff]  ;;  %v11741_v34 = vld [vmem:[#allocation38_spill] sm:$0xff] }
 0x26b   :  { %11733 = vst [vmem:[#allocation33_spill] sm:$0xff] %v9423_v28  ;;  %v9429_v12 = vadd.f32 %v3565_v35, %v3373_v50 }
 0x26c   :  { %v3569_v19 = vpop.f32.mrf.mxu1  ;;  %v3682_v45 = vpop.f32.mrf.mxu0  ;;  %4147 = vmatmul.mubr.bf16.gmra.mxu0 %v11736_v24  ;;  %4260 = vmatmul.mubr.bf16.vlgmr.msra.gmra.mxu1 %v11737_v2  ;;  %v3381_v24 = vadd.f32 %v9153_v29, %v9109_v47  ;;  %v7182_v29 = vld [vmem:[#allocation4 + $0x6a8] ss:$16 sps:$4 sm:$0xff]  }
 0x26d   :  { %11735 = vst [vmem:[#allocation14_spill] sm:$0xff] %v9429_v12  ;;  %v9435_v20 = vadd.f32 %v3569_v19, %v3377_v52  ;;  %v9438_v28 = vadd.f32 %v3682_v45, %v11739_v62  ;;  %4156 = vmatprep.mubr.bf16.mxu0 %v11741_v34  ;;  %4269 = vmatprep.mubr.bf16.mxu1 %v11742_v37  ;;  %v7173_v12 = vld [vmem:[#allocation4 + $0x6c8] ss:$16 sps:$4 sm:$0xff]   ;;  %v7184_v52 = vld [vmem:[#allocation4 + $0x6ac] ss:$16 sps:$4 sm:$0xff]  }
 0x26e   :  { %4614 = vmatpush1.bf16.msra.mxu1 %v7164_v23  ;;  %v3571_v50 = vpop.f32.mrf.mxu1  ;;  %v3684_v35 = vpop.f32.mrf.mxu0  ;;  %v3383_v62 = vadd.f32 %v9163_v13, %v9117_v8  ;;  %v11744_v23 = vld [vmem:[#allocation18_spill] sm:$0xff] }
 0x26f   :  { %11738 = vst [vmem:[#allocation34_spill] sm:$0xff] %v9435_v20  ;;  %11740 = vst [vmem:[#allocation35_spill] sm:$0xff] %v9438_v28  ;;  %v9444_v2 = vadd.f32 %v3571_v50, %v3379_v44  ;;  %v9447_v3 = vadd.f32 %v3684_v35, %v9151_v53  ;;  %4615 = vmatprep.subr.bf16.mxu1 %v7175_v17  ;;  %v3387_v53 = vadd.f32 %v9175_v27, %v9109_v47  ;;  %v11746_v17 = vld [vmem:[#allocation138_spill] sm:$0xff] }
 0x270   :  { %v3573_v19 = vpop.f32.mrf.mxu1  ;;  %v3686_v45 = vpop.f32.mrf.mxu0  ;;  %v7193_v35 = vld [vmem:[#allocation4 + $0x68c] ss:$16 sps:$4 sm:$0xff]  }
 0x271   :  { %v9451_v34 = vadd.f32 %v3573_v19, %v3381_v24  ;;  %v9454_v37 = vadd.f32 %v3686_v45, %v11744_v23  ;;  %v11748_v19 = vld [vmem:[#allocation40_spill] sm:$0xff]  ;;  %v11749_v45 = vld [vmem:[#allocation42_spill] sm:$0xff]  ;;  %v11750_v23 = vld [vmem:[#allocation21_spill] sm:$0xff] }
 0x272   :  { %v3575_v28 = vpop.f32.mrf.mxu1  ;;  %v3688_v20 = vpop.f32.mrf.mxu0  ;;  %4616 = vmatpush1.bf16.msra.mxu1 %v7173_v12  ;;  %v3389_v12 = vadd.f32 %v11750_v23, %v9117_v8 }
 0x273   :  { %11743 = vst [vmem:[#allocation136_spill] sm:$0xff] %v9451_v34  ;;  %11745 = vst [vmem:[#allocation36_spill] sm:$0xff] %v9454_v37  ;;  %v9458_v44 = vadd.f32 %v3575_v28, %v3383_v62  ;;  %v9461_v50 = vadd.f32 %v3688_v20, %v11746_v17  ;;  %4617 = vmatprep.subr.bf16.mxu1 %v7184_v52  ;;  %v11751_v34 = vld [vmem:[#allocation86_spill] sm:$0xff]  ;;  %v11753_v28 = vld [vmem:[#allocation41_spill] sm:$0xff] }
 0x274   :  { %v3579_v13 = vpop.f32.mrf.mxu1  ;;  %v3692_v24 = vpop.f32.mrf.mxu0  ;;  %4157 = vmatmul.mubr.bf16.gmra.mxu0 %v11748_v19  ;;  %4270 = vmatmul.mubr.bf16.gmra.mxu1 %v11749_v45  ;;  %v11754_v20 = vld [vmem:[#allocation43_spill] sm:$0xff]  ;;  %v7191_v17 = vld [vmem:[#allocation4 + $0x688] ss:$16 sps:$4 sm:$0xff]   ;;  %v3391_v19 = vadd.f32 %v9193_v56, %v9109_v47 }
 0x275   :  { %11747 = vst [vmem:[#allocation37_spill] sm:$0xff] %v9461_v50  ;;  %v9467_v37 = vadd.f32 %v3579_v13, %v3387_v53  ;;  %v9470_v27 = vadd.f32 %v3692_v24, %v11751_v34  ;;  %4166 = vmatprep.mubr.bf16.mxu0 %v11753_v28  ;;  %4279 = vmatprep.mubr.bf16.mxu1 %v11754_v20  ;;  %v11755_v50 = vld [vmem:[#allocation111_spill] sm:$0xff]  ;;  %v7202_v53 = vld [vmem:[#allocation4 + $0x66c] ss:$16 sps:$4 sm:$0xff]   ;;  %v7200_v56 = vld [vmem:[#allocation4 + $0x668] ss:$16 sps:$4 sm:$0xff]  }
 0x276   :  { %v3581_v52 = vpop.f32.mrf.mxu1  ;;  %v3694_v62 = vpop.f32.mrf.mxu0  ;;  %4618 = vmatpush1.bf16.msra.mxu1 %v7182_v29  ;;  %v3393_v24 = vadd.f32 %v9203_v57, %v9117_v8 }
 0x277   :  { %11752 = vst [vmem:[#allocation17_spill] sm:$0xff] %v9470_v27  ;;  %v9476_v45 = vadd.f32 %v3581_v52, %v3389_v12  ;;  %v9479_v23 = vadd.f32 %v3694_v62, %v11755_v50  ;;  %4619 = vmatprep.subr.bf16.mxu1 %v7193_v35  ;;  %v3397_v50 = vadd.f32 %v9215_v15, %v9109_v47  ;;  %v11757_v35 = vld [vmem:[#allocation53_spill] sm:$0xff]  ;;  %v7211_v62 = vld [vmem:[#allocation4 + $0x64c] ss:$16 sps:$4 sm:$0xff]  }
 0x278   :  { %v3583_v34 = vpop.f32.mrf.mxu1  ;;  %v3696_v13 = vpop.f32.mrf.mxu0 }
 0x279   :  { %v9483_v28 = vadd.f32 %v3583_v34, %v3391_v19  ;;  %v9486_v29 = vadd.f32 %v3696_v13, %v9197_v6  ;;  %v11758_v34 = vld [vmem:[#allocation44_spill] sm:$0xff]  ;;  %v11759_v6 = vld [vmem:[#allocation46_spill] sm:$0xff] }
 0x27a   :  { %v3585_v20 = vpop.f32.mrf.mxu1  ;;  %v3698_v27 = vpop.f32.mrf.mxu0  ;;  %4620 = vmatpush1.bf16.msra.mxu1 %v7191_v17  ;;  %v3399_v17 = vadd.f32 %v9227_v25, %v9117_v8 }
 0x27b   :  { %11756 = vst [vmem:[#allocation38_spill] sm:$0xff] %v9486_v29  ;;  %v9490_v12 = vadd.f32 %v3585_v20, %v3393_v24  ;;  %v9493_v52 = vadd.f32 %v3698_v27, %v11757_v35  ;;  %4621 = vmatprep.subr.bf16.mxu1 %v7202_v53  ;;  %v11760_v29 = vld [vmem:[#allocation115_spill] sm:$0xff]  ;;  %v11762_v24 = vld [vmem:[#allocation45_spill] sm:$0xff]  ;;  %v7209_v35 = vld [vmem:[#allocation4 + $0x648] ss:$16 sps:$4 sm:$0xff]  }
 0x27c   :  { %v3589_v57 = vpop.f32.mrf.mxu1  ;;  %v3702_v19 = vpop.f32.mrf.mxu0  ;;  %4167 = vmatmul.mubr.bf16.gmra.mxu0 %v11758_v34  ;;  %4280 = vmatmul.mubr.bf16.gmra.mxu1 %v11759_v6  ;;  %v11763_v27 = vld [vmem:[#allocation47_spill] sm:$0xff]  ;;  %v3401_v34 = vadd.f32 %v9233_v14, %v9109_v47  ;;  %v7218_v14 = vld [vmem:[#allocation4 + $0x628] ss:$16 sps:$4 sm:$0xff]  }
 0x27d   :  { %v9499_v13 = vadd.f32 %v3589_v57, %v3397_v50  ;;  %v9502_v15 = vadd.f32 %v3702_v19, %v11760_v29  ;;  %4176 = vmatprep.mubr.bf16.mxu0 %v11762_v24  ;;  %4289 = vmatprep.mubr.bf16.mxu1 %v11763_v27  ;;  %v7220_v50 = vld [vmem:[#allocation4 + $0x62c] ss:$16 sps:$4 sm:$0xff]   ;;  %v3403_v19 = vadd.f32 %v9243_v4, %v9117_v8 }
 0x27e   :  { %v3591_v53 = vpop.f32.mrf.mxu1  ;;  %v3704_v20 = vpop.f32.mrf.mxu0  ;;  %4622 = vmatpush1.bf16.msra.mxu1 %v7200_v56 }
 0x27f   :  { %11761 = vst [vmem:[#allocation39_spill] sm:$0xff] %v9502_v15  ;;  %v9508_v6 = vadd.f32 %v3591_v53, %v3399_v17  ;;  %v9511_v25 = vadd.f32 %v3704_v20, %v9231_v22  ;;  %4623 = vmatprep.subr.bf16.mxu1 %v7211_v62  ;;  %v3407_v22 = vadd.f32 %v9255_v1, %v9109_v47  ;;  %v11765_v62 = vld [vmem:[#allocation91_spill] sm:$0xff]  ;;  %v7229_v20 = vld [vmem:[#allocation4 + $0x60c] ss:$16 sps:$4 sm:$0xff]  }
 0x280   :  { %v3593_v29 = vpop.f32.mrf.mxu1  ;;  %v3706_v57 = vpop.f32.mrf.mxu0 }
 0x281   :  { %v9515_v24 = vadd.f32 %v3593_v29, %v3401_v34  ;;  %v9518_v56 = vadd.f32 %v3706_v57, %v9237_v60  ;;  %v11766_v29 = vld [vmem:[#allocation48_spill] sm:$0xff]  ;;  %v11767_v60 = vld [vmem:[#allocation49_spill] sm:$0xff] }
 0x282   :  { %v3595_v27 = vpop.f32.mrf.mxu1  ;;  %v3708_v15 = vpop.f32.mrf.mxu0  ;;  %4624 = vmatpush1.bf16.msra.mxu1 %v7209_v35  ;;  %v3409_v35 = vadd.f32 %v9267_v11, %v9117_v8 }
 0x283   :  { %11764 = vst [vmem:[#allocation18_spill] sm:$0xff] %v9518_v56  ;;  %v9522_v17 = vadd.f32 %v3595_v27, %v3403_v19  ;;  %v9525_v53 = vadd.f32 %v3708_v15, %v11765_v62  ;;  %4625 = vmatprep.subr.bf16.mxu1 %v7220_v50  ;;  %v11768_v56 = vld [vmem:[#allocation56_spill] sm:$0xff]  ;;  %v11770_v19 = vld [vmem:[#allocation11_spill] sm:$0xff]  ;;  %v11771_v15 = vld [vmem:[#allocation50_spill] sm:$0xff] }
 0x284   :  { %v3599_v4 = vpop.f32.mrf.mxu1  ;;  %v3712_v34 = vpop.f32.mrf.mxu0  ;;  %4177 = vmatmul.mubr.bf16.gmra.mxu0 %v11766_v29  ;;  %4290 = vmatmul.mubr.bf16.gmra.mxu1 %v11767_v60  ;;  %v7227_v62 = vld [vmem:[#allocation4 + $0x608] ss:$16 sps:$4 sm:$0xff]   ;;  %v3411_v29 = vadd.f32 %v9273_v32, %v9109_v47 }
 0x285   :  { %v9531_v57 = vadd.f32 %v3599_v4, %v3407_v22  ;;  %v9534_v1 = vadd.f32 %v3712_v34, %v11768_v56  ;;  %4186 = vmatprep.mubr.bf16.mxu0 %v11770_v19  ;;  %4299 = vmatprep.mubr.bf16.mxu1 %v11771_v15  ;;  %v7235_v22 = vld [vmem:[#allocation4 + $0x7ec] ss:$16 sps:$4 sm:$0xff]   ;;  %v3413_v34 = vadd.f32 %v9283_v58, %v9117_v8  ;;  %v7233_v32 = vld [vmem:[#allocation4 + $0x7e8] ss:$16 sps:$4 sm:$0xff]  }
 0x286   :  { %v3601_v50 = vpop.f32.mrf.mxu1  ;;  %v3714_v27 = vpop.f32.mrf.mxu0  ;;  %4626 = vmatpush1.bf16.msra.mxu1 %v7218_v14  ;;  %v7257_v58 = vld [vmem:[%s11353_s5 + $0x78] sm:$0xff]  }
 0x287   :  { %11769 = vst [vmem:[#allocation138_spill] sm:$0xff] %v9534_v1  ;;  %v9540_v60 = vadd.f32 %v3601_v50, %v3409_v35  ;;  %v9543_v11 = vadd.f32 %v3714_v27, %v9271_v46  ;;  %4627 = vmatprep.subr.bf16.mxu1 %v7229_v20  ;;  %v3417_v46 = vadd.f32 %v9295_v55, %v9109_v47  ;;  %v7238_v50 = vld [vmem:[#allocation4 + $0x7cc] ss:$16 sps:$4 sm:$0xff]  }
 0x288   :  { %v3603_v56 = vpop.f32.mrf.mxu1  ;;  %v3716_v4 = vpop.f32.mrf.mxu0  ;;  %v3419_v55 = vadd.f32 %v9307_v40, %v9117_v8  ;;  %6551 = vmatprep.subr.bf16.mxu0 %v7257_v58 }
 0x289   :  { %v9547_v19 = vadd.f32 %v3603_v56, %v3411_v29  ;;  %v9550_v14 = vadd.f32 %v3716_v4, %v9277_v48  ;;  %v11772_v29 = vld [vmem:[#allocation10_spill] sm:$0xff] }
 0x28a   :  { %v3605_v15 = vpop.f32.mrf.mxu1  ;;  %v3718_v1 = vpop.f32.mrf.mxu0  ;;  %4628 = vmatpush1.bf16.msra.mxu1 %v7227_v62  ;;  %v11773_v62 = vld [vmem:[#allocation51_spill] sm:$0xff] }
 0x28b   :  { %v9554_v35 = vadd.f32 %v3605_v15, %v3413_v34  ;;  %v9557_v20 = vadd.f32 %v3718_v1, %v9289_v54  ;;  %4629 = vmatprep.subr.bf16.mxu1 %v7235_v22  ;;  %v11774_v1 = vld [vmem:[#allocation13_spill] sm:$0xff]  ;;  %v11775_v22 = vld [vmem:[#allocation52_spill] sm:$0xff] }
 0x28c   :  { %v3609_v48 = vpop.f32.mrf.mxu1  ;;  %v3722_v27 = vpop.f32.mrf.mxu0  ;;  %4187 = vmatmul.mubr.bf16.gmra.mxu0 %v11772_v29  ;;  %4300 = vmatmul.mubr.bf16.gmra.mxu1 %v11773_v62  ;;  %v7236_v15 = vld [vmem:[#allocation4 + $0x7c8] ss:$16 sps:$4 sm:$0xff]   ;;  %v3421_v29 = vadd.f32 %v9313_v63, %v9109_v47 }
 0x28d   :  { %v9566_v56 = vadd.f32 %v3609_v48, %v3417_v46  ;;  %v9569_v54 = vadd.f32 %v3722_v27, %v9303_v41  ;;  %4196 = vmatprep.mubr.bf16.mxu0 %v11774_v1  ;;  %4309 = vmatprep.mubr.bf16.mxu1 %v11775_v22  ;;  %v7241_v41 = vld [vmem:[#allocation4 + $0x7ac] ss:$16 sps:$4 sm:$0xff]   ;;  %v3423_v27 = vadd.f32 %v9323_v38, %v9117_v8  ;;  %v7239_v63 = vld [vmem:[#allocation4 + $0x7a8] ss:$16 sps:$4 sm:$0xff]  }
 0x28e   :  { %v3611_v4 = vpop.f32.mrf.mxu1  ;;  %v3724_v34 = vpop.f32.mrf.mxu0  ;;  %4630 = vmatpush2.bf16.msra.mxu1 %v7233_v32 }
 0x28f   :  { %v9575_v62 = vadd.f32 %v3611_v4, %v3419_v55  ;;  %v9578_v40 = vadd.f32 %v3724_v34, %v9311_v42  ;;  %4631 = vmatprep.subr.bf16.mxu1 %v7238_v50  ;;  %v3427_v42 = vadd.f32 %v9335_v49, %v9109_v47  ;;  %v7244_v4 = vld [vmem:[#allocation4 + $0x78c] ss:$16 sps:$4 sm:$0xff]  }
 0x290   :  { %v3613_v46 = vpop.f32.mrf.mxu1  ;;  %v3726_v48 = vpop.f32.mrf.mxu0 }
 0x291   :  { %v9582_v1 = vadd.f32 %v3613_v46, %v3421_v29  ;;  %v9585_v32 = vadd.f32 %v3726_v48, %v9317_v33  ;;  %v11776_v29 = vld [vmem:[#allocation12_spill] sm:$0xff]  ;;  %v11777_v33 = vld [vmem:[#allocation54_spill] sm:$0xff] }
 0x292   :  { %v3615_v58 = vpop.f32.mrf.mxu1  ;;  %v3728_v22 = vpop.f32.mrf.mxu0  ;;  %4632 = vmatpush2.bf16.msra.mxu1 %v7236_v15  ;;  %v3429_v15 = vadd.f32 %v9347_v7, %v9117_v8  ;;  %v11778_v48 = vld [vmem:[#allocation16_spill] sm:$0xff] }
 0x293   :  { %v9589_v55 = vadd.f32 %v3615_v58, %v3423_v27  ;;  %v9592_v50 = vadd.f32 %v3728_v22, %v9329_v36  ;;  %4633 = vmatprep.subr.bf16.mxu1 %v7241_v41  ;;  %v11779_v36 = vld [vmem:[#allocation55_spill] sm:$0xff]  ;;  %v7242_v58 = vld [vmem:[#allocation4 + $0x788] ss:$16 sps:$4 sm:$0xff]   ;;  %v3431_v22 = vadd.f32 %v9353_v61, %v9109_v47 }
 0x294   :  { %v3619_v38 = vpop.f32.mrf.mxu1  ;;  %v3732_v34 = vpop.f32.mrf.mxu0  ;;  %4197 = vmatmul.mubr.bf16.gmra.mxu0 %v11776_v29  ;;  %4310 = vmatmul.mubr.bf16.gmra.mxu1 %v11777_v33  ;;  %v7245_v61 = vld [vmem:[#allocation4 + $0x768] ss:$16 sps:$4 sm:$0xff]  }
 0x295   :  { %v9598_v46 = vadd.f32 %v3619_v38, %v3427_v42  ;;  %v9601_v49 = vadd.f32 %v3732_v34, %v9343_v5  ;;  %4206 = vmatprep.mubr.bf16.mxu0 %v11778_v48  ;;  %4319 = vmatprep.mubr.bf16.mxu1 %v11779_v36  ;;  %v7247_v42 = vld [vmem:[#allocation4 + $0x76c] ss:$16 sps:$4 sm:$0xff]   ;;  %v3433_v34 = vadd.f32 %v9363_v9, %v9117_v8 }
 0x296   :  { %v3621_v41 = vpop.f32.mrf.mxu1  ;;  %v3734_v27 = vpop.f32.mrf.mxu0  ;;  %4634 = vmatpush2.bf16.msra.mxu1 %v7239_v63 }
 0x297   :  { %v9607_v29 = vadd.f32 %v3621_v41, %v3429_v15  ;;  %v9610_v7 = vadd.f32 %v3734_v27, %v9351_v18  ;;  %4635 = vmatprep.subr.bf16.mxu1 %v7244_v4  ;;  %v3437_v18 = vadd.f32 %v9373_v10, %v9109_v47  ;;  %v7250_v41 = vld [vmem:[#allocation4 + $0x74c] ss:$16 sps:$4 sm:$0xff]  }
 0x298   :  { %v3623_v5 = vpop.f32.mrf.mxu1  ;;  %v3736_v38 = vpop.f32.mrf.mxu0 }
 0x299   :  { %v9614_v33 = vadd.f32 %v3623_v5, %v3431_v22  ;;  %v9617_v63 = vadd.f32 %v3736_v38, %v9357_v21  ;;  %v11780_v22 = vld [vmem:[#allocation15_spill] sm:$0xff]  ;;  %v11781_v21 = vld [vmem:[#allocation61_spill] sm:$0xff]  ;;  %v11783_v38 = vld [vmem:[#allocation20_spill] sm:$0xff] }
 0x29a   :  { %v3625_v48 = vpop.f32.mrf.mxu1  ;;  %v3738_v36 = vpop.f32.mrf.mxu0  ;;  %4636 = vmatpush2.bf16.msra.mxu1 %v7242_v58  ;;  %v3439_v58 = vadd.f32 %v9383_v30, %v9117_v8 }
 0x29b   :  { %v9621_v15 = vadd.f32 %v3625_v48, %v3433_v34  ;;  %v9624_v4 = vadd.f32 %v3738_v36, %v9367_v31  ;;  %4637 = vmatprep.subr.bf16.mxu1 %v7247_v42  ;;  %v11784_v31 = vld [vmem:[#allocation62_spill] sm:$0xff]  ;;  %v3441_v36 = vadd.f32 %v9389_v43, %v9109_v47 }
 0x29c   :  { %v3629_v9 = vpop.f32.mrf.mxu1  ;;  %v3742_v27 = vpop.f32.mrf.mxu0  ;;  %4207 = vmatmul.mubr.bf16.gmra.mxu0 %v11780_v22  ;;  %4320 = vmatmul.mubr.bf16.gmra.mxu1 %v11781_v21  ;;  %v7248_v48 = vld [vmem:[#allocation4 + $0x748] ss:$16 sps:$4 sm:$0xff]   ;;  %v11785_v21 = vld [vmem:[#allocation29_spill] sm:$0xff] }
 0x29d   :  { %v9630_v5 = vadd.f32 %v3629_v9, %v3437_v18  ;;  %v9633_v10 = vadd.f32 %v3742_v27, %v9379_v26  ;;  %4216 = vmatprep.mubr.bf16.mxu0 %v11783_v38  ;;  %4329 = vmatprep.mubr.bf16.mxu1 %v11784_v31  ;;  %v7253_v18 = vld [vmem:[#allocation4 + $0x72c] ss:$16 sps:$4 sm:$0xff]   ;;  %v3443_v27 = vadd.f32 %v9397_v0, %v9117_v8  ;;  %v7251_v43 = vld [vmem:[#allocation4 + $0x728] ss:$16 sps:$4 sm:$0xff]  }
 0x29e   :  { %v3631_v42 = vpop.f32.mrf.mxu1  ;;  %v3744_v34 = vpop.f32.mrf.mxu0  ;;  %4638 = vmatpush2.bf16.msra.mxu1 %v7245_v61 }
 0x29f   :  { %11782 = vst [vmem:[#allocation40_spill] sm:$0xff] %v9633_v10  ;;  %v9639_v22 = vadd.f32 %v3631_v42, %v3439_v58  ;;  %v9642_v30 = vadd.f32 %v3744_v34, %v11785_v21  ;;  %4639 = vmatprep.subr.bf16.mxu1 %v7250_v41  ;;  %v3447_v58 = vadd.f32 %v9403_v51, %v9109_v47  ;;  %v7256_v34 = vld [vmem:[#allocation4 + $0x70c] ss:$16 sps:$4 sm:$0xff]   ;;  %v11789_v21 = vld [vmem:[#allocation19_spill] sm:$0xff] }
 0x2a0   :  { %v3633_v26 = vpop.f32.mrf.mxu1  ;;  %v3746_v9 = vpop.f32.mrf.mxu0 }
 0x2a1   :  { %v9646_v38 = vadd.f32 %v3633_v26, %v3441_v36  ;;  %v9649_v61 = vadd.f32 %v3746_v9, %v9393_v59  ;;  %v11790_v59 = vld [vmem:[#allocation67_spill] sm:$0xff]  ;;  %v11791_v26 = vld [vmem:[#allocation32_spill] sm:$0xff] }
 0x2a2   :  { %v3635_v31 = vpop.f32.mrf.mxu1  ;;  %v3748_v10 = vpop.f32.mrf.mxu0  ;;  %4640 = vmatpush2.bf16.msra.mxu1 %v7248_v48  ;;  %v3449_v48 = vadd.f32 %v11791_v26, %v9117_v8 }
 0x2a3   :  { %11786 = vst [vmem:[#allocation42_spill] sm:$0xff] %v9649_v61  ;;  %v9653_v42 = vadd.f32 %v3635_v31, %v3443_v27  ;;  %v9656_v41 = vadd.f32 %v3748_v10, %v9401_v39  ;;  %4641 = vmatprep.subr.bf16.mxu1 %v7253_v18  ;;  %v11792_v61 = vld [vmem:[#allocation31_spill] sm:$0xff]  ;;  %v11794_v27 = vld [vmem:[#allocation68_spill] sm:$0xff]  ;;  %v11795_v39 = vld [vmem:[#allocation66_spill] sm:$0xff] }
 0x2a4   :  { %v3639_v0 = vpop.f32.mrf.mxu1  ;;  %v3752_v36 = vpop.f32.mrf.mxu0  ;;  %4217 = vmatmul.mubr.bf16.gmra.mxu0 %v11789_v21  ;;  %4330 = vmatmul.mubr.bf16.gmra.mxu1 %v11790_v59  ;;  %v7254_v31 = vld [vmem:[#allocation4 + $0x708] ss:$16 sps:$4 sm:$0xff]   ;;  %v11796_v21 = vld [vmem:[#allocation133_spill] sm:$0xff] }
 0x2a5   :  { %11787 = vst [vmem:[#allocation21_spill] sm:$0xff] %v9653_v42  ;;  %11788 = vst [vmem:[#allocation86_spill] sm:$0xff] %v9656_v41  ;;  %v9662_v9 = vadd.f32 %v3639_v0, %v3447_v58  ;;  %v9665_v51 = vadd.f32 %v3752_v36, %v11792_v61  ;;  %4339 = vmatprep.mubr.bf16.mxu1 %v11794_v27  ;;  %4452 = vmatprep.mubr.bf16.mxu0 %v11795_v39  ;;  %v11797_v42 = vld [vmem:[#allocation131_spill] sm:$0xff]  ;;  %v11798_v27 = vld [vmem:[#allocation33_spill] sm:$0xff] }
 0x2a6   :  { %v3641_v10 = vpop.f32.mrf.mxu1  ;;  %v3754_v18 = vpop.f32.mrf.mxu0  ;;  %4642 = vmatpush2.bf16.msra.mxu1 %v7251_v43  ;;  %v3451_v41 = vadd.f32 %v11796_v21, %v9109_v47  ;;  %v3453_v0 = vadd.f32 %v9425_v16, %v9117_v8  ;;  %v7258_v47 = vld [vmem:[%s11353_s5 + $0x38] sm:$0xff]   ;;  %v7259_v8 = vld [vmem:[%s11353_s5 + $0x70] sm:$0xff]  }
 0x2a7   :  { %11793 = vst [vmem:[#allocation41_spill] sm:$0xff] %v9665_v51  ;;  %v9671_v59 = vadd.f32 %v3641_v10, %v3449_v48  ;;  %v9674_v26 = vadd.f32 %v3754_v18, %v11797_v42  ;;  %4643 = vmatprep.subr.bf16.mxu1 %v7256_v34  ;;  %v11800_v34 = vld [vmem:[#allocation14_spill] sm:$0xff]  ;;  %v11802_v10 = vld [vmem:[#allocation72_spill] sm:$0xff] }
 0x2a8   :  { %v3643_v58 = vpop.f32.mrf.mxu1  ;;  %v3756_v61 = vpop.f32.mrf.mxu0  ;;  %v11803_v18 = vld [vmem:[#allocation70_spill] sm:$0xff] }
 0x2a9   :  { %v9678_v36 = vadd.f32 %v3643_v58, %v3451_v41  ;;  %v9681_v39 = vadd.f32 %v3756_v61, %v11798_v27  ;;  %v11806_v58 = vld [vmem:[#allocation35_spill] sm:$0xff] }
 0x2aa   :  { %v3645_v43 = vpop.f32.mrf.mxu1  ;;  %v3758_v51 = vpop.f32.mrf.mxu0  ;;  %4644 = vmatpush2.bf16.msra.mxu1 %v7254_v31  ;;  %v11804_v31 = vld [vmem:[#allocation34_spill] sm:$0xff]  ;;  %v11808_v27 = vld [vmem:[#allocation71_spill] sm:$0xff] }
 0x2ab   :  { %v9686_v42 = vadd.f32 %v3645_v43, %v3453_v0  ;;  %v9689_v48 = vadd.f32 %v3758_v51, %v11800_v34  ;;  %v11807_v0 = vld [vmem:[#allocation73_spill] sm:$0xff]  ;;  %v7260_v34 = vld [vmem:[%s11353_s5 + $0x30] sm:$0xff]  }
 0x2ac   :  { %v3762_v16 = vpop.f32.mrf.mxu0  ;;  %v3875_v41 = vpop.f32.mrf.mxu1  ;;  %4340 = vmatmul.mubr.bf16.gmra.mxu1 %v11802_v10  ;;  %4453 = vmatmul.mubr.bf16.vlgmr.msra.gmra.mxu0 %v11803_v18 }
 0x2ad   :  { %11799 = vst [vmem:[#allocation43_spill] sm:$0xff] %v9686_v42  ;;  %11801 = vst [vmem:[#allocation111_spill] sm:$0xff] %v9689_v48  ;;  %v9697_v21 = vadd.f32 %v3762_v16, %v11804_v31  ;;  %v3876_v61 = vadd.f32 %v3875_v41, %v11806_v58  ;;  %4349 = vmatprep.mubr.bf16.mxu1 %v11807_v0  ;;  %4462 = vmatprep.mubr.bf16.mxu0 %v11808_v27  ;;  %v7261_v16 = vld [vmem:[%s11353_s5 + $0x68] sm:$0xff]   ;;  %v11810_v58 = vld [vmem:[#allocation136_spill] sm:$0xff] }
 0x2ae   :  { %v3764_v51 = vpop.f32.mrf.mxu0  ;;  %v3877_v43 = vpop.f32.mrf.mxu1  ;;  %6552 = vmatpush3.bf16.msra.mxu0 %v7258_v47  ;;  %v11812_v47 = vld [vmem:[#allocation36_spill] sm:$0xff] }
 0x2af   :  { %11805 = vst [vmem:[#allocation53_spill] sm:$0xff] %v9697_v21  ;;  %v9706_v10 = vadd.f32 %v3764_v51, %v9444_v2  ;;  %v3878_v18 = vadd.f32 %v3877_v43, %v9447_v3  ;;  %6553 = vmatprep.subr.bf16.mxu0 %v7259_v8  ;;  %v7262_v2 = vld [vmem:[%s11353_s5 + $0x28] sm:$0xff]   ;;  %v4806_v3 = vmax.f32 %v3876_v61, 0.0  ;;  %v11813_v43 = vld [vmem:[#allocation37_spill] sm:$0xff] }
 0x2b0   :  { %v3766_v41 = vpop.f32.mrf.mxu0  ;;  %v3879_v31 = vpop.f32.mrf.mxu1 }
 0x2b1   :  { %11809 = vst [vmem:[#allocation44_spill] sm:$0xff] %v9706_v10  ;;  %v9713_v0 = vadd.f32 %v3766_v41, %v11810_v58  ;;  %v3880_v27 = vadd.f32 %v3879_v31, %v11812_v47  ;;  %v7263_v41 = vld [vmem:[%s11353_s5 + $0x60] sm:$0xff]   ;;  %v4807_v31 = vmax.f32 %v3878_v18, 0.0 }
 0x2b2   :  { %v3768_v21 = vpop.f32.mrf.mxu0  ;;  %v3881_v48 = vpop.f32.mrf.mxu1  ;;  %6554 = vmatpush3.bf16.msra.mxu0 %v7260_v34  ;;  %v11814_v34 = vld [vmem:[#allocation76_spill] sm:$0xff] }
 0x2b3   :  { %11811 = vst [vmem:[#allocation46_spill] sm:$0xff] %v9713_v0  ;;  %v4810_v8 = vmax.f32 %v3880_v27, 0.0  ;;  %v9720_v51 = vadd.f32 %v3768_v21, %v9458_v44  ;;  %v3882_v10 = vadd.f32 %v3881_v48, %v11813_v43  ;;  %6555 = vmatprep.subr.bf16.mxu0 %v7261_v16  ;;  %v11815_v0 = vld [vmem:[#allocation74_spill] sm:$0xff]  ;;  %v11817_v21 = vld [vmem:[#allocation17_spill] sm:$0xff]  ;;  %v11819_v27 = vld [vmem:[#allocation75_spill] sm:$0xff] }
 0x2b4   :  { %v3772_v58 = vpop.f32.mrf.mxu0  ;;  %v3885_v47 = vpop.f32.mrf.mxu1  ;;  %4350 = vmatmul.mubr.bf16.gmra.mxu1 %v11814_v34  ;;  %4463 = vmatmul.mubr.bf16.gmra.mxu0 %v11815_v0  ;;  %v11818_v16 = vld [vmem:[#allocation77_spill] sm:$0xff] }
 0x2b5   :  { %v9728_v42 = vpack.c.bf16 %v4810_v8, %v4806_v3  ;;  %v4811_v61 = vmax.f32 %v3882_v10, 0.0  ;;  %v9731_v44 = vadd.f32 %v3772_v58, %v9467_v37  ;;  %v3886_v48 = vadd.f32 %v3885_v47, %v11817_v21  ;;  %4359 = vmatprep.mubr.bf16.mxu1 %v11818_v16  ;;  %4472 = vmatprep.mubr.bf16.mxu0 %v11819_v27  ;;  %v7264_v34 = vld [vmem:[%s11353_s5 + $0x20] sm:$0xff]   ;;  %v7265_v37 = vld [vmem:[%s11353_s5 + $0x58] sm:$0xff]   ;;  %v11820_v47 = vld [vmem:[#allocation38_spill] sm:$0xff] }
 0x2b6   :  { %v3774_v43 = vpop.f32.mrf.mxu0  ;;  %v3887_v18 = vpop.f32.mrf.mxu1  ;;  %6556 = vmatpush3.bf16.msra.mxu0 %v7262_v2 }
 0x2b7   :  { %11816 = vst [vmem:[#allocation115_spill] sm:$0xff] %v9728_v42  ;;  %v9740_v0 = vadd.f32 %v3774_v43, %v9476_v45  ;;  %v3888_v10 = vadd.f32 %v3887_v18, %v9479_v23  ;;  %6557 = vmatprep.subr.bf16.mxu0 %v7263_v41  ;;  %v9746_v3 = vpack.c.bf16 %v4811_v61, %v4807_v31  ;;  %v7266_v45 = vld [vmem:[%s11353_s5 + $0x18] sm:$0xff]   ;;  %v4814_v23 = vmax.f32 %v3886_v48, 0.0  ;;  %v11822_v48 = vld [vmem:[#allocation78_spill] sm:$0xff] }
 0x2b8   :  { %v3776_v8 = vpop.f32.mrf.mxu0  ;;  %v3889_v58 = vpop.f32.mrf.mxu1  ;;  %v7273_v61 = vld [vmem:[%s11353_s5 + $0xf8] sm:$0xff]  }
 0x2b9   :  { %v9749_v2 = vadd.f32 %v3776_v8, %v9483_v28  ;;  %v3890_v21 = vadd.f32 %v3889_v58, %v11820_v47  ;;  %v7267_v28 = vld [vmem:[%s11353_s5 + $0x50] sm:$0xff]   ;;  %v4815_v18 = vmax.f32 %v3888_v10, 0.0  ;;  %v11821_v58 = vld [vmem:[#allocation80_spill] sm:$0xff]  ;;  %6663 = vmatprep.subr.bf16.mxu1 %v7273_v61 }
 0x2ba   :  { %v3778_v16 = vpop.f32.mrf.mxu0  ;;  %v3891_v27 = vpop.f32.mrf.mxu1  ;;  %6558 = vmatpush3.bf16.msra.mxu0 %v7264_v34 }
 0x2bb   :  { %v4818_v41 = vmax.f32 %v3890_v21, 0.0  ;;  %v9756_v43 = vadd.f32 %v3778_v16, %v9490_v12  ;;  %v3892_v31 = vadd.f32 %v3891_v27, %v9493_v52  ;;  %6559 = vmatprep.subr.bf16.mxu0 %v7265_v37  ;;  %v11823_v37 = vld [vmem:[#allocation39_spill] sm:$0xff]  ;;  %v11824_v16 = vld [vmem:[#allocation81_spill] sm:$0xff] }
 0x2bc   :  { %v3782_v34 = vpop.f32.mrf.mxu0  ;;  %v3895_v8 = vpop.f32.mrf.mxu1  ;;  %4360 = vmatmul.mubr.bf16.gmra.mxu1 %v11821_v58  ;;  %4473 = vmatmul.mubr.bf16.gmra.mxu0 %v11822_v48  ;;  %v11825_v27 = vld [vmem:[#allocation79_spill] sm:$0xff]  ;;  %v11826_v48 = vld [vmem:[#allocation18_spill] sm:$0xff] }
 0x2bd   :  { %v9767_v12 = vpack.c.bf16 %v4818_v41, %v4814_v23  ;;  %v4819_v47 = vmax.f32 %v3892_v31, 0.0  ;;  %v9770_v52 = vadd.f32 %v3782_v34, %v9499_v13  ;;  %v3896_v21 = vadd.f32 %v3895_v8, %v11823_v37  ;;  %4369 = vmatprep.mubr.bf16.mxu1 %v11824_v16  ;;  %4482 = vmatprep.mubr.bf16.mxu0 %v11825_v27  ;;  %v7268_v58 = vld [vmem:[%s11353_s5 + $0x10] sm:$0xff]   ;;  %v7269_v41 = vld [vmem:[%s11353_s5 + $0x48] sm:$0xff]  }
 0x2be   :  { %v3784_v42 = vpop.f32.mrf.mxu0  ;;  %v3897_v10 = vpop.f32.mrf.mxu1  ;;  %6560 = vmatpush3.bf16.msra.mxu0 %v7266_v45 }
 0x2bf   :  { %v9779_v23 = vadd.f32 %v3784_v42, %v9508_v6  ;;  %v3898_v13 = vadd.f32 %v3897_v10, %v9511_v25  ;;  %6561 = vmatprep.subr.bf16.mxu0 %v7267_v28  ;;  %v9785_v31 = vpack.c.bf16 %v4819_v47, %v4815_v18  ;;  %v7270_v6 = vld [vmem:[%s11353_s5 + $0x8] sm:$0xff]   ;;  %v4822_v25 = vmax.f32 %v3896_v21, 0.0 }
 0x2c0   :  { %v3786_v34 = vpop.f32.mrf.mxu0  ;;  %v3899_v8 = vpop.f32.mrf.mxu1 }
 0x2c1   :  { %v9788_v45 = vadd.f32 %v3786_v34, %v9515_v24  ;;  %v3900_v37 = vadd.f32 %v3899_v8, %v11826_v48  ;;  %v7271_v24 = vld [vmem:[%s11353_s5 + $0x40] sm:$0xff]   ;;  %v4823_v47 = vmax.f32 %v3898_v13, 0.0  ;;  %v11828_v34 = vld [vmem:[#allocation82_spill] sm:$0xff] }
 0x2c2   :  { %v3788_v61 = vpop.f32.mrf.mxu0  ;;  %v3901_v16 = vpop.f32.mrf.mxu1  ;;  %6562 = vmatpush3.bf16.msra.mxu0 %v7268_v58  ;;  %v11827_v58 = vld [vmem:[#allocation84_spill] sm:$0xff]  ;;  %v11829_v48 = vld [vmem:[#allocation138_spill] sm:$0xff] }
 0x2c3   :  { %v4826_v42 = vmax.f32 %v3900_v37, 0.0  ;;  %v9795_v28 = vadd.f32 %v3788_v61, %v9522_v17  ;;  %v3902_v18 = vadd.f32 %v3901_v16, %v9525_v53  ;;  %6563 = vmatprep.subr.bf16.mxu0 %v7269_v41  ;;  %v11830_v41 = vld [vmem:[#allocation85_spill] sm:$0xff]  ;;  %v11831_v37 = vld [vmem:[#allocation83_spill] sm:$0xff] }
 0x2c4   :  { %v3792_v27 = vpop.f32.mrf.mxu0  ;;  %v3905_v10 = vpop.f32.mrf.mxu1  ;;  %4370 = vmatmul.mubr.bf16.gmra.mxu1 %v11827_v58  ;;  %4483 = vmatmul.mubr.bf16.gmra.mxu0 %v11828_v34  ;;  %v7272_v16 = vld [vmem:[%s11353_s5] sm:$0xff]  }
 0x2c5   :  { %v9803_v8 = vpack.c.bf16 %v4826_v42, %v4822_v25  ;;  %v4827_v21 = vmax.f32 %v3902_v18, 0.0  ;;  %v9806_v17 = vadd.f32 %v3792_v27, %v9531_v57  ;;  %v3906_v53 = vadd.f32 %v3905_v10, %v11829_v48  ;;  %4379 = vmatprep.mubr.bf16.mxu1 %v11830_v41  ;;  %4492 = vmatprep.mubr.bf16.mxu0 %v11831_v37  ;;  %v11832_v37 = vld [vmem:[#allocation89_spill] sm:$0xff] }
 0x2c6   :  { %v3794_v61 = vpop.f32.mrf.mxu0  ;;  %v3907_v13 = vpop.f32.mrf.mxu1  ;;  %6564 = vmatpush3.bf16.msra.mxu0 %v7270_v6 }
 0x2c7   :  { %v9815_v25 = vadd.f32 %v3794_v61, %v9540_v60  ;;  %v3908_v42 = vadd.f32 %v3907_v13, %v9543_v11  ;;  %6565 = vmatprep.subr.bf16.mxu0 %v7271_v24  ;;  %v9818_v57 = vpack.c.bf16 %v4827_v21, %v4823_v47  ;;  %v4830_v48 = vmax.f32 %v3906_v53, 0.0  ;;  %v11833_v61 = vld [vmem:[#allocation59_spill] sm:$0xff] }
 0x2c8   :  { %v3796_v18 = vpop.f32.mrf.mxu0  ;;  %v3909_v27 = vpop.f32.mrf.mxu1 }
 0x2c9   :  { %v9821_v10 = vadd.f32 %v3796_v18, %v9547_v19  ;;  %v3910_v58 = vadd.f32 %v3909_v27, %v9550_v14  ;;  %v4831_v24 = vmax.f32 %v3908_v42, 0.0 }
 0x2ca   :  { %v3798_v6 = vpop.f32.mrf.mxu0  ;;  %v3911_v34 = vpop.f32.mrf.mxu1  ;;  %6566 = vmatpush3.bf16.msra.mxu0 %v7272_v16  ;;  %v11834_v16 = vld [vmem:[#allocation60_spill] sm:$0xff] }
 0x2cb   :  { %v4834_v41 = vmax.f32 %v3910_v58, 0.0  ;;  %v9825_v60 = vadd.f32 %v3798_v6, %v9554_v35  ;;  %v3912_v11 = vadd.f32 %v3911_v34, %v9557_v20  ;;  %v11835_v35 = vld [vmem:[#allocation88_spill] sm:$0xff] }
 0x2cc   :  { %v3802_v47 = vpop.f32.mrf.mxu0  ;;  %v3915_v21 = vpop.f32.mrf.mxu1  ;;  %4380 = vmatmul.mubr.bf16.gmra.mxu1 %v11832_v37  ;;  %4493 = vmatmul.mubr.bf16.gmra.mxu0 %v11833_v61  ;;  %v11836_v61 = vld [vmem:[#allocation95_spill] sm:$0xff] }
 0x2cd   :  { %v9830_v19 = vpack.c.bf16 %v4834_v41, %v4830_v48  ;;  %v4835_v14 = vmax.f32 %v3912_v11, 0.0  ;;  %v9833_v13 = vadd.f32 %v3802_v47, %v9566_v56  ;;  %v3916_v53 = vadd.f32 %v3915_v21, %v9569_v54  ;;  %4389 = vmatprep.mubr.bf16.mxu1 %v11834_v16  ;;  %4502 = vmatprep.mubr.bf16.mxu0 %v11835_v35  ;;  %v11838_v35 = vld [vmem:[#allocation64_spill] sm:$0xff] }
 0x2ce   :  { %v3804_v20 = vpop.f32.mrf.mxu0  ;;  %v3917_v42 = vpop.f32.mrf.mxu1 }
 0x2cf   :  { %v9839_v18 = vadd.f32 %v3804_v20, %v9575_v62  ;;  %v3918_v27 = vadd.f32 %v3917_v42, %v9578_v40  ;;  %v9842_v58 = vpack.c.bf16 %v4835_v14, %v4831_v24  ;;  %v4838_v11 = vmax.f32 %v3916_v53, 0.0  ;;  %v11837_v14 = vld [vmem:[#allocation92_spill] sm:$0xff] }
 0x2d0   :  { %v3806_v6 = vpop.f32.mrf.mxu0  ;;  %v3919_v34 = vpop.f32.mrf.mxu1 }
 0x2d1   :  { %v9845_v56 = vadd.f32 %v3806_v6, %v9582_v1  ;;  %v3920_v54 = vadd.f32 %v3919_v34, %v9585_v32  ;;  %v4839_v37 = vmax.f32 %v3918_v27, 0.0 }
 0x2d2   :  { %v3808_v48 = vpop.f32.mrf.mxu0  ;;  %v3921_v41 = vpop.f32.mrf.mxu1 }
 0x2d3   :  { %v4842_v47 = vmax.f32 %v3920_v54, 0.0  ;;  %v9849_v21 = vadd.f32 %v3808_v48, %v9589_v55  ;;  %v3922_v62 = vadd.f32 %v3921_v41, %v9592_v50  ;;  %v11839_v55 = vld [vmem:[#allocation94_spill] sm:$0xff] }
 0x2d4   :  { %v3812_v40 = vpop.f32.mrf.mxu0  ;;  %v3925_v24 = vpop.f32.mrf.mxu1  ;;  %4390 = vmatmul.mubr.bf16.gmra.mxu1 %v11836_v61  ;;  %4503 = vmatmul.mubr.bf16.gmra.mxu0 %v11837_v14  ;;  %v11841_v61 = vld [vmem:[#allocation58_spill] sm:$0xff] }
 0x2d5   :  { %v9854_v1 = vpack.c.bf16 %v4842_v47, %v4838_v11  ;;  %v4843_v16 = vmax.f32 %v3922_v62, 0.0  ;;  %v9857_v32 = vadd.f32 %v3812_v40, %v9598_v46  ;;  %v3926_v53 = vadd.f32 %v3925_v24, %v9601_v49  ;;  %4399 = vmatprep.mubr.bf16.mxu1 %v11838_v35  ;;  %4512 = vmatprep.mubr.bf16.mxu0 %v11839_v55  ;;  %v11840_v24 = vld [vmem:[#allocation98_spill] sm:$0xff]  ;;  %v11843_v35 = vld [vmem:[#allocation99_spill] sm:$0xff] }
 0x2d6   :  { %v3814_v50 = vpop.f32.mrf.mxu0  ;;  %v3927_v20 = vpop.f32.mrf.mxu1 }
 0x2d7   :  { %v9863_v42 = vadd.f32 %v3814_v50, %v9607_v29  ;;  %v3928_v27 = vadd.f32 %v3927_v20, %v9610_v7  ;;  %v9866_v6 = vpack.c.bf16 %v4843_v16, %v4839_v37  ;;  %v4846_v11 = vmax.f32 %v3926_v53, 0.0  ;;  %v11842_v16 = vld [vmem:[#allocation40_spill] sm:$0xff] }
 0x2d8   :  { %v3816_v34 = vpop.f32.mrf.mxu0  ;;  %v3929_v54 = vpop.f32.mrf.mxu1 }
 0x2d9   :  { %v9869_v46 = vadd.f32 %v3816_v34, %v9614_v33  ;;  %v3930_v49 = vadd.f32 %v3929_v54, %v9617_v63  ;;  %v4847_v40 = vmax.f32 %v3928_v27, 0.0 }
 0x2da   :  { %v3818_v48 = vpop.f32.mrf.mxu0  ;;  %v3931_v41 = vpop.f32.mrf.mxu1 }
 0x2db   :  { %v4850_v47 = vmax.f32 %v3930_v49, 0.0  ;;  %v9873_v62 = vadd.f32 %v3818_v48, %v9621_v15  ;;  %v3932_v29 = vadd.f32 %v3931_v41, %v9624_v4  ;;  %v11844_v15 = vld [vmem:[#allocation97_spill] sm:$0xff]  ;;  %v11845_v49 = vld [vmem:[#allocation42_spill] sm:$0xff] }
 0x2dc   :  { %v3822_v7 = vpop.f32.mrf.mxu0  ;;  %v3935_v37 = vpop.f32.mrf.mxu1  ;;  %4400 = vmatmul.mubr.bf16.gmra.mxu1 %v11840_v24  ;;  %4513 = vmatmul.mubr.bf16.gmra.mxu0 %v11841_v61 }
 0x2dd   :  { %v9878_v33 = vpack.c.bf16 %v4850_v47, %v4846_v11  ;;  %v4851_v14 = vmax.f32 %v3932_v29, 0.0  ;;  %v9881_v63 = vadd.f32 %v3822_v7, %v9630_v5  ;;  %v3936_v53 = vadd.f32 %v3935_v37, %v11842_v16  ;;  %4409 = vmatprep.mubr.bf16.mxu1 %v11843_v35  ;;  %4522 = vmatprep.mubr.bf16.mxu0 %v11844_v15  ;;  %v11846_v7 = vld [vmem:[#allocation21_spill] sm:$0xff] }
 0x2de   :  { %v3824_v4 = vpop.f32.mrf.mxu0  ;;  %v3937_v55 = vpop.f32.mrf.mxu1  ;;  %v11849_v16 = vld [vmem:[#allocation69_spill] sm:$0xff] }
 0x2df   :  { %v9887_v50 = vadd.f32 %v3824_v4, %v9639_v22  ;;  %v3938_v20 = vadd.f32 %v3937_v55, %v9642_v30  ;;  %v9890_v27 = vpack.c.bf16 %v4851_v14, %v4847_v40  ;;  %v4854_v47 = vmax.f32 %v3936_v53, 0.0  ;;  %v11847_v22 = vld [vmem:[#allocation86_spill] sm:$0xff]  ;;  %v11848_v14 = vld [vmem:[#allocation101_spill] sm:$0xff]  ;;  %v11852_v55 = vld [vmem:[#allocation100_spill] sm:$0xff] }
 0x2e0   :  { %v3826_v34 = vpop.f32.mrf.mxu0  ;;  %v3939_v54 = vpop.f32.mrf.mxu1  ;;  %v11851_v53 = vld [vmem:[#allocation41_spill] sm:$0xff] }
 0x2e1   :  { %v9893_v5 = vadd.f32 %v3826_v34, %v9646_v38  ;;  %v3940_v48 = vadd.f32 %v3939_v54, %v11845_v49  ;;  %v4855_v61 = vmax.f32 %v3938_v20, 0.0  ;;  %v11853_v34 = vld [vmem:[#allocation102_spill] sm:$0xff] }
 0x2e2   :  { %v3828_v41 = vpop.f32.mrf.mxu0  ;;  %v3941_v11 = vpop.f32.mrf.mxu1 }
 0x2e3   :  { %v4858_v29 = vmax.f32 %v3940_v48, 0.0  ;;  %v9897_v37 = vadd.f32 %v3828_v41, %v11846_v7  ;;  %v3942_v24 = vadd.f32 %v3941_v11, %v11847_v22 }
 0x2e4   :  { %v3832_v30 = vpop.f32.mrf.mxu0  ;;  %v3945_v40 = vpop.f32.mrf.mxu1  ;;  %4410 = vmatmul.mubr.bf16.gmra.mxu1 %v11848_v14  ;;  %4523 = vmatmul.mubr.bf16.gmra.mxu0 %v11849_v16 }
 0x2e5   :  { %v9902_v38 = vpack.c.bf16 %v4858_v29, %v4854_v47  ;;  %v4859_v35 = vmax.f32 %v3942_v24, 0.0  ;;  %v9905_v15 = vadd.f32 %v3832_v30, %v9662_v9  ;;  %v3946_v4 = vadd.f32 %v3945_v40, %v11851_v53  ;;  %4532 = vmatprep.mubr.bf16.mxu0 %v11852_v55  ;;  %4645 = vmatprep.mubr.bf16.mxu1 %v11853_v34  ;;  %v7274_v24 = vld [vmem:[%s11353_s5 + $0xb8] sm:$0xff]   ;;  %v11854_v40 = vld [vmem:[#allocation43_spill] sm:$0xff] }
 0x2e6   :  { %v3834_v54 = vpop.f32.mrf.mxu0  ;;  %v3947_v20 = vpop.f32.mrf.mxu1  ;;  %v11857_v53 = vld [vmem:[#allocation104_spill] sm:$0xff] }
 0x2e7   :  { %11850 = vst [vmem:[#allocation45_spill] sm:$0xff] %v9902_v38  ;;  %v9911_v49 = vadd.f32 %v3834_v54, %v9671_v59  ;;  %v3948_v48 = vadd.f32 %v3947_v20, %v9674_v26  ;;  %v9914_v41 = vpack.c.bf16 %v4859_v35, %v4855_v61  ;;  %v4862_v30 = vmax.f32 %v3946_v4, 0.0  ;;  %v11855_v26 = vld [vmem:[#allocation111_spill] sm:$0xff]  ;;  %v11859_v54 = vld [vmem:[#allocation53_spill] sm:$0xff] }
 0x2e8   :  { %v3836_v11 = vpop.f32.mrf.mxu0  ;;  %v3949_v47 = vpop.f32.mrf.mxu1 }
 0x2e9   :  { %v9917_v9 = vadd.f32 %v3836_v11, %v9678_v36  ;;  %v3950_v29 = vadd.f32 %v3949_v47, %v9681_v39  ;;  %v7275_v36 = vld [vmem:[%s11353_s5 + $0xf0] sm:$0xff]   ;;  %v4863_v55 = vmax.f32 %v3948_v48, 0.0  ;;  %v11860_v11 = vld [vmem:[#allocation105_spill] sm:$0xff]  ;;  %v11861_v47 = vld [vmem:[#allocation106_spill] sm:$0xff] }
 0x2ea   :  { %v3838_v7 = vpop.f32.mrf.mxu0  ;;  %v3951_v22 = vpop.f32.mrf.mxu1  ;;  %v11856_v39 = vld [vmem:[#allocation103_spill] sm:$0xff]  ;;  %v7277_v48 = vld [vmem:[%s11353_s5 + $0xe8] sm:$0xff]  }
 0x2eb   :  { %v4866_v59 = vmax.f32 %v3950_v29, 0.0  ;;  %v9924_v14 = vadd.f32 %v3838_v7, %v11854_v40  ;;  %v3952_v61 = vadd.f32 %v3951_v22, %v11855_v26  ;;  %v7276_v22 = vld [vmem:[%s11353_s5 + $0xb0] sm:$0xff]   ;;  %v11862_v40 = vld [vmem:[#allocation44_spill] sm:$0xff] }
 0x2ec   :  { %v3955_v16 = vpop.f32.mrf.mxu1  ;;  %v9930_v35 = vpop.f32.mrf.mxu0  ;;  %4533 = vmatmul.mubr.bf16.gmra.mxu0 %v11856_v39  ;;  %4646 = vmatmul.mubr.bf16.vlgmr.msra.gmra.mxu1 %v11857_v53 }
 0x2ed   :  { %v9934_v34 = vpack.c.bf16 %v4866_v59, %v4862_v30  ;;  %v4867_v4 = vmax.f32 %v3952_v61, 0.0  ;;  %v3956_v20 = vadd.f32 %v3955_v16, %v11859_v54  ;;  %4542 = vmatprep.mubr.bf16.mxu0 %v11860_v11  ;;  %4655 = vmatprep.mubr.bf16.mxu1 %v11861_v47  ;;  %v11864_v16 = vld [vmem:[#allocation46_spill] sm:$0xff] }
 0x2ee   :  { %v3957_v29 = vpop.f32.mrf.mxu1  ;;  %v9939_v7 = vpop.f32.mrf.mxu0  ;;  %6664 = vmatpush3.bf16.msra.mxu1 %v7274_v24  ;;  %v7278_v54 = vld [vmem:[%s11353_s5 + $0xa8] sm:$0xff]  }
 0x2ef   :  { %11858 = vst [vmem:[#allocation47_spill] sm:$0xff] %v9934_v34  ;;  %v3958_v26 = vadd.f32 %v3957_v29, %v11862_v40  ;;  %6665 = vmatprep.subr.bf16.mxu1 %v7275_v36  ;;  %v9948_v30 = vpack.c.bf16 %v4867_v4, %v4863_v55  ;;  %v4870_v36 = vmax.f32 %v3956_v20, 0.0  ;;  %v7279_v55 = vld [vmem:[%s11353_s5 + $0xe0] sm:$0xff]   ;;  %v11865_v40 = vld [vmem:[#allocation107_spill] sm:$0xff] }
 0x2f0   :  { %v3959_v59 = vpop.f32.mrf.mxu1  ;;  %v9950_v61 = vpop.f32.mrf.mxu0 }
 0x2f1   :  { %11863 = vst [vmem:[#allocation91_spill] sm:$0xff] %v9948_v30  ;;  %v3960_v39 = vadd.f32 %v3959_v59, %v11864_v16  ;;  %v11866_v59 = vld [vmem:[#allocation109_spill] sm:$0xff] }
 0x2f2   :  { %v3961_v53 = vpop.f32.mrf.mxu1  ;;  %v9953_v24 = vpop.f32.mrf.mxu0  ;;  %6666 = vmatpush3.bf16.msra.mxu1 %v7276_v22  ;;  %v4871_v22 = vmax.f32 %v3958_v26, 0.0 }
 0x2f3   :  { %v4874_v11 = vmax.f32 %v3960_v39, 0.0  ;;  %v3962_v47 = vadd.f32 %v3961_v53, %v9720_v51  ;;  %6667 = vmatprep.subr.bf16.mxu1 %v7277_v48  ;;  %v11868_v39 = vld [vmem:[#allocation108_spill] sm:$0xff]  ;;  %v11869_v51 = vld [vmem:[#allocation110_spill] sm:$0xff] }
 0x2f4   :  { %v3965_v4 = vpop.f32.mrf.mxu1  ;;  %v9962_v29 = vpop.f32.mrf.mxu0  ;;  %4543 = vmatmul.mubr.bf16.gmra.mxu0 %v11865_v40  ;;  %4656 = vmatmul.mubr.bf16.gmra.mxu1 %v11866_v59  ;;  %v7280_v40 = vld [vmem:[%s11353_s5 + $0xa0] sm:$0xff]  }
 0x2f5   :  { %v9966_v16 = vpack.c.bf16 %v4874_v11, %v4870_v36  ;;  %v4875_v34 = vmax.f32 %v3962_v47, 0.0  ;;  %v3966_v20 = vadd.f32 %v3965_v4, %v9731_v44  ;;  %4552 = vmatprep.mubr.bf16.mxu0 %v11868_v39  ;;  %4665 = vmatprep.mubr.bf16.mxu1 %v11869_v51 }
 0x2f6   :  { %v3967_v48 = vpop.f32.mrf.mxu1  ;;  %v9971_v53 = vpop.f32.mrf.mxu0  ;;  %6668 = vmatpush3.bf16.msra.mxu1 %v7278_v54 }
 0x2f7   :  { %11867 = vst [vmem:[#allocation48_spill] sm:$0xff] %v9966_v16  ;;  %v3968_v59 = vadd.f32 %v3967_v48, %v9740_v0  ;;  %v9977_v26 = vpack.c.bf16 %v4875_v34, %v4871_v22  ;;  %6669 = vmatprep.subr.bf16.mxu1 %v7279_v55  ;;  %v4878_v39 = vmax.f32 %v3966_v20, 0.0  ;;  %v7281_v0 = vld [vmem:[%s11353_s5 + $0xd8] sm:$0xff]   ;;  %v11872_v48 = vld [vmem:[#allocation113_spill] sm:$0xff] }
 0x2f8   :  { %v3969_v36 = vpop.f32.mrf.mxu1  ;;  %v9979_v11 = vpop.f32.mrf.mxu0  ;;  %v7282_v34 = vld [vmem:[%s11353_s5 + $0x98] sm:$0xff]  }
 0x2f9   :  { %11870 = vst [vmem:[#allocation49_spill] sm:$0xff] %v9977_v26  ;;  %v3970_v44 = vadd.f32 %v3969_v36, %v9749_v2  ;;  %v11871_v2 = vld [vmem:[#allocation112_spill] sm:$0xff] }
 0x2fa   :  { %v3971_v47 = vpop.f32.mrf.mxu1  ;;  %v9982_v4 = vpop.f32.mrf.mxu0  ;;  %6670 = vmatpush3.bf16.msra.mxu1 %v7280_v40  ;;  %v4879_v40 = vmax.f32 %v3968_v59, 0.0 }
 0x2fb   :  { %v4882_v54 = vmax.f32 %v3970_v44, 0.0  ;;  %v3972_v51 = vadd.f32 %v3971_v47, %v9756_v43  ;;  %v11874_v44 = vld [vmem:[#allocation57_spill] sm:$0xff]  ;;  %v11875_v47 = vld [vmem:[#allocation114_spill] sm:$0xff]  ;;  %6671 = vmatprep.subr.bf16.mxu1 %v7281_v0  ;;  %v11877_v0 = vld [vmem:[#allocation116_spill] sm:$0xff] }
 0x2fc   :  { %v3975_v55 = vpop.f32.mrf.mxu1  ;;  %v9991_v22 = vpop.f32.mrf.mxu0  ;;  %4553 = vmatmul.mubr.bf16.gmra.mxu0 %v11871_v2  ;;  %4666 = vmatmul.mubr.bf16.gmra.mxu1 %v11872_v48 }
 0x2fd   :  { %v9995_v20 = vpack.c.bf16 %v4882_v54, %v4878_v39  ;;  %v4883_v36 = vmax.f32 %v3972_v51, 0.0  ;;  %v3976_v43 = vadd.f32 %v3975_v55, %v9770_v52  ;;  %4562 = vmatprep.mubr.bf16.mxu0 %v11874_v44  ;;  %4675 = vmatprep.mubr.bf16.mxu1 %v11875_v47 }
 0x2fe   :  { %v3977_v16 = vpop.f32.mrf.mxu1  ;;  %v10000_v26 = vpop.f32.mrf.mxu0  ;;  %6672 = vmatpush3.bf16.msra.mxu1 %v7282_v34 }
 0x2ff   :  { %11873 = vst [vmem:[#allocation56_spill] sm:$0xff] %v9995_v20  ;;  %v3978_v30 = vadd.f32 %v3977_v16, %v9779_v23  ;;  %v10003_v38 = vpack.c.bf16 %v4883_v36, %v4879_v40  ;;  %v4886_v51 = vmax.f32 %v3976_v43, 0.0  ;;  %v11878_v23 = vld [vmem:[#allocation117_spill] sm:$0xff] }
 0x300   :  { %v3979_v2 = vpop.f32.mrf.mxu1  ;;  %v10005_v59 = vpop.f32.mrf.mxu0  ;;  %v11880_v36 = vld [vmem:[#allocation65_spill] sm:$0xff] }
 0x301   :  { %11876 = vst [vmem:[#allocation11_spill] sm:$0xff] %v10003_v38  ;;  %v3980_v39 = vadd.f32 %v3979_v2, %v9788_v45  ;;  %v4887_v16 = vmax.f32 %v3978_v30, 0.0  ;;  %v11881_v2 = vld [vmem:[#allocation93_spill] sm:$0xff] }
 0x302   :  { %v3981_v54 = vpop.f32.mrf.mxu1  ;;  %v10008_v52 = vpop.f32.mrf.mxu0 }
 0x303   :  { %v4890_v55 = vmax.f32 %v3980_v39, 0.0  ;;  %v3982_v48 = vadd.f32 %v3981_v54, %v9795_v28 }
 0x304   :  { %v3985_v44 = vpop.f32.mrf.mxu1  ;;  %v10011_v47 = vpop.f32.mrf.mxu0  ;;  %4563 = vmatmul.mubr.bf16.gmra.mxu0 %v11877_v0  ;;  %4676 = vmatmul.mubr.bf16.gmra.mxu1 %v11878_v23  ;;  %v7283_v23 = vld [vmem:[%s11353_s5 + $0xd0] sm:$0xff]  }
 0x305   :  { %v10015_v34 = vpack.c.bf16 %v4890_v55, %v4886_v51  ;;  %v4891_v40 = vmax.f32 %v3982_v48, 0.0  ;;  %v3986_v45 = vadd.f32 %v3985_v44, %v9806_v17  ;;  %4572 = vmatprep.mubr.bf16.mxu0 %v11880_v36  ;;  %4685 = vmatprep.mubr.bf16.mxu1 %v11881_v2  ;;  %v11883_v36 = vld [vmem:[#allocation118_spill] sm:$0xff] }
 0x306   :  { %v3987_v43 = vpop.f32.mrf.mxu1  ;;  %v10020_v39 = vpop.f32.mrf.mxu0  ;;  %6673 = vmatprep.subr.bf16.mxu1 %v7283_v23  ;;  %v11888_v23 = vld [vmem:[#allocation63_spill] sm:$0xff] }
 0x307   :  { %11879 = vst [vmem:[#allocation50_spill] sm:$0xff] %v10015_v34  ;;  %v3988_v28 = vadd.f32 %v3987_v43, %v9815_v25  ;;  %v10023_v54 = vpack.c.bf16 %v4891_v40, %v4887_v16  ;;  %v4894_v17 = vmax.f32 %v3986_v45, 0.0  ;;  %v7284_v25 = vld [vmem:[%s11353_s5 + $0x90] sm:$0xff]  }
 0x308   :  { %v3989_v0 = vpop.f32.mrf.mxu1  ;;  %v10025_v20 = vpop.f32.mrf.mxu0  ;;  %6674 = vmatpush3.bf16.msra.mxu1 %v7284_v25 }
 0x309   :  { %11882 = vst [vmem:[#allocation10_spill] sm:$0xff] %v10023_v54  ;;  %v3990_v30 = vadd.f32 %v3989_v0, %v9821_v10  ;;  %v11884_v10 = vld [vmem:[#allocation121_spill] sm:$0xff]  ;;  %v4895_v2 = vmax.f32 %v3988_v28, 0.0  ;;  %v11885_v0 = vld [vmem:[#allocation120_spill] sm:$0xff] }
 0x30a   :  { %v3991_v51 = vpop.f32.mrf.mxu1  ;;  %v10028_v55 = vpop.f32.mrf.mxu0 }
 0x30b   :  { %v4898_v48 = vmax.f32 %v3990_v30, 0.0  ;;  %v3992_v44 = vadd.f32 %v3991_v51, %v9825_v60  ;;  %v11886_v30 = vld [vmem:[#allocation96_spill] sm:$0xff] }
 0x30c   :  { %v3995_v16 = vpop.f32.mrf.mxu1  ;;  %v10037_v40 = vpop.f32.mrf.mxu0  ;;  %4573 = vmatmul.mubr.bf16.gmra.mxu0 %v11883_v36  ;;  %4686 = vmatmul.mubr.bf16.gmra.mxu1 %v11884_v10 }
 0x30d   :  { %v10041_v45 = vpack.c.bf16 %v4898_v48, %v4894_v17  ;;  %v4899_v43 = vmax.f32 %v3992_v44, 0.0  ;;  %v3996_v60 = vadd.f32 %v3995_v16, %v9833_v13  ;;  %4582 = vmatprep.mubr.bf16.mxu0 %v11885_v0  ;;  %4695 = vmatprep.mubr.bf16.mxu1 %v11886_v30 }
 0x30e   :  { %v3997_v51 = vpop.f32.mrf.mxu1  ;;  %v10046_v34 = vpop.f32.mrf.mxu0 }
 0x30f   :  { %v3998_v54 = vadd.f32 %v3997_v51, %v9839_v18  ;;  %v10049_v38 = vpack.c.bf16 %v4899_v43, %v4895_v2  ;;  %v4902_v44 = vmax.f32 %v3996_v60, 0.0  ;;  %v11889_v18 = vld [vmem:[#allocation123_spill] sm:$0xff]  ;;  %v11891_v51 = vld [vmem:[#allocation122_spill] sm:$0xff] }
 0x310   :  { %v3999_v36 = vpop.f32.mrf.mxu1  ;;  %v10051_v28 = vpop.f32.mrf.mxu0 }
 0x311   :  { %v4000_v17 = vadd.f32 %v3999_v36, %v9845_v56  ;;  %v4903_v25 = vmax.f32 %v3998_v54, 0.0  ;;  %v11892_v36 = vld [vmem:[#allocation124_spill] sm:$0xff] }
 0x312   :  { %v4001_v48 = vpop.f32.mrf.mxu1  ;;  %v10054_v13 = vpop.f32.mrf.mxu0 }
 0x313   :  { %11887 = vst [vmem:[#allocation51_spill] sm:$0xff] %v10054_v13  ;;  %v4906_v16 = vmax.f32 %v4000_v17, 0.0  ;;  %v4002_v10 = vadd.f32 %v4001_v48, %v9849_v21 }
 0x314   :  { %v4005_v0 = vpop.f32.mrf.mxu1  ;;  %v10057_v30 = vpop.f32.mrf.mxu0  ;;  %4583 = vmatmul.mubr.bf16.gmra.mxu0 %v11888_v23  ;;  %4696 = vmatmul.mubr.bf16.gmra.mxu1 %v11889_v18  ;;  %v7285_v18 = vld [vmem:[%s11353_s5 + $0xc8] sm:$0xff]  }
 0x315   :  { %v10061_v2 = vpack.c.bf16 %v4906_v16, %v4902_v44  ;;  %v4907_v43 = vmax.f32 %v4002_v10, 0.0  ;;  %v4006_v56 = vadd.f32 %v4005_v0, %v9857_v32  ;;  %4592 = vmatprep.mubr.bf16.mxu0 %v11891_v51  ;;  %4705 = vmatprep.mubr.bf16.mxu1 %v11892_v36  ;;  %v11895_v51 = vld [vmem:[#allocation125_spill] sm:$0xff] }
 0x316   :  { %v4007_v60 = vpop.f32.mrf.mxu1  ;;  %v10066_v17 = vpop.f32.mrf.mxu0  ;;  %6675 = vmatprep.subr.bf16.mxu1 %v7285_v18  ;;  %v11900_v18 = vld [vmem:[#allocation129_spill] sm:$0xff] }
 0x317   :  { %11890 = vst [vmem:[#allocation13_spill] sm:$0xff] %v10061_v2  ;;  %v4008_v21 = vadd.f32 %v4007_v60, %v9863_v42  ;;  %v10069_v48 = vpack.c.bf16 %v4907_v43, %v4903_v25  ;;  %v4910_v32 = vmax.f32 %v4006_v56, 0.0  ;;  %v7286_v42 = vld [vmem:[%s11353_s5 + $0x88] sm:$0xff]  }
 0x318   :  { %v4009_v23 = vpop.f32.mrf.mxu1  ;;  %v10071_v13 = vpop.f32.mrf.mxu0  ;;  %6676 = vmatpush3.bf16.msra.mxu1 %v7286_v42 }
 0x319   :  { %11893 = vst [vmem:[#allocation52_spill] sm:$0xff] %v10069_v48  ;;  %v4010_v54 = vadd.f32 %v4009_v23, %v9869_v46  ;;  %v11896_v46 = vld [vmem:[#allocation127_spill] sm:$0xff]  ;;  %v4911_v36 = vmax.f32 %v4008_v21, 0.0  ;;  %v11897_v23 = vld [vmem:[#allocation126_spill] sm:$0xff] }
 0x31a   :  { %v4011_v44 = vpop.f32.mrf.mxu1  ;;  %v10074_v16 = vpop.f32.mrf.mxu0 }
 0x31b   :  { %11894 = vst [vmem:[#allocation12_spill] sm:$0xff] %v10074_v16  ;;  %v4914_v10 = vmax.f32 %v4010_v54, 0.0  ;;  %v4012_v0 = vadd.f32 %v4011_v44, %v9873_v62  ;;  %v11898_v54 = vld [vmem:[#allocation128_spill] sm:$0xff] }
 0x31c   :  { %v4015_v25 = vpop.f32.mrf.mxu1  ;;  %v10083_v43 = vpop.f32.mrf.mxu0  ;;  %4593 = vmatmul.mubr.bf16.gmra.mxu0 %v11895_v51  ;;  %4706 = vmatmul.mubr.bf16.gmra.mxu1 %v11896_v46 }
 0x31d   :  { %v10087_v56 = vpack.c.bf16 %v4914_v10, %v4910_v32  ;;  %v4915_v60 = vmax.f32 %v4012_v0, 0.0  ;;  %v4016_v62 = vadd.f32 %v4015_v25, %v9881_v63  ;;  %4602 = vmatprep.mubr.bf16.mxu0 %v11897_v23  ;;  %4715 = vmatprep.mubr.bf16.mxu1 %v11898_v54 }
 0x31e   :  { %v4017_v44 = vpop.f32.mrf.mxu1  ;;  %v10092_v16 = vpop.f32.mrf.mxu0 }
 0x31f   :  { %v4018_v2 = vadd.f32 %v4017_v44, %v9887_v50  ;;  %v10095_v48 = vpack.c.bf16 %v4915_v60, %v4911_v36  ;;  %v4918_v0 = vmax.f32 %v4016_v62, 0.0  ;;  %v11901_v50 = vld [vmem:[#allocation130_spill] sm:$0xff]  ;;  %v11903_v44 = vld [vmem:[#allocation132_spill] sm:$0xff] }
 0x320   :  { %v4019_v51 = vpop.f32.mrf.mxu1  ;;  %v10097_v21 = vpop.f32.mrf.mxu0 }
 0x321   :  { %v4020_v32 = vadd.f32 %v4019_v51, %v9893_v5  ;;  %v4919_v42 = vmax.f32 %v4018_v2, 0.0 }
 0x322   :  { %v4021_v10 = vpop.f32.mrf.mxu1  ;;  %v10100_v63 = vpop.f32.mrf.mxu0 }
 0x323   :  { %11899 = vst [vmem:[#allocation54_spill] sm:$0xff] %v10100_v63  ;;  %v4922_v25 = vmax.f32 %v4020_v32, 0.0  ;;  %v4022_v46 = vadd.f32 %v4021_v10, %v9897_v37  ;;  %v7426_v37 = vld [vmem:[%s11352_s4] sm:$0xf] }
 0x324   :  { %v4025_v23 = vpop.f32.mrf.mxu1  ;;  %v10103_v54 = vpop.f32.mrf.mxu0  ;;  %4603 = vmatmul.mubr.bf16.gmra.mxu0 %v11900_v18  ;;  %4716 = vmatmul.mubr.bf16.gmra.mxu1 %v11901_v50  ;;  %v11904_v32 = vld [vmem:[#allocation9_spill] sm:$0xff] }
 0x325   :  { %v10107_v36 = vpack.c.bf16 %v4922_v25, %v4918_v0  ;;  %v4923_v60 = vmax.f32 %v4022_v46, 0.0  ;;  %v4026_v5 = vadd.f32 %v4025_v23, %v9905_v15  ;;  %4725 = vmatprep.mubr.bf16.mxu1 %v11903_v44  ;;  %5293 = vmatprep.mubr.bf16.mxu0 %v9746_v3  ;;  %v11905_v10 = vsub.s32 2, %v11904_v32 }
 0x326   :  { %v4027_v62 = vpop.f32.mrf.mxu1  ;;  %v10112_v51 = vpop.f32.mrf.mxu0  ;;  %v11906_v15 = vsub.s32 3, %v11904_v32  ;;  %v11908_v32 = vld [vmem:[#allocation134_spill] sm:$0xff] }
 0x327   :  { %11902 = vst [vmem:[#allocation16_spill] sm:$0xff] %v10107_v36  ;;  %v10119_v18 = vrot.slane %v7426_v37, %v11905_v10  ;;  %v4028_v2 = vadd.f32 %v4027_v62, %v9911_v49  ;;  %v10122_v0 = vpack.c.bf16 %v4923_v60, %v4919_v42  ;;  %v4926_v63 = vmax.f32 %v4026_v5, 0.0  ;;  %v7287_v42 = vld [vmem:[%s11353_s5 + $0xc0] sm:$0xff]  }
 0x328   :  { %v10126_v25 = vrot.slane %v7426_v37, %v11906_v15  ;;  %v4029_v3 = vpop.f32.mrf.mxu1  ;;  %v10128_v46 = vpop.f32.mrf.mxu0  ;;  %v7288_v60 = vld [vmem:[%s11353_s5 + $0x80] sm:$0xff]   ;;  %6677 = vmatprep.subr.bf16.mxu1 %v7287_v42 }
 0x329   :  { %v4030_v23 = vadd.f32 %v4029_v3, %v9917_v9  ;;  %v4069_v10 = vadd.f32 %v9930_v35, %v10119_v18  ;;  %v11909_v35 = vld [vmem:[#allocation115_spill] sm:$0xff]  ;;  %v4927_v5 = vmax.f32 %v4028_v2, 0.0  ;;  %6678 = vmatpush3.bf16.msra.mxu1 %v7288_v60  ;;  %v4079_v42 = vadd.f32 %v9962_v29, %v10119_v18  ;;  %v11912_v60 = vld [vmem:[#allocation137_spill] sm:$0xff] }
 0x32a   :  { %v4031_v50 = vpop.f32.mrf.mxu1  ;;  %v10131_v44 = vpop.f32.mrf.mxu0  ;;  %v4071_v9 = vadd.f32 %v9939_v7, %v10126_v25  ;;  %v4075_v2 = vadd.f32 %v9953_v24, %v10126_v25  ;;  %v4081_v24 = vadd.f32 %v9971_v53, %v10126_v25  ;;  %v4085_v53 = vadd.f32 %v9982_v4, %v10126_v25 }
 0x32b   :  { %11907 = vst [vmem:[#allocation55_spill] sm:$0xff] %v10131_v44  ;;  %v4930_v36 = vmax.f32 %v4030_v23, 0.0  ;;  %v4032_v49 = vadd.f32 %v4031_v50, %v9924_v14  ;;  %v11910_v23 = vld [vmem:[#allocation135_spill] sm:$0xff]  ;;  %v4073_v44 = vadd.f32 %v9950_v61, %v10119_v18  ;;  %v4091_v4 = vadd.f32 %v10000_v26, %v10126_v25 }
 0x32c   :  { %v10144_v62 = vpop.f32.mrf.mxu0  ;;  %v4261_v37 = vpop.f32.mrf.mxu1  ;;  %4726 = vmatmul.mubr.bf16.gmra.mxu1 %v11908_v32  ;;  %5294 = vmatmul.mubr.bf16.vlgmr.msra.gmra.mxu0 %v11909_v35  ;;  %v4095_v26 = vadd.f32 %v10008_v52, %v10126_v25  ;;  %v4101_v52 = vadd.f32 %v10020_v39, %v10126_v25  ;;  %v4105_v39 = vadd.f32 %v10028_v55, %v10126_v25 }
 0x32d   :  { %v10148_v14 = vpack.c.bf16 %v4930_v36, %v4926_v63  ;;  %v4931_v15 = vmax.f32 %v4032_v49, 0.0  ;;  %v10150_v3 = vadd.f32 %v4261_v37, %v4069_v10  ;;  %4735 = vmatprep.mubr.bf16.mxu1 %v11910_v23  ;;  %5301 = vmatprep.mubr.bf16.mxu0 %v9785_v31  ;;  %v4083_v23 = vadd.f32 %v9979_v11, %v10119_v18 }
 0x32e   :  { %v10154_v50 = vpop.f32.mrf.mxu0  ;;  %v4263_v7 = vpop.f32.mrf.mxu1  ;;  %v4111_v55 = vadd.f32 %v10046_v34, %v10126_v25 }
 0x32f   :  { %v10158_v32 = vadd.f32 %v4263_v7, %v4071_v9  ;;  %v10160_v35 = vpack.c.bf16 %v4931_v15, %v4927_v5  ;;  %v11913_v5 = vld [vmem:[#allocation139_spill] sm:$0xff] }
 0x330   :  { %v10162_v63 = vpop.f32.mrf.mxu0  ;;  %v4265_v36 = vpop.f32.mrf.mxu1 }
 0x331   :  { %v10166_v10 = vadd.f32 %v4265_v36, %v4073_v44 }
 0x332   :  { %v10168_v31 = vpop.f32.mrf.mxu0  ;;  %v4267_v49 = vpop.f32.mrf.mxu1 }
 0x333   :  { %11911 = vst [vmem:[#allocation15_spill] sm:$0xff] %v10168_v31  ;;  %v10172_v61 = vadd.f32 %v4267_v49, %v4075_v2 }
 0x334   :  { %v10174_v9 = vpop.f32.mrf.mxu0  ;;  %v4271_v37 = vpop.f32.mrf.mxu1  ;;  %4736 = vmatmul.mubr.bf16.gmra.mxu1 %v11912_v60  ;;  %5302 = vmatmul.mubr.bf16.gmra.mxu0 %v9767_v12 }
 0x335   :  { %v10180_v44 = vadd.f32 %v4271_v37, %v4079_v42  ;;  %4745 = vmatprep.mubr.bf16.mxu1 %v11913_v5  ;;  %5309 = vmatprep.mubr.bf16.mxu0 %v9818_v57  ;;  %v4089_v57 = vadd.f32 %v9991_v22, %v10119_v18 }
 0x336   :  { %v10184_v15 = vpop.f32.mrf.mxu0  ;;  %v4273_v29 = vpop.f32.mrf.mxu1 }
 0x337   :  { %v10188_v7 = vadd.f32 %v4273_v29, %v4081_v24  ;;  %v11915_v24 = vld [vmem:[#allocation22_spill] sm:$0xff]  ;;  %v11916_v29 = vld [vmem:[#allocation87_spill] sm:$0xff] }
 0x338   :  { %v10190_v36 = vpop.f32.mrf.mxu0  ;;  %v4275_v12 = vpop.f32.mrf.mxu1 }
 0x339   :  { %v10194_v2 = vadd.f32 %v4275_v12, %v4083_v23  ;;  %v4093_v12 = vadd.f32 %v10005_v59, %v10119_v18 }
 0x33a   :  { %v10196_v49 = vpop.f32.mrf.mxu0  ;;  %v4277_v42 = vpop.f32.mrf.mxu1 }
 0x33b   :  { %11914 = vst [vmem:[#allocation61_spill] sm:$0xff] %v10196_v49  ;;  %v10200_v37 = vadd.f32 %v4277_v42, %v4085_v53 }
 0x33c   :  { %v10202_v60 = vpop.f32.mrf.mxu0  ;;  %v4281_v11 = vpop.f32.mrf.mxu1  ;;  %4746 = vmatmul.mubr.bf16.gmra.mxu1 %v11915_v24  ;;  %5310 = vmatmul.mubr.bf16.gmra.mxu0 %v9803_v8 }
 0x33d   :  { %v10208_v5 = vadd.f32 %v4281_v11, %v4089_v57  ;;  %4755 = vmatprep.mubr.bf16.mxu1 %v11916_v29  ;;  %5317 = vmatprep.mubr.bf16.mxu0 %v9842_v58  ;;  %v4099_v58 = vadd.f32 %v10011_v47, %v10119_v18 }
 0x33e   :  { %v10212_v23 = vpop.f32.mrf.mxu0  ;;  %v4283_v22 = vpop.f32.mrf.mxu1 }
 0x33f   :  { %v10216_v53 = vadd.f32 %v4283_v22, %v4091_v4  ;;  %v11918_v4 = vld [vmem:[#allocation23_spill] sm:$0xff] }
 0x340   :  { %v10218_v42 = vpop.f32.mrf.mxu0  ;;  %v4285_v8 = vpop.f32.mrf.mxu1 }
 0x341   :  { %v10222_v57 = vadd.f32 %v4285_v8, %v4093_v12  ;;  %v11919_v12 = vld [vmem:[#allocation24_spill] sm:$0xff] }
 0x342   :  { %v10224_v11 = vpop.f32.mrf.mxu0  ;;  %v4287_v24 = vpop.f32.mrf.mxu1 }
 0x343   :  { %11917 = vst [vmem:[#allocation20_spill] sm:$0xff] %v10224_v11  ;;  %v10228_v29 = vadd.f32 %v4287_v24, %v4095_v26  ;;  %v4103_v26 = vadd.f32 %v10025_v20, %v10119_v18 }
 0x344   :  { %v10230_v49 = vpop.f32.mrf.mxu0  ;;  %v4291_v59 = vpop.f32.mrf.mxu1  ;;  %4756 = vmatmul.mubr.bf16.gmra.mxu1 %v11918_v4  ;;  %5318 = vmatmul.mubr.bf16.gmra.mxu0 %v9830_v19 }
 0x345   :  { %v10236_v22 = vadd.f32 %v4291_v59, %v4099_v58  ;;  %4765 = vmatprep.mubr.bf16.mxu1 %v11919_v12  ;;  %5325 = vmatprep.mubr.bf16.mxu0 %v9866_v6  ;;  %v4109_v6 = vadd.f32 %v10037_v40, %v10119_v18 }
 0x346   :  { %v10240_v8 = vpop.f32.mrf.mxu0  ;;  %v4293_v47 = vpop.f32.mrf.mxu1 }
 0x347   :  { %v10244_v24 = vadd.f32 %v4293_v47, %v4101_v52  ;;  %v11921_v52 = vld [vmem:[#allocation25_spill] sm:$0xff] }
 0x348   :  { %v10246_v4 = vpop.f32.mrf.mxu0  ;;  %v4295_v19 = vpop.f32.mrf.mxu1 }
 0x349   :  { %v10250_v58 = vadd.f32 %v4295_v19, %v4103_v26  ;;  %v11923_v26 = vld [vmem:[#allocation90_spill] sm:$0xff] }
 0x34a   :  { %v10252_v59 = vpop.f32.mrf.mxu0  ;;  %v4297_v12 = vpop.f32.mrf.mxu1 }
 0x34b   :  { %11920 = vst [vmem:[#allocation62_spill] sm:$0xff] %v10252_v59  ;;  %v10256_v11 = vadd.f32 %v4297_v12, %v4105_v39  ;;  %v4113_v39 = vadd.f32 %v10051_v28, %v10119_v18  ;;  %v4121_v28 = vadd.f32 %v10066_v17, %v10126_v25 }
 0x34c   :  { %v10258_v31 = vpop.f32.mrf.mxu0  ;;  %v4301_v20 = vpop.f32.mrf.mxu1  ;;  %4766 = vmatmul.mubr.bf16.gmra.mxu1 %v11921_v52  ;;  %5326 = vmatmul.mubr.bf16.gmra.mxu0 %v9854_v1 }
 0x34d   :  { %v10264_v47 = vadd.f32 %v4301_v20, %v4109_v6  ;;  %4775 = vmatprep.mubr.bf16.mxu1 %v11923_v26  ;;  %5333 = vmatprep.mubr.bf16.mxu0 %v9890_v27  ;;  %v4119_v27 = vadd.f32 %v10057_v30, %v10119_v18  ;;  %v4123_v30 = vadd.f32 %v10071_v13, %v10119_v18  ;;  %v11935_v13 = vld [vmem:[#allocation45_spill] sm:$0xff] }
 0x34e   :  { %v10268_v19 = vpop.f32.mrf.mxu0  ;;  %v4303_v40 = vpop.f32.mrf.mxu1 }
 0x34f   :  { %11922 = vst [vmem:[#allocation29_spill] sm:$0xff] %v10264_v47  ;;  %v10272_v12 = vadd.f32 %v4303_v40, %v4111_v55  ;;  %v11927_v47 = vld [vmem:[#allocation26_spill] sm:$0xff]  ;;  %v11929_v40 = vld [vmem:[#allocation119_spill] sm:$0xff] }
 0x350   :  { %v10274_v52 = vpop.f32.mrf.mxu0  ;;  %v4305_v1 = vpop.f32.mrf.mxu1 }
 0x351   :  { %11924 = vst [vmem:[#allocation19_spill] sm:$0xff] %v10272_v12  ;;  %v10276_v59 = vadd.f32 %v4305_v1, %v4113_v39 }
 0x352   :  { %v10278_v34 = vpop.f32.mrf.mxu0  ;;  %v10280_v6 = vpop.f32.mrf.mxu1 }
 0x353   :  { %11925 = vst [vmem:[#allocation67_spill] sm:$0xff] %v10276_v59  ;;  %11926 = vst [vmem:[#allocation32_spill] sm:$0xff] %v10278_v34 }
 0x354   :  { %v10284_v20 = vpop.f32.mrf.mxu0  ;;  %v4311_v26 = vpop.f32.mrf.mxu1  ;;  %4776 = vmatmul.mubr.bf16.gmra.mxu1 %v11927_v47  ;;  %5334 = vmatmul.mubr.bf16.gmra.mxu0 %v9878_v33 }
 0x355   :  { %v10290_v55 = vadd.f32 %v4311_v26, %v4119_v27  ;;  %4785 = vmatprep.mubr.bf16.mxu1 %v11929_v40  ;;  %5341 = vmatprep.mubr.bf16.mxu0 %v9914_v41  ;;  %v4129_v41 = vadd.f32 %v10083_v43, %v10119_v18  ;;  %v4133_v43 = vadd.f32 %v10097_v21, %v10119_v18  ;;  %v11944_v21 = vld [vmem:[#allocation47_spill] sm:$0xff] }
 0x356   :  { %v10294_v39 = vpop.f32.mrf.mxu0  ;;  %v4313_v1 = vpop.f32.mrf.mxu1 }
 0x357   :  { %11928 = vst [vmem:[#allocation31_spill] sm:$0xff] %v10290_v55  ;;  %v10298_v34 = vadd.f32 %v4313_v1, %v4121_v28  ;;  %v11934_v55 = vld [vmem:[#allocation27_spill] sm:$0xff]  ;;  %v4131_v28 = vadd.f32 %v10092_v16, %v10126_v25 }
 0x358   :  { %v10300_v47 = vpop.f32.mrf.mxu0  ;;  %v4315_v33 = vpop.f32.mrf.mxu1 }
 0x359   :  { %11930 = vst [vmem:[#allocation68_spill] sm:$0xff] %v10298_v34  ;;  %v10302_v59 = vadd.f32 %v4315_v33, %v4123_v30  ;;  %v11937_v30 = vld [vmem:[#allocation28_spill] sm:$0xff]  ;;  %v11938_v33 = vld [vmem:[#allocation91_spill] sm:$0xff] }
 0x35a   :  { %v10304_v17 = vpop.f32.mrf.mxu0  ;;  %v10306_v27 = vpop.f32.mrf.mxu1 }
 0x35b   :  { %11931 = vst [vmem:[#allocation66_spill] sm:$0xff] %v10302_v59  ;;  %11932 = vst [vmem:[#allocation133_spill] sm:$0xff] %v10304_v17 }
 0x35c   :  { %11933 = vst [vmem:[#allocation131_spill] sm:$0xff] %v10306_v27  ;;  %v10310_v26 = vpop.f32.mrf.mxu0  ;;  %v4321_v40 = vpop.f32.mrf.mxu1  ;;  %4786 = vmatmul.mubr.bf16.gmra.mxu1 %v11934_v55  ;;  %5342 = vmatmul.mubr.bf16.gmra.mxu0 %v11935_v13 }
 0x35d   :  { %v10316_v1 = vadd.f32 %v4321_v40, %v4129_v41  ;;  %4795 = vmatprep.mubr.bf16.mxu1 %v11937_v30  ;;  %5349 = vmatprep.mubr.bf16.mxu0 %v11938_v33  ;;  %v4139_v40 = vadd.f32 %v10103_v54, %v10119_v18  ;;  %v4143_v54 = vadd.f32 %v10128_v46, %v10119_v18 }
 0x35e   :  { %v10320_v17 = vpop.f32.mrf.mxu0  ;;  %v4323_v59 = vpop.f32.mrf.mxu1  ;;  %v4151_v46 = vadd.f32 %v10154_v50, %v10126_v25 }
 0x35f   :  { %11936 = vst [vmem:[#allocation33_spill] sm:$0xff] %v10316_v1  ;;  %v10324_v34 = vadd.f32 %v4323_v59, %v4131_v28  ;;  %v11943_v1 = vld [vmem:[#allocation30_spill] sm:$0xff]  ;;  %v4141_v59 = vadd.f32 %v10112_v51, %v10126_v25 }
 0x360   :  { %v10326_v55 = vpop.f32.mrf.mxu0  ;;  %v4325_v13 = vpop.f32.mrf.mxu1 }
 0x361   :  { %11939 = vst [vmem:[#allocation14_spill] sm:$0xff] %v10324_v34  ;;  %v10328_v27 = vadd.f32 %v4325_v13, %v4133_v43  ;;  %v11946_v43 = vld [vmem:[#allocation49_spill] sm:$0xff] }
 0x362   :  { %v10330_v16 = vpop.f32.mrf.mxu0  ;;  %v10332_v41 = vpop.f32.mrf.mxu1 }
 0x363   :  { %11940 = vst [vmem:[#allocation72_spill] sm:$0xff] %v10328_v27  ;;  %11941 = vst [vmem:[#allocation70_spill] sm:$0xff] %v10330_v16 }
 0x364   :  { %11942 = vst [vmem:[#allocation34_spill] sm:$0xff] %v10332_v41  ;;  %v10336_v30 = vpop.f32.mrf.mxu0  ;;  %v4331_v33 = vpop.f32.mrf.mxu1  ;;  %4796 = vmatmul.mubr.bf16.gmra.mxu1 %v11943_v1  ;;  %5350 = vmatmul.mubr.bf16.gmra.mxu0 %v11944_v21 }
 0x365   :  { %v10342_v28 = vadd.f32 %v4331_v33, %v4139_v40  ;;  %5357 = vmatprep.mubr.bf16.mxu0 %v11946_v43  ;;  %v4149_v40 = vadd.f32 %v10144_v62, %v10119_v18 }
 0x366   :  { %v10345_v13 = vpop.f32.mrf.mxu0  ;;  %v4333_v16 = vpop.f32.mrf.mxu1 }
 0x367   :  { %11945 = vst [vmem:[#allocation35_spill] sm:$0xff] %v10342_v28  ;;  %v10349_v27 = vadd.f32 %v4333_v16, %v4141_v59  ;;  %v11951_v28 = vld [vmem:[#allocation48_spill] sm:$0xff]  ;;  %v11953_v59 = vld [vmem:[#allocation11_spill] sm:$0xff] }
 0x368   :  { %v10351_v34 = vpop.f32.mrf.mxu0  ;;  %v4335_v1 = vpop.f32.mrf.mxu1 }
 0x369   :  { %11947 = vst [vmem:[#allocation73_spill] sm:$0xff] %v10349_v27  ;;  %v10353_v41 = vadd.f32 %v4335_v1, %v4143_v54 }
 0x36a   :  { %v10355_v21 = vpop.f32.mrf.mxu0  ;;  %v10357_v51 = vpop.f32.mrf.mxu1 }
 0x36b   :  { %11948 = vst [vmem:[#allocation71_spill] sm:$0xff] %v10353_v41  ;;  %11949 = vst [vmem:[#allocation136_spill] sm:$0xff] %v10355_v21  ;;  %v4153_v21 = vadd.f32 %v10162_v63, %v10119_v18  ;;  %v4161_v63 = vadd.f32 %v10184_v15, %v10126_v25 }
 0x36c   :  { %11950 = vst [vmem:[#allocation36_spill] sm:$0xff] %v10357_v51  ;;  %v4341_v33 = vpop.f32.mrf.mxu1  ;;  %v10361_v43 = vpop.f32.mrf.mxu0  ;;  %5358 = vmatmul.mubr.bf16.gmra.mxu0 %v11951_v28 }
 0x36d   :  { %v10366_v16 = vadd.f32 %v4341_v33, %v4149_v40  ;;  %5365 = vmatprep.mubr.bf16.mxu0 %v11953_v59  ;;  %v4159_v40 = vadd.f32 %v10174_v9, %v10119_v18 }
 0x36e   :  { %v4343_v54 = vpop.f32.mrf.mxu1  ;;  %v10369_v1 = vpop.f32.mrf.mxu0 }
 0x36f   :  { %11952 = vst [vmem:[#allocation37_spill] sm:$0xff] %v10366_v16  ;;  %v10373_v41 = vadd.f32 %v4343_v54, %v4151_v46  ;;  %v11957_v16 = vld [vmem:[#allocation56_spill] sm:$0xff]  ;;  %v11959_v54 = vld [vmem:[#allocation10_spill] sm:$0xff] }
 0x370   :  { %v4345_v62 = vpop.f32.mrf.mxu1  ;;  %v10375_v27 = vpop.f32.mrf.mxu0 }
 0x371   :  { %11954 = vst [vmem:[#allocation76_spill] sm:$0xff] %v10373_v41  ;;  %v10377_v51 = vadd.f32 %v4345_v62, %v4153_v21 }
 0x372   :  { %v10379_v28 = vpop.f32.mrf.mxu1  ;;  %v10381_v50 = vpop.f32.mrf.mxu0 }
 0x373   :  { %11955 = vst [vmem:[#allocation74_spill] sm:$0xff] %v10377_v51  ;;  %11956 = vst [vmem:[#allocation17_spill] sm:$0xff] %v10379_v28  ;;  %v4163_v51 = vadd.f32 %v10190_v36, %v10119_v18  ;;  %v4171_v36 = vadd.f32 %v10212_v23, %v10126_v25 }
 0x374   :  { %v4351_v33 = vpop.f32.mrf.mxu1  ;;  %v10385_v59 = vpop.f32.mrf.mxu0  ;;  %5366 = vmatmul.mubr.bf16.gmra.mxu0 %v11957_v16 }
 0x375   :  { %v10390_v46 = vadd.f32 %v4351_v33, %v4159_v40  ;;  %5373 = vmatprep.mubr.bf16.mxu0 %v11959_v54  ;;  %v4169_v40 = vadd.f32 %v10202_v60, %v10119_v18 }
 0x376   :  { %v4353_v21 = vpop.f32.mrf.mxu1  ;;  %v10393_v62 = vpop.f32.mrf.mxu0 }
 0x377   :  { %11958 = vst [vmem:[#allocation77_spill] sm:$0xff] %v10390_v46  ;;  %v10397_v41 = vadd.f32 %v4353_v21, %v4161_v63  ;;  %v11963_v46 = vld [vmem:[#allocation50_spill] sm:$0xff] }
 0x378   :  { %v4355_v9 = vpop.f32.mrf.mxu1  ;;  %v10399_v28 = vpop.f32.mrf.mxu0 }
 0x379   :  { %11960 = vst [vmem:[#allocation75_spill] sm:$0xff] %v10397_v41  ;;  %v10401_v12 = vadd.f32 %v4355_v9, %v4163_v51  ;;  %v4173_v9 = vadd.f32 %v10218_v42, %v10119_v18  ;;  %v4181_v42 = vadd.f32 %v10240_v8, %v10126_v25 }
 0x37a   :  { %v10403_v16 = vpop.f32.mrf.mxu1  ;;  %v10405_v15 = vpop.f32.mrf.mxu0 }
 0x37b   :  { %11961 = vst [vmem:[#allocation38_spill] sm:$0xff] %v10401_v12  ;;  %11962 = vst [vmem:[#allocation80_spill] sm:$0xff] %v10403_v16 }
 0x37c   :  { %v4361_v33 = vpop.f32.mrf.mxu1  ;;  %v10409_v54 = vpop.f32.mrf.mxu0  ;;  %5374 = vmatmul.mubr.bf16.gmra.mxu0 %v11963_v46 }
 0x37d   :  { %v10414_v63 = vadd.f32 %v4361_v33, %v4169_v40  ;;  %5381 = vmatprep.mubr.bf16.mxu0 %v10049_v38  ;;  %v4179_v38 = vadd.f32 %v10230_v49, %v10119_v18 }
 0x37e   :  { %v4363_v51 = vpop.f32.mrf.mxu1  ;;  %v10417_v21 = vpop.f32.mrf.mxu0 }
 0x37f   :  { %11964 = vst [vmem:[#allocation78_spill] sm:$0xff] %v10414_v63  ;;  %v10421_v12 = vadd.f32 %v4363_v51, %v4171_v36  ;;  %v11969_v51 = vld [vmem:[#allocation52_spill] sm:$0xff] }
 0x380   :  { %v4365_v60 = vpop.f32.mrf.mxu1  ;;  %v10423_v41 = vpop.f32.mrf.mxu0 }
 0x381   :  { %11965 = vst [vmem:[#allocation39_spill] sm:$0xff] %v10421_v12  ;;  %v10425_v16 = vadd.f32 %v4365_v60, %v4173_v9 }
 0x382   :  { %v10427_v46 = vpop.f32.mrf.mxu1  ;;  %v10429_v23 = vpop.f32.mrf.mxu0 }
 0x383   :  { %11966 = vst [vmem:[#allocation81_spill] sm:$0xff] %v10425_v16  ;;  %11967 = vst [vmem:[#allocation79_spill] sm:$0xff] %v10427_v46  ;;  %v4183_v16 = vadd.f32 %v10246_v4, %v10119_v18  ;;  %v4191_v4 = vadd.f32 %v10268_v19, %v10126_v25 }
 0x384   :  { %v4371_v40 = vpop.f32.mrf.mxu1  ;;  %v10433_v33 = vpop.f32.mrf.mxu0  ;;  %5382 = vmatmul.mubr.bf16.gmra.mxu0 %v10041_v45 }
 0x385   :  { %v10438_v36 = vadd.f32 %v4371_v40, %v4179_v38  ;;  %5389 = vmatprep.mubr.bf16.mxu0 %v11969_v51  ;;  %v4189_v38 = vadd.f32 %v10258_v31, %v10119_v18 }
 0x386   :  { %v4373_v9 = vpop.f32.mrf.mxu1  ;;  %v10441_v60 = vpop.f32.mrf.mxu0 }
 0x387   :  { %11968 = vst [vmem:[#allocation18_spill] sm:$0xff] %v10438_v36  ;;  %v10445_v12 = vadd.f32 %v4373_v9, %v4181_v42  ;;  %v11973_v36 = vld [vmem:[#allocation13_spill] sm:$0xff] }
 0x388   :  { %v4375_v49 = vpop.f32.mrf.mxu1  ;;  %v10447_v46 = vpop.f32.mrf.mxu0 }
 0x389   :  { %11970 = vst [vmem:[#allocation84_spill] sm:$0xff] %v10445_v12  ;;  %v10449_v63 = vadd.f32 %v4375_v49, %v4183_v16  ;;  %v4193_v49 = vadd.f32 %v10274_v52, %v10119_v18  ;;  %v4201_v52 = vadd.f32 %v10294_v39, %v10126_v25 }
 0x38a   :  { %v10451_v45 = vpop.f32.mrf.mxu1  ;;  %v10453_v8 = vpop.f32.mrf.mxu0 }
 0x38b   :  { %11971 = vst [vmem:[#allocation82_spill] sm:$0xff] %v10449_v63  ;;  %11972 = vst [vmem:[#allocation138_spill] sm:$0xff] %v10451_v45 }
 0x38c   :  { %v4381_v40 = vpop.f32.mrf.mxu1  ;;  %v10457_v51 = vpop.f32.mrf.mxu0  ;;  %5390 = vmatmul.mubr.bf16.gmra.mxu0 %v11973_v36 }
 0x38d   :  { %v10462_v42 = vadd.f32 %v4381_v40, %v4189_v38  ;;  %5397 = vmatprep.mubr.bf16.mxu0 %v10095_v48  ;;  %v4199_v48 = vadd.f32 %v10284_v20, %v10119_v18 }
 0x38e   :  { %v4383_v16 = vpop.f32.mrf.mxu1  ;;  %v10465_v9 = vpop.f32.mrf.mxu0 }
 0x38f   :  { %11974 = vst [vmem:[#allocation85_spill] sm:$0xff] %v10462_v42  ;;  %v10469_v63 = vadd.f32 %v4383_v16, %v4191_v4 }
 0x390   :  { %v4385_v31 = vpop.f32.mrf.mxu1  ;;  %v10471_v12 = vpop.f32.mrf.mxu0 }
 0x391   :  { %11975 = vst [vmem:[#allocation83_spill] sm:$0xff] %v10469_v63  ;;  %v10473_v45 = vadd.f32 %v4385_v31, %v4193_v49  ;;  %v4203_v31 = vadd.f32 %v10300_v47, %v10119_v18  ;;  %v4211_v47 = vadd.f32 %v10320_v17, %v10126_v25 }
 0x392   :  { %v10475_v36 = vpop.f32.mrf.mxu1  ;;  %v10477_v19 = vpop.f32.mrf.mxu0 }
 0x393   :  { %11976 = vst [vmem:[#allocation89_spill] sm:$0xff] %v10473_v45  ;;  %11977 = vst [vmem:[#allocation59_spill] sm:$0xff] %v10475_v36 }
 0x394   :  { %v4391_v38 = vpop.f32.mrf.mxu1  ;;  %v10481_v40 = vpop.f32.mrf.mxu0  ;;  %5398 = vmatmul.mubr.bf16.gmra.mxu0 %v10087_v56 }
 0x395   :  { %v10486_v4 = vadd.f32 %v4391_v38, %v4199_v48  ;;  %5405 = vmatprep.mubr.bf16.mxu0 %v10122_v0  ;;  %v4209_v0 = vadd.f32 %v10310_v26, %v10119_v18 }
 0x396   :  { %v4393_v16 = vpop.f32.mrf.mxu1  ;;  %v10489_v49 = vpop.f32.mrf.mxu0 }
 0x397   :  { %11978 = vst [vmem:[#allocation60_spill] sm:$0xff] %v10486_v4  ;;  %v10493_v45 = vadd.f32 %v4393_v16, %v4201_v52  ;;  %v11982_v4 = vld [vmem:[#allocation16_spill] sm:$0xff] }
 0x398   :  { %v4395_v20 = vpop.f32.mrf.mxu1  ;;  %v10495_v63 = vpop.f32.mrf.mxu0 }
 0x399   :  { %11979 = vst [vmem:[#allocation88_spill] sm:$0xff] %v10493_v45  ;;  %v10497_v36 = vadd.f32 %v4395_v20, %v4203_v31  ;;  %v4213_v20 = vadd.f32 %v10326_v55, %v10119_v18  ;;  %v4221_v55 = vadd.f32 %v10345_v13, %v10126_v25 }
 0x39a   :  { %v10499_v56 = vpop.f32.mrf.mxu1  ;;  %v10501_v39 = vpop.f32.mrf.mxu0 }
 0x39b   :  { %11980 = vst [vmem:[#allocation95_spill] sm:$0xff] %v10497_v36  ;;  %11981 = vst [vmem:[#allocation92_spill] sm:$0xff] %v10499_v56 }
 0x39c   :  { %v4401_v48 = vpop.f32.mrf.mxu1  ;;  %v10505_v38 = vpop.f32.mrf.mxu0  ;;  %5406 = vmatmul.mubr.bf16.gmra.mxu0 %v11982_v4 }
 0x39d   :  { %v10510_v52 = vadd.f32 %v4401_v48, %v4209_v0  ;;  %5413 = vmatprep.mubr.bf16.mxu0 %v10160_v35  ;;  %v4219_v35 = vadd.f32 %v10336_v30, %v10119_v18 }
 0x39e   :  { %v4403_v16 = vpop.f32.mrf.mxu1  ;;  %v10513_v31 = vpop.f32.mrf.mxu0 }
 0x39f   :  { %11983 = vst [vmem:[#allocation64_spill] sm:$0xff] %v10510_v52  ;;  %v10517_v36 = vadd.f32 %v4403_v16, %v4211_v47 }
 0x3a0   :  { %v4405_v26 = vpop.f32.mrf.mxu1  ;;  %v10519_v45 = vpop.f32.mrf.mxu0 }
 0x3a1   :  { %11984 = vst [vmem:[#allocation94_spill] sm:$0xff] %v10517_v36  ;;  %v10521_v56 = vadd.f32 %v4405_v26, %v4213_v20  ;;  %v4223_v26 = vadd.f32 %v10351_v34, %v10119_v18  ;;  %v4457_v34 = vadd.f32 %v10369_v1, %v10158_v32 }
 0x3a2   :  { %v10523_v4 = vpop.f32.mrf.mxu1  ;;  %v10525_v17 = vpop.f32.mrf.mxu0 }
 0x3a3   :  { %11985 = vst [vmem:[#allocation98_spill] sm:$0xff] %v10521_v56  ;;  %11986 = vst [vmem:[#allocation58_spill] sm:$0xff] %v10523_v4 }
 0x3a4   :  { %v4411_v0 = vpop.f32.mrf.mxu1  ;;  %v10529_v48 = vpop.f32.mrf.mxu0  ;;  %5414 = vmatmul.mubr.bf16.gmra.mxu0 %v10148_v14 }
 0x3a5   :  { %v10534_v47 = vadd.f32 %v4411_v0, %v4219_v35  ;;  %v4455_v0 = vadd.f32 %v10361_v43, %v10150_v3 }
 0x3a6   :  { %v4413_v16 = vpop.f32.mrf.mxu1  ;;  %v10536_v20 = vpop.f32.mrf.mxu0 }
 0x3a7   :  { %11987 = vst [vmem:[#allocation40_spill] sm:$0xff] %v10534_v47  ;;  %v10540_v56 = vadd.f32 %v4413_v16, %v4221_v55 }
 0x3a8   :  { %v4415_v36 = vpop.f32.mrf.mxu1  ;;  %v10542_v30 = vpop.f32.mrf.mxu0 }
 0x3a9   :  { %11988 = vst [vmem:[#allocation99_spill] sm:$0xff] %v10540_v56  ;;  %v10544_v4 = vadd.f32 %v4415_v36, %v4223_v26  ;;  %v4459_v36 = vadd.f32 %v10375_v27, %v10166_v10  ;;  %v4465_v10 = vadd.f32 %v10385_v59, %v10180_v44  ;;  %v4471_v44 = vadd.f32 %v10405_v15, %v10200_v37 }
 0x3aa   :  { %v10546_v52 = vpop.f32.mrf.mxu1  ;;  %v10548_v14 = vpop.f32.mrf.mxu0 }
 0x3ab   :  { %11989 = vst [vmem:[#allocation97_spill] sm:$0xff] %v10544_v4  ;;  %11990 = vst [vmem:[#allocation42_spill] sm:$0xff] %v10546_v52  ;;  %v4461_v4 = vadd.f32 %v10381_v50, %v10172_v61  ;;  %v4467_v50 = vadd.f32 %v10393_v62, %v10188_v7 }
 0x3ac   :  { %11991 = vst [vmem:[#allocation21_spill] sm:$0xff] %v10548_v14  ;;  %v10550_v13 = vpop.f32.mrf.mxu0  ;;  %v4647_v35 = vpop.f32.mrf.mxu1 }
 0x3ad   :  { %11992 = vst [vmem:[#allocation86_spill] sm:$0xff] %v10550_v13  ;;  %v4648_v55 = vadd.f32 %v4647_v35, %v4455_v0 }
 0x3ae   :  { %v10554_v47 = vpop.f32.mrf.mxu0  ;;  %v4649_v18 = vpop.f32.mrf.mxu1 }
 0x3af   :  { %11993 = vst [vmem:[#allocation101_spill] sm:$0xff] %v10554_v47  ;;  %v4650_v56 = vadd.f32 %v4649_v18, %v4457_v34  ;;  %v4808_v43 = vmax.f32 %v4648_v55, 0.0  ;;  %v4469_v18 = vadd.f32 %v10399_v28, %v10194_v2  ;;  %v4475_v28 = vadd.f32 %v10409_v54, %v10208_v5 }
 0x3b0   :  { %v10560_v16 = vpop.f32.mrf.mxu0  ;;  %v4651_v26 = vpop.f32.mrf.mxu1  ;;  %v4481_v5 = vadd.f32 %v10429_v23, %v10228_v29 }
 0x3b1   :  { %v4652_v52 = vadd.f32 %v4651_v26, %v4459_v36  ;;  %v4809_v27 = vmax.f32 %v4650_v56, 0.0 }
 0x3b2   :  { %v10564_v42 = vpop.f32.mrf.mxu0  ;;  %v4653_v3 = vpop.f32.mrf.mxu1 }
 0x3b3   :  { %v4812_v47 = vmax.f32 %v4652_v52, 0.0  ;;  %v4654_v13 = vadd.f32 %v4653_v3, %v4461_v4 }
 0x3b4   :  { %v10566_v14 = vpop.f32.mrf.mxu0  ;;  %v4657_v32 = vpop.f32.mrf.mxu1 }
 0x3b5   :  { %v4936_v1 = vpack.c.bf16 %v4812_v47, %v4808_v43  ;;  %v4813_v35 = vmax.f32 %v4654_v13, 0.0  ;;  %v4658_v52 = vadd.f32 %v4657_v32, %v4465_v10  ;;  %v4477_v10 = vadd.f32 %v10417_v21, %v10216_v53 }
 0x3b6   :  { %v10570_v0 = vpop.f32.mrf.mxu0  ;;  %v4659_v61 = vpop.f32.mrf.mxu1 }
 0x3b7   :  { %v4937_v4 = vpack.c.bf16 %v4813_v35, %v4809_v27  ;;  %v4660_v59 = vadd.f32 %v4659_v61, %v4467_v50  ;;  %v4816_v55 = vmax.f32 %v4658_v52, 0.0  ;;  %v4479_v27 = vadd.f32 %v10423_v41, %v10222_v57 }
 0x3b8   :  { %v10576_v34 = vpop.f32.mrf.mxu0  ;;  %v4661_v36 = vpop.f32.mrf.mxu1  ;;  %v4485_v41 = vadd.f32 %v10433_v33, %v10236_v22  ;;  %v4491_v22 = vadd.f32 %v10453_v8, %v10256_v11  ;;  %v11995_v11 = vld [vmem:[#allocation29_spill] sm:$0xff] }
 0x3b9   :  { %v4662_v56 = vadd.f32 %v4661_v36, %v4469_v18  ;;  %5454 = vmatprep.mubr.bf16.mxu1 %v4937_v4  ;;  %v4817_v3 = vmax.f32 %v4660_v59, 0.0  ;;  %v4495_v8 = vadd.f32 %v10457_v51, %v11995_v11  ;;  %v12001_v11 = vld [vmem:[#allocation68_spill] sm:$0xff] }
 0x3ba   :  { %v10580_v47 = vpop.f32.mrf.mxu0  ;;  %v4663_v13 = vpop.f32.mrf.mxu1  ;;  %5455 = vmatmul.mubr.bf16.vlgmr.msra.gmra.mxu1 %v4936_v1 }
 0x3bb   :  { %v4820_v7 = vmax.f32 %v4662_v56, 0.0  ;;  %v4664_v62 = vadd.f32 %v4663_v13, %v4471_v44 }
 0x3bc   :  { %v10582_v26 = vpop.f32.mrf.mxu0  ;;  %v4667_v2 = vpop.f32.mrf.mxu1 }
 0x3bd   :  { %v4940_v43 = vpack.c.bf16 %v4820_v7, %v4816_v55  ;;  %v4821_v32 = vmax.f32 %v4664_v62, 0.0  ;;  %v4668_v1 = vadd.f32 %v4667_v2, %v4475_v28  ;;  %v4487_v55 = vadd.f32 %v10441_v60, %v10244_v24 }
 0x3be   :  { %v10586_v37 = vpop.f32.mrf.mxu0  ;;  %v4669_v15 = vpop.f32.mrf.mxu1  ;;  %v4489_v7 = vadd.f32 %v10447_v46, %v10250_v58  ;;  %v11994_v58 = vld [vmem:[#allocation51_spill] sm:$0xff] }
 0x3bf   :  { %v4941_v35 = vpack.c.bf16 %v4821_v32, %v4817_v3  ;;  %v4670_v54 = vadd.f32 %v4669_v15, %v4477_v10  ;;  %v4824_v36 = vmax.f32 %v4668_v1, 0.0  ;;  %v7289_v32 = vld [vmem:[#allocation6 + $0x38] sm:$0xff]   ;;  %v4115_v46 = vadd.f32 %v11994_v58, %v10126_v25 }
 0x3c0   :  { %v10592_v61 = vpop.f32.mrf.mxu0  ;;  %v4671_v50 = vpop.f32.mrf.mxu1  ;;  %6799 = vmatprep.subr.bf16.mxu0 %v7289_v32 }
 0x3c1   :  { %v4672_v18 = vadd.f32 %v4671_v50, %v4479_v27  ;;  %5462 = vmatprep.mubr.bf16.mxu1 %v4941_v35  ;;  %v4825_v59 = vmax.f32 %v4670_v54, 0.0  ;;  %6800 = vmatpush3.bf16.msra.mxu0 %v7289_v32  ;;  %v11999_v32 = vld [vmem:[#allocation31_spill] sm:$0xff] }
 0x3c2   :  { %v10596_v52 = vpop.f32.mrf.mxu0  ;;  %v4673_v4 = vpop.f32.mrf.mxu1  ;;  %5463 = vmatmul.mubr.bf16.gmra.mxu1 %v4940_v43 }
 0x3c3   :  { %v4828_v53 = vmax.f32 %v4672_v18, 0.0  ;;  %v4674_v21 = vadd.f32 %v4673_v4, %v4481_v5  ;;  %v4308_v18 = vadd.f32 %v10280_v6, %v4115_v46 }
 0x3c4   :  { %v10598_v44 = vpop.f32.mrf.mxu0  ;;  %v4677_v57 = vpop.f32.mrf.mxu1 }
 0x3c5   :  { %v4944_v56 = vpack.c.bf16 %v4828_v53, %v4824_v36  ;;  %v4829_v13 = vmax.f32 %v4674_v21, 0.0  ;;  %v4678_v62 = vadd.f32 %v4677_v57, %v4485_v41  ;;  %v11996_v53 = vld [vmem:[#allocation19_spill] sm:$0xff]  ;;  %v4501_v51 = vadd.f32 %v10477_v19, %v4308_v18 }
 0x3c6   :  { %v10602_v29 = vpop.f32.mrf.mxu0  ;;  %v4679_v23 = vpop.f32.mrf.mxu1  ;;  %v4497_v21 = vadd.f32 %v10465_v9, %v11996_v53  ;;  %v11997_v57 = vld [vmem:[#allocation67_spill] sm:$0xff] }
 0x3c7   :  { %v4945_v2 = vpack.c.bf16 %v4829_v13, %v4825_v59  ;;  %v4680_v33 = vadd.f32 %v4679_v23, %v4487_v55  ;;  %v4832_v24 = vmax.f32 %v4678_v62, 0.0  ;;  %v4499_v41 = vadd.f32 %v10471_v12, %v11997_v57 }
 0x3c8   :  { %v10608_v28 = vpop.f32.mrf.mxu0  ;;  %v4681_v3 = vpop.f32.mrf.mxu1 }
 0x3c9   :  { %v4682_v43 = vadd.f32 %v4681_v3, %v4489_v7  ;;  %5470 = vmatprep.mubr.bf16.mxu1 %v4945_v2  ;;  %v4833_v50 = vmax.f32 %v4680_v33, 0.0 }
 0x3ca   :  { %v10612_v15 = vpop.f32.mrf.mxu0  ;;  %v4683_v10 = vpop.f32.mrf.mxu1  ;;  %5471 = vmatmul.mubr.bf16.gmra.mxu1 %v4944_v56 }
 0x3cb   :  { %v4836_v60 = vmax.f32 %v4682_v43, 0.0  ;;  %v4684_v27 = vadd.f32 %v4683_v10, %v4491_v22  ;;  %v11998_v22 = vld [vmem:[#allocation12_spill] sm:$0xff]  ;;  %v4505_v10 = vadd.f32 %v10481_v40, %v11999_v32 }
 0x3cc   :  { %v10616_v1 = vpop.f32.mrf.mxu0  ;;  %v4687_v35 = vpop.f32.mrf.mxu1  ;;  %v4125_v12 = vadd.f32 %v11998_v22, %v10126_v25 }
 0x3cd   :  { %v4948_v5 = vpack.c.bf16 %v4836_v60, %v4832_v24  ;;  %v4837_v54 = vmax.f32 %v4684_v27, 0.0  ;;  %v4688_v59 = vadd.f32 %v4687_v35, %v4495_v8  ;;  %v12000_v27 = vld [vmem:[#allocation131_spill] sm:$0xff]  ;;  %v4507_v8 = vadd.f32 %v10489_v49, %v12001_v11 }
 0x3ce   :  { %v10621_v4 = vpop.f32.mrf.mxu0  ;;  %v4689_v36 = vpop.f32.mrf.mxu1  ;;  %v4318_v58 = vadd.f32 %v12000_v27, %v4125_v12  ;;  %v12005_v12 = vld [vmem:[#allocation34_spill] sm:$0xff] }
 0x3cf   :  { %v4949_v56 = vpack.c.bf16 %v4837_v54, %v4833_v50  ;;  %v4690_v55 = vadd.f32 %v4689_v36, %v4497_v21  ;;  %v4840_v2 = vmax.f32 %v4688_v59, 0.0  ;;  %v12002_v50 = vld [vmem:[#allocation66_spill] sm:$0xff] }
 0x3d0   :  { %v10627_v13 = vpop.f32.mrf.mxu0  ;;  %v4691_v23 = vpop.f32.mrf.mxu1  ;;  %v4511_v40 = vadd.f32 %v10501_v39, %v4318_v58  ;;  %v12004_v39 = vld [vmem:[#allocation33_spill] sm:$0xff] }
 0x3d1   :  { %v4692_v7 = vadd.f32 %v4691_v23, %v4499_v41  ;;  %5478 = vmatprep.mubr.bf16.mxu1 %v4949_v56  ;;  %v4841_v19 = vmax.f32 %v4690_v55, 0.0  ;;  %v7290_v41 = vld [vmem:[#allocation6 + $0x30] sm:$0xff]  }
 0x3d2   :  { %v10630_v6 = vpop.f32.mrf.mxu0  ;;  %v4693_v62 = vpop.f32.mrf.mxu1  ;;  %5479 = vmatmul.mubr.bf16.gmra.mxu1 %v4948_v5  ;;  %v4509_v5 = vadd.f32 %v10495_v63, %v12002_v50  ;;  %6801 = vmatprep.subr.bf16.mxu0 %v7290_v41  ;;  %v12003_v63 = vld [vmem:[#allocation54_spill] sm:$0xff] }
 0x3d3   :  { %v4844_v3 = vmax.f32 %v4692_v7, 0.0  ;;  %v4694_v9 = vadd.f32 %v4693_v62, %v4501_v51  ;;  %v4135_v55 = vadd.f32 %v12003_v63, %v10126_v25  ;;  %6802 = vmatpush3.bf16.msra.mxu0 %v7290_v41  ;;  %v12009_v41 = vld [vmem:[#allocation35_spill] sm:$0xff] }
 0x3d4   :  { %v10634_v33 = vpop.f32.mrf.mxu0  ;;  %v4697_v43 = vpop.f32.mrf.mxu1 }
 0x3d5   :  { %v4952_v24 = vpack.c.bf16 %v4844_v3, %v4840_v2  ;;  %v4845_v60 = vmax.f32 %v4694_v9, 0.0  ;;  %v4698_v18 = vadd.f32 %v4697_v43, %v4505_v10  ;;  %v4515_v2 = vadd.f32 %v10505_v38, %v12004_v39  ;;  %v12011_v39 = vld [vmem:[#allocation73_spill] sm:$0xff] }
 0x3d6   :  { %v10639_v46 = vpop.f32.mrf.mxu0  ;;  %v4699_v35 = vpop.f32.mrf.mxu1  ;;  %v4328_v43 = vadd.f32 %v12005_v12, %v4135_v55 }
 0x3d7   :  { %v4953_v54 = vpack.c.bf16 %v4845_v60, %v4841_v19  ;;  %v4700_v21 = vadd.f32 %v4699_v35, %v4507_v8  ;;  %v4848_v23 = vmax.f32 %v4698_v18, 0.0  ;;  %v12006_v19 = vld [vmem:[#allocation14_spill] sm:$0xff]  ;;  %v12007_v60 = vld [vmem:[#allocation72_spill] sm:$0xff] }
 0x3d8   :  { %v10645_v36 = vpop.f32.mrf.mxu0  ;;  %v4701_v53 = vpop.f32.mrf.mxu1  ;;  %v4519_v27 = vadd.f32 %v10519_v45, %v12007_v60  ;;  %v4521_v38 = vadd.f32 %v10525_v17, %v4328_v43  ;;  %v7291_v60 = vld [vmem:[#allocation6 + $0x28] sm:$0xff]  }
 0x3d9   :  { %v4702_v57 = vadd.f32 %v4701_v53, %v4509_v5  ;;  %5486 = vmatprep.mubr.bf16.mxu1 %v4953_v54  ;;  %v4849_v3 = vmax.f32 %v4700_v21, 0.0  ;;  %v12008_v21 = vld [vmem:[#allocation55_spill] sm:$0xff]  ;;  %6803 = vmatprep.subr.bf16.mxu0 %v7291_v60 }
 0x3da   :  { %v10648_v59 = vpop.f32.mrf.mxu0  ;;  %v4703_v56 = vpop.f32.mrf.mxu1  ;;  %5487 = vmatmul.mubr.bf16.gmra.mxu1 %v4952_v24  ;;  %v4517_v24 = vadd.f32 %v10513_v31, %v12006_v19  ;;  %v4145_v45 = vadd.f32 %v12008_v21, %v10126_v25  ;;  %6804 = vmatpush3.bf16.msra.mxu0 %v7291_v60  ;;  %v12021_v60 = vld [vmem:[#allocation61_spill] sm:$0xff] }
 0x3db   :  { %v4852_v49 = vmax.f32 %v4702_v57, 0.0  ;;  %v4704_v51 = vadd.f32 %v4703_v56, %v4511_v40  ;;  %v4525_v56 = vadd.f32 %v10529_v48, %v12009_v41 }
 0x3dc   :  { %v10652_v7 = vpop.f32.mrf.mxu0  ;;  %v4707_v62 = vpop.f32.mrf.mxu1 }
 0x3dd   :  { %v4956_v9 = vpack.c.bf16 %v4852_v49, %v4848_v23  ;;  %v4853_v22 = vmax.f32 %v4704_v51, 0.0  ;;  %v4708_v35 = vadd.f32 %v4707_v62, %v4515_v2  ;;  %v12010_v51 = vld [vmem:[#allocation36_spill] sm:$0xff]  ;;  %v4527_v2 = vadd.f32 %v10536_v20, %v12011_v39  ;;  %v12014_v20 = vld [vmem:[#allocation15_spill] sm:$0xff] }
 0x3de   :  { %v10657_v32 = vpop.f32.mrf.mxu0  ;;  %v4709_v10 = vpop.f32.mrf.mxu1  ;;  %v4338_v63 = vadd.f32 %v12010_v51, %v4145_v45  ;;  %v7292_v45 = vld [vmem:[#allocation6 + $0x20] sm:$0xff]  }
 0x3df   :  { %v4957_v58 = vpack.c.bf16 %v4853_v22, %v4849_v3  ;;  %v4710_v50 = vadd.f32 %v4709_v10, %v4517_v24  ;;  %v4856_v53 = vmax.f32 %v4708_v35, 0.0  ;;  %v12012_v3 = vld [vmem:[#allocation71_spill] sm:$0xff]  ;;  %v12013_v10 = vld [vmem:[#allocation21_spill] sm:$0xff]  ;;  %6805 = vmatprep.subr.bf16.mxu0 %v7292_v45 }
 0x3e0   :  { %v10663_v11 = vpop.f32.mrf.mxu0  ;;  %v4711_v8 = vpop.f32.mrf.mxu1  ;;  %v4531_v19 = vadd.f32 %v12013_v10, %v4338_v63  ;;  %v12020_v63 = vld [vmem:[#allocation74_spill] sm:$0xff]  ;;  %6806 = vmatpush3.bf16.msra.mxu0 %v7292_v45 }
 0x3e1   :  { %v4712_v5 = vadd.f32 %v4711_v8, %v4519_v27  ;;  %5494 = vmatprep.mubr.bf16.mxu1 %v4957_v58  ;;  %v4857_v23 = vmax.f32 %v4710_v50, 0.0 }
 0x3e2   :  { %v10666_v54 = vpop.f32.mrf.mxu0  ;;  %v4713_v18 = vpop.f32.mrf.mxu1  ;;  %5495 = vmatmul.mubr.bf16.gmra.mxu1 %v4956_v9  ;;  %v4529_v9 = vadd.f32 %v10542_v30, %v12012_v3  ;;  %v4155_v30 = vadd.f32 %v12014_v20, %v10126_v25 }
 0x3e3   :  { %v4860_v40 = vmax.f32 %v4712_v5, 0.0  ;;  %v4714_v31 = vadd.f32 %v4713_v18, %v4521_v38  ;;  %v12015_v5 = vld [vmem:[#allocation37_spill] sm:$0xff]  ;;  %v12016_v18 = vld [vmem:[#allocation86_spill] sm:$0xff] }
 0x3e4   :  { %v4717_v57 = vpop.f32.mrf.mxu1  ;;  %v10673_v55 = vpop.f32.mrf.mxu0 }
 0x3e5   :  { %v4960_v49 = vpack.c.bf16 %v4860_v40, %v4856_v53  ;;  %v4861_v17 = vmax.f32 %v4714_v31, 0.0  ;;  %v4718_v12 = vadd.f32 %v4717_v57, %v4525_v56  ;;  %v4535_v53 = vadd.f32 %v12016_v18, %v12015_v5  ;;  %v12017_v57 = vld [vmem:[#allocation17_spill] sm:$0xff] }
 0x3e6   :  { %v4719_v62 = vpop.f32.mrf.mxu1  ;;  %v10680_v27 = vpop.f32.mrf.mxu0  ;;  %v4348_v41 = vadd.f32 %v12017_v57, %v4155_v30  ;;  %v12023_v30 = vld [vmem:[#allocation80_spill] sm:$0xff] }
 0x3e7   :  { %v4961_v22 = vpack.c.bf16 %v4861_v17, %v4857_v23  ;;  %v4720_v48 = vadd.f32 %v4719_v62, %v4527_v2  ;;  %v4864_v35 = vmax.f32 %v4718_v12, 0.0  ;;  %v12019_v17 = vld [vmem:[#allocation101_spill] sm:$0xff]  ;;  %v4539_v62 = vadd.f32 %v10560_v16, %v12020_v63 }
 0x3e8   :  { %v4721_v43 = vpop.f32.mrf.mxu1  ;;  %v10687_v56 = vpop.f32.mrf.mxu0  ;;  %v4165_v16 = vadd.f32 %v12021_v60, %v10126_v25  ;;  %v12029_v60 = vld [vmem:[#allocation39_spill] sm:$0xff] }
 0x3e9   :  { %v4722_v24 = vadd.f32 %v4721_v43, %v4529_v9  ;;  %5502 = vmatprep.mubr.bf16.mxu1 %v4961_v22  ;;  %v4865_v40 = vmax.f32 %v4720_v48, 0.0  ;;  %v4541_v9 = vadd.f32 %v10564_v42, %v4348_v41 }
 0x3ea   :  { %v4723_v58 = vpop.f32.mrf.mxu1  ;;  %5503 = vmatmul.mubr.bf16.gmra.mxu1 %v4960_v49  ;;  %v12018_v49 = vld [vmem:[#allocation76_spill] sm:$0xff]  ;;  %v10694_v43 = vpop.f32.mrf.mxu0 }
 0x3eb   :  { %v4868_v8 = vmax.f32 %v4722_v24, 0.0  ;;  %v4724_v38 = vadd.f32 %v4723_v58, %v4531_v19  ;;  %v4537_v51 = vadd.f32 %v12019_v17, %v12018_v49 }
 0x3ec   :  { %v4727_v50 = vpop.f32.mrf.mxu1  ;;  %v10701_v5 = vpop.f32.mrf.mxu0 }
 0x3ed   :  { %v4964_v31 = vpack.c.bf16 %v4868_v8, %v4864_v35  ;;  %v4869_v21 = vmax.f32 %v4724_v38, 0.0  ;;  %v4728_v2 = vadd.f32 %v4727_v50, %v4535_v53  ;;  %v12022_v35 = vld [vmem:[#allocation77_spill] sm:$0xff]  ;;  %v4358_v50 = vadd.f32 %v12023_v30, %v4165_v16  ;;  %v12024_v53 = vld [vmem:[#allocation75_spill] sm:$0xff] }
 0x3ee   :  { %v4729_v23 = vpop.f32.mrf.mxu1  ;;  %v4545_v8 = vadd.f32 %v10566_v14, %v12022_v35  ;;  %v10708_v17 = vpop.f32.mrf.mxu0  ;;  %v4557_v16 = vadd.f32 %v10586_v37, %v12029_v60 }
 0x3ef   :  { %v4965_v39 = vpack.c.bf16 %v4869_v21, %v4865_v40  ;;  %v4730_v22 = vadd.f32 %v4729_v23, %v4537_v51  ;;  %v4872_v19 = vmax.f32 %v4728_v2, 0.0  ;;  %v4547_v40 = vadd.f32 %v10570_v0, %v12024_v53  ;;  %v12026_v0 = vld [vmem:[#allocation20_spill] sm:$0xff] }
 0x3f0   :  { %v4731_v3 = vpop.f32.mrf.mxu1  ;;  %v4551_v23 = vadd.f32 %v10580_v47, %v4358_v50  ;;  %v4175_v2 = vadd.f32 %v12026_v0, %v10126_v25  ;;  %v12034_v0 = vld [vmem:[#allocation84_spill] sm:$0xff] }
 0x3f1   :  { %v4732_v12 = vadd.f32 %v4731_v3, %v4539_v62  ;;  %5510 = vmatprep.mubr.bf16.mxu1 %v4965_v39  ;;  %v4873_v38 = vmax.f32 %v4730_v22, 0.0 }
 0x3f2   :  { %v4733_v10 = vpop.f32.mrf.mxu1  ;;  %5511 = vmatmul.mubr.bf16.gmra.mxu1 %v4964_v31  ;;  %v12025_v31 = vld [vmem:[#allocation38_spill] sm:$0xff] }
 0x3f3   :  { %v4876_v48 = vmax.f32 %v4732_v12, 0.0  ;;  %v4734_v24 = vadd.f32 %v4733_v10, %v4541_v9  ;;  %v4549_v21 = vadd.f32 %v10576_v34, %v12025_v31  ;;  %v12027_v34 = vld [vmem:[#allocation78_spill] sm:$0xff]  ;;  %v12028_v10 = vld [vmem:[#allocation79_spill] sm:$0xff] }
 0x3f4   :  { %v4737_v58 = vpop.f32.mrf.mxu1  ;;  %v4555_v9 = vadd.f32 %v10582_v26, %v12027_v34 }
 0x3f5   :  { %v4968_v20 = vpack.c.bf16 %v4876_v48, %v4872_v19  ;;  %v4877_v42 = vmax.f32 %v4734_v24, 0.0  ;;  %v4738_v57 = vadd.f32 %v4737_v58, %v4545_v8  ;;  %v4368_v19 = vadd.f32 %v12028_v10, %v4175_v2  ;;  %v10715_v48 = vpop.f32.mrf.mxu0  ;;  %v12030_v58 = vld [vmem:[#allocation81_spill] sm:$0xff] }
 0x3f6   :  { %v4739_v18 = vpop.f32.mrf.mxu1  ;;  %v4559_v35 = vadd.f32 %v10592_v61, %v12030_v58  ;;  %v12031_v61 = vld [vmem:[#allocation62_spill] sm:$0xff]  ;;  %v4567_v2 = vadd.f32 %v10602_v29, %v12034_v0 }
 0x3f7   :  { %v4969_v45 = vpack.c.bf16 %v4877_v42, %v4873_v38  ;;  %v4740_v14 = vadd.f32 %v4739_v18, %v4547_v40  ;;  %v4880_v63 = vmax.f32 %v4738_v57, 0.0  ;;  %v7293_v42 = vld [vmem:[#allocation6 + $0x18] sm:$0xff]   ;;  %v4561_v26 = vadd.f32 %v10596_v52, %v4368_v19  ;;  %v10722_v18 = vpop.f32.mrf.mxu0  ;;  %v7294_v57 = vld [vmem:[#allocation6 + $0x10] sm:$0xff]  }
 0x3f8   :  { %v4741_v41 = vpop.f32.mrf.mxu1  ;;  %6807 = vmatprep.subr.bf16.mxu0 %v7293_v42 }
 0x3f9   :  { %v4742_v49 = vadd.f32 %v4741_v41, %v4549_v21  ;;  %5518 = vmatprep.mubr.bf16.mxu1 %v4969_v45  ;;  %v4881_v22 = vmax.f32 %v4740_v14, 0.0  ;;  %6808 = vmatpush3.bf16.msra.mxu0 %v7293_v42  ;;  %v4185_v21 = vadd.f32 %v12031_v61, %v10126_v25  ;;  %v12032_v41 = vld [vmem:[#allocation18_spill] sm:$0xff] }
 0x3fa   :  { %v4743_v51 = vpop.f32.mrf.mxu1  ;;  %5519 = vmatmul.mubr.bf16.gmra.mxu1 %v4968_v20  ;;  %v4565_v52 = vadd.f32 %v10598_v44, %v12032_v41  ;;  %6809 = vmatprep.subr.bf16.mxu0 %v7294_v57  ;;  %v7295_v44 = vld [vmem:[#allocation6 + $0x8] sm:$0xff]  }
 0x3fb   :  { %v4884_v62 = vmax.f32 %v4742_v49, 0.0  ;;  %v4744_v39 = vadd.f32 %v4743_v51, %v4551_v23  ;;  %v12033_v51 = vld [vmem:[#allocation138_spill] sm:$0xff] }
 0x3fc   :  { %v4747_v3 = vpop.f32.mrf.mxu1 }
 0x3fd   :  { %v4972_v12 = vpack.c.bf16 %v4884_v62, %v4880_v63  ;;  %v4885_v47 = vmax.f32 %v4744_v39, 0.0  ;;  %v4748_v38 = vadd.f32 %v4747_v3, %v4555_v9  ;;  %v4378_v63 = vadd.f32 %v12033_v51, %v4185_v21  ;;  %v10729_v62 = vpop.f32.mrf.mxu0  ;;  %v12035_v3 = vld [vmem:[#allocation82_spill] sm:$0xff]  ;;  %6810 = vmatpush3.bf16.msra.mxu0 %v7294_v57  ;;  %v12040_v21 = vld [vmem:[#allocation89_spill] sm:$0xff] }
 0x3fe   :  { %v4749_v24 = vpop.f32.mrf.mxu1  ;;  %v4569_v34 = vadd.f32 %v10608_v28, %v12035_v3  ;;  %6811 = vmatprep.subr.bf16.mxu0 %v7295_v44  ;;  %v12036_v28 = vld [vmem:[#allocation32_spill] sm:$0xff] }
 0x3ff   :  { %v4973_v8 = vpack.c.bf16 %v4885_v47, %v4881_v22  ;;  %v4750_v30 = vadd.f32 %v4749_v24, %v4557_v16  ;;  %v4888_v40 = vmax.f32 %v4748_v38, 0.0  ;;  %v4571_v47 = vadd.f32 %v10612_v15, %v4378_v63  ;;  %v10736_v24 = vpop.f32.mrf.mxu0  ;;  %v7296_v38 = vld [vmem:[#allocation6] sm:$0xff]   ;;  %v12042_v3 = vld [vmem:[#allocation60_spill] sm:$0xff] }
 0x400   :  { %v4751_v20 = vpop.f32.mrf.mxu1 }
 0x401   :  { %v4752_v50 = vadd.f32 %v4751_v20, %v4559_v35  ;;  %5526 = vmatprep.mubr.bf16.mxu1 %v4973_v8  ;;  %v4889_v23 = vmax.f32 %v4750_v30, 0.0  ;;  %6812 = vmatpush3.bf16.msra.mxu0 %v7295_v44  ;;  %v4195_v35 = vadd.f32 %v12036_v28, %v10126_v25  ;;  %v12037_v20 = vld [vmem:[#allocation85_spill] sm:$0xff] }
 0x402   :  { %v4753_v53 = vpop.f32.mrf.mxu1  ;;  %5527 = vmatmul.mubr.bf16.gmra.mxu1 %v4972_v12  ;;  %v4575_v15 = vadd.f32 %v10616_v1, %v12037_v20  ;;  %6813 = vmatprep.subr.bf16.mxu0 %v7296_v38 }
 0x403   :  { %v4892_v31 = vmax.f32 %v4752_v50, 0.0  ;;  %v4754_v37 = vadd.f32 %v4753_v53, %v4561_v26  ;;  %v12038_v50 = vld [vmem:[#allocation59_spill] sm:$0xff] }
 0x404   :  { %v4757_v45 = vpop.f32.mrf.mxu1  ;;  %v4388_v53 = vadd.f32 %v12038_v50, %v4195_v35 }
 0x405   :  { %v4976_v14 = vpack.c.bf16 %v4892_v31, %v4888_v40  ;;  %v4893_v49 = vmax.f32 %v4754_v37, 0.0  ;;  %v4758_v22 = vadd.f32 %v4757_v45, %v4565_v52  ;;  %v10743_v40 = vpop.f32.mrf.mxu0  ;;  %v12039_v37 = vld [vmem:[#allocation83_spill] sm:$0xff]  ;;  %v4579_v45 = vadd.f32 %v10627_v13, %v12040_v21  ;;  %6814 = vmatpush3.bf16.msra.mxu0 %v7296_v38  ;;  %v12048_v21 = vld [vmem:[#allocation58_spill] sm:$0xff] }
 0x406   :  { %v4759_v39 = vpop.f32.mrf.mxu1  ;;  %v4577_v61 = vadd.f32 %v10621_v4, %v12039_v37  ;;  %v4581_v1 = vadd.f32 %v10630_v6, %v4388_v53  ;;  %v12041_v4 = vld [vmem:[#allocation133_spill] sm:$0xff] }
 0x407   :  { %v4977_v9 = vpack.c.bf16 %v4893_v49, %v4889_v23  ;;  %v4760_v10 = vadd.f32 %v4759_v39, %v4567_v2  ;;  %v4896_v16 = vmax.f32 %v4758_v22, 0.0  ;;  %v10750_v49 = vpop.f32.mrf.mxu0  ;;  %v4205_v2 = vadd.f32 %v12041_v4, %v10126_v25 }
 0x408   :  { %v4761_v12 = vpop.f32.mrf.mxu1 }
 0x409   :  { %v4762_v19 = vadd.f32 %v4761_v12, %v4569_v34  ;;  %5534 = vmatprep.mubr.bf16.mxu1 %v4977_v9  ;;  %v4897_v42 = vmax.f32 %v4760_v10, 0.0  ;;  %v4585_v34 = vadd.f32 %v10634_v33, %v12042_v3  ;;  %v12043_v12 = vld [vmem:[#allocation92_spill] sm:$0xff] }
 0x40a   :  { %v4763_v60 = vpop.f32.mrf.mxu1  ;;  %5535 = vmatmul.mubr.bf16.gmra.mxu1 %v4976_v14  ;;  %v4398_v44 = vadd.f32 %v12043_v12, %v4205_v2 }
 0x40b   :  { %v4900_v29 = vmax.f32 %v4762_v19, 0.0  ;;  %v4764_v58 = vadd.f32 %v4763_v60, %v4571_v47  ;;  %v10757_v47 = vpop.f32.mrf.mxu0  ;;  %v12044_v19 = vld [vmem:[#allocation88_spill] sm:$0xff] }
 0x40c   :  { %v4767_v8 = vpop.f32.mrf.mxu1  ;;  %v4587_v60 = vadd.f32 %v10639_v46, %v12044_v19  ;;  %v12046_v46 = vld [vmem:[#allocation70_spill] sm:$0xff] }
 0x40d   :  { %v4980_v26 = vpack.c.bf16 %v4900_v29, %v4896_v16  ;;  %v4901_v30 = vmax.f32 %v4764_v58, 0.0  ;;  %v4768_v41 = vadd.f32 %v4767_v8, %v4575_v15  ;;  %v12045_v16 = vld [vmem:[#allocation95_spill] sm:$0xff]  ;;  %v4591_v8 = vadd.f32 %v10648_v59, %v4398_v44  ;;  %v10764_v20 = vpop.f32.mrf.mxu0  ;;  %v12053_v19 = vld [vmem:[#allocation42_spill] sm:$0xff] }
 0x40e   :  { %v4769_v31 = vpop.f32.mrf.mxu1  ;;  %v4589_v29 = vadd.f32 %v10645_v36, %v12045_v16  ;;  %v4215_v50 = vadd.f32 %v12046_v46, %v10126_v25  ;;  %v12047_v36 = vld [vmem:[#allocation64_spill] sm:$0xff] }
 0x40f   :  { %v4981_v57 = vpack.c.bf16 %v4901_v30, %v4897_v42  ;;  %v4770_v23 = vadd.f32 %v4769_v31, %v4577_v61  ;;  %v4904_v63 = vmax.f32 %v4768_v41, 0.0  ;;  %v4595_v31 = vadd.f32 %v10652_v7, %v12047_v36 }
 0x410   :  { %v4771_v52 = vpop.f32.mrf.mxu1 }
 0x411   :  { %v4772_v14 = vadd.f32 %v4771_v52, %v4579_v45  ;;  %5542 = vmatprep.mubr.bf16.mxu1 %v4981_v57  ;;  %v4905_v9 = vmax.f32 %v4770_v23, 0.0  ;;  %v4408_v45 = vadd.f32 %v12048_v21, %v4215_v50  ;;  %v10771_v57 = vpop.f32.mrf.mxu0  ;;  %v12049_v52 = vld [vmem:[#allocation94_spill] sm:$0xff] }
 0x412   :  { %v4773_v51 = vpop.f32.mrf.mxu1  ;;  %5543 = vmatmul.mubr.bf16.gmra.mxu1 %v4980_v26  ;;  %v12050_v23 = vld [vmem:[#allocation98_spill] sm:$0xff] }
 0x413   :  { %v4908_v39 = vmax.f32 %v4772_v14, 0.0  ;;  %v4774_v0 = vadd.f32 %v4773_v51, %v4581_v1  ;;  %v4597_v1 = vadd.f32 %v10657_v32, %v12049_v52  ;;  %v4599_v14 = vadd.f32 %v10663_v11, %v12050_v23  ;;  %v10778_v2 = vpop.f32.mrf.mxu0  ;;  %v12051_v32 = vld [vmem:[#allocation136_spill] sm:$0xff] }
 0x414   :  { %v4777_v13 = vpop.f32.mrf.mxu1  ;;  %v12052_v11 = vld [vmem:[#allocation40_spill] sm:$0xff] }
 0x415   :  { %v4984_v22 = vpack.c.bf16 %v4908_v39, %v4904_v63  ;;  %v4909_v6 = vmax.f32 %v4774_v0, 0.0  ;;  %v4778_v28 = vadd.f32 %v4777_v13, %v4585_v34  ;;  %v4601_v0 = vadd.f32 %v10666_v54, %v4408_v45  ;;  %v10785_v16 = vpop.f32.mrf.mxu0 }
 0x416   :  { %v4779_v10 = vpop.f32.mrf.mxu1  ;;  %v4605_v12 = vadd.f32 %v10673_v55, %v12052_v11  ;;  %v6572_v11 = vadd.f32 %v10722_v18, %v10715_v48  ;;  %v6578_v48 = vadd.f32 %v10750_v49, %v10743_v40  ;;  %v6581_v40 = vadd.f32 %v10764_v20, %v10757_v47 }
 0x417   :  { %v4985_v58 = vpack.c.bf16 %v4909_v6, %v4905_v9  ;;  %v4780_v33 = vadd.f32 %v4779_v10, %v4587_v60  ;;  %v4912_v42 = vmax.f32 %v4778_v28, 0.0 }
 0x418   :  { %v4781_v35 = vpop.f32.mrf.mxu1 }
 0x419   :  { %v4782_v38 = vadd.f32 %v4781_v35, %v4589_v29  ;;  %5550 = vmatprep.mubr.bf16.mxu1 %v4985_v58  ;;  %v4913_v37 = vmax.f32 %v4780_v33, 0.0  ;;  %v12054_v58 = vld [vmem:[#allocation99_spill] sm:$0xff]  ;;  %v12055_v35 = vld [vmem:[#allocation97_spill] sm:$0xff] }
 0x41a   :  { %v4783_v15 = vpop.f32.mrf.mxu1  ;;  %5551 = vmatmul.mubr.bf16.gmra.mxu1 %v4984_v22  ;;  %v4225_v22 = vadd.f32 %v12051_v32, %v10126_v25  ;;  %v4607_v28 = vadd.f32 %v10680_v27, %v12054_v58  ;;  %v6569_v32 = vadd.f32 %v10708_v17, %v10701_v5 }
 0x41b   :  { %v4916_v26 = vmax.f32 %v4782_v38, 0.0  ;;  %v4784_v30 = vadd.f32 %v4783_v15, %v4591_v8  ;;  %v4609_v8 = vadd.f32 %v10687_v56, %v12055_v35 }
 0x41c   :  { %v4787_v53 = vpop.f32.mrf.mxu1  ;;  %v4418_v60 = vadd.f32 %v12053_v19, %v4225_v22  ;;  %v10839_v22 = vld [vmem:[%s11354_s6] ss:$0 sm:$0xff] }
 0x41d   :  { %v4988_v61 = vpack.c.bf16 %v4916_v26, %v4912_v42  ;;  %v4917_v59 = vmax.f32 %v4784_v30, 0.0  ;;  %v4788_v63 = vadd.f32 %v4787_v53, %v4595_v31  ;;  %v10792_v26 = vpop.f32.mrf.mxu0 }
 0x41e   :  { %v4789_v41 = vpop.f32.mrf.mxu1  ;;  %v4611_v15 = vadd.f32 %v10694_v43, %v4418_v60  ;;  %v5299_v60 = vadd.f32 %v6572_v11, %v10839_v22  ;;  %v5312_v11 = vadd.f32 %v6581_v40, %v10839_v22 }
 0x41f   :  { %v4989_v51 = vpack.c.bf16 %v4917_v59, %v4913_v37  ;;  %v4790_v7 = vadd.f32 %v4789_v41, %v4597_v1  ;;  %v4920_v3 = vmax.f32 %v4788_v63, 0.0  ;;  %v10794_v37 = vpop.f32.mrf.mxu0 }
 0x420   :  { %v4791_v39 = vpop.f32.mrf.mxu1 }
 0x421   :  { %v4792_v4 = vadd.f32 %v4791_v39, %v4599_v14  ;;  %5558 = vmatprep.mubr.bf16.mxu1 %v4989_v51  ;;  %v4921_v44 = vmax.f32 %v4790_v7, 0.0 }
 0x422   :  { %v4793_v13 = vpop.f32.mrf.mxu1  ;;  %5559 = vmatmul.mubr.bf16.gmra.mxu1 %v4988_v61  ;;  %v10796_v61 = vpop.f32.mrf.mxu0 }
 0x423   :  { %v4924_v34 = vmax.f32 %v4792_v4, 0.0  ;;  %v4794_v9 = vadd.f32 %v4793_v13, %v4601_v0 }
 0x424   :  { %v4797_v6 = vpop.f32.mrf.mxu1  ;;  %v10798_v43 = vpop.f32.mrf.mxu0 }
 0x425   :  { %v4992_v10 = vpack.c.bf16 %v4924_v34, %v4920_v3  ;;  %v4925_v54 = vmax.f32 %v4794_v9, 0.0  ;;  %v4798_v25 = vadd.f32 %v4797_v6, %v4605_v12 }
 0x426   :  { %v4799_v29 = vpop.f32.mrf.mxu1  ;;  %v10800_v59 = vpop.f32.mrf.mxu0 }
 0x427   :  { %v4993_v33 = vpack.c.bf16 %v4925_v54, %v4921_v44  ;;  %v4800_v55 = vadd.f32 %v4799_v29, %v4607_v28  ;;  %v4928_v46 = vmax.f32 %v4798_v25, 0.0  ;;  %v5296_v54 = vadd.f32 %v6569_v32, %v10839_v22 }
 0x428   :  { %v4801_v38 = vpop.f32.mrf.mxu1  ;;  %v10802_v21 = vpop.f32.mrf.mxu0  ;;  %v6575_v28 = vadd.f32 %v10736_v24, %v10729_v62 }
 0x429   :  { %v4802_v42 = vadd.f32 %v4801_v38, %v4609_v8  ;;  %5566 = vmatprep.mubr.bf16.mxu1 %v4993_v33  ;;  %v4929_v36 = vmax.f32 %v4800_v55, 0.0 }
 0x42a   :  { %v4803_v30 = vpop.f32.mrf.mxu1  ;;  %5567 = vmatmul.mubr.bf16.gmra.mxu1 %v4992_v10  ;;  %v10804_v45 = vpop.f32.mrf.mxu0  ;;  %v5304_v55 = vadd.f32 %v6575_v28, %v10839_v22 }
 0x42b   :  { %v4932_v50 = vmax.f32 %v4802_v42, 0.0  ;;  %v4804_v53 = vadd.f32 %v4803_v30, %v4611_v15 }
 0x42c   :  { %v10806_v41 = vpop.f32.mrf.mxu0 }
 0x42d   :  { %v4996_v27 = vpack.c.bf16 %v4932_v50, %v4928_v46  ;;  %v4933_v31 = vmax.f32 %v4804_v53, 0.0  ;;  %v5307_v46 = vadd.f32 %v6578_v48, %v10839_v22 }
 0x42e   :  { %v10808_v52 = vpop.f32.mrf.mxu0 }
 0x42f   :  { %v4997_v56 = vpack.c.bf16 %v4933_v31, %v4929_v36 }
 0x430   :  { %v10810_v1 = vpop.f32.mrf.mxu0 }
 0x431   :  { %5574 = vmatprep.mubr.bf16.mxu1 %v4997_v56 }
 0x432   :  { %5575 = vmatmul.mubr.bf16.gmra.mxu1 %v4996_v27  ;;  %v10812_v23 = vpop.f32.mrf.mxu0  ;;  %v6584_v27 = vadd.f32 %v10778_v2, %v10771_v57  ;;  %v6587_v57 = vadd.f32 %v10792_v26, %v10785_v16 }
 0x434   :  { %v10814_v14 = vpop.f32.mrf.mxu0 }
 0x436   :  { %v10816_v51 = vpop.f32.mrf.mxu0 }
 0x438   :  { %v10818_v63 = vpop.f32.mrf.mxu0 }
 0x43a   :  { %v10820_v39 = vpop.f32.mrf.mxu0 }
 0x43c   :  { %v10822_v0 = vpop.f32.mrf.mxu0 }
 0x43e   :  { %v10824_v7 = vpop.f32.mrf.mxu0 }
 0x440   :  { %v10826_v4 = vpop.f32.mrf.mxu0 }
 0x442   :  { %v10828_v13 = vpop.f32.mrf.mxu0 }
 0x444   :  { %v10830_v3 = vpop.f32.mrf.mxu0 }
 0x446   :  { %v10832_v34 = vpop.f32.mrf.mxu0 }
 0x448   :  { %v10843_v44 = vpop.f32.mrf.mxu0 }
 0x44a   :  { %v10847_v17 = vpop.f32.mrf.mxu0 }
 0x44c   :  { %v10853_v38 = vpop.f32.mrf.mxu0 }
 0x44e   :  { %v10857_v62 = vpop.f32.mrf.mxu0 }
 0x450   :  { %v10863_v32 = vpop.f32.mrf.mxu0 }
 0x452   :  { %v10867_v47 = vpop.f32.mrf.mxu0 }
 0x47a   :  { %v6679_v9 = vpop.f32.mrf.mxu1 }
 0x47c   :  { %v6680_v6 = vpop.f32.mrf.mxu1 }
 0x47d   :  { %v6681_v12 = vadd.f32 %v6680_v6, %v6679_v9 }
 0x47e   :  { %v6682_v10 = vpop.f32.mrf.mxu1 }
 0x47f   :  { %v5457_v29 = vadd.f32 %v6681_v12, %v5296_v54  ;;  %v5315_v54 = vadd.f32 %v6584_v27, %v10839_v22 }
 0x480   :  { %v6683_v19 = vpop.f32.mrf.mxu1 }
 0x481   :  { %v6684_v5 = vadd.f32 %v6683_v19, %v6682_v10  ;;  %v5583_v18 = vmax.f32 %v5457_v29, 0.0 }
 0x482   :  { %v6685_v58 = vpop.f32.mrf.mxu1 }
 0x483   :  { %v5460_v35 = vadd.f32 %v6684_v5, %v5299_v60  ;;  %v6590_v5 = vadd.f32 %v10796_v61, %v10794_v37  ;;  %v6593_v37 = vadd.f32 %v10800_v59, %v10798_v43 }
 0x484   :  { %v6686_v8 = vpop.f32.mrf.mxu1 }
 0x485   :  { %v5584_v33 = vmax.f32 %v5460_v35, 0.0  ;;  %v6687_v25 = vadd.f32 %v6686_v8, %v6685_v58  ;;  %v10873_v8 = vpop.f32.mrf.mxu0 }
 0x486   :  { %v6688_v15 = vpop.f32.mrf.mxu1 }
 0x487   :  { %v5615_v42 = vpack.c.bf16 %v5584_v33, %v5583_v18  ;;  %v5465_v50 = vadd.f32 %v6687_v25, %v5304_v55  ;;  %v5320_v18 = vadd.f32 %v6587_v57, %v10839_v22  ;;  %v10877_v16 = vpop.f32.mrf.mxu0 }
 0x488   :  { %v6689_v30 = vpop.f32.mrf.mxu1 }
 0x489   :  { %v6690_v53 = vadd.f32 %v6689_v30, %v6688_v15  ;;  %6815 = vmatprep.mubr.bf16.mxu0 %v5615_v42  ;;  %v5585_v31 = vmax.f32 %v5465_v50, 0.0  ;;  %v5323_v15 = vadd.f32 %v6590_v5, %v10839_v22  ;;  %v10883_v40 = vpop.f32.mrf.mxu0 }
 0x48a   :  { %v6691_v24 = vpop.f32.mrf.mxu1 }
 0x48b   :  { %v5468_v49 = vadd.f32 %v6690_v53, %v5307_v46  ;;  %v6596_v46 = vadd.f32 %v10804_v45, %v10802_v21  ;;  %v10887_v43 = vpop.f32.mrf.mxu0  ;;  %v6599_v21 = vadd.f32 %v10808_v52, %v10806_v41 }
 0x48c   :  { %v6692_v36 = vpop.f32.mrf.mxu1 }
 0x48d   :  { %v5586_v56 = vmax.f32 %v5468_v49, 0.0  ;;  %v6693_v9 = vadd.f32 %v6692_v36, %v6691_v24  ;;  %v5328_v36 = vadd.f32 %v6593_v37, %v10839_v22  ;;  %v5336_v57 = vadd.f32 %v6599_v21, %v10839_v22 }
 0x48e   :  { %v6694_v6 = vpop.f32.mrf.mxu1 }
 0x48f   :  { %v5616_v12 = vpack.c.bf16 %v5586_v56, %v5585_v31  ;;  %v5473_v19 = vadd.f32 %v6693_v9, %v5312_v11  ;;  %v5331_v56 = vadd.f32 %v6596_v46, %v10839_v22 }
 0x490   :  { %v6695_v10 = vpop.f32.mrf.mxu1 }
 0x491   :  { %v6696_v60 = vadd.f32 %v6695_v10, %v6694_v6  ;;  %6816 = vmatmul.mubr.bf16.vlgmr.msra.gmra.mxu0 %v5616_v12  ;;  %v5587_v58 = vmax.f32 %v5473_v19, 0.0  ;;  %v6602_v12 = vadd.f32 %v10812_v23, %v10810_v1  ;;  %v6605_v1 = vadd.f32 %v10816_v51, %v10814_v14 }
 0x492   :  { %v6697_v20 = vpop.f32.mrf.mxu1 }
 0x493   :  { %v5476_v2 = vadd.f32 %v6696_v60, %v5315_v54  ;;  %v10893_v60 = vpop.f32.mrf.mxu0  ;;  %v5339_v5 = vadd.f32 %v6602_v12, %v10839_v22  ;;  %v6620_v12 = vadd.f32 %v10847_v17, %v10843_v44  ;;  %v6623_v44 = vadd.f32 %v10857_v62, %v10853_v38 }
 0x494   :  { %v6698_v29 = vpop.f32.mrf.mxu1 }
 0x495   :  { %v5588_v28 = vmax.f32 %v5476_v2, 0.0  ;;  %v6699_v35 = vadd.f32 %v6698_v29, %v6697_v20  ;;  %v10897_v41 = vpop.f32.mrf.mxu0 }
 0x496   :  { %v6700_v48 = vpop.f32.mrf.mxu1 }
 0x497   :  { %v5617_v33 = vpack.c.bf16 %v5588_v28, %v5587_v58  ;;  %v5481_v55 = vadd.f32 %v6699_v35, %v5320_v18 }
 0x498   :  { %v6701_v25 = vpop.f32.mrf.mxu1 }
 0x499   :  { %v6702_v42 = vadd.f32 %v6701_v25, %v6700_v48  ;;  %6819 = vmatprep.mubr.bf16.mxu0 %v5617_v33  ;;  %v5589_v50 = vmax.f32 %v5481_v55, 0.0  ;;  %v6608_v48 = vadd.f32 %v10820_v39, %v10818_v63  ;;  %v6611_v63 = vadd.f32 %v10824_v7, %v10822_v0 }
 0x49a   :  { %v6703_v26 = vpop.f32.mrf.mxu1 }
 0x49b   :  { %v5484_v61 = vadd.f32 %v6702_v42, %v5323_v15  ;;  %v10903_v15 = vpop.f32.mrf.mxu0  ;;  %v5344_v42 = vadd.f32 %v6605_v1, %v10839_v22 }
 0x49c   :  { %v6704_v30 = vpop.f32.mrf.mxu1 }
 0x49d   :  { %v5590_v53 = vmax.f32 %v5484_v61, 0.0  ;;  %v6705_v24 = vadd.f32 %v6704_v30, %v6703_v26  ;;  %v5347_v61 = vadd.f32 %v6608_v48, %v10839_v22  ;;  %v10907_v14 = vpop.f32.mrf.mxu0 }
 0x49e   :  { %v6706_v49 = vpop.f32.mrf.mxu1 }
 0x49f   :  { %v5618_v27 = vpack.c.bf16 %v5590_v53, %v5589_v50  ;;  %v5489_v9 = vadd.f32 %v6705_v24, %v5328_v36  ;;  %v6614_v53 = vadd.f32 %v10828_v13, %v10826_v4  ;;  %v6617_v4 = vadd.f32 %v10832_v34, %v10830_v3 }
 0x4a0   :  { %v6707_v31 = vpop.f32.mrf.mxu1 }
 0x4a1   :  { %v6708_v6 = vadd.f32 %v6707_v31, %v6706_v49  ;;  %6820 = vmatmul.mubr.bf16.gmra.mxu0 %v5618_v27  ;;  %v5591_v10 = vmax.f32 %v5489_v9, 0.0  ;;  %v10913_v27 = vpop.f32.mrf.mxu0 }
 0x4a2   :  { %v6709_v59 = vpop.f32.mrf.mxu1 }
 0x4a3   :  { %v5492_v45 = vadd.f32 %v6708_v6, %v5331_v56  ;;  %v5352_v56 = vadd.f32 %v6611_v63, %v10839_v22  ;;  %v10917_v0 = vpop.f32.mrf.mxu0 }
 0x4a4   :  { %v6710_v11 = vpop.f32.mrf.mxu1 }
 0x4a5   :  { %v5592_v54 = vmax.f32 %v5492_v45, 0.0  ;;  %v6711_v19 = vadd.f32 %v6710_v11, %v6709_v59  ;;  %v5355_v59 = vadd.f32 %v6614_v53, %v10839_v22 }
 0x4a6   :  { %v6712_v20 = vpop.f32.mrf.mxu1 }
 0x4a7   :  { %v5619_v2 = vpack.c.bf16 %v5592_v54, %v5591_v10  ;;  %v5497_v58 = vadd.f32 %v6711_v19, %v5336_v57 }
 0x4a8   :  { %v6713_v29 = vpop.f32.mrf.mxu1 }
 0x4a9   :  { %v6714_v28 = vadd.f32 %v6713_v29, %v6712_v20  ;;  %6823 = vmatprep.mubr.bf16.mxu0 %v5619_v2  ;;  %v5593_v18 = vmax.f32 %v5497_v58, 0.0  ;;  %v10923_v20 = vpop.f32.mrf.mxu0  ;;  %v5360_v2 = vadd.f32 %v6617_v4, %v10839_v22  ;;  %v5363_v58 = vadd.f32 %v6620_v12, %v10839_v22 }
 0x4aa   :  { %v6715_v52 = vpop.f32.mrf.mxu1 }
 0x4ab   :  { %v5500_v23 = vadd.f32 %v6714_v28, %v5339_v5  ;;  %v6643_v3 = vpop.f32.mrf.mxu0 }
 0x4ac   :  { %v6716_v35 = vpop.f32.mrf.mxu1 }
 0x4ad   :  { %v5594_v33 = vmax.f32 %v5500_v23, 0.0  ;;  %v6717_v25 = vadd.f32 %v6716_v35, %v6715_v52  ;;  %v6626_v23 = vadd.f32 %v10867_v47, %v10863_v32  ;;  %v6629_v32 = vadd.f32 %v10877_v16, %v10873_v8 }
 0x4ae   :  { %v6718_v55 = vpop.f32.mrf.mxu1 }
 0x4af   :  { %v5620_v26 = vpack.c.bf16 %v5594_v33, %v5593_v18  ;;  %v5505_v30 = vadd.f32 %v6717_v25, %v5344_v42  ;;  %v10931_v33 = vpop.f32.mrf.mxu0 }
 0x4b0   :  { %v6719_v37 = vpop.f32.mrf.mxu1 }
 0x4b1   :  { %v6720_v46 = vadd.f32 %v6719_v37, %v6718_v55  ;;  %6824 = vmatmul.mubr.bf16.gmra.mxu0 %v5620_v26  ;;  %v5595_v24 = vmax.f32 %v5505_v30, 0.0  ;;  %v5368_v55 = vadd.f32 %v6623_v44, %v10839_v22  ;;  %v5371_v37 = vadd.f32 %v6626_v23, %v10839_v22  ;;  %v6646_v38 = vpop.f32.mrf.mxu0 }
 0x4b2   :  { %v6721_v51 = vpop.f32.mrf.mxu1 }
 0x4b3   :  { %v5508_v39 = vadd.f32 %v6720_v46, %v5347_v61  ;;  %v6648_v53 = vpop.f32.mrf.mxu0 }
 0x4b4   :  { %v6722_v50 = vpop.f32.mrf.mxu1 }
 0x4b5   :  { %v5596_v49 = vmax.f32 %v5508_v39, 0.0  ;;  %v6723_v36 = vadd.f32 %v6722_v50, %v6721_v51  ;;  %v6632_v51 = vadd.f32 %v10887_v43, %v10883_v40  ;;  %v6649_v8 = vpop.f32.mrf.mxu0 }
 0x4b6   :  { %v6724_v31 = vpop.f32.mrf.mxu1 }
 0x4b7   :  { %v5621_v9 = vpack.c.bf16 %v5596_v49, %v5595_v24  ;;  %v5513_v21 = vadd.f32 %v6723_v36, %v5352_v56  ;;  %v5376_v49 = vadd.f32 %v6629_v32, %v10839_v22  ;;  %v5379_v56 = vadd.f32 %v6632_v51, %v10839_v22 }
 0x4b8   :  { %v6725_v6 = vpop.f32.mrf.mxu1 }
 0x4b9   :  { %v6726_v45 = vadd.f32 %v6725_v6, %v6724_v31  ;;  %6827 = vmatprep.mubr.bf16.mxu0 %v5621_v9  ;;  %v5597_v10 = vmax.f32 %v5513_v21, 0.0  ;;  %v6638_v21 = vadd.f32 %v10907_v14, %v10903_v15 }
 0x4ba   :  { %v6727_v7 = vpop.f32.mrf.mxu1 }
 0x4bb   :  { %v5516_v13 = vadd.f32 %v6726_v45, %v5355_v59  ;;  %v6635_v59 = vadd.f32 %v10897_v41, %v10893_v60 }
 0x4bc   :  { %v6728_v11 = vpop.f32.mrf.mxu1 }
 0x4bd   :  { %v5598_v54 = vmax.f32 %v5516_v13, 0.0  ;;  %v6729_v19 = vadd.f32 %v6728_v11, %v6727_v7  ;;  %v6651_v13 = vpop.f32.mrf.mxu0  ;;  %v5384_v12 = vadd.f32 %v6635_v59, %v10839_v22 }
 0x4be   :  { %v6730_v57 = vpop.f32.mrf.mxu1 }
 0x4bf   :  { %v5622_v29 = vpack.c.bf16 %v5598_v54, %v5597_v10  ;;  %v5521_v28 = vadd.f32 %v6729_v19, %v5360_v2  ;;  %v5387_v19 = vadd.f32 %v6638_v21, %v10839_v22  ;;  %v6652_v60 = vpop.f32.mrf.mxu0 }
 0x4c0   :  { %v6731_v5 = vpop.f32.mrf.mxu1 }
 0x4c1   :  { %v6732_v52 = vadd.f32 %v6731_v5, %v6730_v57  ;;  %6828 = vmatmul.mubr.bf16.gmra.mxu0 %v5622_v29  ;;  %v5599_v35 = vmax.f32 %v5521_v28, 0.0  ;;  %v6641_v29 = vadd.f32 %v10917_v0, %v10913_v27  ;;  %v6644_v5 = vadd.f32 %v6643_v3, %v10923_v20 }
 0x4c2   :  { %v6733_v34 = vpop.f32.mrf.mxu1  ;;  %v6647_v0 = vadd.f32 %v6646_v38, %v10931_v33  ;;  %v6650_v3 = vadd.f32 %v6649_v8, %v6648_v53  ;;  %v6653_v33 = vadd.f32 %v6652_v60, %v6651_v13 }
 0x4c3   :  { %v5524_v17 = vadd.f32 %v6732_v52, %v5363_v58 }
 0x4c4   :  { %v6734_v1 = vpop.f32.mrf.mxu1 }
 0x4c5   :  { %v5600_v48 = vmax.f32 %v5524_v17, 0.0  ;;  %v6735_v18 = vadd.f32 %v6734_v1, %v6733_v34  ;;  %v6654_v34 = vpop.f32.mrf.mxu0  ;;  %v5392_v17 = vadd.f32 %v6641_v29, %v10839_v22 }
 0x4c6   :  { %v6736_v25 = vpop.f32.mrf.mxu1 }
 0x4c7   :  { %v5623_v42 = vpack.c.bf16 %v5600_v48, %v5599_v35  ;;  %v5529_v61 = vadd.f32 %v6735_v18, %v5368_v55  ;;  %v5395_v35 = vadd.f32 %v6644_v5, %v10839_v22 }
 0x4c8   :  { %v6737_v26 = vpop.f32.mrf.mxu1 }
 0x4c9   :  { %v6738_v30 = vadd.f32 %v6737_v26, %v6736_v25  ;;  %6831 = vmatprep.mubr.bf16.mxu0 %v5623_v42  ;;  %v5601_v63 = vmax.f32 %v5529_v61, 0.0  ;;  %v6655_v25 = vpop.f32.mrf.mxu0 }
 0x4ca   :  { %v6739_v62 = vpop.f32.mrf.mxu1  ;;  %v6656_v53 = vadd.f32 %v6655_v25, %v6654_v34 }
 0x4cb   :  { %v5532_v47 = vadd.f32 %v6738_v30, %v5371_v37  ;;  %v6657_v61 = vpop.f32.mrf.mxu0 }
 0x4cc   :  { %v6740_v46 = vpop.f32.mrf.mxu1  ;;  %v5411_v59 = vadd.f32 %v6656_v53, %v10839_v22 }
 0x4cd   :  { %v5602_v39 = vmax.f32 %v5532_v47, 0.0  ;;  %v6741_v50 = vadd.f32 %v6740_v46, %v6739_v62  ;;  %v5400_v62 = vadd.f32 %v6647_v0, %v10839_v22  ;;  %v5403_v46 = vadd.f32 %v6650_v3, %v10839_v22 }
 0x4ce   :  { %v6742_v24 = vpop.f32.mrf.mxu1 }
 0x4cf   :  { %v5624_v36 = vpack.c.bf16 %v5602_v39, %v5601_v63  ;;  %v5537_v9 = vadd.f32 %v6741_v50, %v5376_v49  ;;  %v6658_v39 = vpop.f32.mrf.mxu0 }
 0x4d0   :  { %v6743_v31 = vpop.f32.mrf.mxu1 }
 0x4d1   :  { %v6744_v6 = vadd.f32 %v6743_v31, %v6742_v24  ;;  %6832 = vmatmul.mubr.bf16.gmra.mxu0 %v5624_v36  ;;  %v5603_v45 = vmax.f32 %v5537_v9, 0.0 }
 0x4d2   :  { %v6745_v16 = vpop.f32.mrf.mxu1 }
 0x4d3   :  { %v5540_v40 = vadd.f32 %v6744_v6, %v5379_v56  ;;  %v6660_v56 = vpop.f32.mrf.mxu0  ;;  %v5408_v6 = vadd.f32 %v6653_v33, %v10839_v22 }
 0x4d4   :  { %v6746_v43 = vpop.f32.mrf.mxu1 }
 0x4d5   :  { %v5604_v7 = vmax.f32 %v5540_v40, 0.0  ;;  %v6747_v4 = vadd.f32 %v6746_v43, %v6745_v16  ;;  %v6661_v21 = vpop.f32.mrf.mxu0 }
 0x4d6   :  { %v6748_v11 = vpop.f32.mrf.mxu1 }
 0x4d7   :  { %v5625_v10 = vpack.c.bf16 %v5604_v7, %v5603_v45  ;;  %v5545_v57 = vadd.f32 %v6747_v4, %v5384_v12  ;;  %v6659_v7 = vadd.f32 %v6658_v39, %v6657_v61 }
 0x4d8   :  { %v6749_v54 = vpop.f32.mrf.mxu1 }
 0x4d9   :  { %v6750_v2 = vadd.f32 %v6749_v54, %v6748_v11  ;;  %6835 = vmatprep.mubr.bf16.mxu0 %v5625_v10  ;;  %v5605_v58 = vmax.f32 %v5545_v57, 0.0  ;;  %v6662_v11 = vadd.f32 %v6661_v21, %v6660_v56  ;;  %v5416_v57 = vadd.f32 %v6659_v7, %v10839_v22 }
 0x4da   :  { %v6751_v41 = vpop.f32.mrf.mxu1 }
 0x4db   :  { %v5548_v15 = vadd.f32 %v6750_v2, %v5387_v19 }
 0x4dc   :  { %v6752_v14 = vpop.f32.mrf.mxu1 }
 0x4dd   :  { %v5606_v28 = vmax.f32 %v5548_v15, 0.0  ;;  %v6753_v52 = vadd.f32 %v6752_v14, %v6751_v41  ;;  %v5419_v41 = vadd.f32 %v6662_v11, %v10839_v22 }
 0x4de   :  { %v6754_v44 = vpop.f32.mrf.mxu1 }
 0x4df   :  { %v5626_v1 = vpack.c.bf16 %v5606_v28, %v5605_v58  ;;  %v5553_v48 = vadd.f32 %v6753_v52, %v5392_v17  ;;  %v10962_v52 = vld [vmem:[%s11356_s8] ss:$0 sm:$0xff] }
 0x4e0   :  { %v6755_v23 = vpop.f32.mrf.mxu1 }
 0x4e1   :  { %v6756_v18 = vadd.f32 %v6755_v23, %v6754_v44  ;;  %6836 = vmatmul.mubr.bf16.gmra.mxu0 %v5626_v1  ;;  %v5607_v42 = vmax.f32 %v5553_v48, 0.0 }
 0x4e2   :  { %v6757_v27 = vpop.f32.mrf.mxu1 }
 0x4e3   :  { %v5556_v55 = vadd.f32 %v6756_v18, %v5395_v35 }
 0x4e4   :  { %v6758_v20 = vpop.f32.mrf.mxu1 }
 0x4e5   :  { %v5608_v26 = vmax.f32 %v5556_v55, 0.0  ;;  %v6759_v37 = vadd.f32 %v6758_v20, %v6757_v27 }
 0x4e6   :  { %v6760_v30 = vpop.f32.mrf.mxu1 }
 0x4e7   :  { %v5627_v32 = vpack.c.bf16 %v5608_v26, %v5607_v42  ;;  %v5561_v51 = vadd.f32 %v6759_v37, %v5400_v62 }
 0x4e8   :  { %v6761_v47 = vpop.f32.mrf.mxu1 }
 0x4e9   :  { %v6762_v63 = vadd.f32 %v6761_v47, %v6760_v30  ;;  %6839 = vmatprep.mubr.bf16.mxu0 %v5627_v32  ;;  %v5609_v49 = vmax.f32 %v5561_v51, 0.0 }
 0x4ea   :  { %v6763_v50 = vpop.f32.mrf.mxu1 }
 0x4eb   :  { %v5564_v38 = vadd.f32 %v6762_v63, %v5403_v46 }
 0x4ec   :  { %v6764_v24 = vpop.f32.mrf.mxu1 }
 0x4ed   :  { %v5610_v36 = vmax.f32 %v5564_v38, 0.0  ;;  %v6765_v31 = vadd.f32 %v6764_v24, %v6763_v50 }
 0x4ee   :  { %v6766_v9 = vpop.f32.mrf.mxu1 }
 0x4ef   :  { %v5628_v8 = vpack.c.bf16 %v5610_v36, %v5609_v49  ;;  %v5569_v40 = vadd.f32 %v6765_v31, %v5408_v6 }
 0x4f0   :  { %v6767_v16 = vpop.f32.mrf.mxu1 }
 0x4f1   :  { %v6768_v43 = vadd.f32 %v6767_v16, %v6766_v9  ;;  %6840 = vmatmul.mubr.bf16.gmra.mxu0 %v5628_v8  ;;  %v5611_v12 = vmax.f32 %v5569_v40, 0.0 }
 0x4f2   :  { %v6769_v45 = vpop.f32.mrf.mxu1 }
 0x4f3   :  { %v5572_v4 = vadd.f32 %v6768_v43, %v5411_v59 }
 0x4f4   :  { %v6770_v13 = vpop.f32.mrf.mxu1 }
 0x4f5   :  { %v5612_v10 = vmax.f32 %v5572_v4, 0.0  ;;  %v6771_v54 = vadd.f32 %v6770_v13, %v6769_v45 }
 0x4f6   :  { %v6772_v19 = vpop.f32.mrf.mxu1 }
 0x4f7   :  { %v5629_v2 = vpack.c.bf16 %v5612_v10, %v5611_v12  ;;  %v5577_v29 = vadd.f32 %v6771_v54, %v5416_v57 }
 0x4f8   :  { %v6773_v60 = vpop.f32.mrf.mxu1 }
 0x4f9   :  { %v6774_v15 = vadd.f32 %v6773_v60, %v6772_v19  ;;  %6843 = vmatprep.mubr.bf16.mxu0 %v5629_v2  ;;  %v5613_v5 = vmax.f32 %v5577_v29, 0.0 }
 0x4fb   :  { %v5580_v14 = vadd.f32 %v6774_v15, %v5419_v41 }
 0x4fd   :  { %v5614_v58 = vmax.f32 %v5580_v14, 0.0 }
 0x4ff   :  { %v5630_v28 = vpack.c.bf16 %v5614_v58, %v5613_v5 }
 0x501   :  { %6844 = vmatmul.mubr.bf16.gmra.mxu0 %v5630_v28 }
 0x551   :  { %v6817_v34 = vpop.f32.mrf.mxu0 }
 0x552   :  { %v10965_v44 = vadd.f32 %v6817_v34, %v10962_v52 }
 0x553   :  { %v5736_v17 = vpop.f32.mrf.mxu0 }
 0x554   :  { %v10968_v22 = vadd.f32 %v10962_v52, %v5736_v17  ;;  %5867 = vmax.xlane.f32.xlu1 %v10965_v44 }
 0x555   :  { %v6818_v1 = vpop.f32.mrf.mxu0 }
 0x556   :  { %v10972_v23 = vadd.f32 %v6818_v1, %v10962_v52  ;;  %5863 = vmax.xlane.f32.xlu0 %v10968_v22 }
 0x557   :  { %v5739_v35 = vpop.f32.mrf.mxu0 }
 0x558   :  { %v10976_v48 = vadd.f32 %v10962_v52, %v5739_v35  ;;  %5869 = vmax.xlane.f32.xlu1 %v10972_v23 }
 0x55a   :  { %5865 = vmax.xlane.f32.xlu0 %v10976_v48 }
 0x561   :  { %v6821_v18 = vpop.f32.mrf.mxu0 }
 0x562   :  { %v10981_v25 = vadd.f32 %v6821_v18, %v10962_v52 }
 0x563   :  { %v5752_v27 = vpop.f32.mrf.mxu0 }
 0x564   :  { %5875 = vmax.xlane.f32.xlu0 %v10981_v25  ;;  %v10985_v55 = vadd.f32 %v10962_v52, %v5752_v27 }
 0x565   :  { %v6822_v0 = vpop.f32.mrf.mxu0 }
 0x566   :  { %v10988_v20 = vadd.f32 %v6822_v0, %v10962_v52 }
 0x567   :  { %v5755_v3 = vpop.f32.mrf.mxu0 }
 0x568   :  { %5877 = vmax.xlane.f32.xlu1 %v10988_v20  ;;  %5871 = vmax.xlane.f32.xlu0 %v10985_v55  ;;  %v10993_v42 = vadd.f32 %v10962_v52, %v5755_v3 }
 0x56c   :  { %5873 = vmax.xlane.f32.xlu1 %v10993_v42 }
 0x571   :  { %v6825_v26 = vpop.f32.mrf.mxu0 }
 0x572   :  { %v10997_v37 = vadd.f32 %v6825_v26, %v10962_v52 }
 0x573   :  { %v5768_v61 = vpop.f32.mrf.mxu0 }
 0x574   :  { %5883 = vmax.xlane.f32.xlu0 %v10997_v37  ;;  %v11001_v62 = vadd.f32 %v10962_v52, %v5768_v61 }
 0x575   :  { %v6826_v30 = vpop.f32.mrf.mxu0 }
 0x576   :  { %v11004_v32 = vadd.f32 %v6826_v30, %v10962_v52 }
 0x577   :  { %v5771_v47 = vpop.f32.mrf.mxu0 }
 0x578   :  { %5885 = vmax.xlane.f32.xlu1 %v11004_v32  ;;  %5879 = vmax.xlane.f32.xlu0 %v11001_v62  ;;  %v11009_v46 = vadd.f32 %v10962_v52, %v5771_v47 }
 0x57c   :  { %5881 = vmax.xlane.f32.xlu1 %v11009_v46 }
 0x581   :  { %v6829_v51 = vpop.f32.mrf.mxu0 }
 0x582   :  { %v11013_v63 = vadd.f32 %v6829_v51, %v10962_v52 }
 0x583   :  { %v5784_v39 = vpop.f32.mrf.mxu0 }
 0x584   :  { %5891 = vmax.xlane.f32.xlu0 %v11013_v63  ;;  %v11017_v33 = vadd.f32 %v10962_v52, %v5784_v39 }
 0x585   :  { %v6830_v50 = vpop.f32.mrf.mxu0 }
 0x586   :  { %v11020_v38 = vadd.f32 %v6830_v50, %v10962_v52 }
 0x587   :  { %v5787_v24 = vpop.f32.mrf.mxu0 }
 0x588   :  { %5893 = vmax.xlane.f32.xlu1 %v11020_v38  ;;  %5887 = vmax.xlane.f32.xlu0 %v11017_v33  ;;  %v11025_v53 = vadd.f32 %v10962_v52, %v5787_v24 }
 0x58c   :  { %5889 = vmax.xlane.f32.xlu1 %v11025_v53 }
 0x591   :  { %v6833_v49 = vpop.f32.mrf.mxu0 }
 0x592   :  { %v11029_v36 = vadd.f32 %v6833_v49, %v10962_v52 }
 0x593   :  { %v5800_v31 = vpop.f32.mrf.mxu0 }
 0x594   :  { %5899 = vmax.xlane.f32.xlu0 %v11029_v36  ;;  %v11033_v9 = vadd.f32 %v10962_v52, %v5800_v31 }
 0x595   :  { %v6834_v56 = vpop.f32.mrf.mxu0 }
 0x596   :  { %v11036_v6 = vadd.f32 %v6834_v56, %v10962_v52 }
 0x597   :  { %v5803_v8 = vpop.f32.mrf.mxu0 }
 0x598   :  { %5901 = vmax.xlane.f32.xlu1 %v11036_v6  ;;  %5895 = vmax.xlane.f32.xlu0 %v11033_v9  ;;  %v11041_v16 = vadd.f32 %v10962_v52, %v5803_v8 }
 0x59c   :  { %5897 = vmax.xlane.f32.xlu1 %v11041_v16 }
 0x5a1   :  { %v6837_v59 = vpop.f32.mrf.mxu0 }
 0x5a2   :  { %v11045_v40 = vadd.f32 %v6837_v59, %v10962_v52 }
 0x5a3   :  { %v5816_v43 = vpop.f32.mrf.mxu0 }
 0x5a4   :  { %5907 = vmax.xlane.f32.xlu0 %v11045_v40  ;;  %v11049_v45 = vadd.f32 %v10962_v52, %v5816_v43 }
 0x5a5   :  { %v6838_v21 = vpop.f32.mrf.mxu0 }
 0x5a6   :  { %v11052_v7 = vadd.f32 %v6838_v21, %v10962_v52 }
 0x5a7   :  { %v5819_v4 = vpop.f32.mrf.mxu0 }
 0x5a8   :  { %5909 = vmax.xlane.f32.xlu1 %v11052_v7  ;;  %5903 = vmax.xlane.f32.xlu0 %v11049_v45  ;;  %v11057_v13 = vadd.f32 %v10962_v52, %v5819_v4 }
 0x5ac   :  { %5905 = vmax.xlane.f32.xlu1 %v11057_v13 }
 0x5b1   :  { %v6841_v11 = vpop.f32.mrf.mxu0 }
 0x5b2   :  { %v11061_v12 = vadd.f32 %v6841_v11, %v10962_v52 }
 0x5b3   :  { %v5832_v10 = vpop.f32.mrf.mxu0 }
 0x5b4   :  { %5915 = vmax.xlane.f32.xlu0 %v11061_v12  ;;  %v11065_v19 = vadd.f32 %v10962_v52, %v5832_v10 }
 0x5b5   :  { %v6842_v54 = vpop.f32.mrf.mxu0 }
 0x5b6   :  { %v11068_v57 = vadd.f32 %v6842_v54, %v10962_v52 }
 0x5b7   :  { %v5835_v2 = vpop.f32.mrf.mxu0 }
 0x5b8   :  { %5917 = vmax.xlane.f32.xlu1 %v11068_v57  ;;  %5911 = vmax.xlane.f32.xlu0 %v11065_v19  ;;  %v11073_v60 = vadd.f32 %v10962_v52, %v5835_v2 }
 0x5bc   :  { %5913 = vmax.xlane.f32.xlu1 %v11073_v60 }
 0x5c1   :  { %v6845_v41 = vpop.f32.mrf.mxu0 }
 0x5c2   :  { %v11081_v58 = vadd.f32 %v6845_v41, %v10962_v52 }
 0x5c3   :  { %v5848_v29 = vpop.f32.mrf.mxu0 }
 0x5c4   :  { %v11077_v15 = vadd.f32 %v10962_v52, %v5848_v29 }
 0x5c5   :  { %v6846_v14 = vpop.f32.mrf.mxu0 }
 0x5c6   :  { %5919 = vmax.xlane.f32.xlu0 %v11077_v15  ;;  %v11089_v34 = vadd.f32 %v6846_v14, %v10962_v52 }
 0x5c7   :  { %v5851_v5 = vpop.f32.mrf.mxu0 }
 0x5c8   :  { %v11084_v28 = vadd.f32 %v10962_v52, %v5851_v5 }
 0x5ca   :  { %5921 = vmax.xlane.f32.xlu1 %v11084_v28  ;;  %5923 = vmax.xlane.f32.xlu0 %v11081_v58 }
 0x5ce   :  { %5925 = vmax.xlane.f32.xlu1 %v11089_v34 }
 0x5dd   :  { %v5868_v17 = vpop.xlane.xlu1 %5867 }
 0x5de   :  { %v5929_v1 = vsub.f32 %v10965_v44, %v5868_v17 }
 0x5df   :  { %v5864_v35 = vpop.xlane.xlu0 %5863 }
 0x5e0   :  { %v5963_v18 = vmul.f32 1.442695, %v5929_v1  ;;  %v5927_v27 = vsub.f32 %v10968_v22, %v5864_v35 }
 0x5e1   :  { %v5870_v0 = vpop.xlane.xlu1 %5869 }
 0x5e2   :  { %7297 = vpow2.f32 %v5963_v18  ;;  %v5959_v3 = vmul.f32 1.442695, %v5927_v27  ;;  %v5930_v26 = vsub.f32 %v10972_v23, %v5870_v0 }
 0x5e3   :  { %v5866_v61 = vpop.xlane.xlu0 %5865 }
 0x5e4   :  { %v5965_v30 = vmul.f32 1.442695, %v5930_v26  ;;  %v5928_v47 = vsub.f32 %v10976_v48, %v5866_v61  ;;  %7299 = vpow2.f32 %v5959_v3 }
 0x5e6   :  { %7301 = vpow2.f32 %v5965_v30  ;;  %v5961_v52 = vmul.f32 1.442695, %v5928_v47 }
 0x5e8   :  { %7303 = vpow2.f32 %v5961_v52 }
 0x5ed   :  { %v5876_v51 = vpop.xlane.xlu0 %5875 }
 0x5ee   :  { %v5933_v44 = vsub.f32 %v10981_v25, %v5876_v51 }
 0x5ef   :  { %v11097_v39 = vpop.eup %7297 }
 0x5f0   :  { %v5971_v50 = vmul.f32 1.442695, %v5933_v44  ;;  %6027 = vadd.xlane.f32.xlu0 %v11097_v39 }
 0x5f1   :  { %v5878_v22 = vpop.xlane.xlu1 %5877  ;;  %v5872_v24 = vpop.xlane.xlu0 %5871 }
 0x5f2   :  { %v11100_v49 = vpop.eup %7299  ;;  %7305 = vpow2.f32 %v5971_v50  ;;  %v5934_v23 = vsub.f32 %v10988_v20, %v5878_v22  ;;  %v5931_v48 = vsub.f32 %v10985_v55, %v5872_v24 }
 0x5f3   :  { %v11104_v31 = vpop.eup %7301 }
 0x5f4   :  { %v5973_v56 = vmul.f32 1.442695, %v5934_v23  ;;  %v5967_v8 = vmul.f32 1.442695, %v5931_v48  ;;  %6029 = vadd.xlane.f32.xlu1 %v11104_v31  ;;  %6023 = vadd.xlane.f32.xlu0 %v11100_v49 }
 0x5f5   :  { %v5874_v25 = vpop.xlane.xlu1 %5873  ;;  %v11109_v43 = vpop.eup %7303 }
 0x5f6   :  { %7307 = vpow2.f32 %v5973_v56  ;;  %v5932_v59 = vsub.f32 %v10993_v42, %v5874_v25 }
 0x5f7   :  { %7309 = vpow2.f32 %v5967_v8 }
 0x5f8   :  { %v5969_v21 = vmul.f32 1.442695, %v5932_v59  ;;  %6025 = vadd.xlane.f32.xlu1 %v11109_v43 }
 0x5fa   :  { %7311 = vpow2.f32 %v5969_v21 }
 0x5fd   :  { %v5884_v55 = vpop.xlane.xlu0 %5883 }
 0x5fe   :  { %v5937_v20 = vsub.f32 %v10997_v37, %v5884_v55 }
 0x5ff   :  { %v11113_v4 = vpop.eup %7305 }
 0x600   :  { %v5979_v11 = vmul.f32 1.442695, %v5937_v20  ;;  %6035 = vadd.xlane.f32.xlu0 %v11113_v4 }
 0x601   :  { %v5886_v10 = vpop.xlane.xlu1 %5885  ;;  %v5880_v54 = vpop.xlane.xlu0 %5879 }
 0x602   :  { %7313 = vpow2.f32 %v5979_v11  ;;  %v5938_v42 = vsub.f32 %v11004_v32, %v5886_v10  ;;  %v5935_v2 = vsub.f32 %v11001_v62, %v5880_v54 }
 0x603   :  { %v11118_v41 = vpop.eup %7307 }
 0x604   :  { %v11120_v29 = vpop.eup %7309  ;;  %v5981_v14 = vmul.f32 1.442695, %v5938_v42  ;;  %v5975_v5 = vmul.f32 1.442695, %v5935_v2  ;;  %6037 = vadd.xlane.f32.xlu1 %v11118_v41 }
 0x605   :  { %6031 = vadd.xlane.f32.xlu0 %v11120_v29  ;;  %v5882_v37 = vpop.xlane.xlu1 %5881 }
 0x606   :  { %7315 = vpow2.f32 %v5981_v14  ;;  %v5936_v17 = vsub.f32 %v11009_v46, %v5882_v37 }
 0x607   :  { %v11125_v1 = vpop.eup %7311  ;;  %7317 = vpow2.f32 %v5975_v5 }
 0x608   :  { %v5977_v32 = vmul.f32 1.442695, %v5936_v17  ;;  %6033 = vadd.xlane.f32.xlu1 %v11125_v1 }
 0x60a   :  { %7319 = vpow2.f32 %v5977_v32 }
 0x60d   :  { %v5892_v62 = vpop.xlane.xlu0 %5891 }
 0x60e   :  { %v5941_v35 = vsub.f32 %v11013_v63, %v5892_v62 }
 0x60f   :  { %v11129_v18 = vpop.eup %7313 }
 0x610   :  { %v5987_v27 = vmul.f32 1.442695, %v5941_v35  ;;  %6043 = vadd.xlane.f32.xlu0 %v11129_v18 }
 0x611   :  { %v5894_v0 = vpop.xlane.xlu1 %5893  ;;  %v5888_v3 = vpop.xlane.xlu0 %5887 }
 0x612   :  { %7321 = vpow2.f32 %v5987_v27  ;;  %v5942_v46 = vsub.f32 %v11020_v38, %v5894_v0  ;;  %v5939_v26 = vsub.f32 %v11017_v33, %v5888_v3 }
 0x613   :  { %v11134_v61 = vpop.eup %7315 }
 0x614   :  { %v11136_v30 = vpop.eup %7317  ;;  %v5989_v47 = vmul.f32 1.442695, %v5942_v46  ;;  %v5983_v52 = vmul.f32 1.442695, %v5939_v26  ;;  %6045 = vadd.xlane.f32.xlu1 %v11134_v61 }
 0x615   :  { %6039 = vadd.xlane.f32.xlu0 %v11136_v30  ;;  %v5890_v63 = vpop.xlane.xlu1 %5889 }
 0x616   :  { %7323 = vpow2.f32 %v5989_v47  ;;  %v5940_v51 = vsub.f32 %v11025_v53, %v5890_v63 }
 0x617   :  { %v11141_v44 = vpop.eup %7319  ;;  %7325 = vpow2.f32 %v5983_v52 }
 0x618   :  { %v5985_v38 = vmul.f32 1.442695, %v5940_v51  ;;  %6041 = vadd.xlane.f32.xlu1 %v11141_v44 }
 0x61a   :  { %7327 = vpow2.f32 %v5985_v38 }
 0x61d   :  { %v5900_v33 = vpop.xlane.xlu0 %5899 }
 0x61e   :  { %v5945_v50 = vsub.f32 %v11029_v36, %v5900_v33 }
 0x61f   :  { %v11145_v22 = vpop.eup %7321 }
 0x620   :  { %v5995_v24 = vmul.f32 1.442695, %v5945_v50  ;;  %6051 = vadd.xlane.f32.xlu0 %v11145_v22 }
 0x621   :  { %v5902_v23 = vpop.xlane.xlu1 %5901  ;;  %v5896_v48 = vpop.xlane.xlu0 %5895 }
 0x622   :  { %7329 = vpow2.f32 %v5995_v24  ;;  %v5946_v53 = vsub.f32 %v11036_v6, %v5902_v23  ;;  %v5943_v56 = vsub.f32 %v11033_v9, %v5896_v48 }
 0x623   :  { %v11150_v8 = vpop.eup %7323 }
 0x624   :  { %v11152_v25 = vpop.eup %7325  ;;  %v5997_v59 = vmul.f32 1.442695, %v5946_v53  ;;  %v5991_v21 = vmul.f32 1.442695, %v5943_v56  ;;  %6053 = vadd.xlane.f32.xlu1 %v11150_v8 }
 0x625   :  { %6047 = vadd.xlane.f32.xlu0 %v11152_v25  ;;  %v5898_v36 = vpop.xlane.xlu1 %5897 }
 0x626   :  { %7331 = vpow2.f32 %v5997_v59  ;;  %v5944_v55 = vsub.f32 %v11041_v16, %v5898_v36 }
 0x627   :  { %v11157_v20 = vpop.eup %7327  ;;  %7333 = vpow2.f32 %v5991_v21 }
 0x628   :  { %v5993_v6 = vmul.f32 1.442695, %v5944_v55  ;;  %6049 = vadd.xlane.f32.xlu1 %v11157_v20 }
 0x62a   :  { %7335 = vpow2.f32 %v5993_v6 }
 0x62d   :  { %v5908_v9 = vpop.xlane.xlu0 %5907 }
 0x62e   :  { %v5949_v11 = vsub.f32 %v11045_v40, %v5908_v9 }
 0x62f   :  { %v11161_v10 = vpop.eup %7329 }
 0x630   :  { %v6003_v54 = vmul.f32 1.442695, %v5949_v11  ;;  %6059 = vadd.xlane.f32.xlu0 %v11161_v10 }
 0x631   :  { %v5910_v42 = vpop.xlane.xlu1 %5909  ;;  %v5904_v2 = vpop.xlane.xlu0 %5903 }
 0x632   :  { %7337 = vpow2.f32 %v6003_v54  ;;  %v5950_v16 = vsub.f32 %v11052_v7, %v5910_v42  ;;  %v5947_v14 = vsub.f32 %v11049_v45, %v5904_v2 }
 0x633   :  { %v11166_v5 = vpop.eup %7331 }
 0x634   :  { %v11168_v37 = vpop.eup %7333  ;;  %v6005_v17 = vmul.f32 1.442695, %v5950_v16  ;;  %v5999_v32 = vmul.f32 1.442695, %v5947_v14  ;;  %6061 = vadd.xlane.f32.xlu1 %v11166_v5 }
 0x635   :  { %6055 = vadd.xlane.f32.xlu0 %v11168_v37  ;;  %v5906_v40 = vpop.xlane.xlu1 %5905 }
 0x636   :  { %7339 = vpow2.f32 %v6005_v17  ;;  %v5948_v62 = vsub.f32 %v11057_v13, %v5906_v40 }
 0x637   :  { %v11173_v35 = vpop.eup %7335  ;;  %7341 = vpow2.f32 %v5999_v32 }
 0x638   :  { %v6001_v7 = vmul.f32 1.442695, %v5948_v62  ;;  %6057 = vadd.xlane.f32.xlu1 %v11173_v35 }
 0x63a   :  { %7343 = vpow2.f32 %v6001_v7 }
 0x63d   :  { %v5916_v45 = vpop.xlane.xlu0 %5915 }
 0x63e   :  { %v5953_v27 = vsub.f32 %v11061_v12, %v5916_v45 }
 0x63f   :  { %v11177_v0 = vpop.eup %7337 }
 0x640   :  { %v6011_v3 = vmul.f32 1.442695, %v5953_v27  ;;  %6067 = vadd.xlane.f32.xlu0 %v11177_v0 }
 0x641   :  { %v5918_v46 = vpop.xlane.xlu1 %5917  ;;  %v5912_v26 = vpop.xlane.xlu0 %5911 }
 0x642   :  { %7345 = vpow2.f32 %v6011_v3  ;;  %v5954_v13 = vsub.f32 %v11068_v57, %v5918_v46  ;;  %v5951_v47 = vsub.f32 %v11065_v19, %v5912_v26 }
 0x643   :  { %v11182_v52 = vpop.eup %7339 }
 0x644   :  { %v11184_v63 = vpop.eup %7341  ;;  %v6013_v51 = vmul.f32 1.442695, %v5954_v13  ;;  %v6007_v38 = vmul.f32 1.442695, %v5951_v47  ;;  %6069 = vadd.xlane.f32.xlu1 %v11182_v52 }
 0x645   :  { %6063 = vadd.xlane.f32.xlu0 %v11184_v63  ;;  %v5914_v12 = vpop.xlane.xlu1 %5913 }
 0x646   :  { %7347 = vpow2.f32 %v6013_v51  ;;  %v5952_v33 = vsub.f32 %v11073_v60, %v5914_v12 }
 0x647   :  { %v11189_v50 = vpop.eup %7343  ;;  %7349 = vpow2.f32 %v6007_v38 }
 0x648   :  { %v6009_v57 = vmul.f32 1.442695, %v5952_v33  ;;  %6065 = vadd.xlane.f32.xlu1 %v11189_v50 }
 0x64a   :  { %7351 = vpow2.f32 %v6009_v57 }
 0x64f   :  { %v11192_v19 = vpop.eup %7345  ;;  %v5920_v24 = vpop.xlane.xlu0 %5919 }
 0x650   :  { %v5955_v23 = vsub.f32 %v11077_v15, %v5920_v24  ;;  %6075 = vadd.xlane.f32.xlu0 %v11192_v19 }
 0x652   :  { %v6015_v48 = vmul.f32 1.442695, %v5955_v23 }
 0x653   :  { %v11196_v53 = vpop.eup %7347  ;;  %v5922_v56 = vpop.xlane.xlu1 %5921 }
 0x654   :  { %v5924_v59 = vpop.xlane.xlu0 %5923  ;;  %v11198_v60 = vpop.eup %7349  ;;  %7353 = vpow2.f32 %v6015_v48  ;;  %v5956_v21 = vsub.f32 %v11084_v28, %v5922_v56  ;;  %6077 = vadd.xlane.f32.xlu1 %v11196_v53 }
 0x655   :  { %v5957_v36 = vsub.f32 %v11081_v58, %v5924_v59  ;;  %6071 = vadd.xlane.f32.xlu0 %v11198_v60 }
 0x656   :  { %v6017_v55 = vmul.f32 1.442695, %v5956_v21 }
 0x657   :  { %v6019_v15 = vmul.f32 1.442695, %v5957_v36  ;;  %v11204_v6 = vpop.eup %7351  ;;  %v5926_v9 = vpop.xlane.xlu1 %5925 }
 0x658   :  { %7355 = vpow2.f32 %v6017_v55  ;;  %v5958_v11 = vsub.f32 %v11089_v34, %v5926_v9  ;;  %6073 = vadd.xlane.f32.xlu1 %v11204_v6 }
 0x659   :  { %7357 = vpow2.f32 %v6019_v15 }
 0x65a   :  { %v6021_v54 = vmul.f32 1.442695, %v5958_v11 }
 0x65c   :  { %7359 = vpow2.f32 %v6021_v54 }
 0x661   :  { %v11208_v28 = vpop.eup %7353 }
 0x662   :  { %6079 = vadd.xlane.f32.xlu0 %v11208_v28 }
 0x665   :  { %v11211_v58 = vpop.eup %7355 }
 0x666   :  { %v11213_v42 = vpop.eup %7357  ;;  %6081 = vadd.xlane.f32.xlu1 %v11211_v58 }
 0x667   :  { %6083 = vadd.xlane.f32.xlu0 %v11213_v42 }
 0x669   :  { %v11217_v2 = vpop.eup %7359 }
 0x66a   :  { %6085 = vadd.xlane.f32.xlu1 %v11217_v2 }
 0x679   :  { %v6028_v34 = vpop.xlane.xlu0 %6027 }
 0x67a   :  { %7361 = vrcp.f32 %v6028_v34 }
 0x67d   :  { %v6030_v16 = vpop.xlane.xlu1 %6029  ;;  %v6024_v14 = vpop.xlane.xlu0 %6023 }
 0x67e   :  { %7363 = vrcp.f32 %v6030_v16 }
 0x67f   :  { %7365 = vrcp.f32 %v6024_v14 }
 0x681   :  { %v6026_v17 = vpop.xlane.xlu1 %6025 }
 0x682   :  { %7367 = vrcp.f32 %v6026_v17 }
 0x687   :  { %v7362_v32 = vpop.eup %7361 }
 0x688   :  { %v6121_v40 = vmul.f32 %v7362_v32, %v11097_v39 }
 0x689   :  { %v6036_v62 = vpop.xlane.xlu0 %6035 }
 0x68a   :  { %6153 = vst [vmem:[%s11357_s9 + $0x10] sm:$0xff] %v6121_v40  ;;  %7369 = vrcp.f32 %v6036_v62 }
 0x68b   :  { %v7364_v7 = vpop.eup %7363 }
 0x68c   :  { %v7366_v45 = vpop.eup %7365  ;;  %v6122_v27 = vmul.f32 %v7364_v7, %v11104_v31 }
 0x68d   :  { %v6119_v3 = vmul.f32 %v7366_v45, %v11100_v49  ;;  %v6038_v46 = vpop.xlane.xlu1 %6037 }
 0x68e   :  { %6154 = vst [vmem:[%s11357_s9 + $0x18] sm:$0xff] %v6122_v27  ;;  %7371 = vrcp.f32 %v6038_v46  ;;  %v6032_v26 = vpop.xlane.xlu0 %6031 }
 0x68f   :  { %v7368_v39 = vpop.eup %7367  ;;  %6151 = vst [vmem:[%s11357_s9] sm:$0xff] %v6119_v3  ;;  %7373 = vrcp.f32 %v6032_v26 }
 0x690   :  { %v6120_v13 = vmul.f32 %v7368_v39, %v11109_v43 }
 0x691   :  { %v6034_v47 = vpop.xlane.xlu1 %6033 }
 0x692   :  { %6152 = vst [vmem:[%s11357_s9 + $0x8] sm:$0xff] %v6120_v13  ;;  %7375 = vrcp.f32 %v6034_v47 }
 0x697   :  { %v7370_v49 = vpop.eup %7369 }
 0x698   :  { %v6125_v31 = vmul.f32 %v7370_v49, %v11113_v4 }
 0x699   :  { %v6044_v51 = vpop.xlane.xlu0 %6043 }
 0x69a   :  { %6157 = vst [vmem:[%s11357_s9 + $0x30] sm:$0xff] %v6125_v31  ;;  %7377 = vrcp.f32 %v6044_v51 }
 0x69b   :  { %v7372_v38 = vpop.eup %7371 }
 0x69c   :  { %v7374_v12 = vpop.eup %7373  ;;  %v6126_v33 = vmul.f32 %v7372_v38, %v11118_v41 }
 0x69d   :  { %v6123_v43 = vmul.f32 %v7374_v12, %v11120_v29  ;;  %v6046_v57 = vpop.xlane.xlu1 %6045 }
 0x69e   :  { %6158 = vst [vmem:[%s11357_s9 + $0x38] sm:$0xff] %v6126_v33  ;;  %7379 = vrcp.f32 %v6046_v57  ;;  %v6040_v24 = vpop.xlane.xlu0 %6039 }
 0x69f   :  { %v7376_v4 = vpop.eup %7375  ;;  %6155 = vst [vmem:[%s11357_s9 + $0x20] sm:$0xff] %v6123_v43  ;;  %7381 = vrcp.f32 %v6040_v24 }
 0x6a0   :  { %v6124_v23 = vmul.f32 %v7376_v4, %v11125_v1 }
 0x6a1   :  { %v6042_v48 = vpop.xlane.xlu1 %6041 }
 0x6a2   :  { %6156 = vst [vmem:[%s11357_s9 + $0x28] sm:$0xff] %v6124_v23  ;;  %7383 = vrcp.f32 %v6042_v48 }
 0x6a7   :  { %v7378_v41 = vpop.eup %7377 }
 0x6a8   :  { %v6129_v29 = vmul.f32 %v7378_v41, %v11129_v18 }
 0x6a9   :  { %v6052_v56 = vpop.xlane.xlu0 %6051 }
 0x6aa   :  { %6161 = vst [vmem:[%s11357_s9 + $0x50] sm:$0xff] %v6129_v29  ;;  %7385 = vrcp.f32 %v6052_v56 }
 0x6ab   :  { %v7380_v59 = vpop.eup %7379 }
 0x6ac   :  { %v7382_v21 = vpop.eup %7381  ;;  %v6130_v36 = vmul.f32 %v7380_v59, %v11134_v61 }
 0x6ad   :  { %v6127_v1 = vmul.f32 %v7382_v21, %v11136_v30  ;;  %v6054_v55 = vpop.xlane.xlu1 %6053 }
 0x6ae   :  { %6162 = vst [vmem:[%s11357_s9 + $0x58] sm:$0xff] %v6130_v36  ;;  %7387 = vrcp.f32 %v6054_v55  ;;  %v6048_v15 = vpop.xlane.xlu0 %6047 }
 0x6af   :  { %v7384_v18 = vpop.eup %7383  ;;  %6159 = vst [vmem:[%s11357_s9 + $0x40] sm:$0xff] %v6127_v1  ;;  %7389 = vrcp.f32 %v6048_v15 }
 0x6b0   :  { %v6128_v9 = vmul.f32 %v7384_v18, %v11141_v44 }
 0x6b1   :  { %v6050_v11 = vpop.xlane.xlu1 %6049 }
 0x6b2   :  { %6160 = vst [vmem:[%s11357_s9 + $0x48] sm:$0xff] %v6128_v9  ;;  %7391 = vrcp.f32 %v6050_v11 }
 0x6b7   :  { %v7386_v61 = vpop.eup %7385 }
 0x6b8   :  { %v6133_v30 = vmul.f32 %v7386_v61, %v11145_v22 }
 0x6b9   :  { %v6060_v54 = vpop.xlane.xlu0 %6059 }
 0x6ba   :  { %6165 = vst [vmem:[%s11357_s9 + $0x70] sm:$0xff] %v6133_v30  ;;  %7393 = vrcp.f32 %v6060_v54 }
 0x6bb   :  { %v7388_v34 = vpop.eup %7387 }
 0x6bc   :  { %v7390_v16 = vpop.eup %7389  ;;  %v6134_v14 = vmul.f32 %v7388_v34, %v11150_v8 }
 0x6bd   :  { %v6131_v44 = vmul.f32 %v7390_v16, %v11152_v25  ;;  %v6062_v17 = vpop.xlane.xlu1 %6061 }
 0x6be   :  { %6166 = vst [vmem:[%s11357_s9 + $0x78] sm:$0xff] %v6134_v14  ;;  %7395 = vrcp.f32 %v6062_v17  ;;  %v6056_v32 = vpop.xlane.xlu0 %6055 }
 0x6bf   :  { %v7392_v22 = vpop.eup %7391  ;;  %6163 = vst [vmem:[%s11357_s9 + $0x60] sm:$0xff] %v6131_v44  ;;  %7397 = vrcp.f32 %v6056_v32 }
 0x6c0   :  { %v6132_v40 = vmul.f32 %v7392_v22, %v11157_v20 }
 0x6c1   :  { %v6058_v62 = vpop.xlane.xlu1 %6057 }
 0x6c2   :  { %6164 = vst [vmem:[%s11357_s9 + $0x68] sm:$0xff] %v6132_v40  ;;  %7399 = vrcp.f32 %v6058_v62 }
 0x6c7   :  { %v7394_v8 = vpop.eup %7393 }
 0x6c8   :  { %v6137_v25 = vmul.f32 %v7394_v8, %v11161_v10 }
 0x6c9   :  { %v6068_v7 = vpop.xlane.xlu0 %6067 }
 0x6ca   :  { %6169 = vst [vmem:[%s11357_s9 + $0x90] sm:$0xff] %v6137_v25  ;;  %7401 = vrcp.f32 %v6068_v7 }
 0x6cb   :  { %v7396_v45 = vpop.eup %7395 }
 0x6cc   :  { %v7398_v27 = vpop.eup %7397  ;;  %v6138_v3 = vmul.f32 %v7396_v45, %v11166_v5 }
 0x6cd   :  { %v6135_v20 = vmul.f32 %v7398_v27, %v11168_v37  ;;  %v6070_v46 = vpop.xlane.xlu1 %6069 }
 0x6ce   :  { %6170 = vst [vmem:[%s11357_s9 + $0x98] sm:$0xff] %v6138_v3  ;;  %7403 = vrcp.f32 %v6070_v46  ;;  %v6064_v26 = vpop.xlane.xlu0 %6063 }
 0x6cf   :  { %v7400_v10 = vpop.eup %7399  ;;  %6167 = vst [vmem:[%s11357_s9 + $0x80] sm:$0xff] %v6135_v20  ;;  %7405 = vrcp.f32 %v6064_v26 }
 0x6d0   :  { %v6136_v39 = vmul.f32 %v7400_v10, %v11173_v35 }
 0x6d1   :  { %v6066_v13 = vpop.xlane.xlu1 %6065 }
 0x6d2   :  { %6168 = vst [vmem:[%s11357_s9 + $0x88] sm:$0xff] %v6136_v39  ;;  %7407 = vrcp.f32 %v6066_v13 }
 0x6d7   :  { %v7402_v5 = vpop.eup %7401 }
 0x6d8   :  { %v6141_v37 = vmul.f32 %v7402_v5, %v11177_v0 }
 0x6d9   :  { %v6076_v47 = vpop.xlane.xlu0 %6075 }
 0x6da   :  { %6173 = vst [vmem:[%s11357_s9 + $0xb0] sm:$0xff] %v6141_v37  ;;  %7409 = vrcp.f32 %v6076_v47 }
 0x6db   :  { %v7404_v49 = vpop.eup %7403 }
 0x6dc   :  { %v7406_v31 = vpop.eup %7405  ;;  %v6142_v51 = vmul.f32 %v7404_v49, %v11182_v52 }
 0x6dd   :  { %v6139_v35 = vmul.f32 %v7406_v31, %v11184_v63  ;;  %v6078_v38 = vpop.xlane.xlu1 %6077 }
 0x6de   :  { %6174 = vst [vmem:[%s11357_s9 + $0xb8] sm:$0xff] %v6142_v51  ;;  %7411 = vrcp.f32 %v6078_v38  ;;  %v6072_v12 = vpop.xlane.xlu0 %6071 }
 0x6df   :  { %v7408_v0 = vpop.eup %7407  ;;  %6171 = vst [vmem:[%s11357_s9 + $0xa0] sm:$0xff] %v6139_v35  ;;  %7413 = vrcp.f32 %v6072_v12 }
 0x6e0   :  { %v6140_v33 = vmul.f32 %v7408_v0, %v11189_v50 }
 0x6e1   :  { %v6074_v43 = vpop.xlane.xlu1 %6073 }
 0x6e2   :  { %6172 = vst [vmem:[%s11357_s9 + $0xa8] sm:$0xff] %v6140_v33  ;;  %7415 = vrcp.f32 %v6074_v43 }
 0x6e7   :  { %v7410_v52 = vpop.eup %7409 }
 0x6e8   :  { %v6145_v63 = vmul.f32 %v7410_v52, %v11192_v19 }
 0x6ea   :  { %6177 = vst [vmem:[%s11357_s9 + $0xd0] sm:$0xff] %v6145_v63 }
 0x6eb   :  { %v7412_v57 = vpop.eup %7411  ;;  %v6080_v24 = vpop.xlane.xlu0 %6079 }
 0x6ec   :  { %v7414_v4 = vpop.eup %7413  ;;  %v6146_v23 = vmul.f32 %v7412_v57, %v11196_v53  ;;  %7417 = vrcp.f32 %v6080_v24 }
 0x6ed   :  { %v6143_v50 = vmul.f32 %v7414_v4, %v11198_v60 }
 0x6ee   :  { %6178 = vst [vmem:[%s11357_s9 + $0xd8] sm:$0xff] %v6146_v23 }
 0x6ef   :  { %v7416_v48 = vpop.eup %7415  ;;  %6175 = vst [vmem:[%s11357_s9 + $0xc0] sm:$0xff] %v6143_v50  ;;  %v6082_v19 = vpop.xlane.xlu1 %6081 }
 0x6f0   :  { %v6144_v41 = vmul.f32 %v7416_v48, %v11204_v6  ;;  %7419 = vrcp.f32 %v6082_v19  ;;  %v6084_v29 = vpop.xlane.xlu0 %6083 }
 0x6f1   :  { %7421 = vrcp.f32 %v6084_v29 }
 0x6f2   :  { %6176 = vst [vmem:[%s11357_s9 + $0xc8] sm:$0xff] %v6144_v41 }
 0x6f3   :  { %v6086_v53 = vpop.xlane.xlu1 %6085 }
 0x6f4   :  { %7423 = vrcp.f32 %v6086_v53 }
 0x6f9   :  { %v7418_v60 = vpop.eup %7417 }
 0x6fa   :  { %v6147_v56 = vmul.f32 %v7418_v60, %v11208_v28 }
 0x6fc   :  { %6179 = vst [vmem:[%s11357_s9 + $0xe0] sm:$0xff] %v6147_v56 }
 0x6fd   :  { %v7420_v59 = vpop.eup %7419 }
 0x6fe   :  { %v7422_v21 = vpop.eup %7421  ;;  %v6148_v6 = vmul.f32 %v7420_v59, %v11211_v58 }
 0x6ff   :  { %v6149_v36 = vmul.f32 %v7422_v21, %v11213_v42 }
 0x700   :  { %6180 = vst [vmem:[%s11357_s9 + $0xe8] sm:$0xff] %v6148_v6 }
 0x701   :  { %v7424_v1 = vpop.eup %7423  ;;  %6181 = vst [vmem:[%s11357_s9 + $0xf0] sm:$0xff] %v6149_v36 }
 0x702   :  { %v6150_v28 = vmul.f32 %v7424_v1, %v11217_v2 }
 0x704   :  { %6182 = vst [vmem:[%s11357_s9 + $0xf8] sm:$0xff] %v6150_v28 }
 0x705   :  { %6187 = vsyncpa [#allocation3], 1 }
 0x706   :  { %6188 = vsyncpa [#allocation5], 1 }

</bundles_post_ra>
